<compile_context>
chip_gen: v5e
topology: v5e:2x2
jax: 0.10.0
libtpu: 0.0.40
codegen_flags: <defaults>
</compile_context>

<pallas_src>
import math

import jax
import jax.numpy as jnp
from jax.experimental import pallas as pl
from jax.experimental.pallas import tpu as pltpu

# ----- small, synthetic hyper-parameters (consistent with the module's forward) -----
BATCH = 32            # forced by the hard-coded transformer_output.view(32, -1)
SEQ = 3               # [head, relation, class] tokens
DIM = 100             # embedding_dim
HEADS = 4
HEAD_DIM = DIM // HEADS
INTER = 256 * 4       # BertConfig intermediate_size
PROJ_IN = 384         # hard-coded pad target in forward
PROJ_OUT = 128
ENTITY_VOCAB = 512    # shrunk from 14541
RELATION_VOCAB = 32   # shrunk from 237
CLASS_VOCAB = 64      # shrunk from 1267
LABEL_SMOOTH = 0.1
LN_EPS = 1e-12        # BertConfig layer_norm_eps


def _layernorm(t, g, b):
    mu = jnp.mean(t, axis=-1, keepdims=True)
    var = jnp.mean(jnp.square(t - mu), axis=-1, keepdims=True)
    return (t - mu) * jax.lax.rsqrt(var + LN_EPS) * g + b


def _gelu_tanh(t):
    # tanh-approximate GELU: transcendental goes to the EUP slot (erf polynomial avoided)
    c = math.sqrt(2.0 / math.pi)
    return 0.5 * t * (1.0 + jnp.tanh(c * (t + 0.044715 * t * t * t)))


def ontology_kernel(head_ref, rel_ref, cls_ref, tail_ref,
                    ent_emb_ref, rel_emb_ref, cls_emb_ref,
                    wq_ref, bq_ref, wk_ref, bk_ref, wv_ref, bv_ref,
                    wao_ref, bao_ref, g1_ref, b1_ref,
                    bi_ref, bo_ref, g2_ref, b2_ref, bp_ref, bc_ref,
                    wi_hbm, wo_hbm, wp_hbm, wc_hbm,
                    loss_ref, y_ref,
                    wi_v, wo_v, wp_v, wc_v, dma_sem):
    f32 = jnp.float32
    bf16 = jnp.bfloat16

    # ----- kick off late-used weight DMAs so they overlap the front half of the kernel -----
    cp_wi = pltpu.make_async_copy(wi_hbm, wi_v, dma_sem.at[0]); cp_wi.start()
    cp_wo = pltpu.make_async_copy(wo_hbm, wo_v, dma_sem.at[1]); cp_wo.start()
    cp_wp = pltpu.make_async_copy(wp_hbm, wp_v, dma_sem.at[2]); cp_wp.start()
    cp_wc = pltpu.make_async_copy(wc_hbm, wc_v, dma_sem.at[3]); cp_wc.start()

    # ----- fused embedding gathers: bf16 one-hot @ bf16 table on the MXU (f32 acc) -----
    ent_iota = jax.lax.broadcasted_iota(jnp.int32, (BATCH, ENTITY_VOCAB), 1)   # reused for tgt
    rel_iota = jax.lax.broadcasted_iota(jnp.int32, (BATCH, RELATION_VOCAB), 1)
    cls_iota = jax.lax.broadcasted_iota(jnp.int32, (BATCH, CLASS_VOCAB), 1)

    head_oh = (ent_iota == head_ref[...]).astype(bf16)
    rel_oh = (rel_iota == rel_ref[...]).astype(bf16)
    cls_oh = (cls_iota == cls_ref[...]).astype(bf16)

    x0 = jnp.dot(head_oh, ent_emb_ref[...], preferred_element_type=f32)        # (32, DIM)
    x1 = jnp.dot(rel_oh, rel_emb_ref[...], preferred_element_type=f32)         # (32, DIM)
    x2 = jnp.dot(cls_oh, cls_emb_ref[...], preferred_element_type=f32)         # (32, DIM)
    x = jnp.concatenate([x0, x1, x2], axis=0)                                  # (96, DIM) f32

    # ----- QKV on the SEQ-folded slab (one matmul each) -----
    xb = x.astype(bf16)
    q = jnp.dot(xb, wq_ref[...], preferred_element_type=f32) + bq_ref[...]
    k = jnp.dot(xb, wk_ref[...], preferred_element_type=f32) + bk_ref[...]
    v = jnp.dot(xb, wv_ref[...], preferred_element_type=f32) + bv_ref[...]
    qs = [q[i * BATCH:(i + 1) * BATCH, :] for i in range(SEQ)]                 # sublane-aligned
    ks = [k[i * BATCH:(i + 1) * BATCH, :] for i in range(SEQ)]
    vs = [v[i * BATCH:(i + 1) * BATCH, :] for i in range(SEQ)]

    # ----- 4-head self-attention over 3 tokens via two batched segment matmuls -----
    # seg[d, h] = 1 iff lane d belongs to head h (block-diagonal selector; exact in bf16)
    d_idx = jax.lax.broadcasted_iota(jnp.int32, (DIM, HEADS), 0)
    h_idx = jax.lax.broadcasted_iota(jnp.int32, (DIM, HEADS), 1)
    seg = ((d_idx >= h_idx * HEAD_DIM) &
           (d_idx < (h_idx + 1) * HEAD_DIM)).astype(bf16)                      # (DIM, HEADS)
    d_t = jax.lax.broadcasted_iota(jnp.int32, (HEADS, DIM), 1)
    h_t = jax.lax.broadcasted_iota(jnp.int32, (HEADS, DIM), 0)
    seg_t = ((d_t >= h_t * HEAD_DIM) &
             (d_t < (h_t + 1) * HEAD_DIM)).astype(bf16)                        # (HEADS, DIM)

    scale = 1.0 / math.sqrt(HEAD_DIM)
    # all nine (query i, key j) pairs stacked along sublanes -> ONE MXU issue for the scores
    qk = jnp.concatenate([qs[i] * ks[j] for i in range(SEQ) for j in range(SEQ)], axis=0)
    scores = jnp.dot(qk.astype(bf16), seg, preferred_element_type=f32) * scale  # (288, HEADS)
    s = [[scores[(i * SEQ + j) * BATCH:(i * SEQ + j + 1) * BATCH, :]
          for j in range(SEQ)] for i in range(SEQ)]

    # tiny 3-way softmax per query token on (32, HEADS) blocks (VPU/EUP only)
    p_blocks = []
    for i in range(SEQ):
        m = jnp.maximum(jnp.maximum(s[i][0], s[i][1]), s[i][2])
        e = [jnp.exp(s[i][j] - m) for j in range(SEQ)]
        inv = pl.reciprocal(e[0] + e[1] + e[2], approx=True)
        p_blocks.extend([e[j] * inv for j in range(SEQ)])
    p_all = jnp.concatenate(p_blocks, axis=0)                                   # (288, HEADS)

    # ONE MXU issue to broadcast probabilities back across each head's lanes
    pb = jnp.dot(p_all, seg_t, preferred_element_type=f32)                      # (288, DIM)
    ctx_parts = [sum(pb[(i * SEQ + j) * BATCH:(i * SEQ + j + 1) * BATCH, :] * vs[j]
                     for j in range(SEQ)) for i in range(SEQ)]
    ctx = jnp.concatenate(ctx_parts, axis=0)                                    # (96, DIM)

    # ----- attention output + first residual LayerNorm -----
    attn = jnp.dot(ctx.astype(bf16), wao_ref[...],
                   preferred_element_type=f32) + bao_ref[...]
    h1 = _layernorm(attn + x, g1_ref[...], b1_ref[...])                         # (96, DIM)

    # ----- FFN (weights arrive via the overlapped DMAs) -----
    cp_wi.wait()
    cp_wo.wait()
    inter = _gelu_tanh(jnp.dot(h1.astype(bf16), wi_v[...],
                               preferred_element_type=f32) + bi_ref[...])
    ffn = jnp.dot(inter.astype(bf16), wo_v[...],
                  preferred_element_type=f32) + bo_ref[...]
    h2 = _layernorm(ffn + h1, g2_ref[...], b2_ref[...])                         # (96, DIM)

    # ----- output projection (pre-repacked wp: per-token blocks along lanes) -----
    # torch: view(32, 300) -> zero-pad to 384 -> Linear(384, 128). Pad columns multiply
    # zero rows of W, so proj = sum_i h2_i @ Wp[i*DIM:(i+1)*DIM], realized as one matmul.
    cp_wp.wait()
    z = jnp.dot(h2.astype(bf16), wp_v[...], preferred_element_type=f32)         # (96, 3*128)
    proj = (z[0 * BATCH:1 * BATCH, 0 * PROJ_OUT:1 * PROJ_OUT]
            + z[1 * BATCH:2 * BATCH, 1 * PROJ_OUT:2 * PROJ_OUT]
            + z[2 * BATCH:3 * BATCH, 2 * PROJ_OUT:3 * PROJ_OUT]
            + bp_ref[...])                                                      # (32, 128)

    # ----- classifier + sigmoid + label-smoothed BCE(sum)/batch, via one shared softplus -----
    cp_wc.wait()
    logit = jnp.dot(proj.astype(bf16), wc_v[...],
                    preferred_element_type=f32) + bc_ref[...]                   # (32, VOCAB)

    sp = jnp.maximum(logit, 0.0) + jnp.log(1.0 + jnp.exp(-jnp.abs(logit)))      # softplus
    y_ref[...] = jnp.exp(logit - sp)                                            # == sigmoid(logit)

    tgt = (1.0 - LABEL_SMOOTH) * (ent_iota == tail_ref[...]).astype(f32) \
        + LABEL_SMOOTH / ENTITY_VOCAB
    bce = sp - tgt * logit                 # == -(tgt*log(y) + (1-tgt)*log(1-y))
    row = jnp.sum(bce, axis=-1, keepdims=True)                                  # (B, 1)
    loss_ref[...] = jnp.sum(row, axis=0, keepdims=True) / BATCH                 # (1, 1)


def init_params(key):
    keys = jax.random.split(key, 11)

    def n(k, shape, dtype=jnp.bfloat16, scale=0.02):
        return (scale * jax.random.normal(k, shape)).astype(dtype)

    z = lambda *s: jnp.zeros(s, jnp.float32)
    o = lambda *s: jnp.ones(s, jnp.float32)

    # output_projection stored (in=384, out=128) like x @ W + b; repack once host-side:
    # drop the always-zero pad rows (300:384) and move the 3 per-token (DIM,128) blocks
    # onto the lane axis -> (DIM, 3*128).
    wp_full = n(keys[9], (PROJ_IN, PROJ_OUT), dtype=jnp.float32)
    wp_repacked = jnp.concatenate(
        [wp_full[i * DIM:(i + 1) * DIM, :] for i in range(SEQ)], axis=1
    ).astype(jnp.bfloat16)                                            # (DIM, SEQ*PROJ_OUT)

    return {
        # embedding tables stored bf16 (one-hot gather dots run bf16 x bf16, f32 acc)
        'entity_emb':   n(keys[0], (ENTITY_VOCAB, DIM)),
        'relation_emb': n(keys[1], (RELATION_VOCAB, DIM)),
        'class_emb':    n(keys[2], (CLASS_VOCAB, DIM)),
        'wq': n(keys[3], (DIM, DIM)),       'bq': z(1, DIM),
        'wk': n(keys[4], (DIM, DIM)),       'bk': z(1, DIM),
        'wv': n(keys[5], (DIM, DIM)),       'bv': z(1, DIM),
        'wao': n(keys[6], (DIM, DIM)),      'bao': z(1, DIM),
        'g1': o(1, DIM),                    'b1': z(1, DIM),
        'wi': n(keys[7], (DIM, INTER)),     'bi': z(1, INTER),
        'wo': n(keys[8], (INTER, DIM)),     'bo': z(1, DIM),
        'g2': o(1, DIM),                    'b2': z(1, DIM),
        'wp': wp_repacked,                  'bp': z(1, PROJ_OUT),
        'wc': n(keys[10], (PROJ_OUT, ENTITY_VOCAB)), 'bc': z(1, ENTITY_VOCAB),
    }


# weights resident in VMEM before the body starts (small / used early)
_VMEM_WEIGHTS = ['wq', 'bq', 'wk', 'bk', 'wv', 'bv', 'wao', 'bao', 'g1', 'b1',
                 'bi', 'bo', 'g2', 'b2', 'bp', 'bc']
# big, late-used weights: stay in HBM (pl.ANY) and are DMA'd manually for overlap
_HBM_WEIGHTS = ['wi', 'wo', 'wp', 'wc']


@jax.jit
def ontology_forward(params, head_ids, relation_ids, head_class, tail_ids):
    to_col = lambda v: v.astype(jnp.int32).reshape(BATCH, 1)
    vmem_args = (to_col(head_ids), to_col(relation_ids), to_col(head_class), to_col(tail_ids),
                 params['entity_emb'], params['relation_emb'], params['class_emb']) \
        + tuple(params[k] for k in _VMEM_WEIGHTS)
    hbm_args = tuple(params[k] for k in _HBM_WEIGHTS)
    args = vmem_args + hbm_args

    vmem = lambda: pl.BlockSpec(memory_space=pltpu.MemorySpace.VMEM)
    anyspec = lambda: pl.BlockSpec(memory_space=pl.ANY)

    loss, y = pl.pallas_call(
        ontology_kernel,
        out_shape=(jax.ShapeDtypeStruct((1, 1), jnp.float32),
                   jax.ShapeDtypeStruct((BATCH, ENTITY_VOCAB), jnp.float32)),
        in_specs=[vmem() for _ in vmem_args] + [anyspec() for _ in hbm_args],
        out_specs=(vmem(), vmem()),
        scratch_shapes=[
            pltpu.VMEM((DIM, INTER), jnp.bfloat16),             # wi landing buffer
            pltpu.VMEM((INTER, DIM), jnp.bfloat16),             # wo landing buffer
            pltpu.VMEM((DIM, SEQ * PROJ_OUT), jnp.bfloat16),    # wp landing buffer
            pltpu.VMEM((PROJ_OUT, ENTITY_VOCAB), jnp.bfloat16), # wc landing buffer
            pltpu.SemaphoreType.DMA((4,)),
        ],
    )(*args)
    return loss[0, 0], y


if __name__ == "__main__":
    key = jax.random.PRNGKey(0)
    pkey, dkey = jax.random.split(key)
    params = init_params(pkey)

    k1, k2, k3, k4 = jax.random.split(dkey, 4)
    head_ids = jax.random.randint(k1, (BATCH,), 0, ENTITY_VOCAB)
    relation_ids = jax.random.randint(k2, (BATCH,), 0, RELATION_VOCAB)
    head_class = jax.random.randint(k3, (BATCH,), 0, CLASS_VOCAB)
    tail_ids = jax.random.randint(k4, (BATCH,), 0, ENTITY_VOCAB)

    loss, y = ontology_forward(params, head_ids, relation_ids, head_class, tail_ids)
    jax.block_until_ready((loss, y))

    assert y.shape == (BATCH, ENTITY_VOCAB), y.shape
    assert y.dtype == jnp.float32
    assert bool(jnp.isfinite(loss)), loss
    assert bool(jnp.all((y >= 0.0) & (y <= 1.0)))
    print("KERNEL_OK")
</pallas_src>

<mosaic_0001>
module attributes {stable_mosaic.version = 11 : i64} {
  func.func @ontology_kernel(%arg0: memref<32x1xi32, #tpu.memory_space<vmem>>, %arg1: memref<32x1xi32, #tpu.memory_space<vmem>>, %arg2: memref<32x1xi32, #tpu.memory_space<vmem>>, %arg3: memref<32x1xi32, #tpu.memory_space<vmem>>, %arg4: memref<512x100xbf16, #tpu.memory_space<vmem>>, %arg5: memref<32x100xbf16, #tpu.memory_space<vmem>>, %arg6: memref<64x100xbf16, #tpu.memory_space<vmem>>, %arg7: memref<100x100xbf16, #tpu.memory_space<vmem>>, %arg8: memref<1x100xf32, #tpu.memory_space<vmem>>, %arg9: memref<100x100xbf16, #tpu.memory_space<vmem>>, %arg10: memref<1x100xf32, #tpu.memory_space<vmem>>, %arg11: memref<100x100xbf16, #tpu.memory_space<vmem>>, %arg12: memref<1x100xf32, #tpu.memory_space<vmem>>, %arg13: memref<100x100xbf16, #tpu.memory_space<vmem>>, %arg14: memref<1x100xf32, #tpu.memory_space<vmem>>, %arg15: memref<1x100xf32, #tpu.memory_space<vmem>>, %arg16: memref<1x100xf32, #tpu.memory_space<vmem>>, %arg17: memref<1x1024xf32, #tpu.memory_space<vmem>>, %arg18: memref<1x100xf32, #tpu.memory_space<vmem>>, %arg19: memref<1x100xf32, #tpu.memory_space<vmem>>, %arg20: memref<1x100xf32, #tpu.memory_space<vmem>>, %arg21: memref<1x128xf32, #tpu.memory_space<vmem>>, %arg22: memref<1x512xf32, #tpu.memory_space<vmem>>, %arg23: memref<100x1024xbf16, #tpu.memory_space<any>>, %arg24: memref<1024x100xbf16, #tpu.memory_space<any>>, %arg25: memref<100x384xbf16, #tpu.memory_space<any>>, %arg26: memref<128x512xbf16, #tpu.memory_space<any>>, %arg27: memref<1x1xf32, #tpu.memory_space<vmem>>, %arg28: memref<32x512xf32, #tpu.memory_space<vmem>>, %arg29: memref<100x1024xbf16, #tpu.memory_space<vmem>>, %arg30: memref<1024x100xbf16, #tpu.memory_space<vmem>>, %arg31: memref<100x384xbf16, #tpu.memory_space<vmem>>, %arg32: memref<128x512xbf16, #tpu.memory_space<vmem>>, %arg33: memref<4x!tpu.dma_semaphore, #tpu.memory_space<semaphore_mem>>) attributes {dimension_semantics = [], scalar_prefetch = 0 : i64, scratch_operands = 5 : i64, tpu.core_type = #tpu.core_type<tc>} {
    %c0_i32 = arith.constant 0 : i32
    %0 = tpu.memref_slice %arg33[%c0_i32] : memref<4x!tpu.dma_semaphore, #tpu.memory_space<semaphore_mem>> -> memref<1x!tpu.dma_semaphore, #tpu.memory_space<semaphore_mem>>
    %1 = tpu.memref_squeeze %0 : memref<1x!tpu.dma_semaphore, #tpu.memory_space<semaphore_mem>> -> memref<!tpu.dma_semaphore, #tpu.memory_space<semaphore_mem>>
    tpu.enqueue_dma source(%arg23 : memref<100x1024xbf16, #tpu.memory_space<any>>) target(%arg29 : memref<100x1024xbf16, #tpu.memory_space<vmem>>) target_semaphore(%1 : memref<!tpu.dma_semaphore, #tpu.memory_space<semaphore_mem>>)
    %c1_i32 = arith.constant 1 : i32
    %2 = tpu.memref_slice %arg33[%c1_i32] : memref<4x!tpu.dma_semaphore, #tpu.memory_space<semaphore_mem>> -> memref<1x!tpu.dma_semaphore, #tpu.memory_space<semaphore_mem>>
    %3 = tpu.memref_squeeze %2 : memref<1x!tpu.dma_semaphore, #tpu.memory_space<semaphore_mem>> -> memref<!tpu.dma_semaphore, #tpu.memory_space<semaphore_mem>>
    tpu.enqueue_dma source(%arg24 : memref<1024x100xbf16, #tpu.memory_space<any>>) target(%arg30 : memref<1024x100xbf16, #tpu.memory_space<vmem>>) target_semaphore(%3 : memref<!tpu.dma_semaphore, #tpu.memory_space<semaphore_mem>>)
    %c2_i32 = arith.constant 2 : i32
    %4 = tpu.memref_slice %arg33[%c2_i32] : memref<4x!tpu.dma_semaphore, #tpu.memory_space<semaphore_mem>> -> memref<1x!tpu.dma_semaphore, #tpu.memory_space<semaphore_mem>>
    %5 = tpu.memref_squeeze %4 : memref<1x!tpu.dma_semaphore, #tpu.memory_space<semaphore_mem>> -> memref<!tpu.dma_semaphore, #tpu.memory_space<semaphore_mem>>
    tpu.enqueue_dma source(%arg25 : memref<100x384xbf16, #tpu.memory_space<any>>) target(%arg31 : memref<100x384xbf16, #tpu.memory_space<vmem>>) target_semaphore(%5 : memref<!tpu.dma_semaphore, #tpu.memory_space<semaphore_mem>>)
    %c3_i32 = arith.constant 3 : i32
    %6 = tpu.memref_slice %arg33[%c3_i32] : memref<4x!tpu.dma_semaphore, #tpu.memory_space<semaphore_mem>> -> memref<1x!tpu.dma_semaphore, #tpu.memory_space<semaphore_mem>>
    %7 = tpu.memref_squeeze %6 : memref<1x!tpu.dma_semaphore, #tpu.memory_space<semaphore_mem>> -> memref<!tpu.dma_semaphore, #tpu.memory_space<semaphore_mem>>
    tpu.enqueue_dma source(%arg26 : memref<128x512xbf16, #tpu.memory_space<any>>) target(%arg32 : memref<128x512xbf16, #tpu.memory_space<vmem>>) target_semaphore(%7 : memref<!tpu.dma_semaphore, #tpu.memory_space<semaphore_mem>>)
    %8 = tpu.iota {dimensions = array<i32: 1>} : vector<32x512xi32>
    %9 = tpu.iota {dimensions = array<i32: 1>} : vector<32x32xi32>
    %10 = tpu.iota {dimensions = array<i32: 1>} : vector<32x64xi32>
    %c0 = arith.constant 0 : index
    %c0_0 = arith.constant 0 : index
    %11 = vector.load %arg0[%c0, %c0_0] : memref<32x1xi32, #tpu.memory_space<vmem>>, vector<32x1xi32>
    %12 = vector.broadcast %11 : vector<32x1xi32> to vector<32x512xi32>
    %13 = arith.cmpi eq, %8, %12 : vector<32x512xi32>
    %14 = arith.extui %13 : vector<32x512xi1> to vector<32x512xi32>
    %15 = arith.sitofp %14 : vector<32x512xi32> to vector<32x512xf32>
    %16 = arith.truncf %15 : vector<32x512xf32> to vector<32x512xbf16>
    %c0_1 = arith.constant 0 : index
    %c0_2 = arith.constant 0 : index
    %17 = vector.load %arg1[%c0_1, %c0_2] : memref<32x1xi32, #tpu.memory_space<vmem>>, vector<32x1xi32>
    %18 = vector.broadcast %17 : vector<32x1xi32> to vector<32x32xi32>
    %19 = arith.cmpi eq, %9, %18 : vector<32x32xi32>
    %20 = arith.extui %19 : vector<32x32xi1> to vector<32x32xi32>
    %21 = arith.sitofp %20 : vector<32x32xi32> to vector<32x32xf32>
    %22 = arith.truncf %21 : vector<32x32xf32> to vector<32x32xbf16>
    %c0_3 = arith.constant 0 : index
    %c0_4 = arith.constant 0 : index
    %23 = vector.load %arg2[%c0_3, %c0_4] : memref<32x1xi32, #tpu.memory_space<vmem>>, vector<32x1xi32>
    %24 = vector.broadcast %23 : vector<32x1xi32> to vector<32x64xi32>
    %25 = arith.cmpi eq, %10, %24 : vector<32x64xi32>
    %26 = arith.extui %25 : vector<32x64xi1> to vector<32x64xi32>
    %27 = arith.sitofp %26 : vector<32x64xi32> to vector<32x64xf32>
    %28 = arith.truncf %27 : vector<32x64xf32> to vector<32x64xbf16>
    %c0_5 = arith.constant 0 : index
    %c0_6 = arith.constant 0 : index
    %29 = vector.load %arg4[%c0_5, %c0_6] : memref<512x100xbf16, #tpu.memory_space<vmem>>, vector<512x100xbf16>
    %cst = arith.constant dense<0.000000e+00> : vector<32x100xf32>
    %30 = tpu.matmul %16, %29, %cst {dimension_numbers = #tpu.dot_dimension_numbers<[1], [0], [0], [1], [0, 0, 1, 1], [], []>} : vector<32x512xbf16>, vector<512x100xbf16>, vector<32x100xf32> -> vector<32x100xf32>
    %c0_7 = arith.constant 0 : index
    %c0_8 = arith.constant 0 : index
    %31 = vector.load %arg5[%c0_7, %c0_8] : memref<32x100xbf16, #tpu.memory_space<vmem>>, vector<32x100xbf16>
    %cst_9 = arith.constant dense<0.000000e+00> : vector<32x100xf32>
    %32 = tpu.matmul %22, %31, %cst_9 {dimension_numbers = #tpu.dot_dimension_numbers<[1], [0], [0], [1], [0, 0, 1, 1], [], []>} : vector<32x32xbf16>, vector<32x100xbf16>, vector<32x100xf32> -> vector<32x100xf32>
    %c0_10 = arith.constant 0 : index
    %c0_11 = arith.constant 0 : index
    %33 = vector.load %arg6[%c0_10, %c0_11] : memref<64x100xbf16, #tpu.memory_space<vmem>>, vector<64x100xbf16>
    %cst_12 = arith.constant dense<0.000000e+00> : vector<32x100xf32>
    %34 = tpu.matmul %28, %33, %cst_12 {dimension_numbers = #tpu.dot_dimension_numbers<[1], [0], [0], [1], [0, 0, 1, 1], [], []>} : vector<32x64xbf16>, vector<64x100xbf16>, vector<32x100xf32> -> vector<32x100xf32>
    %35 = tpu.concatenate %30, %32, %34 in 0 : vector<32x100xf32>, vector<32x100xf32>, vector<32x100xf32> -> vector<96x100xf32>
    %36 = arith.truncf %35 : vector<96x100xf32> to vector<96x100xbf16>
    %c0_13 = arith.constant 0 : index
    %c0_14 = arith.constant 0 : index
    %37 = vector.load %arg7[%c0_13, %c0_14] : memref<100x100xbf16, #tpu.memory_space<vmem>>, vector<100x100xbf16>
    %cst_15 = arith.constant dense<0.000000e+00> : vector<96x100xf32>
    %38 = tpu.matmul %36, %37, %cst_15 {dimension_numbers = #tpu.dot_dimension_numbers<[1], [0], [0], [1], [0, 0, 1, 1], [], []>} : vector<96x100xbf16>, vector<100x100xbf16>, vector<96x100xf32> -> vector<96x100xf32>
    %c0_16 = arith.constant 0 : index
    %c0_17 = arith.constant 0 : index
    %39 = vector.load %arg8[%c0_16, %c0_17] : memref<1x100xf32, #tpu.memory_space<vmem>>, vector<1x100xf32>
    %40 = vector.broadcast %39 : vector<1x100xf32> to vector<96x100xf32>
    %41 = arith.addf %38, %40 : vector<96x100xf32>
    %c0_18 = arith.constant 0 : index
    %c0_19 = arith.constant 0 : index
    %42 = vector.load %arg9[%c0_18, %c0_19] : memref<100x100xbf16, #tpu.memory_space<vmem>>, vector<100x100xbf16>
    %cst_20 = arith.constant dense<0.000000e+00> : vector<96x100xf32>
    %43 = tpu.matmul %36, %42, %cst_20 {dimension_numbers = #tpu.dot_dimension_numbers<[1], [0], [0], [1], [0, 0, 1, 1], [], []>} : vector<96x100xbf16>, vector<100x100xbf16>, vector<96x100xf32> -> vector<96x100xf32>
    %c0_21 = arith.constant 0 : index
    %c0_22 = arith.constant 0 : index
    %44 = vector.load %arg10[%c0_21, %c0_22] : memref<1x100xf32, #tpu.memory_space<vmem>>, vector<1x100xf32>
    %45 = vector.broadcast %44 : vector<1x100xf32> to vector<96x100xf32>
    %46 = arith.addf %43, %45 : vector<96x100xf32>
    %c0_23 = arith.constant 0 : index
    %c0_24 = arith.constant 0 : index
    %47 = vector.load %arg11[%c0_23, %c0_24] : memref<100x100xbf16, #tpu.memory_space<vmem>>, vector<100x100xbf16>
    %cst_25 = arith.constant dense<0.000000e+00> : vector<96x100xf32>
    %48 = tpu.matmul %36, %47, %cst_25 {dimension_numbers = #tpu.dot_dimension_numbers<[1], [0], [0], [1], [0, 0, 1, 1], [], []>} : vector<96x100xbf16>, vector<100x100xbf16>, vector<96x100xf32> -> vector<96x100xf32>
    %c0_26 = arith.constant 0 : index
    %c0_27 = arith.constant 0 : index
    %49 = vector.load %arg12[%c0_26, %c0_27] : memref<1x100xf32, #tpu.memory_space<vmem>>, vector<1x100xf32>
    %50 = vector.broadcast %49 : vector<1x100xf32> to vector<96x100xf32>
    %51 = arith.addf %48, %50 : vector<96x100xf32>
    %52 = vector.extract_strided_slice %41 {offsets = [0, 0], sizes = [32, 100], strides = [1, 1]} : vector<96x100xf32> to vector<32x100xf32>
    %53 = vector.extract_strided_slice %41 {offsets = [32, 0], sizes = [32, 100], strides = [1, 1]} : vector<96x100xf32> to vector<32x100xf32>
    %54 = vector.extract_strided_slice %41 {offsets = [64, 0], sizes = [32, 100], strides = [1, 1]} : vector<96x100xf32> to vector<32x100xf32>
    %55 = vector.extract_strided_slice %46 {offsets = [0, 0], sizes = [32, 100], strides = [1, 1]} : vector<96x100xf32> to vector<32x100xf32>
    %56 = vector.extract_strided_slice %46 {offsets = [32, 0], sizes = [32, 100], strides = [1, 1]} : vector<96x100xf32> to vector<32x100xf32>
    %57 = vector.extract_strided_slice %46 {offsets = [64, 0], sizes = [32, 100], strides = [1, 1]} : vector<96x100xf32> to vector<32x100xf32>
    %58 = vector.extract_strided_slice %51 {offsets = [0, 0], sizes = [32, 100], strides = [1, 1]} : vector<96x100xf32> to vector<32x100xf32>
    %59 = vector.extract_strided_slice %51 {offsets = [32, 0], sizes = [32, 100], strides = [1, 1]} : vector<96x100xf32> to vector<32x100xf32>
    %60 = vector.extract_strided_slice %51 {offsets = [64, 0], sizes = [32, 100], strides = [1, 1]} : vector<96x100xf32> to vector<32x100xf32>
    %61 = tpu.iota {dimensions = array<i32: 0>} : vector<100x4xi32>
    %62 = tpu.iota {dimensions = array<i32: 1>} : vector<100x4xi32>
    %c25_i32 = arith.constant 25 : i32
    %63 = vector.broadcast %c25_i32 : i32 to vector<100x4xi32>
    %64 = arith.muli %62, %63 : vector<100x4xi32>
    %65 = arith.cmpi sge, %61, %64 : vector<100x4xi32>
    %c1_i32_28 = arith.constant 1 : i32
    %66 = vector.broadcast %c1_i32_28 : i32 to vector<100x4xi32>
    %67 = arith.addi %62, %66 : vector<100x4xi32>
    %c25_i32_29 = arith.constant 25 : i32
    %68 = vector.broadcast %c25_i32_29 : i32 to vector<100x4xi32>
    %69 = arith.muli %67, %68 : vector<100x4xi32>
    %70 = arith.cmpi slt, %61, %69 : vector<100x4xi32>
    %71 = arith.andi %65, %70 : vector<100x4xi1>
    %72 = arith.extui %71 : vector<100x4xi1> to vector<100x4xi32>
    %73 = arith.sitofp %72 : vector<100x4xi32> to vector<100x4xf32>
    %74 = arith.truncf %73 : vector<100x4xf32> to vector<100x4xbf16>
    %75 = tpu.iota {dimensions = array<i32: 1>} : vector<4x100xi32>
    %76 = tpu.iota {dimensions = array<i32: 0>} : vector<4x100xi32>
    %c25_i32_30 = arith.constant 25 : i32
    %77 = vector.broadcast %c25_i32_30 : i32 to vector<4x100xi32>
    %78 = arith.muli %76, %77 : vector<4x100xi32>
    %79 = arith.cmpi sge, %75, %78 : vector<4x100xi32>
    %c1_i32_31 = arith.constant 1 : i32
    %80 = vector.broadcast %c1_i32_31 : i32 to vector<4x100xi32>
    %81 = arith.addi %76, %80 : vector<4x100xi32>
    %c25_i32_32 = arith.constant 25 : i32
    %82 = vector.broadcast %c25_i32_32 : i32 to vector<4x100xi32>
    %83 = arith.muli %81, %82 : vector<4x100xi32>
    %84 = arith.cmpi slt, %75, %83 : vector<4x100xi32>
    %85 = arith.andi %79, %84 : vector<4x100xi1>
    %86 = arith.extui %85 : vector<4x100xi1> to vector<4x100xi32>
    %87 = arith.sitofp %86 : vector<4x100xi32> to vector<4x100xf32>
    %88 = arith.truncf %87 : vector<4x100xf32> to vector<4x100xbf16>
    %89 = arith.mulf %52, %55 : vector<32x100xf32>
    %90 = arith.mulf %52, %56 : vector<32x100xf32>
    %91 = arith.mulf %52, %57 : vector<32x100xf32>
    %92 = arith.mulf %53, %55 : vector<32x100xf32>
    %93 = arith.mulf %53, %56 : vector<32x100xf32>
    %94 = arith.mulf %53, %57 : vector<32x100xf32>
    %95 = arith.mulf %54, %55 : vector<32x100xf32>
    %96 = arith.mulf %54, %56 : vector<32x100xf32>
    %97 = arith.mulf %54, %57 : vector<32x100xf32>
    %98 = tpu.concatenate %89, %90, %91, %92, %93, %94, %95, %96, %97 in 0 : vector<32x100xf32>, vector<32x100xf32>, vector<32x100xf32>, vector<32x100xf32>, vector<32x100xf32>, vector<32x100xf32>, vector<32x100xf32>, vector<32x100xf32>, vector<32x100xf32> -> vector<288x100xf32>
    %99 = arith.truncf %98 : vector<288x100xf32> to vector<288x100xbf16>
    %cst_33 = arith.constant dense<0.000000e+00> : vector<288x4xf32>
    %100 = tpu.matmul %99, %74, %cst_33 {dimension_numbers = #tpu.dot_dimension_numbers<[1], [0], [0], [1], [0, 0, 1, 1], [], []>} : vector<288x100xbf16>, vector<100x4xbf16>, vector<288x4xf32> -> vector<288x4xf32>
    %cst_34 = arith.constant 2.000000e-01 : f32
    %101 = vector.broadcast %cst_34 : f32 to vector<288x4xf32>
    %102 = arith.mulf %100, %101 : vector<288x4xf32>
    %103 = vector.extract_strided_slice %102 {offsets = [0, 0], sizes = [32, 4], strides = [1, 1]} : vector<288x4xf32> to vector<32x4xf32>
    %104 = vector.extract_strided_slice %102 {offsets = [32, 0], sizes = [32, 4], strides = [1, 1]} : vector<288x4xf32> to vector<32x4xf32>
    %105 = vector.extract_strided_slice %102 {offsets = [64, 0], sizes = [32, 4], strides = [1, 1]} : vector<288x4xf32> to vector<32x4xf32>
    %106 = vector.extract_strided_slice %102 {offsets = [96, 0], sizes = [32, 4], strides = [1, 1]} : vector<288x4xf32> to vector<32x4xf32>
    %107 = vector.extract_strided_slice %102 {offsets = [128, 0], sizes = [32, 4], strides = [1, 1]} : vector<288x4xf32> to vector<32x4xf32>
    %108 = vector.extract_strided_slice %102 {offsets = [160, 0], sizes = [32, 4], strides = [1, 1]} : vector<288x4xf32> to vector<32x4xf32>
    %109 = vector.extract_strided_slice %102 {offsets = [192, 0], sizes = [32, 4], strides = [1, 1]} : vector<288x4xf32> to vector<32x4xf32>
    %110 = vector.extract_strided_slice %102 {offsets = [224, 0], sizes = [32, 4], strides = [1, 1]} : vector<288x4xf32> to vector<32x4xf32>
    %111 = vector.extract_strided_slice %102 {offsets = [256, 0], sizes = [32, 4], strides = [1, 1]} : vector<288x4xf32> to vector<32x4xf32>
    %112 = arith.maximumf %103, %104 : vector<32x4xf32>
    %113 = arith.maximumf %112, %105 : vector<32x4xf32>
    %114 = arith.subf %103, %113 : vector<32x4xf32>
    %115 = math.exp %114 : vector<32x4xf32>
    %116 = arith.subf %104, %113 : vector<32x4xf32>
    %117 = math.exp %116 : vector<32x4xf32>
    %118 = arith.subf %105, %113 : vector<32x4xf32>
    %119 = math.exp %118 : vector<32x4xf32>
    %120 = arith.addf %115, %117 : vector<32x4xf32>
    %121 = arith.addf %120, %119 : vector<32x4xf32>
    %122 = tpu.reciprocal %121 {approx = true} : vector<32x4xf32> -> vector<32x4xf32>
    %123 = arith.mulf %115, %122 : vector<32x4xf32>
    %124 = arith.mulf %117, %122 : vector<32x4xf32>
    %125 = arith.mulf %119, %122 : vector<32x4xf32>
    %126 = arith.maximumf %106, %107 : vector<32x4xf32>
    %127 = arith.maximumf %126, %108 : vector<32x4xf32>
    %128 = arith.subf %106, %127 : vector<32x4xf32>
    %129 = math.exp %128 : vector<32x4xf32>
    %130 = arith.subf %107, %127 : vector<32x4xf32>
    %131 = math.exp %130 : vector<32x4xf32>
    %132 = arith.subf %108, %127 : vector<32x4xf32>
    %133 = math.exp %132 : vector<32x4xf32>
    %134 = arith.addf %129, %131 : vector<32x4xf32>
    %135 = arith.addf %134, %133 : vector<32x4xf32>
    %136 = tpu.reciprocal %135 {approx = true} : vector<32x4xf32> -> vector<32x4xf32>
    %137 = arith.mulf %129, %136 : vector<32x4xf32>
    %138 = arith.mulf %131, %136 : vector<32x4xf32>
    %139 = arith.mulf %133, %136 : vector<32x4xf32>
    %140 = arith.maximumf %109, %110 : vector<32x4xf32>
    %141 = arith.maximumf %140, %111 : vector<32x4xf32>
    %142 = arith.subf %109, %141 : vector<32x4xf32>
    %143 = math.exp %142 : vector<32x4xf32>
    %144 = arith.subf %110, %141 : vector<32x4xf32>
    %145 = math.exp %144 : vector<32x4xf32>
    %146 = arith.subf %111, %141 : vector<32x4xf32>
    %147 = math.exp %146 : vector<32x4xf32>
    %148 = arith.addf %143, %145 : vector<32x4xf32>
    %149 = arith.addf %148, %147 : vector<32x4xf32>
    %150 = tpu.reciprocal %149 {approx = true} : vector<32x4xf32> -> vector<32x4xf32>
    %151 = arith.mulf %143, %150 : vector<32x4xf32>
    %152 = arith.mulf %145, %150 : vector<32x4xf32>
    %153 = arith.mulf %147, %150 : vector<32x4xf32>
    %154 = tpu.concatenate %123, %124, %125, %137, %138, %139, %151, %152, %153 in 0 : vector<32x4xf32>, vector<32x4xf32>, vector<32x4xf32>, vector<32x4xf32>, vector<32x4xf32>, vector<32x4xf32>, vector<32x4xf32>, vector<32x4xf32>, vector<32x4xf32> -> vector<288x4xf32>
    %cst_35 = arith.constant dense<0.000000e+00> : vector<288x100xf32>
    %155 = tpu.matmul %154, %88, %cst_35 {dimension_numbers = #tpu.dot_dimension_numbers<[1], [0], [0], [1], [0, 0, 1, 1], [], []>} : vector<288x4xf32>, vector<4x100xbf16>, vector<288x100xf32> -> vector<288x100xf32>
    %156 = vector.extract_strided_slice %155 {offsets = [0, 0], sizes = [32, 100], strides = [1, 1]} : vector<288x100xf32> to vector<32x100xf32>
    %157 = arith.mulf %156, %58 : vector<32x100xf32>
    %cst_36 = arith.constant 0.000000e+00 : f32
    %158 = vector.broadcast %cst_36 : f32 to vector<32x100xf32>
    %159 = arith.addf %158, %157 : vector<32x100xf32>
    %160 = vector.extract_strided_slice %155 {offsets = [32, 0], sizes = [32, 100], strides = [1, 1]} : vector<288x100xf32> to vector<32x100xf32>
    %161 = arith.mulf %160, %59 : vector<32x100xf32>
    %162 = arith.addf %159, %161 : vector<32x100xf32>
    %163 = vector.extract_strided_slice %155 {offsets = [64, 0], sizes = [32, 100], strides = [1, 1]} : vector<288x100xf32> to vector<32x100xf32>
    %164 = arith.mulf %163, %60 : vector<32x100xf32>
    %165 = arith.addf %162, %164 : vector<32x100xf32>
    %166 = vector.extract_strided_slice %155 {offsets = [96, 0], sizes = [32, 100], strides = [1, 1]} : vector<288x100xf32> to vector<32x100xf32>
    %167 = arith.mulf %166, %58 : vector<32x100xf32>
    %cst_37 = arith.constant 0.000000e+00 : f32
    %168 = vector.broadcast %cst_37 : f32 to vector<32x100xf32>
    %169 = arith.addf %168, %167 : vector<32x100xf32>
    %170 = vector.extract_strided_slice %155 {offsets = [128, 0], sizes = [32, 100], strides = [1, 1]} : vector<288x100xf32> to vector<32x100xf32>
    %171 = arith.mulf %170, %59 : vector<32x100xf32>
    %172 = arith.addf %169, %171 : vector<32x100xf32>
    %173 = vector.extract_strided_slice %155 {offsets = [160, 0], sizes = [32, 100], strides = [1, 1]} : vector<288x100xf32> to vector<32x100xf32>
    %174 = arith.mulf %173, %60 : vector<32x100xf32>
    %175 = arith.addf %172, %174 : vector<32x100xf32>
    %176 = vector.extract_strided_slice %155 {offsets = [192, 0], sizes = [32, 100], strides = [1, 1]} : vector<288x100xf32> to vector<32x100xf32>
    %177 = arith.mulf %176, %58 : vector<32x100xf32>
    %cst_38 = arith.constant 0.000000e+00 : f32
    %178 = vector.broadcast %cst_38 : f32 to vector<32x100xf32>
    %179 = arith.addf %178, %177 : vector<32x100xf32>
    %180 = vector.extract_strided_slice %155 {offsets = [224, 0], sizes = [32, 100], strides = [1, 1]} : vector<288x100xf32> to vector<32x100xf32>
    %181 = arith.mulf %180, %59 : vector<32x100xf32>
    %182 = arith.addf %179, %181 : vector<32x100xf32>
    %183 = vector.extract_strided_slice %155 {offsets = [256, 0], sizes = [32, 100], strides = [1, 1]} : vector<288x100xf32> to vector<32x100xf32>
    %184 = arith.mulf %183, %60 : vector<32x100xf32>
    %185 = arith.addf %182, %184 : vector<32x100xf32>
    %186 = tpu.concatenate %165, %175, %185 in 0 : vector<32x100xf32>, vector<32x100xf32>, vector<32x100xf32> -> vector<96x100xf32>
    %187 = arith.truncf %186 : vector<96x100xf32> to vector<96x100xbf16>
    %c0_39 = arith.constant 0 : index
    %c0_40 = arith.constant 0 : index
    %188 = vector.load %arg13[%c0_39, %c0_40] : memref<100x100xbf16, #tpu.memory_space<vmem>>, vector<100x100xbf16>
    %cst_41 = arith.constant dense<0.000000e+00> : vector<96x100xf32>
    %189 = tpu.matmul %187, %188, %cst_41 {dimension_numbers = #tpu.dot_dimension_numbers<[1], [0], [0], [1], [0, 0, 1, 1], [], []>} : vector<96x100xbf16>, vector<100x100xbf16>, vector<96x100xf32> -> vector<96x100xf32>
    %c0_42 = arith.constant 0 : index
    %c0_43 = arith.constant 0 : index
    %190 = vector.load %arg14[%c0_42, %c0_43] : memref<1x100xf32, #tpu.memory_space<vmem>>, vector<1x100xf32>
    %191 = vector.broadcast %190 : vector<1x100xf32> to vector<96x100xf32>
    %192 = arith.addf %189, %191 : vector<96x100xf32>
    %193 = arith.addf %192, %35 : vector<96x100xf32>
    %c0_44 = arith.constant 0 : index
    %c0_45 = arith.constant 0 : index
    %194 = vector.load %arg15[%c0_44, %c0_45] : memref<1x100xf32, #tpu.memory_space<vmem>>, vector<1x100xf32>
    %c0_46 = arith.constant 0 : index
    %c0_47 = arith.constant 0 : index
    %195 = vector.load %arg16[%c0_46, %c0_47] : memref<1x100xf32, #tpu.memory_space<vmem>>, vector<1x100xf32>
    %cst_48 = arith.constant dense<0.000000e+00> : vector<96xf32>
    %196 = vector.multi_reduction <add>, %193, %cst_48 [1] : vector<96x100xf32> to vector<96xf32>
    %197 = vector.shape_cast %196 : vector<96xf32> to vector<96x1xf32>
    %cst_49 = arith.constant 1.000000e+02 : f32
    %198 = vector.broadcast %cst_49 : f32 to vector<96x1xf32>
    %199 = arith.divf %197, %198 : vector<96x1xf32>
    %200 = vector.broadcast %199 : vector<96x1xf32> to vector<96x100xf32>
    %201 = arith.subf %193, %200 : vector<96x100xf32>
    %202 = arith.mulf %201, %201 : vector<96x100xf32>
    %cst_50 = arith.constant dense<0.000000e+00> : vector<96xf32>
    %203 = vector.multi_reduction <add>, %202, %cst_50 [1] : vector<96x100xf32> to vector<96xf32>
    %204 = vector.shape_cast %203 : vector<96xf32> to vector<96x1xf32>
    %cst_51 = arith.constant 1.000000e+02 : f32
    %205 = vector.broadcast %cst_51 : f32 to vector<96x1xf32>
    %206 = arith.divf %204, %205 : vector<96x1xf32>
    %207 = vector.broadcast %199 : vector<96x1xf32> to vector<96x100xf32>
    %208 = arith.subf %193, %207 : vector<96x100xf32>
    %cst_52 = arith.constant 9.99999996E-13 : f32
    %209 = vector.broadcast %cst_52 : f32 to vector<96x1xf32>
    %210 = arith.addf %206, %209 : vector<96x1xf32>
    %211 = math.rsqrt %210 : vector<96x1xf32>
    %212 = vector.broadcast %211 : vector<96x1xf32> to vector<96x100xf32>
    %213 = arith.mulf %208, %212 : vector<96x100xf32>
    %214 = vector.broadcast %194 : vector<1x100xf32> to vector<96x100xf32>
    %215 = arith.mulf %213, %214 : vector<96x100xf32>
    %216 = vector.broadcast %195 : vector<1x100xf32> to vector<96x100xf32>
    %217 = arith.addf %215, %216 : vector<96x100xf32>
    %c0_i32_53 = arith.constant 0 : i32
    %218 = tpu.memref_slice %arg33[%c0_i32_53] : memref<4x!tpu.dma_semaphore, #tpu.memory_space<semaphore_mem>> -> memref<1x!tpu.dma_semaphore, #tpu.memory_space<semaphore_mem>>
    %219 = tpu.memref_squeeze %218 : memref<1x!tpu.dma_semaphore, #tpu.memory_space<semaphore_mem>> -> memref<!tpu.dma_semaphore, #tpu.memory_space<semaphore_mem>>
    tpu.wait_dma2 semaphore(%219 : memref<!tpu.dma_semaphore, #tpu.memory_space<semaphore_mem>>) src(%arg23 : memref<100x1024xbf16, #tpu.memory_space<any>>) dst(%arg29 : memref<100x1024xbf16, #tpu.memory_space<vmem>>)
    %c1_i32_54 = arith.constant 1 : i32
    %220 = tpu.memref_slice %arg33[%c1_i32_54] : memref<4x!tpu.dma_semaphore, #tpu.memory_space<semaphore_mem>> -> memref<1x!tpu.dma_semaphore, #tpu.memory_space<semaphore_mem>>
    %221 = tpu.memref_squeeze %220 : memref<1x!tpu.dma_semaphore, #tpu.memory_space<semaphore_mem>> -> memref<!tpu.dma_semaphore, #tpu.memory_space<semaphore_mem>>
    tpu.wait_dma2 semaphore(%221 : memref<!tpu.dma_semaphore, #tpu.memory_space<semaphore_mem>>) src(%arg24 : memref<1024x100xbf16, #tpu.memory_space<any>>) dst(%arg30 : memref<1024x100xbf16, #tpu.memory_space<vmem>>)
    %222 = arith.truncf %217 : vector<96x100xf32> to vector<96x100xbf16>
    %c0_55 = arith.constant 0 : index
    %c0_56 = arith.constant 0 : index
    %223 = vector.load %arg29[%c0_55, %c0_56] : memref<100x1024xbf16, #tpu.memory_space<vmem>>, vector<100x1024xbf16>
    %cst_57 = arith.constant dense<0.000000e+00> : vector<96x1024xf32>
    %224 = tpu.matmul %222, %223, %cst_57 {dimension_numbers = #tpu.dot_dimension_numbers<[1], [0], [0], [1], [0, 0, 1, 1], [], []>} : vector<96x100xbf16>, vector<100x1024xbf16>, vector<96x1024xf32> -> vector<96x1024xf32>
    %c0_58 = arith.constant 0 : index
    %c0_59 = arith.constant 0 : index
    %225 = vector.load %arg17[%c0_58, %c0_59] : memref<1x1024xf32, #tpu.memory_space<vmem>>, vector<1x1024xf32>
    %226 = vector.broadcast %225 : vector<1x1024xf32> to vector<96x1024xf32>
    %227 = arith.addf %224, %226 : vector<96x1024xf32>
    %cst_60 = arith.constant 5.000000e-01 : f32
    %228 = vector.broadcast %cst_60 : f32 to vector<96x1024xf32>
    %229 = arith.mulf %228, %227 : vector<96x1024xf32>
    %cst_61 = arith.constant 4.471500e-02 : f32
    %230 = vector.broadcast %cst_61 : f32 to vector<96x1024xf32>
    %231 = arith.mulf %230, %227 : vector<96x1024xf32>
    %232 = arith.mulf %231, %227 : vector<96x1024xf32>
    %233 = arith.mulf %232, %227 : vector<96x1024xf32>
    %234 = arith.addf %227, %233 : vector<96x1024xf32>
    %cst_62 = arith.constant 0.797884583 : f32
    %235 = vector.broadcast %cst_62 : f32 to vector<96x1024xf32>
    %236 = arith.mulf %235, %234 : vector<96x1024xf32>
    %237 = math.tanh %236 : vector<96x1024xf32>
    %cst_63 = arith.constant 1.000000e+00 : f32
    %238 = vector.broadcast %cst_63 : f32 to vector<96x1024xf32>
    %239 = arith.addf %238, %237 : vector<96x1024xf32>
    %240 = arith.mulf %229, %239 : vector<96x1024xf32>
    %241 = arith.truncf %240 : vector<96x1024xf32> to vector<96x1024xbf16>
    %c0_64 = arith.constant 0 : index
    %c0_65 = arith.constant 0 : index
    %242 = vector.load %arg30[%c0_64, %c0_65] : memref<1024x100xbf16, #tpu.memory_space<vmem>>, vector<1024x100xbf16>
    %cst_66 = arith.constant dense<0.000000e+00> : vector<96x100xf32>
    %243 = tpu.matmul %241, %242, %cst_66 {dimension_numbers = #tpu.dot_dimension_numbers<[1], [0], [0], [1], [0, 0, 1, 1], [], []>} : vector<96x1024xbf16>, vector<1024x100xbf16>, vector<96x100xf32> -> vector<96x100xf32>
    %c0_67 = arith.constant 0 : index
    %c0_68 = arith.constant 0 : index
    %244 = vector.load %arg18[%c0_67, %c0_68] : memref<1x100xf32, #tpu.memory_space<vmem>>, vector<1x100xf32>
    %245 = vector.broadcast %244 : vector<1x100xf32> to vector<96x100xf32>
    %246 = arith.addf %243, %245 : vector<96x100xf32>
    %247 = arith.addf %246, %217 : vector<96x100xf32>
    %c0_69 = arith.constant 0 : index
    %c0_70 = arith.constant 0 : index
    %248 = vector.load %arg19[%c0_69, %c0_70] : memref<1x100xf32, #tpu.memory_space<vmem>>, vector<1x100xf32>
    %c0_71 = arith.constant 0 : index
    %c0_72 = arith.constant 0 : index
    %249 = vector.load %arg20[%c0_71, %c0_72] : memref<1x100xf32, #tpu.memory_space<vmem>>, vector<1x100xf32>
    %cst_73 = arith.constant dense<0.000000e+00> : vector<96xf32>
    %250 = vector.multi_reduction <add>, %247, %cst_73 [1] : vector<96x100xf32> to vector<96xf32>
    %251 = vector.shape_cast %250 : vector<96xf32> to vector<96x1xf32>
    %cst_74 = arith.constant 1.000000e+02 : f32
    %252 = vector.broadcast %cst_74 : f32 to vector<96x1xf32>
    %253 = arith.divf %251, %252 : vector<96x1xf32>
    %254 = vector.broadcast %253 : vector<96x1xf32> to vector<96x100xf32>
    %255 = arith.subf %247, %254 : vector<96x100xf32>
    %256 = arith.mulf %255, %255 : vector<96x100xf32>
    %cst_75 = arith.constant dense<0.000000e+00> : vector<96xf32>
    %257 = vector.multi_reduction <add>, %256, %cst_75 [1] : vector<96x100xf32> to vector<96xf32>
    %258 = vector.shape_cast %257 : vector<96xf32> to vector<96x1xf32>
    %cst_76 = arith.constant 1.000000e+02 : f32
    %259 = vector.broadcast %cst_76 : f32 to vector<96x1xf32>
    %260 = arith.divf %258, %259 : vector<96x1xf32>
    %261 = vector.broadcast %253 : vector<96x1xf32> to vector<96x100xf32>
    %262 = arith.subf %247, %261 : vector<96x100xf32>
    %cst_77 = arith.constant 9.99999996E-13 : f32
    %263 = vector.broadcast %cst_77 : f32 to vector<96x1xf32>
    %264 = arith.addf %260, %263 : vector<96x1xf32>
    %265 = math.rsqrt %264 : vector<96x1xf32>
    %266 = vector.broadcast %265 : vector<96x1xf32> to vector<96x100xf32>
    %267 = arith.mulf %262, %266 : vector<96x100xf32>
    %268 = vector.broadcast %248 : vector<1x100xf32> to vector<96x100xf32>
    %269 = arith.mulf %267, %268 : vector<96x100xf32>
    %270 = vector.broadcast %249 : vector<1x100xf32> to vector<96x100xf32>
    %271 = arith.addf %269, %270 : vector<96x100xf32>
    %c2_i32_78 = arith.constant 2 : i32
    %272 = tpu.memref_slice %arg33[%c2_i32_78] : memref<4x!tpu.dma_semaphore, #tpu.memory_space<semaphore_mem>> -> memref<1x!tpu.dma_semaphore, #tpu.memory_space<semaphore_mem>>
    %273 = tpu.memref_squeeze %272 : memref<1x!tpu.dma_semaphore, #tpu.memory_space<semaphore_mem>> -> memref<!tpu.dma_semaphore, #tpu.memory_space<semaphore_mem>>
    tpu.wait_dma2 semaphore(%273 : memref<!tpu.dma_semaphore, #tpu.memory_space<semaphore_mem>>) src(%arg25 : memref<100x384xbf16, #tpu.memory_space<any>>) dst(%arg31 : memref<100x384xbf16, #tpu.memory_space<vmem>>)
    %274 = arith.truncf %271 : vector<96x100xf32> to vector<96x100xbf16>
    %c0_79 = arith.constant 0 : index
    %c0_80 = arith.constant 0 : index
    %275 = vector.load %arg31[%c0_79, %c0_80] : memref<100x384xbf16, #tpu.memory_space<vmem>>, vector<100x384xbf16>
    %cst_81 = arith.constant dense<0.000000e+00> : vector<96x384xf32>
    %276 = tpu.matmul %274, %275, %cst_81 {dimension_numbers = #tpu.dot_dimension_numbers<[1], [0], [0], [1], [0, 0, 1, 1], [], []>} : vector<96x100xbf16>, vector<100x384xbf16>, vector<96x384xf32> -> vector<96x384xf32>
    %277 = vector.extract_strided_slice %276 {offsets = [0, 0], sizes = [32, 128], strides = [1, 1]} : vector<96x384xf32> to vector<32x128xf32>
    %278 = vector.extract_strided_slice %276 {offsets = [32, 128], sizes = [32, 128], strides = [1, 1]} : vector<96x384xf32> to vector<32x128xf32>
    %279 = arith.addf %277, %278 : vector<32x128xf32>
    %280 = vector.extract_strided_slice %276 {offsets = [64, 256], sizes = [32, 128], strides = [1, 1]} : vector<96x384xf32> to vector<32x128xf32>
    %281 = arith.addf %279, %280 : vector<32x128xf32>
    %c0_82 = arith.constant 0 : index
    %c0_83 = arith.constant 0 : index
    %282 = vector.load %arg21[%c0_82, %c0_83] : memref<1x128xf32, #tpu.memory_space<vmem>>, vector<1x128xf32>
    %283 = vector.broadcast %282 : vector<1x128xf32> to vector<32x128xf32>
    %284 = arith.addf %281, %283 : vector<32x128xf32>
    %c3_i32_84 = arith.constant 3 : i32
    %285 = tpu.memref_slice %arg33[%c3_i32_84] : memref<4x!tpu.dma_semaphore, #tpu.memory_space<semaphore_mem>> -> memref<1x!tpu.dma_semaphore, #tpu.memory_space<semaphore_mem>>
    %286 = tpu.memref_squeeze %285 : memref<1x!tpu.dma_semaphore, #tpu.memory_space<semaphore_mem>> -> memref<!tpu.dma_semaphore, #tpu.memory_space<semaphore_mem>>
    tpu.wait_dma2 semaphore(%286 : memref<!tpu.dma_semaphore, #tpu.memory_space<semaphore_mem>>) src(%arg26 : memref<128x512xbf16, #tpu.memory_space<any>>) dst(%arg32 : memref<128x512xbf16, #tpu.memory_space<vmem>>)
    %287 = arith.truncf %284 : vector<32x128xf32> to vector<32x128xbf16>
    %c0_85 = arith.constant 0 : index
    %c0_86 = arith.constant 0 : index
    %288 = vector.load %arg32[%c0_85, %c0_86] : memref<128x512xbf16, #tpu.memory_space<vmem>>, vector<128x512xbf16>
    %cst_87 = arith.constant dense<0.000000e+00> : vector<32x512xf32>
    %289 = tpu.matmul %287, %288, %cst_87 {dimension_numbers = #tpu.dot_dimension_numbers<[1], [0], [0], [1], [0, 0, 1, 1], [], []>} : vector<32x128xbf16>, vector<128x512xbf16>, vector<32x512xf32> -> vector<32x512xf32>
    %c0_88 = arith.constant 0 : index
    %c0_89 = arith.constant 0 : index
    %290 = vector.load %arg22[%c0_88, %c0_89] : memref<1x512xf32, #tpu.memory_space<vmem>>, vector<1x512xf32>
    %291 = vector.broadcast %290 : vector<1x512xf32> to vector<32x512xf32>
    %292 = arith.addf %289, %291 : vector<32x512xf32>
    %cst_90 = arith.constant 0.000000e+00 : f32
    %293 = vector.broadcast %cst_90 : f32 to vector<32x512xf32>
    %294 = arith.maximumf %292, %293 : vector<32x512xf32>
    %295 = math.absf %292 : vector<32x512xf32>
    %cst_91 = arith.constant 0.000000e+00 : f32
    %296 = vector.broadcast %cst_91 : f32 to vector<32x512xf32>
    %297 = arith.subf %296, %295 : vector<32x512xf32>
    %298 = math.exp %297 : vector<32x512xf32>
    %cst_92 = arith.constant 1.000000e+00 : f32
    %299 = vector.broadcast %cst_92 : f32 to vector<32x512xf32>
    %300 = arith.addf %299, %298 : vector<32x512xf32>
    %301 = math.log %300 : vector<32x512xf32>
    %302 = arith.addf %294, %301 : vector<32x512xf32>
    %303 = arith.subf %292, %302 : vector<32x512xf32>
    %304 = math.exp %303 : vector<32x512xf32>
    %c0_93 = arith.constant 0 : index
    %c0_94 = arith.constant 0 : index
    %305 = vector.load %arg28[%c0_93, %c0_94] : memref<32x512xf32, #tpu.memory_space<vmem>>, vector<32x512xf32>
    tpu.vector_store %arg28[%c0_93, %c0_94], %304 {strides = array<i32>} : memref<32x512xf32, #tpu.memory_space<vmem>>, vector<32x512xf32>,
    %c0_95 = arith.constant 0 : index
    %c0_96 = arith.constant 0 : index
    %306 = vector.load %arg3[%c0_95, %c0_96] : memref<32x1xi32, #tpu.memory_space<vmem>>, vector<32x1xi32>
    %307 = vector.broadcast %306 : vector<32x1xi32> to vector<32x512xi32>
    %308 = arith.cmpi eq, %8, %307 : vector<32x512xi32>
    %309 = arith.extui %308 : vector<32x512xi1> to vector<32x512xi32>
    %310 = arith.sitofp %309 : vector<32x512xi32> to vector<32x512xf32>
    %cst_97 = arith.constant 0.899999976 : f32
    %311 = vector.broadcast %cst_97 : f32 to vector<32x512xf32>
    %312 = arith.mulf %311, %310 : vector<32x512xf32>
    %cst_98 = arith.constant 1.95312503E-4 : f32
    %313 = vector.broadcast %cst_98 : f32 to vector<32x512xf32>
    %314 = arith.addf %312, %313 : vector<32x512xf32>
    %315 = arith.mulf %314, %292 : vector<32x512xf32>
    %316 = arith.subf %302, %315 : vector<32x512xf32>
    %cst_99 = arith.constant dense<0.000000e+00> : vector<32xf32>
    %317 = vector.multi_reduction <add>, %316, %cst_99 [1] : vector<32x512xf32> to vector<32xf32>
    %318 = vector.shape_cast %317 : vector<32xf32> to vector<32x1xf32>
    %cst_100 = arith.constant dense<0.000000e+00> : vector<1xf32>
    %319 = vector.multi_reduction <add>, %318, %cst_100 [0] : vector<32x1xf32> to vector<1xf32>
    %320 = vector.shape_cast %319 : vector<1xf32> to vector<1x1xf32>
    %cst_101 = arith.constant 3.200000e+01 : f32
    %321 = vector.broadcast %cst_101 : f32 to vector<1x1xf32>
    %322 = arith.divf %320, %321 : vector<1x1xf32>
    %c0_102 = arith.constant 0 : index
    %c0_103 = arith.constant 0 : index
    %323 = vector.load %arg27[%c0_102, %c0_103] : memref<1x1xf32, #tpu.memory_space<vmem>>, vector<1x1xf32>
    tpu.vector_store %arg27[%c0_102, %c0_103], %322 {strides = array<i32>} : memref<1x1xf32, #tpu.memory_space<vmem>>, vector<1x1xf32>,
    return
  }
}

</mosaic_0001>

<bundles_post_ra>
// kernel: ontology_forward.1
= control target key start
LH: loop header
LB: loop body
LE: loop exit
PB: predicated region body
PF: predicated region fallthrough
CT: control target
= control target key end

     0   :  { %s11926_s0 = inlined_call_operand.vmem [shape: s32[32,1], index: 0, kind: input, shape index: {}]   ;;  %s11927_s1 = inlined_call_operand.vmem [shape: s32[32,1], index: 1, kind: input, shape index: {}]   ;;  %s11928_s2 = inlined_call_operand.vmem [shape: s32[32,1], index: 2, kind: input, shape index: {}]   ;;  %s11929_s3 = inlined_call_operand.vmem [shape: s32[32,1], index: 3, kind: input, shape index: {}]   ;;  %s11930_s4 = inlined_call_operand.vmem [shape: bf16[512,100], index: 4, kind: input, shape index: {}]   ;;  %s11931_s5 = inlined_call_operand.vmem [shape: bf16[32,100], index: 5, kind: input, shape index: {}]   ;;  %s11932_s6 = inlined_call_operand.vmem [shape: bf16[64,100], index: 6, kind: input, shape index: {}]   ;;  %s11933_s7 = inlined_call_operand.vmem [shape: bf16[100,100], index: 7, kind: input, shape index: {}]   ;;  %s11934_s8 = inlined_call_operand.vmem [shape: f32[1,100], index: 8, kind: input, shape index: {}]   ;;  %s11935_s9 = inlined_call_operand.vmem [shape: bf16[100,100], index: 9, kind: input, shape index: {}]   ;;  %s11936_s10 = inlined_call_operand.vmem [shape: f32[1,100], index: 10, kind: input, shape index: {}]   ;;  %s11937_s11 = inlined_call_operand.vmem [shape: bf16[100,100], index: 11, kind: input, shape index: {}]   ;;  %s11938_s12 = inlined_call_operand.vmem [shape: f32[1,100], index: 12, kind: input, shape index: {}]   ;;  %s11939_s13 = inlined_call_operand.vmem [shape: bf16[100,100], index: 13, kind: input, shape index: {}]   ;;  %s11940_s14 = inlined_call_operand.vmem [shape: f32[1,100], index: 14, kind: input, shape index: {}]   ;;  %s11941_s15 = inlined_call_operand.vmem [shape: f32[1,100], index: 15, kind: input, shape index: {}]   ;;  %s11942_s16 = inlined_call_operand.vmem [shape: f32[1,100], index: 16, kind: input, shape index: {}]   ;;  %s11943_s17 = inlined_call_operand.vmem [shape: f32[1,1024], index: 17, kind: input, shape index: {}]   ;;  %s11944_s18 = inlined_call_operand.vmem [shape: f32[1,100], index: 18, kind: input, shape index: {}]   ;;  %s11945_s19 = inlined_call_operand.vmem [shape: f32[1,100], index: 19, kind: input, shape index: {}]   ;;  %s11946_s20 = inlined_call_operand.vmem [shape: f32[1,100], index: 20, kind: input, shape index: {}]   ;;  %s11947_s21 = inlined_call_operand.vmem [shape: f32[1,128], index: 21, kind: input, shape index: {}]   ;;  %s11948_s22 = inlined_call_operand.vmem [shape: f32[1,512], index: 22, kind: input, shape index: {}]   ;;  %s11949_s23 = inlined_call_operand.vmem [shape: bf16[100,1024], index: 23, kind: input, shape index: {}]   ;;  %s11950_s24 = inlined_call_operand.vmem [shape: bf16[1024,100], index: 24, kind: input, shape index: {}]   ;;  %s11951_s25 = inlined_call_operand.vmem [shape: bf16[100,384], index: 25, kind: input, shape index: {}]   ;;  %s11952_s26 = inlined_call_operand.vmem [shape: bf16[128,512], index: 26, kind: input, shape index: {}]   ;;  %s11953_s27 = inlined_call_operand.hbm [shape: f32[1,1], index: 27, kind: output, shape index: {0}]   ;;  %s11954_s28 = inlined_call_operand.hbm [shape: f32[32,512], index: 28, kind: output, shape index: {1}]  }
   0x1   :  { %12003 = sst [smem:[#allocation49_spill]] %s11926_s0 }
   0x2   :  { %12004 = sst [smem:[#allocation50_spill]] %s11927_s1 }
   0x3   :  { %12005 = sst [smem:[#allocation51_spill]] %s11928_s2 }
   0x4   :  { %12006 = sst [smem:[#allocation52_spill]] %s11929_s3 }
   0x5   :  { %12007 = sst [smem:[#allocation53_spill]] %s11930_s4 }
   0x6   :  { %12008 = sst [smem:[#allocation54_spill]] %s11931_s5 }
   0x7   :  { %12009 = sst [smem:[#allocation55_spill]] %s11932_s6 }
   0x8   :  { %12010 = sst [smem:[#allocation56_spill]] %s11933_s7 }
   0x9   :  { %12011 = sst [smem:[#allocation57_spill]] %s11934_s8 }
   0xa   :  { %12012 = sst [smem:[#allocation58_spill]] %s11935_s9 }
   0xb   :  { %12013 = sst [smem:[#allocation59_spill]] %s11936_s10 }
   0xc   :  { %12014 = sst [smem:[#allocation60_spill]] %s11937_s11 }
   0xd   :  { %12015 = sst [smem:[#allocation61_spill]] %s11938_s12 }
   0xe   :  { %34 = vsyncpa [#allocation8], 0 }
   0xf   :  { %35 = vsyncpa [#allocation10], 0  ;;  %v93_v0 = vld [vmem:[%s11949_s23] sm:$0xff]  ;;  %v95_v1 = vld [vmem:[%s11949_s23 + $0x8] sm:$0xff] }
  0x10   :  { %94 = vst [vmem:[#allocation2] sm:$0xff] %v93_v0  ;;  %v97_v2 = vld [vmem:[%s11949_s23 + $0x10] sm:$0xff]  ;;  %v99_v3 = vld [vmem:[%s11949_s23 + $0x18] sm:$0xff]  ;;  %v101_v4 = vld [vmem:[%s11949_s23 + $0x20] sm:$0xff] }
  0x11   :  { %96 = vst [vmem:[#allocation2 + $0x8] sm:$0xff] %v95_v1  ;;  %v103_v5 = vld [vmem:[%s11949_s23 + $0x28] sm:$0xff]  ;;  %v105_v6 = vld [vmem:[%s11949_s23 + $0x30] sm:$0xff]  ;;  %v107_v7 = vld [vmem:[%s11949_s23 + $0x38] sm:$0xff] }
  0x12   :  { %98 = vst [vmem:[#allocation2 + $0x10] sm:$0xff] %v97_v2  ;;  %v109_v8 = vld [vmem:[%s11949_s23 + $0x40] sm:$0xff]  ;;  %v111_v9 = vld [vmem:[%s11949_s23 + $0x48] sm:$0xff]  ;;  %v113_v10 = vld [vmem:[%s11949_s23 + $0x50] sm:$0xff] }
  0x13   :  { %100 = vst [vmem:[#allocation2 + $0x18] sm:$0xff] %v99_v3  ;;  %v115_v11 = vld [vmem:[%s11949_s23 + $0x58] sm:$0xff]  ;;  %v117_v12 = vld [vmem:[%s11949_s23 + $0x60] sm:$0xff]  ;;  %v119_v13 = vld [vmem:[%s11949_s23 + $0x68] sm:$0xff] }
  0x14   :  { %102 = vst [vmem:[#allocation2 + $0x20] sm:$0xff] %v101_v4  ;;  %v121_v14 = vld [vmem:[%s11949_s23 + $0x70] sm:$0xff]  ;;  %v123_v15 = vld [vmem:[%s11949_s23 + $0x78] sm:$0xff]  ;;  %v125_v16 = vld [vmem:[%s11949_s23 + $0x80] sm:$0xff] }
  0x15   :  { %104 = vst [vmem:[#allocation2 + $0x28] sm:$0xff] %v103_v5  ;;  %v127_v17 = vld [vmem:[%s11949_s23 + $0x88] sm:$0xff]  ;;  %v129_v18 = vld [vmem:[%s11949_s23 + $0x90] sm:$0xff]  ;;  %v131_v19 = vld [vmem:[%s11949_s23 + $0x98] sm:$0xff] }
  0x16   :  { %106 = vst [vmem:[#allocation2 + $0x30] sm:$0xff] %v105_v6  ;;  %v133_v20 = vld [vmem:[%s11949_s23 + $0xa0] sm:$0xff]  ;;  %v135_v21 = vld [vmem:[%s11949_s23 + $0xa8] sm:$0xff]  ;;  %v137_v22 = vld [vmem:[%s11949_s23 + $0xb0] sm:$0xff] }
  0x17   :  { %108 = vst [vmem:[#allocation2 + $0x38] sm:$0xff] %v107_v7  ;;  %v139_v23 = vld [vmem:[%s11949_s23 + $0xb8] sm:$0xff]  ;;  %v141_v24 = vld [vmem:[%s11949_s23 + $0xc0] sm:$0xff]  ;;  %v143_v25 = vld [vmem:[%s11949_s23 + $0xc8] sm:$0xff] }
  0x18   :  { %110 = vst [vmem:[#allocation2 + $0x40] sm:$0xff] %v109_v8  ;;  %v145_v26 = vld [vmem:[%s11949_s23 + $0xd0] sm:$0xff]  ;;  %v147_v27 = vld [vmem:[%s11949_s23 + $0xd8] sm:$0xff]  ;;  %v149_v28 = vld [vmem:[%s11949_s23 + $0xe0] sm:$0xff] }
  0x19   :  { %112 = vst [vmem:[#allocation2 + $0x48] sm:$0xff] %v111_v9  ;;  %v151_v29 = vld [vmem:[%s11949_s23 + $0xe8] sm:$0xff]  ;;  %v153_v30 = vld [vmem:[%s11949_s23 + $0xf0] sm:$0xff]  ;;  %v155_v31 = vld [vmem:[%s11949_s23 + $0xf8] sm:$0xff] }
  0x1a   :  { %114 = vst [vmem:[#allocation2 + $0x50] sm:$0xff] %v113_v10  ;;  %v157_v32 = vld [vmem:[%s11949_s23 + $0x100] sm:$0xff]  ;;  %v159_v33 = vld [vmem:[%s11949_s23 + $0x108] sm:$0xff]  ;;  %v161_v34 = vld [vmem:[%s11949_s23 + $0x110] sm:$0xff] }
  0x1b   :  { %116 = vst [vmem:[#allocation2 + $0x58] sm:$0xff] %v115_v11  ;;  %v163_v35 = vld [vmem:[%s11949_s23 + $0x118] sm:$0xff]  ;;  %v165_v36 = vld [vmem:[%s11949_s23 + $0x120] sm:$0xff]  ;;  %v167_v37 = vld [vmem:[%s11949_s23 + $0x128] sm:$0xff] }
  0x1c   :  { %118 = vst [vmem:[#allocation2 + $0x60] sm:$0xff] %v117_v12  ;;  %v169_v38 = vld [vmem:[%s11949_s23 + $0x130] sm:$0xff]  ;;  %v171_v39 = vld [vmem:[%s11949_s23 + $0x138] sm:$0xff]  ;;  %v173_v40 = vld [vmem:[%s11949_s23 + $0x140] sm:$0xff] }
  0x1d   :  { %120 = vst [vmem:[#allocation2 + $0x68] sm:$0xff] %v119_v13  ;;  %v175_v41 = vld [vmem:[%s11949_s23 + $0x148] sm:$0xff]  ;;  %v177_v42 = vld [vmem:[%s11949_s23 + $0x150] sm:$0xff]  ;;  %v179_v43 = vld [vmem:[%s11949_s23 + $0x158] sm:$0xff] }
  0x1e   :  { %122 = vst [vmem:[#allocation2 + $0x70] sm:$0xff] %v121_v14  ;;  %v181_v44 = vld [vmem:[%s11949_s23 + $0x160] sm:$0xff]  ;;  %v183_v45 = vld [vmem:[%s11949_s23 + $0x168] sm:$0xff]  ;;  %v185_v46 = vld [vmem:[%s11949_s23 + $0x170] sm:$0xff] }
  0x1f   :  { %124 = vst [vmem:[#allocation2 + $0x78] sm:$0xff] %v123_v15  ;;  %v187_v47 = vld [vmem:[%s11949_s23 + $0x178] sm:$0xff]  ;;  %v189_v48 = vld [vmem:[%s11949_s23 + $0x180] sm:$0xff]  ;;  %v191_v49 = vld [vmem:[%s11949_s23 + $0x188] sm:$0xff] }
  0x20   :  { %126 = vst [vmem:[#allocation2 + $0x80] sm:$0xff] %v125_v16  ;;  %v193_v50 = vld [vmem:[%s11949_s23 + $0x190] sm:$0xff]  ;;  %v195_v51 = vld [vmem:[%s11949_s23 + $0x198] sm:$0xff] }
  0x21   :  { %128 = vst [vmem:[#allocation2 + $0x88] sm:$0xff] %v127_v17 }
  0x22   :  { %130 = vst [vmem:[#allocation2 + $0x90] sm:$0xff] %v129_v18 }
  0x23   :  { %132 = vst [vmem:[#allocation2 + $0x98] sm:$0xff] %v131_v19 }
  0x24   :  { %134 = vst [vmem:[#allocation2 + $0xa0] sm:$0xff] %v133_v20 }
  0x25   :  { %136 = vst [vmem:[#allocation2 + $0xa8] sm:$0xff] %v135_v21 }
  0x26   :  { %138 = vst [vmem:[#allocation2 + $0xb0] sm:$0xff] %v137_v22 }
  0x27   :  { %140 = vst [vmem:[#allocation2 + $0xb8] sm:$0xff] %v139_v23 }
  0x28   :  { %142 = vst [vmem:[#allocation2 + $0xc0] sm:$0xff] %v141_v24 }
  0x29   :  { %144 = vst [vmem:[#allocation2 + $0xc8] sm:$0xff] %v143_v25 }
  0x2a   :  { %146 = vst [vmem:[#allocation2 + $0xd0] sm:$0xff] %v145_v26 }
  0x2b   :  { %148 = vst [vmem:[#allocation2 + $0xd8] sm:$0xff] %v147_v27 }
  0x2c   :  { %150 = vst [vmem:[#allocation2 + $0xe0] sm:$0xff] %v149_v28 }
  0x2d   :  { %152 = vst [vmem:[#allocation2 + $0xe8] sm:$0xff] %v151_v29 }
  0x2e   :  { %154 = vst [vmem:[#allocation2 + $0xf0] sm:$0xff] %v153_v30 }
  0x2f   :  { %156 = vst [vmem:[#allocation2 + $0xf8] sm:$0xff] %v155_v31 }
  0x30   :  { %158 = vst [vmem:[#allocation2 + $0x100] sm:$0xff] %v157_v32 }
  0x31   :  { %160 = vst [vmem:[#allocation2 + $0x108] sm:$0xff] %v159_v33 }
  0x32   :  { %162 = vst [vmem:[#allocation2 + $0x110] sm:$0xff] %v161_v34 }
  0x33   :  { %164 = vst [vmem:[#allocation2 + $0x118] sm:$0xff] %v163_v35 }
  0x34   :  { %166 = vst [vmem:[#allocation2 + $0x120] sm:$0xff] %v165_v36 }
  0x35   :  { %168 = vst [vmem:[#allocation2 + $0x128] sm:$0xff] %v167_v37 }
  0x36   :  { %170 = vst [vmem:[#allocation2 + $0x130] sm:$0xff] %v169_v38 }
  0x37   :  { %172 = vst [vmem:[#allocation2 + $0x138] sm:$0xff] %v171_v39 }
  0x38   :  { %174 = vst [vmem:[#allocation2 + $0x140] sm:$0xff] %v173_v40 }
  0x39   :  { %176 = vst [vmem:[#allocation2 + $0x148] sm:$0xff] %v175_v41 }
  0x3a   :  { %178 = vst [vmem:[#allocation2 + $0x150] sm:$0xff] %v177_v42 }
  0x3b   :  { %180 = vst [vmem:[#allocation2 + $0x158] sm:$0xff] %v179_v43 }
  0x3c   :  { %182 = vst [vmem:[#allocation2 + $0x160] sm:$0xff] %v181_v44 }
  0x3d   :  { %184 = vst [vmem:[#allocation2 + $0x168] sm:$0xff] %v183_v45 }
  0x3e   :  { %186 = vst [vmem:[#allocation2 + $0x170] sm:$0xff] %v185_v46 }
  0x3f   :  { %188 = vst [vmem:[#allocation2 + $0x178] sm:$0xff] %v187_v47 }
  0x40   :  { %190 = vst [vmem:[#allocation2 + $0x180] sm:$0xff] %v189_v48 }
  0x41   :  { %192 = vst [vmem:[#allocation2 + $0x188] sm:$0xff] %v191_v49 }
  0x42   :  { %194 = vst [vmem:[#allocation2 + $0x190] sm:$0xff] %v193_v50 }
  0x43   :  { %196 = vst [vmem:[#allocation2 + $0x198] sm:$0xff] %v195_v51 }
  0x44   :  { %202 = vsyncadd [#allocation6], 6656  ;;  %v214_v52 = vld [vmem:[%s11950_s24] sm:$0xff]  ;;  %v216_v53 = vld [vmem:[%s11950_s24 + $0x8] sm:$0xff] }
  0x45   :  { %215 = vst [vmem:[#allocation3 + $0xb0] sm:$0xff] %v214_v52  ;;  %v218_v54 = vld [vmem:[%s11950_s24 + $0x10] sm:$0xff]  ;;  %v220_v55 = vld [vmem:[%s11950_s24 + $0x18] sm:$0xff]  ;;  %v222_v56 = vld [vmem:[%s11950_s24 + $0x20] sm:$0xff] }
  0x46   :  { %217 = vst [vmem:[#allocation3 + $0x1b0] sm:$0xff] %v216_v53  ;;  %v224_v57 = vld [vmem:[%s11950_s24 + $0x28] sm:$0xff]  ;;  %v226_v58 = vld [vmem:[%s11950_s24 + $0x30] sm:$0xff]  ;;  %v228_v59 = vld [vmem:[%s11950_s24 + $0x38] sm:$0xff] }
  0x47   :  { %219 = vst [vmem:[#allocation3 + $0xd8] sm:$0xff] %v218_v54  ;;  %v230_v60 = vld [vmem:[%s11950_s24 + $0x40] sm:$0xff]  ;;  %v232_v61 = vld [vmem:[%s11950_s24 + $0x48] sm:$0xff]  ;;  %v234_v62 = vld [vmem:[%s11950_s24 + $0x50] sm:$0xff] }
  0x48   :  { %221 = vst [vmem:[#allocation3 + $0x18] sm:$0xff] %v220_v55  ;;  %v236_v63 = vld [vmem:[%s11950_s24 + $0x58] sm:$0xff]  ;;  %v238_v0 = vld [vmem:[%s11950_s24 + $0x60] sm:$0xff]  ;;  %v240_v1 = vld [vmem:[%s11950_s24 + $0x68] sm:$0xff] }
  0x49   :  { %223 = vst [vmem:[#allocation3 + $0x50] sm:$0xff] %v222_v56  ;;  %v242_v2 = vld [vmem:[%s11950_s24 + $0x70] sm:$0xff]  ;;  %v244_v3 = vld [vmem:[%s11950_s24 + $0x78] sm:$0xff]  ;;  %v246_v4 = vld [vmem:[%s11950_s24 + $0x80] sm:$0xff] }
  0x4a   :  { %225 = vst [vmem:[#allocation3 + $0x168] sm:$0xff] %v224_v57  ;;  %v248_v5 = vld [vmem:[%s11950_s24 + $0x88] sm:$0xff]  ;;  %v250_v6 = vld [vmem:[%s11950_s24 + $0x90] sm:$0xff]  ;;  %v252_v7 = vld [vmem:[%s11950_s24 + $0x98] sm:$0xff] }
  0x4b   :  { %227 = vst [vmem:[#allocation3 + $0x130] sm:$0xff] %v226_v58  ;;  %v254_v8 = vld [vmem:[%s11950_s24 + $0xa0] sm:$0xff]  ;;  %v256_v9 = vld [vmem:[%s11950_s24 + $0xa8] sm:$0xff]  ;;  %v258_v10 = vld [vmem:[%s11950_s24 + $0xb0] sm:$0xff] }
  0x4c   :  { %229 = vst [vmem:[#allocation3 + $0x48] sm:$0xff] %v228_v59  ;;  %v260_v11 = vld [vmem:[%s11950_s24 + $0xb8] sm:$0xff]  ;;  %v262_v12 = vld [vmem:[%s11950_s24 + $0xc0] sm:$0xff]  ;;  %v264_v13 = vld [vmem:[%s11950_s24 + $0xc8] sm:$0xff] }
  0x4d   :  { %231 = vst [vmem:[#allocation3 + $0x180] sm:$0xff] %v230_v60  ;;  %v266_v14 = vld [vmem:[%s11950_s24 + $0xd0] sm:$0xff]  ;;  %v268_v15 = vld [vmem:[%s11950_s24 + $0xd8] sm:$0xff]  ;;  %v270_v16 = vld [vmem:[%s11950_s24 + $0xe0] sm:$0xff] }
  0x4e   :  { %233 = vst [vmem:[#allocation3 + $0x110] sm:$0xff] %v232_v61  ;;  %v272_v17 = vld [vmem:[%s11950_s24 + $0xe8] sm:$0xff]  ;;  %v274_v18 = vld [vmem:[%s11950_s24 + $0xf0] sm:$0xff]  ;;  %v276_v19 = vld [vmem:[%s11950_s24 + $0xf8] sm:$0xff] }
  0x4f   :  { %235 = vst [vmem:[#allocation3 + $0x118] sm:$0xff] %v234_v62  ;;  %v278_v20 = vld [vmem:[%s11950_s24 + $0x100] sm:$0xff]  ;;  %v280_v21 = vld [vmem:[%s11950_s24 + $0x108] sm:$0xff]  ;;  %v282_v22 = vld [vmem:[%s11950_s24 + $0x110] sm:$0xff] }
  0x50   :  { %237 = vst [vmem:[#allocation3 + $0x98] sm:$0xff] %v236_v63  ;;  %v284_v23 = vld [vmem:[%s11950_s24 + $0x118] sm:$0xff]  ;;  %v286_v24 = vld [vmem:[%s11950_s24 + $0x120] sm:$0xff]  ;;  %v288_v25 = vld [vmem:[%s11950_s24 + $0x128] sm:$0xff] }
  0x51   :  { %239 = vst [vmem:[#allocation3 + $0x120] sm:$0xff] %v238_v0  ;;  %v290_v26 = vld [vmem:[%s11950_s24 + $0x130] sm:$0xff]  ;;  %v292_v27 = vld [vmem:[%s11950_s24 + $0x138] sm:$0xff]  ;;  %v294_v28 = vld [vmem:[%s11950_s24 + $0x140] sm:$0xff] }
  0x52   :  { %241 = vst [vmem:[#allocation3 + $0x150] sm:$0xff] %v240_v1  ;;  %v296_v29 = vld [vmem:[%s11950_s24 + $0x148] sm:$0xff]  ;;  %v298_v30 = vld [vmem:[%s11950_s24 + $0x150] sm:$0xff]  ;;  %v300_v31 = vld [vmem:[%s11950_s24 + $0x158] sm:$0xff] }
  0x53   :  { %243 = vst [vmem:[#allocation3 + $0x108] sm:$0xff] %v242_v2  ;;  %v302_v32 = vld [vmem:[%s11950_s24 + $0x160] sm:$0xff]  ;;  %v304_v33 = vld [vmem:[%s11950_s24 + $0x168] sm:$0xff]  ;;  %v306_v34 = vld [vmem:[%s11950_s24 + $0x170] sm:$0xff] }
  0x54   :  { %245 = vst [vmem:[#allocation3 + $0x60] sm:$0xff] %v244_v3  ;;  %v308_v35 = vld [vmem:[%s11950_s24 + $0x178] sm:$0xff]  ;;  %v310_v36 = vld [vmem:[%s11950_s24 + $0x180] sm:$0xff]  ;;  %v312_v37 = vld [vmem:[%s11950_s24 + $0x188] sm:$0xff] }
  0x55   :  { %247 = vst [vmem:[#allocation3 + $0xe0] sm:$0xff] %v246_v4  ;;  %v314_v38 = vld [vmem:[%s11950_s24 + $0x190] sm:$0xff]  ;;  %v316_v39 = vld [vmem:[%s11950_s24 + $0x198] sm:$0xff]  ;;  %v318_v40 = vld [vmem:[%s11950_s24 + $0x1a0] sm:$0xff] }
  0x56   :  { %249 = vst [vmem:[#allocation3 + $0x188] sm:$0xff] %v248_v5  ;;  %v320_v41 = vld [vmem:[%s11950_s24 + $0x1a8] sm:$0xff]  ;;  %v322_v42 = vld [vmem:[%s11950_s24 + $0x1b0] sm:$0xff]  ;;  %v324_v43 = vld [vmem:[%s11950_s24 + $0x1b8] sm:$0xff] }
  0x57   :  { %251 = vst [vmem:[#allocation3 + $0x138] sm:$0xff] %v250_v6  ;;  %v326_v44 = vld [vmem:[%s11950_s24 + $0x1c0] sm:$0xff]  ;;  %v328_v45 = vld [vmem:[%s11950_s24 + $0x1c8] sm:$0xff]  ;;  %v330_v46 = vld [vmem:[%s11950_s24 + $0x1d0] sm:$0xff] }
  0x58   :  { %253 = vst [vmem:[#allocation3 + $0x140] sm:$0xff] %v252_v7  ;;  %v332_v47 = vld [vmem:[%s11950_s24 + $0x1d8] sm:$0xff]  ;;  %v334_v48 = vld [vmem:[%s11950_s24 + $0x1e0] sm:$0xff]  ;;  %v336_v49 = vld [vmem:[%s11950_s24 + $0x1e8] sm:$0xff] }
  0x59   :  { %255 = vst [vmem:[#allocation3 + $0x80] sm:$0xff] %v254_v8  ;;  %v338_v50 = vld [vmem:[%s11950_s24 + $0x1f0] sm:$0xff]  ;;  %v340_v51 = vld [vmem:[%s11950_s24 + $0x1f8] sm:$0xff] }
  0x5a   :  { %257 = vst [vmem:[#allocation3 + $0x1a8] sm:$0xff] %v256_v9 }
  0x5b   :  { %259 = vst [vmem:[#allocation3 + $0x1b8] sm:$0xff] %v258_v10 }
  0x5c   :  { %261 = vst [vmem:[#allocation3 + $0x28] sm:$0xff] %v260_v11 }
  0x5d   :  { %263 = vst [vmem:[#allocation3 + $0x1e8] sm:$0xff] %v262_v12 }
  0x5e   :  { %265 = vst [vmem:[#allocation3 + $0xf8] sm:$0xff] %v264_v13 }
  0x5f   :  { %267 = vst [vmem:[#allocation3 + $0x160] sm:$0xff] %v266_v14 }
  0x60   :  { %269 = vst [vmem:[#allocation3 + $0x30] sm:$0xff] %v268_v15 }
  0x61   :  { %271 = vst [vmem:[#allocation3 + $0x1e0] sm:$0xff] %v270_v16 }
  0x62   :  { %273 = vst [vmem:[#allocation3] sm:$0xff] %v272_v17 }
  0x63   :  { %275 = vst [vmem:[#allocation3 + $0xf0] sm:$0xff] %v274_v18 }
  0x64   :  { %277 = vst [vmem:[#allocation3 + $0x8] sm:$0xff] %v276_v19 }
  0x65   :  { %279 = vst [vmem:[#allocation3 + $0x148] sm:$0xff] %v278_v20 }
  0x66   :  { %281 = vst [vmem:[#allocation3 + $0x1d0] sm:$0xff] %v280_v21 }
  0x67   :  { %283 = vst [vmem:[#allocation3 + $0x100] sm:$0xff] %v282_v22 }
  0x68   :  { %285 = vst [vmem:[#allocation3 + $0xc8] sm:$0xff] %v284_v23 }
  0x69   :  { %287 = vst [vmem:[#allocation3 + $0x40] sm:$0xff] %v286_v24 }
  0x6a   :  { %289 = vst [vmem:[#allocation3 + $0x1f8] sm:$0xff] %v288_v25 }
  0x6b   :  { %291 = vst [vmem:[#allocation3 + $0x20] sm:$0xff] %v290_v26 }
  0x6c   :  { %293 = vst [vmem:[#allocation3 + $0x128] sm:$0xff] %v292_v27 }
  0x6d   :  { %295 = vst [vmem:[#allocation3 + $0x1a0] sm:$0xff] %v294_v28 }
  0x6e   :  { %297 = vst [vmem:[#allocation3 + $0x1f0] sm:$0xff] %v296_v29 }
  0x6f   :  { %299 = vst [vmem:[#allocation3 + $0xe8] sm:$0xff] %v298_v30 }
  0x70   :  { %301 = vst [vmem:[#allocation3 + $0x78] sm:$0xff] %v300_v31 }
  0x71   :  { %303 = vst [vmem:[#allocation3 + $0x70] sm:$0xff] %v302_v32 }
  0x72   :  { %305 = vst [vmem:[#allocation3 + $0x90] sm:$0xff] %v304_v33 }
  0x73   :  { %307 = vst [vmem:[#allocation3 + $0x1d8] sm:$0xff] %v306_v34 }
  0x74   :  { %309 = vst [vmem:[#allocation3 + $0xd0] sm:$0xff] %v308_v35 }
  0x75   :  { %311 = vst [vmem:[#allocation3 + $0xb8] sm:$0xff] %v310_v36 }
  0x76   :  { %313 = vst [vmem:[#allocation3 + $0x88] sm:$0xff] %v312_v37 }
  0x77   :  { %315 = vst [vmem:[#allocation3 + $0xa8] sm:$0xff] %v314_v38 }
  0x78   :  { %317 = vst [vmem:[#allocation3 + $0x1c8] sm:$0xff] %v316_v39 }
  0x79   :  { %319 = vst [vmem:[#allocation3 + $0x170] sm:$0xff] %v318_v40 }
  0x7a   :  { %321 = vst [vmem:[#allocation3 + $0x178] sm:$0xff] %v320_v41 }
  0x7b   :  { %323 = vst [vmem:[#allocation3 + $0x68] sm:$0xff] %v322_v42 }
  0x7c   :  { %325 = vst [vmem:[#allocation3 + $0x190] sm:$0xff] %v324_v43 }
  0x7d   :  { %327 = vst [vmem:[#allocation3 + $0x198] sm:$0xff] %v326_v44 }
  0x7e   :  { %329 = vst [vmem:[#allocation3 + $0x38] sm:$0xff] %v328_v45 }
  0x7f   :  { %331 = vst [vmem:[#allocation3 + $0xc0] sm:$0xff] %v330_v46 }
  0x80   :  { %333 = vst [vmem:[#allocation3 + $0x1c0] sm:$0xff] %v332_v47 }
  0x81   :  { %335 = vst [vmem:[#allocation3 + $0x158] sm:$0xff] %v334_v48 }
  0x82   :  { %337 = vst [vmem:[#allocation3 + $0x10] sm:$0xff] %v336_v49 }
  0x83   :  { %339 = vst [vmem:[#allocation3 + $0x58] sm:$0xff] %v338_v50 }
  0x84   :  { %341 = vst [vmem:[#allocation3 + $0xa0] sm:$0xff] %v340_v51 }
  0x85   :  { %347 = vsyncadd [#allocation6 + $0x1], 8192  ;;  %v361_v52 = vld [vmem:[%s11951_s25] sm:$0xff]  ;;  %v363_v53 = vld [vmem:[%s11951_s25 + $0x8] sm:$0xff] }
  0x86   :  { %362 = vst [vmem:[#allocation4] sm:$0xff] %v361_v52  ;;  %v365_v54 = vld [vmem:[%s11951_s25 + $0x10] sm:$0xff]  ;;  %v367_v55 = vld [vmem:[%s11951_s25 + $0x18] sm:$0xff]  ;;  %v369_v56 = vld [vmem:[%s11951_s25 + $0x20] sm:$0xff] }
  0x87   :  { %364 = vst [vmem:[#allocation4 + $0x8] sm:$0xff] %v363_v53  ;;  %v371_v57 = vld [vmem:[%s11951_s25 + $0x28] sm:$0xff]  ;;  %v373_v58 = vld [vmem:[%s11951_s25 + $0x30] sm:$0xff]  ;;  %v375_v59 = vld [vmem:[%s11951_s25 + $0x38] sm:$0xff] }
  0x88   :  { %366 = vst [vmem:[#allocation4 + $0x10] sm:$0xff] %v365_v54  ;;  %v377_v60 = vld [vmem:[%s11951_s25 + $0x40] sm:$0xff]  ;;  %v379_v61 = vld [vmem:[%s11951_s25 + $0x48] sm:$0xff]  ;;  %v381_v62 = vld [vmem:[%s11951_s25 + $0x50] sm:$0xff] }
  0x89   :  { %368 = vst [vmem:[#allocation4 + $0x18] sm:$0xff] %v367_v55  ;;  %v383_v63 = vld [vmem:[%s11951_s25 + $0x58] sm:$0xff]  ;;  %v385_v0 = vld [vmem:[%s11951_s25 + $0x60] sm:$0xff]  ;;  %v387_v1 = vld [vmem:[%s11951_s25 + $0x68] sm:$0xff] }
  0x8a   :  { %370 = vst [vmem:[#allocation4 + $0x20] sm:$0xff] %v369_v56  ;;  %v389_v2 = vld [vmem:[%s11951_s25 + $0x70] sm:$0xff]  ;;  %v391_v3 = vld [vmem:[%s11951_s25 + $0x78] sm:$0xff]  ;;  %v393_v4 = vld [vmem:[%s11951_s25 + $0x80] sm:$0xff] }
  0x8b   :  { %372 = vst [vmem:[#allocation4 + $0x28] sm:$0xff] %v371_v57  ;;  %v395_v5 = vld [vmem:[%s11951_s25 + $0x88] sm:$0xff]  ;;  %v397_v6 = vld [vmem:[%s11951_s25 + $0x90] sm:$0xff]  ;;  %v6432_v7 = vld [vmem:[%s11951_s25 + $0x98] sm:$0xf] }
  0x8c   :  { %374 = vst [vmem:[#allocation4 + $0x30] sm:$0xff] %v373_v58 }
  0x8d   :  { %376 = vst [vmem:[#allocation4 + $0x38] sm:$0xff] %v375_v59 }
  0x8e   :  { %378 = vst [vmem:[#allocation4 + $0x40] sm:$0xff] %v377_v60 }
  0x8f   :  { %380 = vst [vmem:[#allocation4 + $0x48] sm:$0xff] %v379_v61 }
  0x90   :  { %382 = vst [vmem:[#allocation4 + $0x50] sm:$0xff] %v381_v62 }
  0x91   :  { %384 = vst [vmem:[#allocation4 + $0x58] sm:$0xff] %v383_v63 }
  0x92   :  { %386 = vst [vmem:[#allocation4 + $0x60] sm:$0xff] %v385_v0 }
  0x93   :  { %388 = vst [vmem:[#allocation4 + $0x68] sm:$0xff] %v387_v1 }
  0x94   :  { %390 = vst [vmem:[#allocation4 + $0x70] sm:$0xff] %v389_v2 }
  0x95   :  { %392 = vst [vmem:[#allocation4 + $0x78] sm:$0xff] %v391_v3 }
  0x96   :  { %394 = vst [vmem:[#allocation4 + $0x80] sm:$0xff] %v393_v4 }
  0x97   :  { %396 = vst [vmem:[#allocation4 + $0x88] sm:$0xff] %v395_v5 }
  0x98   :  { %398 = vst [vmem:[#allocation4 + $0x90] sm:$0xff] %v397_v6 }
  0x99   :  { %410 = vst [vmem:[#allocation4 + $0x98] sm:$0xf] %v6432_v7 }
  0x9a   :  { %414 = vsyncadd [#allocation6 + $0x2], 2496  ;;  %v426_v8 = vld [vmem:[%s11952_s26] sm:$0xff]  ;;  %v428_v9 = vld [vmem:[%s11952_s26 + $0x8] sm:$0xff]  ;;  %s12016_s4 = sld [smem:[#allocation49_spill]]  ;;  %v11967_v42 = vmov 0  }
  0x9b   :  { %427 = vst [vmem:[#allocation5] sm:$0xff] %v426_v8  ;;  %v430_v10 = vld [vmem:[%s11952_s26 + $0x10] sm:$0xff]  ;;  %v432_v11 = vld [vmem:[%s11952_s26 + $0x18] sm:$0xff]  ;;  %v434_v12 = vld [vmem:[%s11952_s26 + $0x20] sm:$0xff]  ;;  %7797 = vset.pattern.permute.xlu1 %v11967_v42  ;;  %7796 = vset.pattern.permute.xlu0 %v11967_v42  ;;  %s12017_s30 = sld [smem:[#allocation50_spill]] }
  0x9c   :  { %429 = vst [vmem:[#allocation5 + $0x8] sm:$0xff] %v428_v9  ;;  %v436_v13 = vld [vmem:[%s11952_s26 + $0x28] sm:$0xff]  ;;  %v438_v14 = vld [vmem:[%s11952_s26 + $0x30] sm:$0xff]  ;;  %v440_v15 = vld [vmem:[%s11952_s26 + $0x38] sm:$0xff]  ;;  %7798 = vset.pattern.permute.xlu2 %v11967_v42 }
  0x9d   :  { %431 = vst [vmem:[#allocation5 + $0x10] sm:$0xff] %v430_v10  ;;  %v442_v16 = vld [vmem:[%s11952_s26 + $0x40] sm:$0xff]  ;;  %v444_v17 = vld [vmem:[%s11952_s26 + $0x48] sm:$0xff]  ;;  %v446_v18 = vld [vmem:[%s11952_s26 + $0x50] sm:$0xff] }
  0x9e   :  { %433 = vst [vmem:[#allocation5 + $0x18] sm:$0xff] %v432_v11  ;;  %v448_v19 = vld [vmem:[%s11952_s26 + $0x58] sm:$0xff]  ;;  %v450_v20 = vld [vmem:[%s11952_s26 + $0x60] sm:$0xff]  ;;  %v452_v21 = vld [vmem:[%s11952_s26 + $0x68] sm:$0xff] }
  0x9f   :  { %435 = vst [vmem:[#allocation5 + $0x20] sm:$0xff] %v434_v12  ;;  %v454_v22 = vld [vmem:[%s11952_s26 + $0x70] sm:$0xff]  ;;  %v456_v23 = vld [vmem:[%s11952_s26 + $0x78] sm:$0xff]  ;;  %v458_v24 = vld [vmem:[%s11952_s26 + $0x80] sm:$0xff] }
  0xa0   :  { %437 = vst [vmem:[#allocation5 + $0x28] sm:$0xff] %v436_v13  ;;  %v460_v25 = vld [vmem:[%s11952_s26 + $0x88] sm:$0xff]  ;;  %v462_v26 = vld [vmem:[%s11952_s26 + $0x90] sm:$0xff]  ;;  %v464_v27 = vld [vmem:[%s11952_s26 + $0x98] sm:$0xff] }
  0xa1   :  { %439 = vst [vmem:[#allocation5 + $0x30] sm:$0xff] %v438_v14  ;;  %v466_v28 = vld [vmem:[%s11952_s26 + $0xa0] sm:$0xff]  ;;  %v468_v29 = vld [vmem:[%s11952_s26 + $0xa8] sm:$0xff]  ;;  %v470_v30 = vld [vmem:[%s11952_s26 + $0xb0] sm:$0xff] }
  0xa2   :  { %441 = vst [vmem:[#allocation5 + $0x38] sm:$0xff] %v440_v15  ;;  %v472_v31 = vld [vmem:[%s11952_s26 + $0xb8] sm:$0xff]  ;;  %v474_v32 = vld [vmem:[%s11952_s26 + $0xc0] sm:$0xff]  ;;  %v476_v33 = vld [vmem:[%s11952_s26 + $0xc8] sm:$0xff] }
  0xa3   :  { %443 = vst [vmem:[#allocation5 + $0x40] sm:$0xff] %v442_v16  ;;  %v478_v34 = vld [vmem:[%s11952_s26 + $0xd0] sm:$0xff]  ;;  %v480_v35 = vld [vmem:[%s11952_s26 + $0xd8] sm:$0xff]  ;;  %v482_v36 = vld [vmem:[%s11952_s26 + $0xe0] sm:$0xff] }
  0xa4   :  { %445 = vst [vmem:[#allocation5 + $0x48] sm:$0xff] %v444_v17  ;;  %v484_v37 = vld [vmem:[%s11952_s26 + $0xe8] sm:$0xff]  ;;  %v486_v38 = vld [vmem:[%s11952_s26 + $0xf0] sm:$0xff]  ;;  %v488_v39 = vld [vmem:[%s11952_s26 + $0xf8] sm:$0xff] }
  0xa5   :  { %447 = vst [vmem:[#allocation5 + $0x50] sm:$0xff] %v446_v18  ;;  %v503_v40 = vld [vmem:[%s12016_s4 + $0x10] sm:$0xff]  ;;  %v501_v41 = vld [vmem:[%s12016_s4] sm:$0xff] }
  0xa6   :  { %449 = vst [vmem:[#allocation5 + $0x58] sm:$0xff] %v448_v19  ;;  %512 = vperm.xlu1 %7797, %v503_v40   ;;  %506 = vperm.xlu0 %7796, %v501_v41   ;;  %v573_v43 = vld [vmem:[%s12017_s30] sm:$0xff] }
  0xa7   :  { %451 = vst [vmem:[#allocation5 + $0x60] sm:$0xff] %v450_v20  ;;  %578 = vperm.xlu2 %7798, %v573_v43  }
  0xa8   :  { %453 = vst [vmem:[#allocation5 + $0x68] sm:$0xff] %v452_v21 }
  0xa9   :  { %455 = vst [vmem:[#allocation5 + $0x70] sm:$0xff] %v454_v22 }
  0xaa   :  { %457 = vst [vmem:[#allocation5 + $0x78] sm:$0xff] %v456_v23 }
  0xab   :  { %459 = vst [vmem:[#allocation5 + $0x80] sm:$0xff] %v458_v24 }
  0xac   :  { %461 = vst [vmem:[#allocation5 + $0x88] sm:$0xff] %v460_v25 }
  0xad   :  { %463 = vst [vmem:[#allocation5 + $0x90] sm:$0xff] %v462_v26 }
  0xae   :  { %465 = vst [vmem:[#allocation5 + $0x98] sm:$0xff] %v464_v27 }
  0xaf   :  { %467 = vst [vmem:[#allocation5 + $0xa0] sm:$0xff] %v466_v28 }
  0xb0   :  { %469 = vst [vmem:[#allocation5 + $0xa8] sm:$0xff] %v468_v29 }
  0xb1   :  { %471 = vst [vmem:[#allocation5 + $0xb0] sm:$0xff] %v470_v30 }
  0xb2   :  { %473 = vst [vmem:[#allocation5 + $0xb8] sm:$0xff] %v472_v31 }
  0xb3   :  { %475 = vst [vmem:[#allocation5 + $0xc0] sm:$0xff] %v474_v32 }
  0xb4   :  { %477 = vst [vmem:[#allocation5 + $0xc8] sm:$0xff] %v476_v33 }
  0xb5   :  { %479 = vst [vmem:[#allocation5 + $0xd0] sm:$0xff] %v478_v34 }
  0xb6   :  { %481 = vst [vmem:[#allocation5 + $0xd8] sm:$0xff] %v480_v35 }
  0xb7   :  { %483 = vst [vmem:[#allocation5 + $0xe0] sm:$0xff] %v482_v36 }
  0xb8   :  { %485 = vst [vmem:[#allocation5 + $0xe8] sm:$0xff] %v484_v37 }
  0xb9   :  { %487 = vst [vmem:[#allocation5 + $0xf0] sm:$0xff] %v486_v38 }
  0xba   :  { %489 = vst [vmem:[#allocation5 + $0xf8] sm:$0xff] %v488_v39 }
  0xbb   :  { %495 = vsyncadd [#allocation6 + $0x3], 4096  ;;  %s12018_s10 = sld [smem:[#allocation53_spill]]  ;;  %v504_v48 = vld [vmem:[%s12016_s4 + $0x18] sm:$0xff]  ;;  %v502_v49 = vld [vmem:[%s12016_s4 + $0x8] sm:$0xff]  ;;  %v496_v23 = vlaneseq }
  0xbc   :  { %v574_v53 = vld [vmem:[%s12017_s30 + $0x8] sm:$0xff]  ;;  %515 = vperm.xlu1 %7797, %v504_v48   ;;  %509 = vperm.xlu0 %7796, %v502_v49   ;;  %v576_v59 = vld [vmem:[%s12017_s30 + $0x18] sm:$0xff]  ;;  %v575_v60 = vld [vmem:[%s12017_s30 + $0x10] sm:$0xff]  ;;  %s12019_s25 = sld [smem:[#allocation51_spill]]  ;;  %v8309_v34 = vmov 1.0|1.0  }
  0xbd   :  { %581 = vperm.xlu2 %7798, %v574_v53   ;;  %s12020_s26 = sld [smem:[#allocation54_spill]]  ;;  %v9114_v27 = vand.u32 127, %v496_v23 }
  0xbe   :  { %s12021_s24 = sld [smem:[#allocation55_spill]] }
  0xbf   :  { %12022 = vst [vmem:[#allocation21_spill] sm:$0xff] %v9114_v27  ;;  %v9120_v29 = vadd.s32 128, %v9114_v27  ;;  %v9123_v30 = vadd.s32 256, %v9114_v27  ;;  %v9129_v33 = vadd.s32 384, %v9114_v27  ;;  %s12026_s12 = sld [smem:[#allocation56_spill]] }
  0xc0   :  { %s12027_s5 = sld [smem:[#allocation58_spill]] }
  0xc1   :  { %v7570_v44 = vld [vmem:[%s12018_s10 + $0x38] sm:$0xff]  ;;  %v7569_v50 = vld [vmem:[%s12018_s10 + $0x30] sm:$0xff]  ;;  %v7568_v55 = vld [vmem:[%s12018_s10 + $0x28] sm:$0xff]  ;;  %12023 = vst [vmem:[#allocation22_spill] sm:$0xff] %v9120_v29  ;;  %s12028_s3 = sld [smem:[#allocation60_spill]] }
  0xc2   :  { %v7578_v45 = vld [vmem:[%s12018_s10 + $0x78] sm:$0xff]  ;;  %889 = vmatpush.bf16.msra.mxu0 %v7570_v44  ;;  %v7577_v51 = vld [vmem:[%s12018_s10 + $0x70] sm:$0xff]  ;;  %v7576_v56 = vld [vmem:[%s12018_s10 + $0x68] sm:$0xff]  ;;  %12024 = vst [vmem:[#allocation23_spill] sm:$0xff] %v9123_v30  ;;  %s12030_s4 = sld [smem:[#allocation59_spill]] }
  0xc3   :  { %v7586_v46 = vld [vmem:[%s12018_s10 + $0xb8] sm:$0xff]  ;;  %908 = vmatpush.bf16.msra.mxu1 %v7578_v45  ;;  %v7585_v52 = vld [vmem:[%s12018_s10 + $0xb0] sm:$0xff]  ;;  %v7584_v57 = vld [vmem:[%s12018_s10 + $0xa8] sm:$0xff]  ;;  %12025 = vst [vmem:[#allocation24_spill] sm:$0xff] %v9129_v33 }
  0xc4   :  { %v7594_v47 = vld [vmem:[%s12018_s10 + $0xf8] sm:$0xff]  ;;  %927 = vmatpush.bf16.msra.mxu2 %v7586_v46  ;;  %v7593_v54 = vld [vmem:[%s12018_s10 + $0xf0] sm:$0xff]  ;;  %v7592_v58 = vld [vmem:[%s12018_s10 + $0xe8] sm:$0xff]  ;;  %587 = vperm.xlu1 %7797, %v576_v59  }
  0xc5   :  { %946 = vmatpush.bf16.msra.mxu3 %v7594_v47  ;;  %v7567_v61 = vld [vmem:[%s12018_s10 + $0x20] sm:$0xff]  ;;  %584 = vperm.xlu0 %7796, %v575_v60   ;;  %v7566_v2 = vld [vmem:[%s12018_s10 + $0x18] sm:$0xff]  ;;  %v605_v6 = vld [vmem:[%s12019_s25 + $0x10] sm:$0xff] }
  0xc6   :  { %890 = vmatpush.bf16.msra.mxu0 %v7569_v50  ;;  %v7575_v62 = vld [vmem:[%s12018_s10 + $0x60] sm:$0xff]  ;;  %v7574_v3 = vld [vmem:[%s12018_s10 + $0x58] sm:$0xff]  ;;  %v604_v7 = vld [vmem:[%s12019_s25 + $0x8] sm:$0xff] }
  0xc7   :  { %909 = vmatpush.bf16.msra.mxu1 %v7577_v51  ;;  %v7583_v63 = vld [vmem:[%s12018_s10 + $0xa0] sm:$0xff]  ;;  %v7582_v4 = vld [vmem:[%s12018_s10 + $0x98] sm:$0xff]  ;;  %v7565_v8 = vld [vmem:[%s12018_s10 + $0x10] sm:$0xff] }
  0xc8   :  { %928 = vmatpush.bf16.msra.mxu2 %v7585_v52  ;;  %v603_v0 = vld [vmem:[%s12019_s25] sm:$0xff]  ;;  %v7590_v5 = vld [vmem:[%s12018_s10 + $0xd8] sm:$0xff]  ;;  %v7573_v9 = vld [vmem:[%s12018_s10 + $0x50] sm:$0xff] }
  0xc9   :  { %947 = vmatpush.bf16.msra.mxu3 %v7593_v54  ;;  %v7591_v1 = vld [vmem:[%s12018_s10 + $0xe0] sm:$0xff]  ;;  %608 = vperm.xlu2 %7798, %v603_v0   ;;  %v7581_v10 = vld [vmem:[%s12018_s10 + $0x90] sm:$0xff]  ;;  %v606_v11 = vld [vmem:[%s12019_s25 + $0x18] sm:$0xff] }
  0xca   :  { %891 = vmatpush.bf16.msra.mxu0 %v7568_v55  ;;  %v7589_v12 = vld [vmem:[%s12018_s10 + $0xd0] sm:$0xff]  ;;  %v7564_v13 = vld [vmem:[%s12018_s10 + $0x8] sm:$0xff]  ;;  %v7563_v17 = vld [vmem:[%s12018_s10] sm:$0xff] }
  0xcb   :  { %910 = vmatpush.bf16.msra.mxu1 %v7576_v56  ;;  %v7572_v14 = vld [vmem:[%s12018_s10 + $0x48] sm:$0xff]  ;;  %v7571_v18 = vld [vmem:[%s12018_s10 + $0x40] sm:$0xff]  ;;  %v7600_v22 = vld [vmem:[%s12021_s24 + $0x18] sm:$0xff] }
  0xcc   :  { %929 = vmatpush.bf16.msra.mxu2 %v7584_v57  ;;  %614 = vperm.xlu1 %7797, %v605_v6   ;;  %v7580_v15 = vld [vmem:[%s12018_s10 + $0x88] sm:$0xff]  ;;  %v7579_v19 = vld [vmem:[%s12018_s10 + $0x80] sm:$0xff]  ;;  %v7599_v25 = vld [vmem:[%s12021_s24 + $0x10] sm:$0xff] }
  0xcd   :  { %948 = vmatpush.bf16.msra.mxu3 %v7592_v58  ;;  %611 = vperm.xlu0 %7796, %v604_v7   ;;  %v7588_v16 = vld [vmem:[%s12018_s10 + $0xc8] sm:$0xff]  ;;  %v7587_v20 = vld [vmem:[%s12018_s10 + $0xc0] sm:$0xff]  ;;  %v1083_v40 = vld [vmem:[%s12026_s12 + $0x30] sm:$0x3]  ;;  %v11965_v58 = vmov 0.0  }
  0xce   :  { %892 = vmatpush.bf16.msra.mxu0 %v7567_v61  ;;  %v7596_v21 = vld [vmem:[%s12020_s26 + $0x8] sm:$0xff]  ;;  %v7595_v24 = vld [vmem:[%s12020_s26] sm:$0xff]  ;;  %v1201_v41 = vld [vmem:[%s12027_s5 + $0x30] sm:$0x3]  ;;  %v1113_v43 = vunpack.c.l.b16 %v1083_v40 }
  0xcf   :  { %911 = vmatpush.bf16.msra.mxu1 %v7575_v62  ;;  %v7598_v28 = vld [vmem:[%s12021_s24 + $0x8] sm:$0xff]  ;;  %v7597_v31 = vld [vmem:[%s12021_s24] sm:$0xff]  ;;  %v1231_v44 = vunpack.c.l.b16 %v1201_v41  ;;  %v1299_v45 = vld [vmem:[%s12028_s3 + $0x30] sm:$0x3] }
  0xd0   :  { %930 = vmatpush.bf16.msra.mxu2 %v7583_v63  ;;  %v1329_v46 = vunpack.c.l.b16 %v1299_v45  ;;  %v1120_v47 = vpack.c.b16 %v1113_v43, %v1113_v43  ;;  %v7606_v53 = vld [vmem:[%s12026_s12 + $0x28] sm:$0xff]  ;;  %v7605_v61 = vld [vmem:[%s12026_s12 + $0x20] sm:$0xff] }
  0xd1   :  { %949 = vmatpush.bf16.msra.mxu3 %v7591_v1  ;;  %617 = vperm.xlu2 %7798, %v606_v11   ;;  %v1238_v48 = vpack.c.b16 %v1231_v44, %v1231_v44  ;;  %v7612_v54 = vld [vmem:[%s12027_s5 + $0x28] sm:$0xff]  ;;  %v7611_v62 = vld [vmem:[%s12027_s5 + $0x20] sm:$0xff] }
  0xd2   :  { %893 = vmatpush.bf16.msra.mxu0 %v7566_v2  ;;  %v1336_v49 = vpack.c.b16 %v1329_v46, %v1329_v46  ;;  %v7618_v57 = vld [vmem:[%s12028_s3 + $0x28] sm:$0xff] }
  0xd3   :  { %912 = vmatpush.bf16.msra.mxu1 %v7574_v3 }
  0xd4   :  { %931 = vmatpush.bf16.msra.mxu2 %v7582_v4 }
  0xd5   :  { %950 = vmatpush.bf16.msra.mxu3 %v7590_v5 }
  0xd6   :  { %894 = vmatpush.bf16.msra.mxu0 %v7565_v8 }
  0xd7   :  { %913 = vmatpush.bf16.msra.mxu1 %v7573_v9 }
  0xd8   :  { %932 = vmatpush.bf16.msra.mxu2 %v7581_v10 }
  0xd9   :  { %951 = vmatpush.bf16.msra.mxu3 %v7589_v12  ;;  %v7617_v12 = vld [vmem:[%s12028_s3 + $0x20] sm:$0xff] }
  0xda   :  { %895 = vmatpush.bf16.msra.mxu0 %v7564_v13  ;;  %v7604_v13 = vld [vmem:[%s12026_s12 + $0x18] sm:$0xff] }
  0xdb   :  { %914 = vmatpush.bf16.msra.mxu1 %v7572_v14  ;;  %v7610_v14 = vld [vmem:[%s12027_s5 + $0x18] sm:$0xff] }
  0xdc   :  { %933 = vmatpush.bf16.msra.mxu2 %v7580_v15  ;;  %v7616_v15 = vld [vmem:[%s12028_s3 + $0x18] sm:$0xff] }
  0xdd   :  { %952 = vmatpush.bf16.msra.mxu3 %v7588_v16  ;;  %v7603_v16 = vld [vmem:[%s12026_s12 + $0x10] sm:$0xff] }
  0xde   :  { %896 = vmatpush.bf16.msra.mxu0 %v7563_v17  ;;  %v7609_v17 = vld [vmem:[%s12027_s5 + $0x10] sm:$0xff] }
  0xdf   :  { %915 = vmatpush.bf16.msra.mxu1 %v7571_v18  ;;  %v7615_v18 = vld [vmem:[%s12028_s3 + $0x10] sm:$0xff] }
  0xe0   :  { %934 = vmatpush.bf16.msra.mxu2 %v7579_v19  ;;  %v7602_v19 = vld [vmem:[%s12026_s12 + $0x8] sm:$0xff] }
  0xe1   :  { %953 = vmatpush.bf16.msra.mxu3 %v7587_v20  ;;  %v7608_v20 = vld [vmem:[%s12027_s5 + $0x8] sm:$0xff] }
  0xe2   :  { %994 = vmatpush.bf16.msrb.mxu0 %v7596_v21  ;;  %v7614_v21 = vld [vmem:[%s12028_s3 + $0x8] sm:$0xff] }
  0xe3   :  { %1050 = vmatpush.bf16.msrb.mxu1 %v7600_v22  ;;  %v7601_v22 = vld [vmem:[%s12026_s12] sm:$0xff] }
  0xe6   :  { %995 = vmatpush.bf16.msrb.mxu0 %v7595_v24  ;;  %v7607_v24 = vld [vmem:[%s12027_s5] sm:$0xff] }
  0xe7   :  { %1051 = vmatpush.bf16.msrb.mxu1 %v7599_v25  ;;  %v7613_v25 = vld [vmem:[%s12028_s3] sm:$0xff]  ;;  %s12029_s3 = sld [smem:[#allocation57_spill]] }
  0xeb   :  { %1052 = vmatpush.bf16.msrb.mxu1 %v7598_v28 }
  0xef   :  { %1053 = vmatpush.bf16.msrb.mxu1 %v7597_v31 }
 0x101   :  { %v579_v36 = vpop.permute.xlu2 %578 }
 0x117   :  { %v582_v39 = vpop.permute.xlu2 %581 }
 0x118   :  { %v507_v26 = vpop.permute.xlu0 %506  ;;  %v513_v35 = vpop.permute.xlu1 %512 }
 0x119   :  { %vm517_vm0 = vcmp.eq.s32.totalorder %v9114_v27, %v507_v26  ;;  %vm518_vm5 = vcmp.eq.s32.totalorder %v9120_v29, %v507_v26  ;;  %vm519_vm8 = vcmp.eq.s32.totalorder %v9123_v30, %v507_v26  ;;  %vm520_vm10 = vcmp.eq.s32.totalorder %v9129_v33, %v507_v26 }
 0x11a   :  { %vm525_vm12 = vcmp.eq.s32.totalorder %v9114_v27, %v513_v35  ;;  %vm526_vm14 = vcmp.eq.s32.totalorder %v9120_v29, %v513_v35 }
 0x123   :  { %v609_v56 = vpop.permute.xlu2 %608 }
 0x12b   :  { %v618_v4 = vpop.permute.xlu2 %617 }
 0x12e   :  { %v510_v32 = vpop.permute.xlu0 %509  ;;  %v516_v37 = vpop.permute.xlu1 %515 }
 0x12f   :  { %vm521_vm1 = vcmp.eq.s32.totalorder %v9114_v27, %v510_v32  ;;  %vm522_vm2 = vcmp.eq.s32.totalorder %v9120_v29, %v510_v32  ;;  %vm523_vm3 = vcmp.eq.s32.totalorder %v9123_v30, %v510_v32  ;;  %vm524_vm6 = vcmp.eq.s32.totalorder %v9129_v33, %v510_v32 }
 0x130   :  { %vm6585_vm4 = vmpackc.low %vm521_vm1, %vm517_vm0  ;;  %vm529_vm13 = vcmp.eq.s32.totalorder %v9114_v27, %v516_v37  ;;  %vm530_vm15 = vcmp.eq.s32.totalorder %v9120_v29, %v516_v37  ;;  %vm527_vm0 = vcmp.eq.s32.totalorder %v9123_v30, %v513_v35  ;;  %vm531_vm1 = vcmp.eq.s32.totalorder %v9123_v30, %v516_v37 }
 0x131   :  { %6586 = vmatmul.msk.bf16.vlgmr.msra.gmra.mxu0 %vm6585_vm4, %v8309_v34  ;;  %vm6589_vm7 = vmpackc.low %vm522_vm2, %vm518_vm5  ;;  %vm532_vm4 = vcmp.eq.s32.totalorder %v9129_v33, %v516_v37 }
 0x132   :  { %6590 = vmatmul.msk.bf16.vlgmr.msra.gmra.mxu1 %vm6589_vm7, %v8309_v34  ;;  %vm6593_vm9 = vmpackc.low %vm523_vm3, %vm519_vm8  ;;  %vm528_vm3 = vcmp.eq.s32.totalorder %v9129_v33, %v513_v35  ;;  %vm1146_vm8 = vcmask 1041408  }
 0x133   :  { %6594 = vmatmul.msk.bf16.vlgmr.msra.gmra.mxu2 %vm6593_vm9, %v8309_v34  ;;  %vm6597_vm11 = vmpackc.low %vm524_vm6, %vm520_vm10  ;;  %vm589_vm9 = vcmp.eq.s32.totalorder %v9114_v27, %v579_v36  ;;  %vm590_vm10 = vcmp.eq.s32.totalorder %v9114_v27, %v582_v39  ;;  %v1148_v51 = vsel %vm1146_vm8, %v1120_v47, 0  ;;  %v1246_v52 = vsel %vm1146_vm8, %v1238_v48, 0 }
 0x134   :  { %6598 = vmatmul.msk.bf16.vlgmr.msra.gmra.mxu3 %vm6597_vm11, %v8309_v34  ;;  %vm6587_vm2 = vmpackc.low %vm529_vm13, %vm525_vm12  ;;  %1151 = vmatpush.bf16.msrb.mxu2 %v1148_v51  ;;  %v1344_v55 = vsel %vm1146_vm8, %v1336_v49, 0  ;;  %v6449_v59 = vsel %vm589_vm9, 1.0, %v11965_v58  ;;  %v6450_v60 = vsel %vm590_vm10, 1.0, %v11965_v58  ;;  %vm619_vm11 = vcmp.eq.s32.totalorder %v9114_v27, %v609_v56 }
 0x135   :  { %vm6591_vm5 = vmpackc.low %vm530_vm15, %vm526_vm14  ;;  %1249 = vmatpush.bf16.msrb.mxu3 %v1246_v52  ;;  %1347 = vmatpush.bf16.msra.mxu0 %v1344_v55  ;;  %v601_v63 = vpack.c.bf16 %v6450_v60, %v6449_v59  ;;  %v6453_v0 = vsel %vm619_vm11, 1.0, %v11965_v58  ;;  %vm981_vm13 = vcmask 261120   ;;  %vm1039_vm14 = vcmask 523264  }
 0x136   :  { %vm6595_vm6 = vmpackc.low %vm531_vm1, %vm527_vm0  ;;  %v588_v1 = vpop.permute.xlu1 %587  ;;  %vm622_vm1 = vcmp.eq.s32.totalorder %v9114_v27, %v618_v4 }
 0x137   :  { %v9143_v38 = vpop.permute.xlu0 %584  ;;  %vm6599_vm7 = vmpackc.low %vm532_vm4, %vm528_vm3  ;;  %vm592_vm15 = vcmp.eq.s32.totalorder %v9114_v27, %v588_v1  ;;  %v6456_v8 = vsel %vm622_vm1, 1.0, %v11965_v58  ;;  %vm1127_vm3 = vcmask 818176  }
 0x138   :  { %1152 = vmatpush.bf16.msrb.mxu2 %v7606_v53  ;;  %vm591_vm0 = vcmp.eq.s32.totalorder %v9114_v27, %v9143_v38  ;;  %v6452_v6 = vsel %vm592_vm15, 1.0, %v11965_v58 }
 0x139   :  { %1250 = vmatpush.bf16.msrb.mxu3 %v7612_v54  ;;  %1348 = vmatpush.bf16.msra.mxu0 %v7618_v57  ;;  %v6451_v7 = vsel %vm591_vm0, 1.0, %v11965_v58 }
 0x13a   :  { %v602_v10 = vpack.c.bf16 %v6452_v6, %v6451_v7  ;;  %v9283_v6 = vshrl.u32 %v496_v23, 7  ;;  %v9286_v7 = vmul.u32 25, %v9114_v27 }
 0x13c   :  { %1153 = vmatpush.bf16.msrb.mxu2 %v7605_v61  ;;  %v1395_v23 = vadd.s32 72, %v9283_v6 }
 0x13d   :  { %1251 = vmatpush.bf16.msrb.mxu3 %v7611_v62  ;;  %1349 = vmatpush.bf16.msra.mxu0 %v7617_v12  ;;  %v1397_v12 = vadd.s32 88, %v9283_v6 }
 0x13e   :  { %v615_v5 = vpop.permute.xlu1 %614  ;;  %vm1409_vm0 = vcmp.ge.s32.totalorder %v1395_v23, %v9286_v7 }
 0x13f   :  { %v612_v50 = vpop.permute.xlu0 %611 }
 0x140   :  { %vm620_vm12 = vcmp.eq.s32.totalorder %v9114_v27, %v612_v50  ;;  %1154 = vmatpush.bf16.msrb.mxu2 %v7604_v13  ;;  %v1394_v13 = vadd.s32 64, %v9283_v6 }
 0x141   :  { %6588 = vmatmul.msk.bf16.gmra.mxu0 %vm6587_vm2, %v8309_v34  ;;  %v6454_v2 = vsel %vm620_vm12, 1.0, %v11965_v58  ;;  %vm621_vm2 = vcmp.eq.s32.totalorder %v9114_v27, %v615_v5  ;;  %1252 = vmatpush.bf16.msrb.mxu3 %v7610_v14 }
 0x142   :  { %6592 = vmatmul.msk.bf16.gmra.mxu1 %vm6591_vm5, %v8309_v34  ;;  %v631_v3 = vpack.c.bf16 %v6454_v2, %v6453_v0  ;;  %v6455_v9 = vsel %vm621_vm2, 1.0, %v11965_v58  ;;  %1350 = vmatpush.bf16.msra.mxu0 %v7616_v15 }
 0x143   :  { %6596 = vmatmul.msk.bf16.gmra.mxu2 %vm6595_vm6, %v8309_v34  ;;  %v632_v11 = vpack.c.bf16 %v6456_v8, %v6455_v9  ;;  %v1413_v8 = vadd.s32 1, %v9114_v27  ;;  %v1398_v9 = vadd.s32 96, %v9283_v6 }
 0x144   :  { %6600 = vmatmul.msk.bf16.gmra.mxu3 %vm6599_vm7, %v8309_v34  ;;  %1155 = vmatpush.bf16.msrb.mxu2 %v7603_v16  ;;  %vm1411_vm7 = vcmp.ge.s32.totalorder %v1397_v12, %v9286_v7 }
 0x145   :  { %1253 = vmatpush.bf16.msrb.mxu3 %v7609_v17  ;;  %vm1412_vm4 = vcmp.ge.s32.totalorder %v1398_v9, %v9286_v7 }
 0x146   :  { %1351 = vmatpush.bf16.msra.mxu0 %v7615_v18 }
 0x148   :  { %1156 = vmatpush.bf16.msrb.mxu2 %v7602_v19 }
 0x149   :  { %1254 = vmatpush.bf16.msrb.mxu3 %v7608_v20 }
 0x14a   :  { %1352 = vmatpush.bf16.msra.mxu0 %v7614_v21 }
 0x14c   :  { %1157 = vmatpush.bf16.msrb.mxu2 %v7601_v22  ;;  %v1392_v22 = vadd.s32 48, %v9283_v6 }
 0x14d   :  { %1255 = vmatpush.bf16.msrb.mxu3 %v7607_v24  ;;  %v1393_v24 = vadd.s32 56, %v9283_v6 }
 0x14e   :  { %1353 = vmatpush.bf16.msra.mxu0 %v7613_v25  ;;  %v1390_v25 = vadd.s32 32, %v9283_v6 }
 0x151   :  { %6609 = vmatmul.msk.bf16.vlgmr.msrb.gmra.mxu0 %vm981_vm13, %v601_v63 }
 0x152   :  { %6627 = vmatmul.msk.bf16.vlgmr.msrb.gmra.mxu1 %vm1039_vm14, %v631_v3 }
 0x161   :  { %6610 = vmatmul.msk.bf16.gmra.mxu0 %vm981_vm13, %v602_v10  ;;  %v9290_v10 = vmul.u32 25, %v1413_v8 }
 0x162   :  { %6628 = vmatmul.msk.bf16.gmra.mxu1 %vm1039_vm14, %v632_v11  ;;  %v1396_v11 = vadd.s32 80, %v9283_v6  ;;  %vm1408_vm14 = vcmp.ge.s32.totalorder %v1394_v13, %v9286_v7 }
 0x163   :  { %vm1427_vm5 = vcmp.lt.s32.totalorder %v1398_v9, %v9290_v10  ;;  %vm1426_vm11 = vcmp.lt.s32.totalorder %v1397_v12, %v9290_v10  ;;  %vm1423_vm15 = vcmp.lt.s32.totalorder %v1394_v13, %v9290_v10  ;;  %vm1424_vm1 = vcmp.lt.s32.totalorder %v1395_v23, %v9290_v10 }
 0x164   :  { %vm1410_vm6 = vcmp.ge.s32.totalorder %v1396_v11, %v9286_v7  ;;  %vm1440_vm9 = vmand %vm1412_vm4, %vm1427_vm5  ;;  %vm1425_vm10 = vcmp.lt.s32.totalorder %v1396_v11, %v9290_v10 }
 0x165   :  { %v6731_v15 = vsel %vm1440_vm9, 1.0, %v11965_v58  ;;  %vm1438_vm12 = vmand %vm1410_vm6, %vm1425_vm10  ;;  %vm1407_vm9 = vcmp.ge.s32.totalorder %v1393_v24, %v9286_v7  ;;  %vm1421_vm10 = vcmp.lt.s32.totalorder %v1392_v22, %v9290_v10 }
 0x166   :  { %v1473_v16 = vpack.c.bf16 %v6731_v15, %v6731_v15  ;;  %vm1439_vm13 = vmand %vm1411_vm7, %vm1426_vm11  ;;  %vm1406_vm7 = vcmp.ge.s32.totalorder %v1392_v22, %v9286_v7  ;;  %vm1422_vm11 = vcmp.lt.s32.totalorder %v1393_v24, %v9290_v10 }
 0x167   :  { %vm6733_vm2 = vmpackc.low %vm1439_vm13, %vm1438_vm12 }
 0x168   :  { %v1592_v17 = vsel %vm1146_vm8, %v1473_v16, 0  ;;  %vm1436_vm4 = vmand %vm1408_vm14, %vm1423_vm15  ;;  %vm1404_vm15 = vcmp.ge.s32.totalorder %v1390_v25, %v9286_v7 }
 0x169   :  { %1595 = vmatpush.bf16.msra.mxu1 %v1592_v17  ;;  %vm1437_vm5 = vmand %vm1409_vm0, %vm1424_vm1  ;;  %vm1419_vm1 = vcmp.lt.s32.totalorder %v1390_v25, %v9290_v10 }
 0x16a   :  { %vm6735_vm6 = vmpackc.low %vm1437_vm5, %vm1436_vm4 }
 0x16b   :  { %vm1434_vm12 = vmand %vm1406_vm7, %vm1421_vm10 }
 0x16c   :  { %vm1435_vm13 = vmand %vm1407_vm9, %vm1422_vm11 }
 0x16d   :  { %6734 = vmatpush.bf16.msk.msra.mxu1 %vm6733_vm2, %v8309_v34  ;;  %vm6737_vm14 = vmpackc.low %vm1435_vm13, %vm1434_vm12 }
 0x16e   :  { %vm1432_vm4 = vmand %vm1404_vm15, %vm1419_vm1  ;;  %vm1400_vm15 = vcmp.ge.s32.totalorder %v9283_v6, %v9286_v7  ;;  %vm1415_vm1 = vcmp.lt.s32.totalorder %v9283_v6, %v9290_v10 }
 0x171   :  { %6736 = vmatpush.bf16.msk.msra.mxu1 %vm6735_vm6, %v8309_v34 }
 0x175   :  { %6738 = vmatpush.bf16.msk.msra.mxu1 %vm6737_vm14, %v8309_v34 }
 0x1ae   :  { %v898_v26 = vpop.f32.mrf.mxu0 }
 0x1af   :  { %v917_v28 = vpop.f32.mrf.mxu1 }
 0x1b0   :  { %v918_v37 = vadd.f32 %v917_v28, %v898_v26  ;;  %v1391_v26 = vadd.s32 40, %v9283_v6  ;;  %v1388_v28 = vadd.s32 16, %v9283_v6 }
 0x1b2   :  { %vm1405_vm0 = vcmp.ge.s32.totalorder %v1391_v26, %v9286_v7  ;;  %vm1420_vm2 = vcmp.lt.s32.totalorder %v1391_v26, %v9290_v10  ;;  %vm1402_vm7 = vcmp.ge.s32.totalorder %v1388_v28, %v9286_v7  ;;  %vm1417_vm10 = vcmp.lt.s32.totalorder %v1388_v28, %v9290_v10 }
 0x1b3   :  { %vm1433_vm5 = vmand %vm1405_vm0, %vm1420_vm2 }
 0x1b4   :  { %vm6739_vm6 = vmpackc.low %vm1433_vm5, %vm1432_vm4 }
 0x1b5   :  { %6740 = vmatpush.bf16.msk.msra.mxu1 %vm6739_vm6, %v8309_v34  ;;  %vm1430_vm12 = vmand %vm1402_vm7, %vm1417_vm10 }
 0x1b6   :  { %v936_v31 = vpop.f32.mrf.mxu2  ;;  %v900_v32 = vpop.f32.mrf.mxu0  ;;  %vm1428_vm4 = vmand %vm1400_vm15, %vm1415_vm1 }
 0x1b7   :  { %v955_v35 = vpop.f32.mrf.mxu3  ;;  %v919_v36 = vpop.f32.mrf.mxu1  ;;  %v937_v38 = vadd.f32 %v936_v31, %v918_v37  ;;  %v1389_v31 = vadd.s32 24, %v9283_v6  ;;  %v9358_v37 = vld [vmem:[%s12029_s3] ss:$0 sm:$0xff]  ;;  %s12031_s3 = sld [smem:[#allocation61_spill]] }
 0x1b8   :  { %v920_v39 = vadd.f32 %v919_v36, %v900_v32  ;;  %v1387_v32 = vadd.s32 8, %v9283_v6 }
 0x1b9   :  { %v9244_v46 = vadd.f32 %v955_v35, %v937_v38  ;;  %vm1403_vm9 = vcmp.ge.s32.totalorder %v1389_v31, %v9286_v7  ;;  %vm1418_vm11 = vcmp.lt.s32.totalorder %v1389_v31, %v9290_v10  ;;  %v9363_v38 = vld [vmem:[%s12030_s4] ss:$0 sm:$0xff] }
 0x1ba   :  { %vm1431_vm13 = vmand %vm1403_vm9, %vm1418_vm11  ;;  %vm1401_vm0 = vcmp.ge.s32.totalorder %v1387_v32, %v9286_v7  ;;  %vm1416_vm2 = vcmp.lt.s32.totalorder %v1387_v32, %v9290_v10  ;;  %vm1933_vm11 = vcmask 31744  }
 0x1bb   :  { %vm6741_vm14 = vmpackc.low %vm1431_vm13, %vm1430_vm12 }
 0x1bc   :  { %6742 = vmatpush.bf16.msk.msra.mxu1 %vm6741_vm14, %v8309_v34  ;;  %vm1429_vm5 = vmand %vm1401_vm0, %vm1416_vm2 }
 0x1bd   :  { %vm6743_vm6 = vmpackc.low %vm1429_vm5, %vm1428_vm4 }
 0x1be   :  { %v938_v40 = vpop.f32.mrf.mxu2  ;;  %v903_v41 = vpop.f32.mrf.mxu0 }
 0x1bf   :  { %v939_v43 = vadd.f32 %v938_v40, %v920_v39  ;;  %v957_v44 = vpop.f32.mrf.mxu3  ;;  %v922_v45 = vpop.f32.mrf.mxu1 }
 0x1c0   :  { %v923_v53 = vadd.f32 %v922_v45, %v903_v41  ;;  %6744 = vmatpush.bf16.msk.msra.mxu1 %vm6743_vm6, %v8309_v34 }
 0x1c1   :  { %v9246_v47 = vadd.f32 %v957_v44, %v939_v43 }
 0x1c3   :  { %v1065_v48 = vpack.c.bf16 %v9246_v47, %v9244_v46 }
 0x1c5   :  { %6653 = vmatmul.msk.bf16.vlgmr.msrb.gmra.mxu2 %vm1127_vm3, %v1065_v48  ;;  %6683 = vmatmul.msk.bf16.vlgmr.msrb.gmra.mxu3 %vm1127_vm3, %v1065_v48 }
 0x1c6   :  { %6713 = vmatmul.msk.bf16.vlgmr.msra.gmra.mxu0 %vm1127_vm3, %v1065_v48  ;;  %v941_v49 = vpop.f32.mrf.mxu2  ;;  %v905_v51 = vpop.f32.mrf.mxu0 }
 0x1c7   :  { %v960_v50 = vpop.f32.mrf.mxu3  ;;  %v924_v52 = vpop.f32.mrf.mxu1  ;;  %v942_v54 = vadd.f32 %v941_v49, %v923_v53 }
 0x1c8   :  { %v925_v55 = vadd.f32 %v924_v52, %v905_v51 }
 0x1c9   :  { %v9253_v60 = vadd.f32 %v960_v50, %v942_v54 }
 0x1ce   :  { %v943_v56 = vpop.f32.mrf.mxu2  ;;  %v9257_v62 = vpop.f32.mrf.mxu0 }
 0x1cf   :  { %v944_v57 = vadd.f32 %v943_v56, %v925_v55  ;;  %v962_v59 = vpop.f32.mrf.mxu3  ;;  %v9275_v4 = vpop.f32.mrf.mxu1 }
 0x1d1   :  { %v9255_v61 = vadd.f32 %v962_v59, %v944_v57 }
 0x1d3   :  { %v1066_v63 = vpack.c.bf16 %v9255_v61, %v9253_v60 }
 0x1d5   :  { %6654 = vmatmul.msk.bf16.gmra.mxu2 %vm1127_vm3, %v1066_v63  ;;  %6684 = vmatmul.msk.bf16.gmra.mxu3 %vm1127_vm3, %v1066_v63 }
 0x1d6   :  { %6714 = vmatmul.msk.bf16.gmra.mxu0 %vm1127_vm3, %v1066_v63  ;;  %v9264_v0 = vpop.f32.mrf.mxu0 }
 0x1d7   :  { %v1067_v1 = vpack.c.bf16 %v9264_v0, %v9257_v62  ;;  %v9302_v14 = vpop.f32.mrf.mxu1 }
 0x1d8   :  { %v1069_v18 = vpack.c.bf16 %v9302_v14, %v9275_v4 }
 0x1de   :  { %v9270_v2 = vpop.f32.mrf.mxu0 }
 0x1df   :  { %v9315_v19 = vpop.f32.mrf.mxu1 }
 0x1e5   :  { %6655 = vmatmul.msk.bf16.gmra.mxu2 %vm1127_vm3, %v1067_v1  ;;  %6685 = vmatmul.msk.bf16.gmra.mxu3 %vm1127_vm3, %v1067_v1 }
 0x1e6   :  { %6715 = vmatmul.msk.bf16.gmra.mxu0 %vm1127_vm3, %v1067_v1  ;;  %v9273_v3 = vpop.f32.mrf.mxu0 }
 0x1e7   :  { %v1068_v5 = vpack.c.bf16 %v9273_v3, %v9270_v2  ;;  %v9319_v20 = vpop.f32.mrf.mxu1 }
 0x1e8   :  { %v1070_v21 = vpack.c.bf16 %v9319_v20, %v9315_v19 }
 0x1f5   :  { %6656 = vmatmul.msk.bf16.gmra.mxu2 %vm1127_vm3, %v1068_v5  ;;  %6686 = vmatmul.msk.bf16.gmra.mxu3 %vm1127_vm3, %v1068_v5 }
 0x1f6   :  { %6716 = vmatmul.msk.bf16.gmra.mxu0 %vm1127_vm3, %v1068_v5 }
 0x205   :  { %6657 = vmatmul.msk.bf16.gmra.mxu2 %vm1127_vm3, %v1069_v18  ;;  %6687 = vmatmul.msk.bf16.gmra.mxu3 %vm1127_vm3, %v1069_v18 }
 0x206   :  { %6717 = vmatmul.msk.bf16.gmra.mxu0 %vm1127_vm3, %v1069_v18 }
 0x215   :  { %6658 = vmatmul.msk.bf16.gmra.mxu2 %vm1127_vm3, %v1070_v21  ;;  %6688 = vmatmul.msk.bf16.gmra.mxu3 %vm1127_vm3, %v1070_v21 }
 0x216   :  { %6718 = vmatmul.msk.bf16.gmra.mxu0 %vm1127_vm3, %v1070_v21 }
 0x248   :  { %v1159_v35 = vpop.f32.mrf.mxu2  ;;  %v1257_v36 = vpop.f32.mrf.mxu3 }
 0x249   :  { %v9366_v39 = vadd.f32 %v9358_v37, %v1159_v35  ;;  %v9369_v40 = vadd.f32 %v9363_v38, %v1257_v36 }
 0x24b   :  { %v1483_v45 = vmul.f32 %v9369_v40, %v9366_v39 }
 0x250   :  { %v1161_v41 = vpop.f32.mrf.mxu2  ;;  %v1259_v34 = vpop.f32.mrf.mxu3 }
 0x251   :  { %v9372_v43 = vadd.f32 %v9358_v37, %v1161_v41  ;;  %v9375_v44 = vadd.f32 %v9363_v38, %v1259_v34 }
 0x253   :  { %v1484_v48 = vmul.f32 %v9375_v44, %v9372_v43 }
 0x255   :  { %v1519_v49 = vpack.c.bf16 %v1484_v48, %v1483_v45 }
 0x257   :  { %6745 = vmatmul.msk.bf16.vlgmr.msra.gmra.mxu1 %vm1127_vm3, %v1519_v49 }
 0x258   :  { %v1164_v50 = vpop.f32.mrf.mxu2  ;;  %v1262_v51 = vpop.f32.mrf.mxu3 }
 0x259   :  { %v9383_v52 = vadd.f32 %v9358_v37, %v1164_v50  ;;  %v9386_v53 = vadd.f32 %v9363_v38, %v1262_v51 }
 0x25b   :  { %v1485_v59 = vmul.f32 %v9386_v53, %v9383_v52 }
 0x260   :  { %v1166_v54 = vpop.f32.mrf.mxu2  ;;  %v1264_v55 = vpop.f32.mrf.mxu3 }
 0x261   :  { %v9389_v56 = vadd.f32 %v9358_v37, %v1166_v54  ;;  %v9392_v57 = vadd.f32 %v9363_v38, %v1264_v55 }
 0x263   :  { %v1486_v63 = vmul.f32 %v9392_v57, %v9389_v56 }
 0x265   :  { %v1520_v1 = vpack.c.bf16 %v1486_v63, %v1485_v59 }
 0x267   :  { %6746 = vmatmul.msk.bf16.gmra.mxu1 %vm1127_vm3, %v1520_v1 }
 0x268   :  { %v1169_v5 = vpop.f32.mrf.mxu2  ;;  %v1267_v7 = vpop.f32.mrf.mxu3 }
 0x269   :  { %v1170_v8 = vadd.f32 %v9358_v37, %v1169_v5  ;;  %v1268_v9 = vadd.f32 %v9363_v38, %v1267_v7 }
 0x26b   :  { %v1487_v23 = vmul.f32 %v1268_v9, %v9366_v39  ;;  %v9404_v15 = vmul.f32 %v1268_v9, %v1170_v8  ;;  %v9410_v18 = vmul.f32 %v9369_v40, %v1170_v8 }
 0x270   :  { %v1171_v10 = vpop.f32.mrf.mxu2  ;;  %v1269_v11 = vpop.f32.mrf.mxu3 }
 0x271   :  { %v1172_v12 = vadd.f32 %v9358_v37, %v1171_v10  ;;  %v1270_v13 = vadd.f32 %v9363_v38, %v1269_v11 }
 0x273   :  { %v1488_v16 = vmul.f32 %v1270_v13, %v9372_v43  ;;  %v9407_v17 = vmul.f32 %v1270_v13, %v1172_v12  ;;  %v9413_v21 = vmul.f32 %v9375_v44, %v1172_v12 }
 0x275   :  { %v1527_v22 = vpack.c.bf16 %v9407_v17, %v9404_v15  ;;  %v1521_v24 = vpack.c.bf16 %v1488_v16, %v1487_v23  ;;  %v1525_v25 = vpack.c.bf16 %v9413_v21, %v9410_v18 }
 0x277   :  { %6747 = vmatmul.msk.bf16.gmra.mxu1 %vm1127_vm3, %v1521_v24 }
 0x278   :  { %v1174_v26 = vpop.f32.mrf.mxu2  ;;  %v1272_v28 = vpop.f32.mrf.mxu3 }
 0x279   :  { %v1175_v31 = vadd.f32 %v9358_v37, %v1174_v26  ;;  %v1273_v32 = vadd.f32 %v9363_v38, %v1272_v28 }
 0x27b   :  { %v1489_v45 = vmul.f32 %v1273_v32, %v9383_v52  ;;  %v9425_v48 = vmul.f32 %v1273_v32, %v1175_v31  ;;  %v9431_v51 = vmul.f32 %v9386_v53, %v1175_v31 }
 0x280   :  { %v1176_v35 = vpop.f32.mrf.mxu2  ;;  %v1274_v36 = vpop.f32.mrf.mxu3 }
 0x281   :  { %v1177_v41 = vadd.f32 %v9358_v37, %v1176_v35  ;;  %v1275_v34 = vadd.f32 %v9363_v38, %v1274_v36 }
 0x283   :  { %v1490_v49 = vmul.f32 %v1275_v34, %v9389_v56  ;;  %v9428_v50 = vmul.f32 %v1275_v34, %v1177_v41  ;;  %v9434_v54 = vmul.f32 %v9392_v57, %v1177_v41 }
 0x285   :  { %v1528_v55 = vpack.c.bf16 %v9428_v50, %v9425_v48  ;;  %v1522_v59 = vpack.c.bf16 %v1490_v49, %v1489_v45  ;;  %v1526_v63 = vpack.c.bf16 %v9434_v54, %v9431_v51 }
 0x287   :  { %6748 = vmatmul.msk.bf16.gmra.mxu1 %vm1127_vm3, %v1522_v59 }
 0x288   :  { %v1179_v1 = vpop.f32.mrf.mxu2  ;;  %v1277_v5 = vpop.f32.mrf.mxu3 }
 0x289   :  { %v1180_v7 = vadd.f32 %v9358_v37, %v1179_v1  ;;  %v1278_v10 = vadd.f32 %v9363_v38, %v1277_v5 }
 0x28b   :  { %v9443_v11 = vmul.f32 %v1278_v10, %v1170_v8  ;;  %v9445_v23 = vmul.f32 %v1278_v10, %v1180_v7  ;;  %v9450_v35 = vmul.f32 %v9369_v40, %v1180_v7  ;;  %v9452_v36 = vmul.f32 %v1268_v9, %v1180_v7 }
 0x28c   :  { %v1491_v45 = vmul.f32 %v1278_v10, %v9366_v39 }
 0x290   :  { %v1181_v16 = vpop.f32.mrf.mxu2  ;;  %v1279_v24 = vpop.f32.mrf.mxu3 }
 0x291   :  { %v1182_v26 = vadd.f32 %v9358_v37, %v1181_v16  ;;  %v1280_v28 = vadd.f32 %v9363_v38, %v1279_v24 }
 0x293   :  { %v9456_v49 = vmul.f32 %v9375_v44, %v1182_v26  ;;  %v9458_v8 = vmul.f32 %v1270_v13, %v1182_v26  ;;  %v1492_v51 = vmul.f32 %v1280_v28, %v9372_v43  ;;  %v1504_v54 = vmul.f32 %v1280_v28, %v1172_v12 }
 0x294   :  { %v9461_v59 = vmul.f32 %v1280_v28, %v1182_v26 }
 0x295   :  { %v1529_v1 = vpack.c.bf16 %v1504_v54, %v9443_v11  ;;  %v1523_v5 = vpack.c.bf16 %v1492_v51, %v1491_v45  ;;  %v1531_v40 = vpack.c.bf16 %v9456_v49, %v9450_v35  ;;  %v1533_v9 = vpack.c.bf16 %v9458_v8, %v9452_v36 }
 0x296   :  { %v1535_v39 = vpack.c.bf16 %v9461_v59, %v9445_v23 }
 0x297   :  { %6749 = vmatmul.msk.bf16.gmra.mxu1 %vm1127_vm3, %v1523_v5 }
 0x298   :  { %v1184_v44 = vpop.f32.mrf.mxu2  ;;  %v1282_v13 = vpop.f32.mrf.mxu3 }
 0x299   :  { %v1185_v43 = vadd.f32 %v9358_v37, %v1184_v44  ;;  %v1283_v12 = vadd.f32 %v9363_v38, %v1282_v13 }
 0x29b   :  { %v1505_v7 = vmul.f32 %v1283_v12, %v1175_v31  ;;  %v9473_v10 = vmul.f32 %v1283_v12, %v1185_v43  ;;  %v9478_v28 = vmul.f32 %v9386_v53, %v1185_v43  ;;  %v9480_v35 = vmul.f32 %v1273_v32, %v1185_v43 }
 0x29c   :  { %v1493_v45 = vmul.f32 %v1283_v12, %v9383_v52 }
 0x2a0   :  { %v1186_v11 = vpop.f32.mrf.mxu2  ;;  %v1284_v16 = vpop.f32.mrf.mxu3 }
 0x2a1   :  { %v1187_v24 = vadd.f32 %v9358_v37, %v1186_v11  ;;  %v1285_v26 = vadd.f32 %v9363_v38, %v1284_v16 }
 0x2a3   :  { %v9484_v49 = vmul.f32 %v9392_v57, %v1187_v24  ;;  %v9486_v51 = vmul.f32 %v1275_v34, %v1187_v24  ;;  %v1494_v31 = vmul.f32 %v1285_v26, %v9389_v56  ;;  %v1506_v54 = vmul.f32 %v1285_v26, %v1177_v41 }
 0x2a4   :  { %v9489_v5 = vmul.f32 %v1285_v26, %v1187_v24  ;;  %v1474_v57 = vmul.u32 25, %v9283_v6  ;;  %v1476_v56 = vadd.s32 1, %v9283_v6 }
 0x2a5   :  { %v1530_v37 = vpack.c.bf16 %v1506_v54, %v1505_v7  ;;  %v1524_v44 = vpack.c.bf16 %v1494_v31, %v1493_v45  ;;  %v1532_v38 = vpack.c.bf16 %v9484_v49, %v9478_v28  ;;  %v1534_v53 = vpack.c.bf16 %v9486_v51, %v9480_v35 }
 0x2a6   :  { %v1536_v52 = vpack.c.bf16 %v9489_v5, %v9473_v10  ;;  %vm1475_vm7 = vcmp.ge.s32.totalorder %v9114_v27, %v1474_v57  ;;  %v1477_v32 = vmul.u32 25, %v1476_v56 }
 0x2a7   :  { %6750 = vmatmul.msk.bf16.gmra.mxu1 %vm1127_vm3, %v1524_v44 }
 0x2a8   :  { %vm1478_vm9 = vcmp.lt.s32.totalorder %v9114_v27, %v1477_v32 }
 0x2a9   :  { %vm1479_vm10 = vmand %vm1475_vm7, %vm1478_vm9 }
 0x2aa   :  { %v6732_v41 = vsel %vm1479_vm10, 1.0, %v11965_v58 }
 0x2ab   :  { %v1482_v34 = vpack.c.bf16 %v6732_v41, %v6732_v41 }
 0x2ad   :  { %v2043_v13 = vsel %vm1146_vm8, %v1482_v34, 0 }
 0x2ae   :  { %2052 = vmatpush.bf16.msra.mxu2 %v2043_v13 }
 0x2b7   :  { %6751 = vmatmul.msk.bf16.gmra.mxu1 %vm1127_vm3, %v1525_v25 }
 0x2c7   :  { %6752 = vmatmul.msk.bf16.gmra.mxu1 %vm1127_vm3, %v1526_v63 }
 0x2d4   :  { %v1603_v6 = vpop.f32.mrf.mxu1 }
 0x2d5   :  { %v1693_v15 = vmul.f32 0.2, %v1603_v6 }
 0x2d7   :  { %6753 = vmatmul.msk.bf16.gmra.mxu1 %vm1127_vm3, %v1527_v22 }
 0x2dc   :  { %v1605_v43 = vpop.f32.mrf.mxu1 }
 0x2dd   :  { %v1694_v45 = vmul.f32 0.2, %v1605_v43 }
 0x2e4   :  { %v1608_v12 = vpop.f32.mrf.mxu1 }
 0x2e5   :  { %v1695_v6 = vmul.f32 0.2, %v1608_v12 }
 0x2e7   :  { %6754 = vmatmul.msk.bf16.gmra.mxu1 %vm1127_vm3, %v1528_v55 }
 0x2ec   :  { %v1610_v7 = vpop.f32.mrf.mxu1 }
 0x2f4   :  { %v1613_v11 = vpop.f32.mrf.mxu1 }
 0x2f5   :  { %v1697_v63 = vmul.f32 0.2, %v1613_v11 }
 0x2f7   :  { %6755 = vmatmul.msk.bf16.gmra.mxu1 %vm1127_vm3, %v1529_v1  ;;  %v1729_v22 = vmax.f32 %v1693_v15, %v1697_v63 }
 0x2fc   :  { %v1615_v18 = vpop.f32.mrf.mxu1 }
 0x2fd   :  { %v1698_v48 = vmul.f32 0.2, %v1615_v18 }
 0x2ff   :  { %v1730_v57 = vmax.f32 %v1694_v45, %v1698_v48 }
 0x304   :  { %v1618_v21 = vpop.f32.mrf.mxu1 }
 0x305   :  { %v1699_v32 = vmul.f32 0.2, %v1618_v21 }
 0x307   :  { %6756 = vmatmul.msk.bf16.gmra.mxu1 %vm1127_vm3, %v1530_v37 }
 0x30c   :  { %v1620_v25 = vpop.f32.mrf.mxu1 }
 0x30d   :  { %v1700_v12 = vmul.f32 0.2, %v1620_v25 }
 0x314   :  { %v1623_v17 = vpop.f32.mrf.mxu1 }
 0x315   :  { %v1701_v16 = vmul.f32 0.2, %v1623_v17  ;;  %v1731_v17 = vmax.f32 %v1695_v6, %v1699_v32 }
 0x317   :  { %v1733_v24 = vmax.f32 %v1729_v22, %v1701_v16  ;;  %6757 = vmatmul.msk.bf16.gmra.mxu1 %vm1127_vm3, %v1531_v40 }
 0x319   :  { %v1737_v50 = vsub.f32 %v1693_v15, %v1733_v24  ;;  %v1749_v55 = vsub.f32 %v1697_v63, %v1733_v24  ;;  %v1761_v26 = vsub.f32 %v1701_v16, %v1733_v24 }
 0x31b   :  { %v1741_v31 = vmul.f32 1.442695, %v1737_v50  ;;  %v1753_v1 = vmul.f32 1.442695, %v1749_v55  ;;  %v1765_v54 = vmul.f32 1.442695, %v1761_v26 }
 0x31c   :  { %v1625_v44 = vpop.f32.mrf.mxu1 }
 0x31d   :  { %7805 = vpow2.f32 %v1741_v31  ;;  %v1702_v37 = vmul.f32 0.2, %v1625_v44  ;;  %v1696_v31 = vmul.f32 0.2, %v1610_v7 }
 0x31e   :  { %7807 = vpow2.f32 %v1753_v1 }
 0x31f   :  { %v1734_v56 = vmax.f32 %v1730_v57, %v1702_v37  ;;  %7809 = vpow2.f32 %v1765_v54 }
 0x321   :  { %v1738_v41 = vsub.f32 %v1694_v45, %v1734_v56  ;;  %v1750_v34 = vsub.f32 %v1698_v48, %v1734_v56  ;;  %v1762_v13 = vsub.f32 %v1702_v37, %v1734_v56  ;;  %v1732_v56 = vmax.f32 %v1696_v31, %v1700_v12 }
 0x323   :  { %v7806_v40 = vpop.eup %7805  ;;  %v1743_v11 = vmul.f32 1.442695, %v1738_v41  ;;  %v1755_v18 = vmul.f32 1.442695, %v1750_v34  ;;  %v1767_v43 = vmul.f32 1.442695, %v1762_v13 }
 0x324   :  { %v9520_v63 = vpop.eup %7807  ;;  %v1628_v15 = vpop.f32.mrf.mxu1 }
 0x325   :  { %v1773_v22 = vadd.f32 %v9520_v63, %v7806_v40  ;;  %7811 = vpow2.f32 %v1743_v11  ;;  %v1703_v16 = vmul.f32 0.2, %v1628_v15  ;;  %v7810_v24 = vpop.eup %7809 }
 0x326   :  { %7813 = vpow2.f32 %v1755_v18 }
 0x327   :  { %v1777_v50 = vadd.f32 %v7810_v24, %v1773_v22  ;;  %v1735_v21 = vmax.f32 %v1731_v17, %v1703_v16  ;;  %6758 = vmatmul.msk.bf16.gmra.mxu1 %vm1127_vm3, %v1532_v38  ;;  %7815 = vpow2.f32 %v1767_v43 }
 0x329   :  { %7817 = vrcp.f32 %v1777_v50  ;;  %v1739_v48 = vsub.f32 %v1695_v6, %v1735_v21  ;;  %v1751_v55 = vsub.f32 %v1699_v32, %v1735_v21  ;;  %v1763_v26 = vsub.f32 %v1703_v16, %v1735_v21 }
 0x32b   :  { %v7812_v45 = vpop.eup %7811  ;;  %v1745_v1 = vmul.f32 1.442695, %v1739_v48  ;;  %v1757_v54 = vmul.f32 1.442695, %v1751_v55  ;;  %v1769_v57 = vmul.f32 1.442695, %v1763_v26 }
 0x32c   :  { %v7814_v44 = vpop.eup %7813  ;;  %v1630_v37 = vpop.f32.mrf.mxu1 }
 0x32d   :  { %v1774_v41 = vadd.f32 %v7814_v44, %v7812_v45  ;;  %7819 = vpow2.f32 %v1745_v1  ;;  %v1704_v34 = vmul.f32 0.2, %v1630_v37  ;;  %v7816_v28 = vpop.eup %7815 }
 0x32e   :  { %7821 = vpow2.f32 %v1757_v54 }
 0x32f   :  { %v7818_v49 = vpop.eup %7817  ;;  %v1778_v38 = vadd.f32 %v7816_v28, %v1774_v41  ;;  %v1736_v25 = vmax.f32 %v1732_v56, %v1704_v34  ;;  %7823 = vpow2.f32 %v1769_v57 }
 0x330   :  { %v1785_v32 = vmul.f32 %v7818_v49, %v7806_v40  ;;  %v1793_v13 = vmul.f32 %v7818_v49, %v7810_v24 }
 0x331   :  { %7825 = vrcp.f32 %v1778_v38  ;;  %v1740_v7 = vsub.f32 %v1696_v31, %v1736_v25  ;;  %v1752_v6 = vsub.f32 %v1700_v12, %v1736_v25  ;;  %v1764_v11 = vsub.f32 %v1704_v34, %v1736_v25 }
 0x332   :  { %6763 = vmatmul.msk.f32.vlgmr.msra.gmra.mxu2 %vm1933_vm11, %v1785_v32 }
 0x333   :  { %v7820_v18 = vpop.eup %7819  ;;  %v1747_v43 = vmul.f32 1.442695, %v1740_v7  ;;  %v1759_v15 = vmul.f32 1.442695, %v1752_v6  ;;  %v1771_v22 = vmul.f32 1.442695, %v1764_v11 }
 0x334   :  { %v7822_v17 = vpop.eup %7821  ;;  %v1633_v16 = vpop.f32.mrf.mxu1 }
 0x335   :  { %v1775_v50 = vadd.f32 %v7822_v17, %v7820_v18  ;;  %7827 = vpow2.f32 %v1747_v43  ;;  %v7824_v21 = vpop.eup %7823  ;;  %v1705_v59 = vmul.f32 0.2, %v1633_v16 }
 0x336   :  { %7829 = vpow2.f32 %v1759_v15 }
 0x337   :  { %v7826_v48 = vpop.eup %7825  ;;  %v1779_v55 = vadd.f32 %v7824_v21, %v1775_v50  ;;  %6759 = vmatmul.msk.bf16.gmra.mxu1 %vm1127_vm3, %v1533_v9  ;;  %7831 = vpow2.f32 %v1771_v22 }
 0x338   :  { %v1786_v40 = vmul.f32 %v7826_v48, %v7812_v45  ;;  %v1794_v24 = vmul.f32 %v7826_v48, %v7816_v28  ;;  %v1789_v28 = vmul.f32 %v7818_v49, %v9520_v63  ;;  %v1790_v35 = vmul.f32 %v7826_v48, %v7814_v44 }
 0x339   :  { %7833 = vrcp.f32 %v1779_v55 }
 0x33a   :  { %6764 = vmatmul.msk.f32.gmra.mxu2 %vm1933_vm11, %v1786_v40 }
 0x33b   :  { %v7828_v12 = vpop.eup %7827 }
 0x33c   :  { %v7830_v26 = vpop.eup %7829  ;;  %v1635_v31 = vpop.f32.mrf.mxu1 }
 0x33d   :  { %v1776_v1 = vadd.f32 %v7830_v26, %v7828_v12  ;;  %v7832_v54 = vpop.eup %7831  ;;  %v1706_v10 = vmul.f32 0.2, %v1635_v31 }
 0x33f   :  { %v7834_v57 = vpop.eup %7833  ;;  %v1780_v37 = vadd.f32 %v7832_v54, %v1776_v1 }
 0x340   :  { %v1787_v56 = vmul.f32 %v7834_v57, %v7820_v18  ;;  %v1795_v41 = vmul.f32 %v7834_v57, %v7824_v21 }
 0x341   :  { %7835 = vrcp.f32 %v1780_v37 }
 0x342   :  { %6765 = vmatmul.msk.f32.gmra.mxu2 %vm1933_vm11, %v1787_v56 }
 0x344   :  { %v1638_v36 = vpop.f32.mrf.mxu1 }
 0x347   :  { %v7836_v8 = vpop.eup %7835  ;;  %6760 = vmatmul.msk.bf16.gmra.mxu1 %vm1127_vm3, %v1534_v53  ;;  %v1791_v53 = vmul.f32 %v7834_v57, %v7822_v17 }
 0x348   :  { %v1788_v9 = vmul.f32 %v7836_v8, %v7828_v12  ;;  %v9538_v45 = vmul.f32 %v7836_v8, %v7832_v54  ;;  %v1792_v63 = vmul.f32 %v7836_v8, %v7830_v26  ;;  %v1707_v12 = vmul.f32 0.2, %v1638_v36 }
 0x34a   :  { %6766 = vmatmul.msk.f32.gmra.mxu2 %vm1933_vm11, %v1788_v9 }
 0x34c   :  { %v9541_v34 = vpop.f32.mrf.mxu1 }
 0x352   :  { %6767 = vmatmul.msk.f32.gmra.mxu2 %vm1933_vm11, %v1789_v28 }
 0x354   :  { %v1643_v38 = vpop.f32.mrf.mxu1 }
 0x355   :  { %v1709_v23 = vmul.f32 0.2, %v1643_v38 }
 0x357   :  { %6761 = vmatmul.msk.bf16.gmra.mxu1 %vm1127_vm3, %v1535_v39  ;;  %v1797_v44 = vmax.f32 %v1705_v59, %v1709_v23 }
 0x35a   :  { %6768 = vmatmul.msk.f32.gmra.mxu2 %vm1933_vm11, %v1790_v35 }
 0x35c   :  { %v1645_v51 = vpop.f32.mrf.mxu1 }
 0x35d   :  { %v1710_v6 = vmul.f32 0.2, %v1645_v51 }
 0x35f   :  { %v1798_v22 = vmax.f32 %v1706_v10, %v1710_v6 }
 0x362   :  { %6769 = vmatmul.msk.f32.gmra.mxu2 %vm1933_vm11, %v1791_v53  ;;  %v1708_v53 = vmul.f32 0.2, %v9541_v34 }
 0x364   :  { %v1648_v25 = vpop.f32.mrf.mxu1 }
 0x365   :  { %v1711_v16 = vmul.f32 0.2, %v1648_v25 }
 0x367   :  { %6762 = vmatmul.msk.bf16.gmra.mxu1 %vm1127_vm3, %v1536_v52  ;;  %v1799_v57 = vmax.f32 %v1707_v12, %v1711_v16 }
 0x36a   :  { %6770 = vmatmul.msk.f32.gmra.mxu2 %vm1933_vm11, %v1792_v63 }
 0x36c   :  { %v1650_v49 = vpop.f32.mrf.mxu1 }
 0x36d   :  { %v1712_v38 = vmul.f32 0.2, %v1650_v49 }
 0x372   :  { %6771 = vmatmul.msk.f32.gmra.mxu2 %vm1933_vm11, %v1793_v13 }
 0x374   :  { %v1653_v39 = vpop.f32.mrf.mxu1 }
 0x375   :  { %v1713_v32 = vmul.f32 0.2, %v1653_v39 }
 0x377   :  { %v1801_v7 = vmax.f32 %v1797_v44, %v1713_v32  ;;  %v1800_v44 = vmax.f32 %v1708_v53, %v1712_v38 }
 0x379   :  { %v1805_v11 = vsub.f32 %v1705_v59, %v1801_v7  ;;  %v1817_v18 = vsub.f32 %v1709_v23, %v1801_v7  ;;  %v1829_v43 = vsub.f32 %v1713_v32, %v1801_v7 }
 0x37a   :  { %6772 = vmatmul.msk.f32.gmra.mxu2 %vm1933_vm11, %v1794_v24 }
 0x37b   :  { %v1809_v5 = vmul.f32 1.442695, %v1805_v11  ;;  %v1821_v52 = vmul.f32 1.442695, %v1817_v18  ;;  %v1833_v15 = vmul.f32 1.442695, %v1829_v43 }
 0x37c   :  { %v1655_v17 = vpop.f32.mrf.mxu1 }
 0x37d   :  { %7837 = vpow2.f32 %v1809_v5  ;;  %v1714_v50 = vmul.f32 0.2, %v1655_v17 }
 0x37e   :  { %7839 = vpow2.f32 %v1821_v52 }
 0x37f   :  { %v1802_v13 = vmax.f32 %v1798_v22, %v1714_v50  ;;  %7841 = vpow2.f32 %v1833_v15 }
 0x381   :  { %v1806_v21 = vsub.f32 %v1706_v10, %v1802_v13  ;;  %v1818_v48 = vsub.f32 %v1710_v6, %v1802_v13  ;;  %v1830_v55 = vsub.f32 %v1714_v50, %v1802_v13 }
 0x382   :  { %6773 = vmatmul.msk.f32.gmra.mxu2 %vm1933_vm11, %v1795_v41 }
 0x383   :  { %v7838_v40 = vpop.eup %7837  ;;  %v1811_v24 = vmul.f32 1.442695, %v1806_v21  ;;  %v1823_v26 = vmul.f32 1.442695, %v1818_v48  ;;  %v1835_v1 = vmul.f32 1.442695, %v1830_v55 }
 0x384   :  { %v9559_v31 = vpop.eup %7839  ;;  %v1658_v54 = vpop.f32.mrf.mxu1 }
 0x385   :  { %v1841_v37 = vadd.f32 %v9559_v31, %v7838_v40  ;;  %7843 = vpow2.f32 %v1811_v24  ;;  %v1715_v56 = vmul.f32 0.2, %v1658_v54  ;;  %v7842_v8 = vpop.eup %7841 }
 0x386   :  { %7845 = vpow2.f32 %v1823_v26  ;;  %v9571_v26 = vpop.f32.mrf.mxu0 }
 0x387   :  { %v1845_v9 = vadd.f32 %v7842_v8, %v1841_v37  ;;  %v1803_v28 = vmax.f32 %v1799_v57, %v1715_v56  ;;  %7847 = vpow2.f32 %v1835_v1 }
 0x389   :  { %7849 = vrcp.f32 %v1845_v9  ;;  %v1807_v41 = vsub.f32 %v1707_v12, %v1803_v28  ;;  %v1819_v36 = vsub.f32 %v1711_v16, %v1803_v28  ;;  %v1831_v35 = vsub.f32 %v1715_v56, %v1803_v28 }
 0x38a   :  { %6774 = vmatmul.msk.f32.gmra.mxu2 %vm1933_vm11, %v9538_v45 }
 0x38b   :  { %v7844_v51 = vpop.eup %7843  ;;  %v1813_v25 = vmul.f32 1.442695, %v1807_v41  ;;  %v1825_v63 = vmul.f32 1.442695, %v1819_v36  ;;  %v1837_v59 = vmul.f32 1.442695, %v1831_v35 }
 0x38c   :  { %v7846_v23 = vpop.eup %7845  ;;  %v1660_v39 = vpop.f32.mrf.mxu1 }
 0x38d   :  { %v1842_v32 = vadd.f32 %v7846_v23, %v7844_v51  ;;  %7851 = vpow2.f32 %v1813_v25  ;;  %v1716_v49 = vmul.f32 0.2, %v1660_v39  ;;  %v7848_v7 = vpop.eup %7847 }
 0x38e   :  { %7853 = vpow2.f32 %v1825_v63  ;;  %v9578_v41 = vpop.f32.mrf.mxu0 }
 0x38f   :  { %v7850_v6 = vpop.eup %7849  ;;  %v1846_v11 = vadd.f32 %v7848_v7, %v1842_v32  ;;  %v1804_v18 = vmax.f32 %v1800_v44, %v1716_v49  ;;  %7855 = vpow2.f32 %v1837_v59 }
 0x390   :  { %v1853_v43 = vmul.f32 %v7850_v6, %v7838_v40  ;;  %v9565_v45 = vmul.f32 %v7850_v6, %v7842_v8  ;;  %v1857_v63 = vmul.f32 %v7850_v6, %v9559_v31  ;;  %v2252_v31 = vld [vmem:[%s11939_s13 + $0x30] sm:$0x3] }
 0x391   :  { %7857 = vrcp.f32 %v1846_v11  ;;  %v1808_v34 = vsub.f32 %v1708_v53, %v1804_v18  ;;  %v1820_v10 = vsub.f32 %v1712_v38, %v1804_v18  ;;  %v1832_v5 = vsub.f32 %v1716_v49, %v1804_v18 }
 0x392   :  { %6775 = vmatmul.msk.f32.gmra.mxu2 %vm1933_vm11, %v1853_v43 }
 0x393   :  { %v7852_v52 = vpop.eup %7851  ;;  %v1815_v15 = vmul.f32 1.442695, %v1808_v34  ;;  %v1827_v17 = vmul.f32 1.442695, %v1820_v10  ;;  %v1839_v50 = vmul.f32 1.442695, %v1832_v5 }
 0x394   :  { %v7854_v22 = vpop.eup %7853  ;;  %v1663_v13 = vpop.f32.mrf.mxu1 }
 0x395   :  { %v1843_v16 = vadd.f32 %v7854_v22, %v7852_v52  ;;  %7859 = vpow2.f32 %v1815_v15  ;;  %v7856_v21 = vpop.eup %7855  ;;  %v7624_v15 = vld [vmem:[%s11939_s13 + $0x28] sm:$0xff] }
 0x396   :  { %7861 = vpow2.f32 %v1827_v17  ;;  %v9585_v25 = vpop.f32.mrf.mxu0 }
 0x397   :  { %v7858_v48 = vpop.eup %7857  ;;  %v1847_v55 = vadd.f32 %v7856_v21, %v1843_v16  ;;  %7863 = vpow2.f32 %v1839_v50  ;;  %v7623_v50 = vld [vmem:[%s11939_s13 + $0x20] sm:$0xff] }
 0x398   :  { %v1854_v40 = vmul.f32 %v7858_v48, %v7844_v51  ;;  %v9568_v12 = vmul.f32 %v7858_v48, %v7848_v7  ;;  %v1858_v44 = vmul.f32 %v7858_v48, %v7846_v23  ;;  %v2282_v23 = vunpack.c.l.b16 %v2252_v31 }
 0x399   :  { %7865 = vrcp.f32 %v1847_v55  ;;  %v7622_v55 = vld [vmem:[%s11939_s13 + $0x18] sm:$0xff] }
 0x39a   :  { %6776 = vmatmul.msk.f32.gmra.mxu2 %vm1933_vm11, %v1854_v40  ;;  %v2289_v34 = vpack.c.b16 %v2282_v23, %v2282_v23 }
 0x39b   :  { %v7860_v24 = vpop.eup %7859 }
 0x39c   :  { %v7862_v1 = vpop.eup %7861  ;;  %v1665_v54 = vpop.f32.mrf.mxu1  ;;  %v2315_v5 = vsel %vm1146_vm8, %v2289_v34, 0 }
 0x39d   :  { %v1844_v57 = vadd.f32 %v7862_v1, %v7860_v24  ;;  %v7864_v37 = vpop.eup %7863  ;;  %2318 = vmatpush.bf16.msra.mxu3 %v2315_v5 }
 0x39e   :  { %v9591_v32 = vpop.f32.mrf.mxu0 }
 0x39f   :  { %v7866_v56 = vpop.eup %7865  ;;  %v1848_v8 = vadd.f32 %v7864_v37, %v1844_v57 }
 0x3a0   :  { %v1855_v9 = vmul.f32 %v7866_v56, %v7852_v52  ;;  %v9573_v28 = vmul.f32 %v7866_v56, %v7856_v21  ;;  %v1859_v11 = vmul.f32 %v7866_v56, %v7854_v22  ;;  %v1717_v21 = vmul.f32 0.2, %v1663_v13  ;;  %v7621_v56 = vld [vmem:[%s11939_s13 + $0x10] sm:$0xff] }
 0x3a1   :  { %7867 = vrcp.f32 %v1848_v8  ;;  %2319 = vmatpush.bf16.msra.mxu3 %v7624_v15 }
 0x3a2   :  { %6777 = vmatmul.msk.f32.gmra.mxu2 %vm1933_vm11, %v1855_v9 }
 0x3a4   :  { %v9576_v38 = vpop.f32.mrf.mxu1 }
 0x3a5   :  { %2320 = vmatpush.bf16.msra.mxu3 %v7623_v50 }
 0x3a6   :  { %v9597_v18 = vpop.f32.mrf.mxu0 }
 0x3a7   :  { %v7868_v36 = vpop.eup %7867 }
 0x3a8   :  { %v1856_v35 = vmul.f32 %v7868_v36, %v7860_v24  ;;  %v9580_v51 = vmul.f32 %v7868_v36, %v7864_v37  ;;  %v1860_v10 = vmul.f32 %v7868_v36, %v7862_v1  ;;  %v1718_v36 = vmul.f32 0.2, %v1665_v54 }
 0x3a9   :  { %2321 = vmatpush.bf16.msra.mxu3 %v7622_v55 }
 0x3aa   :  { %6778 = vmatmul.msk.f32.gmra.mxu2 %vm1933_vm11, %v1856_v35 }
 0x3ac   :  { %v9583_v53 = vpop.f32.mrf.mxu1 }
 0x3ad   :  { %2322 = vmatpush.bf16.msra.mxu3 %v7621_v56 }
 0x3ae   :  { %v9611_v17 = vpop.f32.mrf.mxu0 }
 0x3b2   :  { %6779 = vmatmul.msk.f32.gmra.mxu2 %vm1933_vm11, %v1857_v63 }
 0x3b4   :  { %v1673_v59 = vpop.f32.mrf.mxu1 }
 0x3b5   :  { %v9589_v39 = vpop.f32.mrf.mxu2  ;;  %v1721_v16 = vmul.f32 0.2, %v1673_v59 }
 0x3b6   :  { %v9625_v57 = vpop.f32.mrf.mxu0 }
 0x3b7   :  { %v1865_v40 = vmax.f32 %v1717_v21, %v1721_v16 }
 0x3ba   :  { %6780 = vmatmul.msk.f32.gmra.mxu2 %vm1933_vm11, %v1858_v44 }
 0x3bc   :  { %v1675_v49 = vpop.f32.mrf.mxu1 }
 0x3bd   :  { %v9594_v7 = vpop.f32.mrf.mxu2 }
 0x3be   :  { %v9640_v54 = vpop.f32.mrf.mxu0 }
 0x3c2   :  { %6781 = vmatmul.msk.f32.gmra.mxu2 %vm1933_vm11, %v1859_v11  ;;  %v7620_v11 = vld [vmem:[%s11939_s13 + $0x8] sm:$0xff] }
 0x3c3   :  { %2323 = vmatpush.bf16.msra.mxu3 %v7620_v11  ;;  %v1720_v11 = vmul.f32 0.2, %v9583_v53 }
 0x3c4   :  { %v1678_v43 = vpop.f32.mrf.mxu1 }
 0x3c5   :  { %v9602_v6 = vpop.f32.mrf.mxu2 }
 0x3ca   :  { %6782 = vmatmul.msk.f32.gmra.mxu2 %vm1933_vm11, %v1860_v10  ;;  %v1723_v10 = vmul.f32 0.2, %v1678_v43 }
 0x3cc   :  { %v9606_v52 = vpop.f32.mrf.mxu1 }
 0x3cd   :  { %v9613_v22 = vpop.f32.mrf.mxu2 }
 0x3d2   :  { %6783 = vmatmul.msk.f32.gmra.mxu2 %vm1933_vm11, %v9565_v45  ;;  %v1722_v45 = vmul.f32 0.2, %v1675_v49 }
 0x3d4   :  { %v1683_v48 = vpop.f32.mrf.mxu1  ;;  %v1866_v31 = vmax.f32 %v1718_v36, %v1722_v45 }
 0x3d5   :  { %v1725_v24 = vmul.f32 0.2, %v1683_v48  ;;  %v9623_v1 = vpop.f32.mrf.mxu2 }
 0x3d7   :  { %v1869_v37 = vmax.f32 %v1865_v40, %v1725_v24 }
 0x3d9   :  { %v1873_v8 = vsub.f32 %v1717_v21, %v1869_v37  ;;  %v1885_v13 = vsub.f32 %v1721_v16, %v1869_v37  ;;  %v1897_v9 = vsub.f32 %v1725_v24, %v1869_v37  ;;  %v1719_v21 = vmul.f32 0.2, %v9576_v38 }
 0x3da   :  { %6784 = vmatmul.msk.f32.gmra.mxu2 %vm1933_vm11, %v9568_v12  ;;  %v7619_v12 = vld [vmem:[%s11939_s13] sm:$0xff] }
 0x3db   :  { %v1877_v35 = vmul.f32 1.442695, %v1873_v8  ;;  %v1889_v63 = vmul.f32 1.442695, %v1885_v13  ;;  %v1901_v59 = vmul.f32 1.442695, %v1897_v9  ;;  %2324 = vmatpush.bf16.msra.mxu3 %v7619_v12  ;;  %v1867_v56 = vmax.f32 %v1719_v21, %v1723_v10 }
 0x3dc   :  { %v1685_v44 = vpop.f32.mrf.mxu1 }
 0x3dd   :  { %7869 = vpow2.f32 %v1877_v35  ;;  %v1726_v23 = vmul.f32 0.2, %v1685_v44  ;;  %v9635_v49 = vpop.f32.mrf.mxu2  ;;  %v1375_v44 = vpop.f32.mrf.mxu0 }
 0x3de   :  { %7871 = vpow2.f32 %v1889_v63 }
 0x3df   :  { %v1870_v34 = vmax.f32 %v1866_v31, %v1726_v23  ;;  %7873 = vpow2.f32 %v1901_v59 }
 0x3e1   :  { %v1874_v5 = vsub.f32 %v1718_v36, %v1870_v34  ;;  %v1886_v15 = vsub.f32 %v1722_v45, %v1870_v34  ;;  %v1898_v50 = vsub.f32 %v1726_v23, %v1870_v34  ;;  %v1724_v36 = vmul.f32 0.2, %v9606_v52 }
 0x3e2   :  { %6785 = vmatmul.msk.f32.gmra.mxu2 %vm1933_vm11, %v9573_v28 }
 0x3e3   :  { %v7870_v16 = vpop.eup %7869  ;;  %v1879_v48 = vmul.f32 1.442695, %v1874_v5  ;;  %v1891_v55 = vmul.f32 1.442695, %v1886_v15  ;;  %v1903_v24 = vmul.f32 1.442695, %v1898_v50  ;;  %v1868_v15 = vmax.f32 %v1720_v11, %v1724_v36 }
 0x3e4   :  { %v9645_v40 = vpop.eup %7871  ;;  %v1688_v37 = vpop.f32.mrf.mxu1 }
 0x3e5   :  { %v1909_v8 = vadd.f32 %v9645_v40, %v7870_v16  ;;  %7875 = vpow2.f32 %v1879_v48  ;;  %v1727_v43 = vmul.f32 0.2, %v1688_v37  ;;  %v9648_v45 = vpop.f32.mrf.mxu2  ;;  %v7874_v13 = vpop.eup %7873 }
 0x3e6   :  { %7877 = vpow2.f32 %v1891_v55 }
 0x3e7   :  { %v1913_v28 = vadd.f32 %v7874_v13, %v1909_v8  ;;  %v1871_v9 = vmax.f32 %v1867_v56, %v1727_v43  ;;  %7879 = vpow2.f32 %v1903_v24 }
 0x3e9   :  { %7881 = vrcp.f32 %v1913_v28  ;;  %v1875_v38 = vsub.f32 %v1719_v21, %v1871_v9  ;;  %v1887_v35 = vsub.f32 %v1723_v10, %v1871_v9  ;;  %v1899_v63 = vsub.f32 %v1727_v43, %v1871_v9 }
 0x3ea   :  { %6786 = vmatmul.msk.f32.gmra.mxu2 %vm1933_vm11, %v9580_v51 }
 0x3eb   :  { %v7876_v59 = vpop.eup %7875  ;;  %v1881_v31 = vmul.f32 1.442695, %v1875_v38  ;;  %v1893_v23 = vmul.f32 1.442695, %v1887_v35  ;;  %v1905_v12 = vmul.f32 1.442695, %v1899_v63 }
 0x3ec   :  { %v9654_v34 = vpop.eup %7877  ;;  %v1690_v5 = vpop.f32.mrf.mxu1  ;;  %v7799_v63 = vld [vmem:[%s12031_s3] ss:$0 sm:$0xff] }
 0x3ed   :  { %v1910_v52 = vadd.f32 %v9654_v34, %v7876_v59  ;;  %7883 = vpow2.f32 %v1881_v31  ;;  %v1728_v50 = vmul.f32 0.2, %v1690_v5  ;;  %v9657_v10 = vpop.f32.mrf.mxu2  ;;  %v7880_v21 = vpop.eup %7879  ;;  %v9678_v5 = vadd.f32 %v7799_v63, %v9611_v17 }
 0x3ee   :  { %7885 = vpow2.f32 %v1893_v23  ;;  %v9675_v23 = vadd.f32 %v7799_v63, %v9597_v18 }
 0x3ef   :  { %v9659_v51 = vpop.eup %7881  ;;  %v1914_v48 = vadd.f32 %v7880_v21, %v1910_v52  ;;  %v1872_v55 = vmax.f32 %v1868_v15, %v1728_v50  ;;  %7887 = vpow2.f32 %v1905_v12  ;;  %v2171_v17 = vmul.f32 %v9635_v49, %v9678_v5 }
 0x3f0   :  { %v1921_v53 = vmul.f32 %v9659_v51, %v7870_v16  ;;  %v9663_v24 = vmul.f32 %v9659_v51, %v7874_v13  ;;  %v1377_v16 = vpop.f32.mrf.mxu0  ;;  %v2170_v18 = vmul.f32 %v9623_v1, %v9675_v23 }
 0x3f1   :  { %7889 = vrcp.f32 %v1914_v48  ;;  %v1876_v37 = vsub.f32 %v1720_v11, %v1872_v55  ;;  %v1888_v56 = vsub.f32 %v1724_v36, %v1872_v55  ;;  %v1900_v8 = vsub.f32 %v1728_v50, %v1872_v55 }
 0x3f2   :  { %6787 = vmatmul.msk.f32.gmra.mxu2 %vm1933_vm11, %v1921_v53  ;;  %v9685_v50 = vadd.f32 %v7799_v63, %v9571_v26  ;;  %v9688_v48 = vadd.f32 %v7799_v63, %v9578_v41  ;;  %v9690_v55 = vadd.f32 %v7799_v63, %v1375_v44  ;;  %v9697_v53 = vadd.f32 %v7799_v63, %v1377_v16 }
 0x3f3   :  { %v7884_v43 = vpop.eup %7883  ;;  %v1883_v28 = vmul.f32 1.442695, %v1876_v37  ;;  %v1895_v9 = vmul.f32 1.442695, %v1888_v56  ;;  %v1907_v35 = vmul.f32 1.442695, %v1900_v8 }
 0x3f4   :  { %v9666_v38 = vpop.eup %7885  ;;  %v2162_v26 = vmul.f32 %v9589_v39, %v9685_v50  ;;  %v2163_v41 = vmul.f32 %v9594_v7, %v9688_v48 }
 0x3f5   :  { %v1911_v13 = vadd.f32 %v9666_v38, %v7884_v43  ;;  %7891 = vpow2.f32 %v1883_v28  ;;  %v2078_v31 = vpop.f32.mrf.mxu2  ;;  %v7888_v11 = vpop.eup %7887 }
 0x3f6   :  { %7893 = vpow2.f32 %v1895_v9  ;;  %v2178_v44 = vmul.f32 %v2078_v31, %v9690_v55  ;;  %v2174_v8 = vadd.f32 %v2170_v18, %v2162_v26  ;;  %v2175_v28 = vadd.f32 %v2171_v17, %v2163_v41 }
 0x3f7   :  { %v9672_v36 = vpop.eup %7889  ;;  %v1915_v12 = vadd.f32 %v7888_v11, %v1911_v13  ;;  %7895 = vpow2.f32 %v1907_v35  ;;  %v9708_v18 = vadd.f32 %v7799_v63, %v9625_v57  ;;  %v9711_v17 = vadd.f32 %v7799_v63, %v9640_v54 }
 0x3f8   :  { %v1922_v15 = vmul.f32 %v9672_v36, %v7876_v59  ;;  %v9682_v52 = vmul.f32 %v9672_v36, %v7880_v21  ;;  %v1380_v35 = vpop.f32.mrf.mxu0  ;;  %v2182_v16 = vadd.f32 %v2178_v44, %v2174_v8  ;;  %v9714_v44 = vadd.f32 %v7799_v63, %v9585_v25 }
 0x3f9   :  { %7897 = vrcp.f32 %v1915_v12  ;;  %v2173_v57 = vmul.f32 %v9657_v10, %v9711_v17  ;;  %v1925_v10 = vmul.f32 %v9659_v51, %v9645_v40 }
 0x3fa   :  { %6788 = vmatmul.msk.f32.gmra.mxu2 %vm1933_vm11, %v1922_v15  ;;  %v2164_v25 = vmul.f32 %v9602_v6, %v9714_v44 }
 0x3fb   :  { %v7892_v59 = vpop.eup %7891 }
 0x3fc   :  { %v7894_v21 = vpop.eup %7893 }
 0x3fd   :  { %v1912_v37 = vadd.f32 %v7894_v21, %v7892_v59  ;;  %v2081_v56 = vpop.f32.mrf.mxu2  ;;  %v7896_v1 = vpop.eup %7895 }
 0x3fe   :  { %v2179_v49 = vmul.f32 %v2081_v56, %v9697_v53  ;;  %v2172_v56 = vmul.f32 %v9648_v45, %v9708_v18 }
 0x3ff   :  { %v7898_v9 = vpop.eup %7897  ;;  %v1916_v13 = vadd.f32 %v7896_v1, %v1912_v37  ;;  %v9719_v37 = vadd.f32 %v7799_v63, %v1380_v35 }
 0x400   :  { %v2183_v12 = vadd.f32 %v2179_v49, %v2175_v28  ;;  %v1923_v15 = vmul.f32 %v7898_v9, %v7884_v43  ;;  %v1931_v58 = vmul.f32 %v7898_v9, %v7888_v11  ;;  %v1382_v43 = vpop.f32.mrf.mxu0  ;;  %v9717_v11 = vadd.f32 %v7799_v63, %v9591_v32 }
 0x401   :  { %7899 = vrcp.f32 %v1916_v13  ;;  %v9726_v54 = vadd.f32 %v7799_v63, %v1382_v43  ;;  %v2176_v8 = vadd.f32 %v2172_v56, %v2164_v25 }
 0x402   :  { %v2234_v39 = vpack.c.bf16 %v2183_v12, %v2182_v16  ;;  %6789 = vmatmul.msk.f32.gmra.mxu2 %vm1933_vm11, %v1923_v15  ;;  %v1927_v16 = vmul.f32 %v7898_v9, %v9666_v38 }
 0x404   :  { %6823 = vmatmul.msk.bf16.vlgmr.msra.gmra.mxu3 %vm1127_vm3, %v2234_v39 }
 0x405   :  { %v2084_v7 = vpop.f32.mrf.mxu2 }
 0x406   :  { %v2180_v32 = vmul.f32 %v2084_v7, %v9719_v37 }
 0x407   :  { %v7900_v31 = vpop.eup %7899 }
 0x408   :  { %v1924_v26 = vmul.f32 %v7900_v31, %v7892_v59  ;;  %v1932_v41 = vmul.f32 %v7900_v31, %v7896_v1  ;;  %v2165_v59 = vmul.f32 %v9613_v22, %v9717_v11  ;;  %v2184_v49 = vadd.f32 %v2180_v32, %v2176_v8 }
 0x409   :  { %v1926_v22 = vmul.f32 %v9672_v36, %v9654_v34  ;;  %v1928_v15 = vmul.f32 %v7900_v31, %v7894_v21 }
 0x40a   :  { %6790 = vmatmul.msk.f32.gmra.mxu2 %vm1933_vm11, %v1924_v26  ;;  %v2177_v28 = vadd.f32 %v2173_v57, %v2165_v59 }
 0x40d   :  { %v2087_v1 = vpop.f32.mrf.mxu2 }
 0x40e   :  { %v2181_v45 = vmul.f32 %v2087_v1, %v9726_v54 }
 0x410   :  { %v2185_v35 = vadd.f32 %v2181_v45, %v2177_v28 }
 0x412   :  { %6791 = vmatmul.msk.f32.gmra.mxu2 %vm1933_vm11, %v1925_v10  ;;  %v2235_v63 = vpack.c.bf16 %v2185_v35, %v2184_v49 }
 0x414   :  { %6824 = vmatmul.msk.bf16.gmra.mxu3 %vm1127_vm3, %v2235_v63 }
 0x415   :  { %v2090_v6 = vpop.f32.mrf.mxu2 }
 0x416   :  { %v2186_v7 = vmul.f32 %v2090_v6, %v9685_v50 }
 0x41a   :  { %6792 = vmatmul.msk.f32.gmra.mxu2 %vm1933_vm11, %v1926_v22 }
 0x41d   :  { %v2093_v13 = vpop.f32.mrf.mxu2 }
 0x422   :  { %6793 = vmatmul.msk.f32.gmra.mxu2 %vm1933_vm11, %v1927_v16 }
 0x425   :  { %v2096_v12 = vpop.f32.mrf.mxu2 }
 0x426   :  { %v2188_v1 = vmul.f32 %v2096_v12, %v9714_v44  ;;  %v9767_v12 = vld [vmem:[%s11940_s14] ss:$0 sm:$0xff] }
 0x42a   :  { %6794 = vmatmul.msk.f32.gmra.mxu2 %vm1933_vm11, %v1928_v15 }
 0x42d   :  { %v2099_v40 = vpop.f32.mrf.mxu2 }
 0x42e   :  { %v2189_v8 = vmul.f32 %v2099_v40, %v9717_v11 }
 0x432   :  { %6795 = vmatmul.msk.f32.gmra.mxu2 %vm1933_vm11, %v9663_v24  ;;  %v2187_v24 = vmul.f32 %v2093_v13, %v9688_v48 }
 0x435   :  { %v2102_v51 = vpop.f32.mrf.mxu2 }
 0x436   :  { %v2194_v21 = vmul.f32 %v2102_v51, %v9675_v23 }
 0x43a   :  { %6796 = vmatmul.msk.f32.gmra.mxu2 %vm1933_vm11, %v9682_v52  ;;  %v2198_v52 = vadd.f32 %v2194_v21, %v2186_v7 }
 0x43d   :  { %v2105_v34 = vpop.f32.mrf.mxu2 }
 0x43e   :  { %v2195_v39 = vmul.f32 %v2105_v34, %v9678_v5 }
 0x440   :  { %v2199_v43 = vadd.f32 %v2195_v39, %v2187_v24 }
 0x442   :  { %6797 = vmatmul.msk.f32.gmra.mxu2 %vm1933_vm11, %v1931_v58 }
 0x445   :  { %v2108_v36 = vpop.f32.mrf.mxu2 }
 0x446   :  { %v2196_v59 = vmul.f32 %v2108_v36, %v9708_v18 }
 0x448   :  { %v2200_v49 = vadd.f32 %v2196_v59, %v2188_v1 }
 0x44a   :  { %6798 = vmatmul.msk.f32.gmra.mxu2 %vm1933_vm11, %v1932_v41 }
 0x44d   :  { %v2111_v38 = vpop.f32.mrf.mxu2 }
 0x44e   :  { %v2197_v32 = vmul.f32 %v2111_v38, %v9711_v17 }
 0x450   :  { %v2201_v35 = vadd.f32 %v2197_v32, %v2189_v8 }
 0x455   :  { %v2114_v9 = vpop.f32.mrf.mxu2 }
 0x456   :  { %v2202_v31 = vmul.f32 %v2114_v9, %v9690_v55 }
 0x458   :  { %v2206_v56 = vadd.f32 %v2202_v31, %v2198_v52 }
 0x45d   :  { %v2117_v26 = vpop.f32.mrf.mxu2 }
 0x45e   :  { %v2203_v58 = vmul.f32 %v2117_v26, %v9697_v53 }
 0x460   :  { %v2207_v57 = vadd.f32 %v2203_v58, %v2199_v43 }
 0x462   :  { %v2236_v41 = vpack.c.bf16 %v2207_v57, %v2206_v56 }
 0x464   :  { %6825 = vmatmul.msk.bf16.gmra.mxu3 %vm1127_vm3, %v2236_v41 }
 0x465   :  { %v2120_v25 = vpop.f32.mrf.mxu2 }
 0x466   :  { %v2204_v28 = vmul.f32 %v2120_v25, %v9719_v37 }
 0x468   :  { %v2208_v63 = vadd.f32 %v2204_v28, %v2200_v49 }
 0x46d   :  { %v2123_v45 = vpop.f32.mrf.mxu2 }
 0x46e   :  { %v2205_v10 = vmul.f32 %v2123_v45, %v9726_v54 }
 0x470   :  { %v2209_v6 = vadd.f32 %v2205_v10, %v2201_v35 }
 0x472   :  { %v2237_v22 = vpack.c.bf16 %v2209_v6, %v2208_v63 }
 0x474   :  { %6826 = vmatmul.msk.bf16.gmra.mxu3 %vm1127_vm3, %v2237_v22 }
 0x475   :  { %v2126_v13 = vpop.f32.mrf.mxu2 }
 0x476   :  { %v2210_v1 = vmul.f32 %v2126_v13, %v9685_v50 }
 0x47d   :  { %v2129_v16 = vpop.f32.mrf.mxu2 }
 0x47e   :  { %v2211_v8 = vmul.f32 %v2129_v16, %v9688_v48 }
 0x485   :  { %v2132_v15 = vpop.f32.mrf.mxu2 }
 0x486   :  { %v2212_v50 = vmul.f32 %v2132_v15, %v9714_v44 }
 0x487   :  { %v2326_v40 = vpop.f32.mrf.mxu3 }
 0x488   :  { %v2327_v51 = vadd.f32 %v9767_v12, %v2326_v40 }
 0x48a   :  { %v9771_v34 = vadd.f32 %v2327_v51, %v9244_v46 }
 0x48c   :  { %v2370_v36 = vsel %vm1127_vm3, %v9771_v34, 0.0 }
 0x48d   :  { %2371 = vadd.xlane.f32.xlu0 %v2370_v36  ;;  %v2135_v38 = vpop.f32.mrf.mxu2 }
 0x48e   :  { %v2213_v48 = vmul.f32 %v2135_v38, %v9717_v11 }
 0x48f   :  { %v2328_v9 = vpop.f32.mrf.mxu3 }
 0x490   :  { %v2329_v21 = vadd.f32 %v9767_v12, %v2328_v9 }
 0x492   :  { %v9777_v39 = vadd.f32 %v2329_v21, %v9246_v47 }
 0x494   :  { %v2373_v7 = vsel %vm1127_vm3, %v9777_v39, 0.0 }
 0x495   :  { %2374 = vadd.xlane.f32.xlu1 %v2373_v7  ;;  %v2138_v24 = vpop.f32.mrf.mxu2 }
 0x497   :  { %v2331_v31 = vpop.f32.mrf.mxu3 }
 0x498   :  { %v2332_v46 = vadd.f32 %v9767_v12, %v2331_v31 }
 0x49a   :  { %v9783_v26 = vadd.f32 %v2332_v46, %v9253_v60  ;;  %v2218_v60 = vmul.f32 %v2138_v24, %v9675_v23 }
 0x49c   :  { %v2376_v52 = vsel %vm1127_vm3, %v9783_v26, 0.0 }
 0x49d   :  { %2377 = vadd.xlane.f32.xlu2 %v2376_v52  ;;  %v2141_v43 = vpop.f32.mrf.mxu2 }
 0x49e   :  { %v2219_v32 = vmul.f32 %v2141_v43, %v9678_v5  ;;  %v8311_v43 = vmov 100.0  }
 0x49f   :  { %v2333_v58 = vpop.f32.mrf.mxu3  ;;  %7901 = vrcp.f32 %v8311_v43 }
 0x4a0   :  { %v2334_v47 = vadd.f32 %v9767_v12, %v2333_v58  ;;  %v2223_v49 = vadd.f32 %v2219_v32, %v2211_v8 }
 0x4a2   :  { %v9789_v56 = vadd.f32 %v2334_v47, %v9255_v61  ;;  %v2222_v61 = vadd.f32 %v2218_v60, %v2210_v1 }
 0x4a4   :  { %v2379_v57 = vsel %vm1127_vm3, %v9789_v56, 0.0 }
 0x4a5   :  { %2380 = vadd.xlane.f32.xlu2 %v2379_v57  ;;  %v2144_v41 = vpop.f32.mrf.mxu2  ;;  %v7902_v58 = vpop.eup %7901 }
 0x4a6   :  { %v2220_v23 = vmul.f32 %v2144_v41, %v9708_v18  ;;  %v2407_v47 = vmul.f32 100.0, %v7902_v58  ;;  %vm2411_vm12 = vweird.f32 %v7902_v58 }
 0x4a8   :  { %v2224_v16 = vadd.f32 %v2220_v23, %v2212_v50 }
 0x4ad   :  { %v2147_v25 = vpop.f32.mrf.mxu2 }
 0x4ae   :  { %v2221_v5 = vmul.f32 %v2147_v25, %v9711_v17 }
 0x4b0   :  { %v2225_v40 = vadd.f32 %v2221_v5, %v2213_v48 }
 0x4b5   :  { %v2150_v59 = vpop.f32.mrf.mxu2 }
 0x4b6   :  { %v2226_v28 = vmul.f32 %v2150_v59, %v9690_v55 }
 0x4b8   :  { %v2230_v10 = vadd.f32 %v2226_v28, %v2222_v61 }
 0x4bd   :  { %v2153_v45 = vpop.f32.mrf.mxu2 }
 0x4be   :  { %v2227_v35 = vmul.f32 %v2153_v45, %v9697_v53 }
 0x4c0   :  { %v2231_v63 = vadd.f32 %v2227_v35, %v2223_v49 }
 0x4c2   :  { %v2238_v6 = vpack.c.bf16 %v2231_v63, %v2230_v10 }
 0x4c4   :  { %6827 = vmatmul.msk.bf16.gmra.mxu3 %vm1127_vm3, %v2238_v6 }
 0x4c5   :  { %v2156_v22 = vpop.f32.mrf.mxu2 }
 0x4c6   :  { %v2228_v55 = vmul.f32 %v2156_v22, %v9719_v37 }
 0x4c8   :  { %v2232_v51 = vadd.f32 %v2228_v55, %v2224_v16 }
 0x4cd   :  { %v2159_v13 = vpop.f32.mrf.mxu2 }
 0x4ce   :  { %v2229_v53 = vmul.f32 %v2159_v13, %v9726_v54 }
 0x4d0   :  { %v2233_v36 = vadd.f32 %v2229_v53, %v2225_v40 }
 0x4d2   :  { %v2239_v9 = vpack.c.bf16 %v2233_v36, %v2232_v51 }
 0x4d4   :  { %6828 = vmatmul.msk.bf16.gmra.mxu3 %vm1127_vm3, %v2239_v9 }
 0x4e7   :  { %v2336_v21 = vpop.f32.mrf.mxu3 }
 0x4e8   :  { %v2337_v18 = vadd.f32 %v9767_v12, %v2336_v21 }
 0x4ea   :  { %v9809_v17 = vadd.f32 %v2337_v18, %v9257_v62 }
 0x4ec   :  { %v2382_v44 = vsel %vm1127_vm3, %v9809_v17, 0.0 }
 0x4ed   :  { %2383 = vadd.xlane.f32.xlu0 %v2382_v44 }
 0x4ef   :  { %v2338_v11 = vpop.f32.mrf.mxu3 }
 0x4f0   :  { %v2339_v37 = vadd.f32 %v9767_v12, %v2338_v11 }
 0x4f2   :  { %v9815_v54 = vadd.f32 %v2339_v37, %v9264_v0 }
 0x4f4   :  { %v2385_v15 = vsel %vm1127_vm3, %v9815_v54, 0.0 }
 0x4f5   :  { %2386 = vadd.xlane.f32.xlu1 %v2385_v15 }
 0x4f7   :  { %v2341_v38 = vpop.f32.mrf.mxu3 }
 0x4f8   :  { %v2342_v7 = vadd.f32 %v9767_v12, %v2341_v38 }
 0x4fa   :  { %v9821_v62 = vadd.f32 %v2342_v7, %v9270_v2  ;;  %v2408_v2 = vsub.f32 1.0, %v2407_v47 }
 0x4fc   :  { %v2388_v24 = vsel %vm1127_vm3, %v9821_v62, 0.0  ;;  %v2409_v57 = vmul.f32 %v7902_v58, %v2408_v2 }
 0x4fd   :  { %2389 = vadd.xlane.f32.xlu2 %v2388_v24 }
 0x4fe   :  { %v2410_v59 = vadd.f32 %v7902_v58, %v2409_v57 }
 0x4ff   :  { %v2343_v31 = vpop.f32.mrf.mxu3 }
 0x500   :  { %v2344_v46 = vadd.f32 %v9767_v12, %v2343_v31  ;;  %v9837_v1 = vsel %vm2411_vm12, %v7902_v58, %v2410_v59  ;;  %v2372_v8 = vpop.xlane.xlu0 %2371 }
 0x501   :  { %12032 = vst [vmem:[#allocation25_spill] sm:$0xff] %v9837_v1  ;;  %v2413_v45 = vmul.f32 %v9837_v1, %v2372_v8 }
 0x502   :  { %v9827_v0 = vadd.f32 %v2344_v46, %v9273_v3 }
 0x503   :  { %v9845_v35 = vsub.f32 %v9771_v34, %v2413_v45 }
 0x504   :  { %v2391_v52 = vsel %vm1127_vm3, %v9827_v0, 0.0 }
 0x505   :  { %2392 = vadd.xlane.f32.xlu0 %v2391_v52  ;;  %v2437_v5 = vmul.f32 %v9845_v35, %v9845_v35 }
 0x507   :  { %v2449_v48 = vsel %vm1127_vm3, %v2437_v5, 0.0 }
 0x508   :  { %v2375_v63 = vpop.xlane.xlu1 %2374 }
 0x510   :  { %v2378_v3 = vpop.xlane.xlu2 %2377 }
 0x511   :  { %v2415_v40 = vmul.f32 %v9837_v1, %v2378_v3 }
 0x518   :  { %v2381_v10 = vpop.xlane.xlu2 %2380 }
 0x519   :  { %v2416_v22 = vmul.f32 %v9837_v1, %v2381_v10 }
 0x51b   :  { %v9858_v34 = vsub.f32 %v9789_v56, %v2416_v22 }
 0x51d   :  { %v2440_v56 = vmul.f32 %v9858_v34, %v9858_v34 }
 0x51f   :  { %v2458_v21 = vsel %vm1127_vm3, %v2440_v56, 0.0 }
 0x547   :  { %v2346_v41 = vpop.f32.mrf.mxu3 }
 0x548   :  { %v2347_v25 = vadd.f32 %v9767_v12, %v2346_v41 }
 0x54a   :  { %v9833_v60 = vadd.f32 %v2347_v25, %v9275_v4 }
 0x54c   :  { %v2394_v32 = vsel %vm1127_vm3, %v9833_v60, 0.0 }
 0x54d   :  { %2395 = vadd.xlane.f32.xlu1 %v2394_v32 }
 0x54f   :  { %v2348_v28 = vpop.f32.mrf.mxu3 }
 0x550   :  { %v2349_v61 = vadd.f32 %v9767_v12, %v2348_v28 }
 0x552   :  { %v9842_v49 = vadd.f32 %v2349_v61, %v9302_v14  ;;  %v2414_v14 = vmul.f32 %v9837_v1, %v2375_v63 }
 0x554   :  { %v2397_v4 = vsel %vm1127_vm3, %v9842_v49, 0.0  ;;  %v9864_v13 = vsub.f32 %v9777_v39, %v2414_v14  ;;  %v9877_v39 = vsub.f32 %v9783_v26, %v2415_v40 }
 0x555   :  { %2398 = vadd.xlane.f32.xlu2 %v2397_v4 }
 0x556   :  { %v2438_v36 = vmul.f32 %v9864_v13, %v9864_v13 }
 0x557   :  { %v2351_v6 = vpop.f32.mrf.mxu3 }
 0x558   :  { %v2352_v23 = vadd.f32 %v9767_v12, %v2351_v6  ;;  %v2452_v44 = vsel %vm1127_vm3, %v2438_v36, 0.0 }
 0x55a   :  { %v9855_v50 = vadd.f32 %v2352_v23, %v9315_v19 }
 0x55c   :  { %v2400_v55 = vsel %vm1127_vm3, %v9855_v50, 0.0 }
 0x55d   :  { %2450 = vadd.xlane.f32.xlu2 %v2449_v48  ;;  %2401 = vadd.xlane.f32.xlu0 %v2400_v55 }
 0x55f   :  { %v2353_v16 = vpop.f32.mrf.mxu3 }
 0x560   :  { %v2354_v53 = vadd.f32 %v9767_v12, %v2353_v16  ;;  %v2384_v19 = vpop.xlane.xlu0 %2383 }
 0x561   :  { %v2417_v51 = vmul.f32 %v9837_v1, %v2384_v19 }
 0x562   :  { %v9874_v9 = vadd.f32 %v2354_v53, %v9319_v20  ;;  %v2439_v20 = vmul.f32 %v9877_v39, %v9877_v39 }
 0x563   :  { %v9883_v18 = vsub.f32 %v9809_v17, %v2417_v51 }
 0x564   :  { %v2403_v12 = vsel %vm1127_vm3, %v9874_v9, 0.0  ;;  %v2455_v17 = vsel %vm1127_vm3, %v2439_v20, 0.0 }
 0x565   :  { %2459 = vadd.xlane.f32.xlu2 %v2458_v21  ;;  %2404 = vadd.xlane.f32.xlu1 %v2403_v12  ;;  %v2441_v37 = vmul.f32 %v9883_v18, %v9883_v18 }
 0x566   :  { %2453 = vadd.xlane.f32.xlu0 %v2452_v44 }
 0x567   :  { %v2461_v38 = vsel %vm1127_vm3, %v2441_v37, 0.0 }
 0x568   :  { %v2387_v11 = vpop.xlane.xlu1 %2386 }
 0x569   :  { %v2418_v26 = vmul.f32 %v9837_v1, %v2387_v11 }
 0x56b   :  { %v9892_v15 = vsub.f32 %v9815_v54, %v2418_v26 }
 0x56d   :  { %2456 = vadd.xlane.f32.xlu1 %v2455_v17  ;;  %v2442_v24 = vmul.f32 %v9892_v15, %v9892_v15 }
 0x56e   :  { %2462 = vadd.xlane.f32.xlu0 %v2461_v38 }
 0x56f   :  { %v2464_v52 = vsel %vm1127_vm3, %v2442_v24, 0.0 }
 0x570   :  { %v2390_v7 = vpop.xlane.xlu2 %2389 }
 0x571   :  { %v2419_v31 = vmul.f32 %v9837_v1, %v2390_v7 }
 0x573   :  { %v9900_v46 = vsub.f32 %v9821_v62, %v2419_v31 }
 0x575   :  { %2465 = vadd.xlane.f32.xlu1 %v2464_v52  ;;  %v2443_v54 = vmul.f32 %v9900_v46, %v9900_v46 }
 0x577   :  { %v2467_v43 = vsel %vm1127_vm3, %v2443_v54, 0.0  ;;  %v9953_v54 = vld [vmem:[%s11941_s15] ss:$0 sm:$0xff] }
 0x578   :  { %v2393_v58 = vpop.xlane.xlu0 %2392  ;;  %2468 = vadd.xlane.f32.xlu2 %v2467_v43 }
 0x579   :  { %v2420_v47 = vmul.f32 %v9837_v1, %v2393_v58 }
 0x57b   :  { %v9908_v2 = vsub.f32 %v9827_v0, %v2420_v47 }
 0x57d   :  { %v2444_v57 = vmul.f32 %v9908_v2, %v9908_v2 }
 0x57f   :  { %v2470_v62 = vsel %vm1127_vm3, %v2444_v57, 0.0  ;;  %v9960_v57 = vld [vmem:[%s11942_s16] ss:$0 sm:$0xff] }
 0x580   :  { %2471 = vadd.xlane.f32.xlu0 %v2470_v62 }
 0x5c0   :  { %v2396_v41 = vpop.xlane.xlu1 %2395 }
 0x5c1   :  { %v2421_v25 = vmul.f32 %v9837_v1, %v2396_v41 }
 0x5c3   :  { %v9915_v59 = vsub.f32 %v9833_v60, %v2421_v25 }
 0x5c5   :  { %v2445_v3 = vmul.f32 %v9915_v59, %v9915_v59 }
 0x5c7   :  { %v2473_v32 = vsel %vm1127_vm3, %v2445_v3, 0.0 }
 0x5c8   :  { %v2399_v8 = vpop.xlane.xlu2 %2398  ;;  %2474 = vadd.xlane.f32.xlu1 %v2473_v32 }
 0x5c9   :  { %v2422_v0 = vmul.f32 %v9837_v1, %v2399_v8 }
 0x5cb   :  { %v9922_v28 = vsub.f32 %v9842_v49, %v2422_v0 }
 0x5cd   :  { %v2446_v45 = vmul.f32 %v9922_v28, %v9922_v28 }
 0x5cf   :  { %v2476_v61 = vsel %vm1127_vm3, %v2446_v45, 0.0 }
 0x5d0   :  { %2477 = vadd.xlane.f32.xlu2 %v2476_v61  ;;  %v2451_v60 = vpop.xlane.xlu2 %2450  ;;  %v2402_v4 = vpop.xlane.xlu0 %2401 }
 0x5d1   :  { %v2485_v10 = vmul.f32 %v2451_v60, %v9837_v1  ;;  %v2423_v63 = vmul.f32 %v9837_v1, %v2402_v4 }
 0x5d3   :  { %v2497_v6 = vadd.f32 1e-12, %v2485_v10  ;;  %v9930_v22 = vsub.f32 %v9855_v50, %v2423_v63 }
 0x5d5   :  { %7903 = vrsqrt.f32 %v2497_v6  ;;  %v2447_v49 = vmul.f32 %v9930_v22, %v9930_v22  ;;  %vm2515_vm14 = vweird.f32 %v2497_v6 }
 0x5d7   :  { %v2479_v23 = vsel %vm1127_vm3, %v2447_v49, 0.0 }
 0x5d8   :  { %v2460_v5 = vpop.xlane.xlu2 %2459  ;;  %v2405_v14 = vpop.xlane.xlu1 %2404  ;;  %2480 = vadd.xlane.f32.xlu0 %v2479_v23 }
 0x5d9   :  { %v2488_v48 = vmul.f32 %v2460_v5, %v9837_v1  ;;  %v2424_v55 = vmul.f32 %v9837_v1, %v2405_v14  ;;  %v2454_v16 = vpop.xlane.xlu0 %2453 }
 0x5da   :  { %v2486_v40 = vmul.f32 %v2454_v16, %v9837_v1 }
 0x5db   :  { %v7904_v53 = vpop.eup %7903  ;;  %v2500_v19 = vadd.f32 1e-12, %v2488_v48  ;;  %v9939_v50 = vsub.f32 %v9874_v9, %v2424_v55 }
 0x5dc   :  { %v2510_v56 = vmul.f32 %v7904_v53, %v2497_v6  ;;  %v2498_v51 = vadd.f32 1e-12, %v2486_v40  ;;  %vm2516_vm13 = vweird.f32 %v7904_v53 }
 0x5dd   :  { %7905 = vrsqrt.f32 %v2500_v19  ;;  %v2448_v36 = vmul.f32 %v9939_v50, %v9939_v50  ;;  %vm2517_vm15 = vmor %vm2515_vm14, %vm2516_vm13  ;;  %vm2545_vm2 = vweird.f32 %v2500_v19 }
 0x5de   :  { %v2511_v21 = vmul.f32 %v7904_v53, %v2510_v56  ;;  %7907 = vrsqrt.f32 %v2498_v51  ;;  %vm2525_vm5 = vweird.f32 %v2498_v51 }
 0x5df   :  { %v2482_v12 = vsel %vm1127_vm3, %v2448_v36, 0.0 }
 0x5e0   :  { %v2512_v44 = vmul.f32 0.5, %v2511_v21  ;;  %2483 = vadd.xlane.f32.xlu1 %v2482_v12  ;;  %v2457_v11 = vpop.xlane.xlu1 %2456 }
 0x5e1   :  { %v2487_v20 = vmul.f32 %v2457_v11, %v9837_v1  ;;  %v2463_v26 = vpop.xlane.xlu0 %2462 }
 0x5e2   :  { %v2513_v37 = vsub.f32 1.5, %v2512_v44  ;;  %v2489_v9 = vmul.f32 %v2463_v26, %v9837_v1 }
 0x5e3   :  { %v7906_v17 = vpop.eup %7905  ;;  %v9946_v38 = vadd.f32 1e-12, %v2487_v20 }
 0x5e4   :  { %v7908_v7 = vpop.eup %7907  ;;  %v2514_v24 = vmul.f32 %v7904_v53, %v2513_v37  ;;  %v2540_v31 = vmul.f32 %v7906_v17, %v2500_v19  ;;  %v9948_v52 = vadd.f32 1e-12, %v2489_v9  ;;  %vm2546_vm0 = vweird.f32 %v7906_v17 }
 0x5e5   :  { %v2520_v43 = vmul.f32 %v7908_v7, %v2498_v51  ;;  %7909 = vrsqrt.f32 %v9946_v38  ;;  %vm2526_vm1 = vweird.f32 %v7908_v7  ;;  %vm2547_vm4 = vmor %vm2545_vm2, %vm2546_vm0  ;;  %vm2535_vm10 = vweird.f32 %v9946_v38 }
 0x5e6   :  { %v2518_v58 = vsel %vm2517_vm15, %v7904_v53, %v2514_v24  ;;  %v2541_v47 = vmul.f32 %v7906_v17, %v2540_v31  ;;  %7911 = vrsqrt.f32 %v9948_v52  ;;  %vm2527_vm6 = vmor %vm2525_vm5, %vm2526_vm1  ;;  %vm2555_vm12 = vweird.f32 %v9948_v52 }
 0x5e7   :  { %v2629_v62 = vmul.f32 %v2518_v58, %v9845_v35  ;;  %v2521_v41 = vmul.f32 %v7908_v7, %v2520_v43 }
 0x5e8   :  { %v2542_v25 = vmul.f32 0.5, %v2541_v47  ;;  %v2466_v3 = vpop.xlane.xlu1 %2465 }
 0x5e9   :  { %v2644_v32 = vmul.f32 %v9953_v54, %v2629_v62  ;;  %v2522_v8 = vmul.f32 0.5, %v2521_v41  ;;  %v2490_v0 = vmul.f32 %v2466_v3, %v9837_v1 }
 0x5ea   :  { %v2543_v45 = vsub.f32 1.5, %v2542_v25 }
 0x5eb   :  { %v7910_v61 = vpop.eup %7909  ;;  %v9966_v60 = vadd.f32 %v9960_v57, %v2644_v32  ;;  %v2523_v4 = vsub.f32 1.5, %v2522_v8  ;;  %v2502_v10 = vadd.f32 1e-12, %v2490_v0  ;;  %v2469_v63 = vpop.xlane.xlu2 %2468 }
 0x5ec   :  { %v7912_v6 = vpop.eup %7911  ;;  %v2544_v35 = vmul.f32 %v7906_v17, %v2543_v45  ;;  %v2530_v49 = vmul.f32 %v7910_v61, %v9946_v38  ;;  %v2491_v23 = vmul.f32 %v2469_v63, %v9837_v1  ;;  %vm2536_vm7 = vweird.f32 %v7910_v61 }
 0x5ed   :  { %12033 = vst [vmem:[#allocation26_spill] sm:$0xff] %v9966_v60  ;;  %v2524_v5 = vmul.f32 %v7908_v7, %v2523_v4  ;;  %v2550_v14 = vmul.f32 %v7912_v6, %v9948_v52  ;;  %7913 = vrsqrt.f32 %v2502_v10  ;;  %vm2556_vm9 = vweird.f32 %v7912_v6  ;;  %vm2537_vm11 = vmor %vm2535_vm10, %vm2536_vm7 }
 0x5ee   :  { %v2548_v48 = vsel %vm2547_vm4, %v7906_v17, %v2544_v35  ;;  %v2531_v55 = vmul.f32 %v7910_v61, %v2530_v49  ;;  %v2503_v16 = vadd.f32 1e-12, %v2491_v23  ;;  %vm2557_vm13 = vmor %vm2555_vm12, %vm2556_vm9  ;;  %vm2565_vm15 = vweird.f32 %v2502_v10 }
 0x5ef   :  { %v2632_v40 = vmul.f32 %v2548_v48, %v9858_v34  ;;  %v2528_v53 = vsel %vm2527_vm6, %v7908_v7, %v2524_v5  ;;  %v2551_v56 = vmul.f32 %v7912_v6, %v2550_v14 }
 0x5f0   :  { %v2630_v19 = vmul.f32 %v2528_v53, %v9864_v13  ;;  %v2532_v36 = vmul.f32 0.5, %v2531_v55  ;;  %7915 = vrsqrt.f32 %v2503_v16  ;;  %vm2575_vm2 = vweird.f32 %v2503_v16 }
 0x5f1   :  { %v2647_v21 = vmul.f32 %v9953_v54, %v2632_v40  ;;  %v2552_v12 = vmul.f32 0.5, %v2551_v56 }
 0x5f2   :  { %v2645_v51 = vmul.f32 %v9953_v54, %v2630_v19  ;;  %v2533_v44 = vsub.f32 1.5, %v2532_v36 }
 0x5f3   :  { %v7914_v11 = vpop.eup %7913  ;;  %v9976_v20 = vadd.f32 %v9960_v57, %v2647_v21  ;;  %v2553_v26 = vsub.f32 1.5, %v2552_v12  ;;  %v2472_v34 = vpop.xlane.xlu0 %2471 }
 0x5f4   :  { %v9979_v37 = vadd.f32 %v9960_v57, %v2645_v51  ;;  %v2534_v13 = vmul.f32 %v7910_v61, %v2533_v44  ;;  %v2560_v9 = vmul.f32 %v7914_v11, %v2502_v10  ;;  %v2492_v7 = vmul.f32 %v2472_v34, %v9837_v1 }
 0x5f5   :  { %12034 = vst [vmem:[#allocation27_spill] sm:$0xff] %v9976_v20  ;;  %v2554_v17 = vmul.f32 %v7912_v6, %v2553_v26  ;;  %vm2566_vm14 = vweird.f32 %v7914_v11 }
 0x5f6   :  { %12035 = vst [vmem:[#allocation28_spill] sm:$0xff] %v9979_v37  ;;  %v7916_v24 = vpop.eup %7915  ;;  %v2538_v31 = vsel %vm2537_vm11, %v7910_v61, %v2534_v13  ;;  %v2561_v43 = vmul.f32 %v7914_v11, %v2560_v9  ;;  %v2504_v3 = vadd.f32 1e-12, %v2492_v7  ;;  %vm2567_vm0 = vmor %vm2565_vm15, %vm2566_vm14 }
 0x5f7   :  { %v2631_v58 = vmul.f32 %v2538_v31, %v9877_v39  ;;  %v2558_v47 = vsel %vm2557_vm13, %v7912_v6, %v2554_v17  ;;  %v2570_v62 = vmul.f32 %v7916_v24, %v2503_v16  ;;  %vm2576_vm1 = vweird.f32 %v7916_v24 }
 0x5f8   :  { %v2633_v41 = vmul.f32 %v2558_v47, %v9883_v18  ;;  %v2562_v25 = vmul.f32 0.5, %v2561_v43  ;;  %7917 = vrsqrt.f32 %v2504_v3  ;;  %vm2577_vm4 = vmor %vm2575_vm2, %vm2576_vm1  ;;  %vm2585_vm6 = vweird.f32 %v2504_v3 }
 0x5f9   :  { %v2646_v38 = vmul.f32 %v9953_v54, %v2631_v58  ;;  %v2571_v32 = vmul.f32 %v7916_v24, %v2570_v62 }
 0x5fa   :  { %v2648_v8 = vmul.f32 %v9953_v54, %v2633_v41  ;;  %v2563_v52 = vsub.f32 1.5, %v2562_v25 }
 0x5fb   :  { %v9989_v0 = vadd.f32 %v9960_v57, %v2646_v38  ;;  %v2572_v45 = vmul.f32 0.5, %v2571_v32 }
 0x5fc   :  { %v9992_v39 = vadd.f32 %v9960_v57, %v2648_v8  ;;  %v2564_v61 = vmul.f32 %v7914_v11, %v2563_v52 }
 0x5fd   :  { %12036 = vst [vmem:[#allocation29_spill] sm:$0xff] %v9989_v0  ;;  %v2573_v18 = vsub.f32 1.5, %v2572_v45 }
 0x5fe   :  { %12037 = vst [vmem:[#allocation30_spill] sm:$0xff] %v9992_v39  ;;  %v2568_v4 = vsel %vm2567_vm0, %v7914_v11, %v2564_v61  ;;  %v7918_v35 = vpop.eup %7917 }
 0x5ff   :  { %v2634_v63 = vmul.f32 %v2568_v4, %v9892_v15  ;;  %v2574_v6 = vmul.f32 %v7916_v24, %v2573_v18  ;;  %v2580_v5 = vmul.f32 %v7918_v35, %v2504_v3  ;;  %vm2586_vm5 = vweird.f32 %v7918_v35 }
 0x600   :  { %vm2587_vm7 = vmor %vm2585_vm6, %vm2586_vm5 }
 0x601   :  { %v2649_v49 = vmul.f32 %v9953_v54, %v2634_v63  ;;  %v2578_v23 = vsel %vm2577_vm4, %v7916_v24, %v2574_v6  ;;  %v2581_v10 = vmul.f32 %v7918_v35, %v2580_v5 }
 0x602   :  { %v2635_v14 = vmul.f32 %v2578_v23, %v9900_v46 }
 0x603   :  { %v9998_v48 = vadd.f32 %v9960_v57, %v2649_v49  ;;  %v2582_v40 = vmul.f32 0.5, %v2581_v10 }
 0x604   :  { %v2650_v55 = vmul.f32 %v9953_v54, %v2635_v14 }
 0x605   :  { %12038 = vst [vmem:[#allocation31_spill] sm:$0xff] %v9998_v48  ;;  %v2583_v15 = vsub.f32 1.5, %v2582_v40 }
 0x606   :  { %v10002_v53 = vadd.f32 %v9960_v57, %v2650_v55 }
 0x607   :  { %v2584_v16 = vmul.f32 %v7918_v35, %v2583_v15 }
 0x608   :  { %12039 = vst [vmem:[#allocation32_spill] sm:$0xff] %v10002_v53 }
 0x609   :  { %v2588_v56 = vsel %vm2587_vm7, %v7918_v35, %v2584_v16 }
 0x60a   :  { %v2636_v19 = vmul.f32 %v2588_v56, %v9908_v2 }
 0x60c   :  { %v2651_v46 = vmul.f32 %v9953_v54, %v2636_v19 }
 0x60e   :  { %v10007_v36 = vadd.f32 %v9960_v57, %v2651_v46 }
 0x610   :  { %12040 = vst [vmem:[#allocation33_spill] sm:$0xff] %v10007_v36 }
 0x63b   :  { %v2475_v21 = vpop.xlane.xlu1 %2474 }
 0x63c   :  { %v2493_v12 = vmul.f32 %v2475_v21, %v9837_v1 }
 0x63e   :  { %v2505_v51 = vadd.f32 1e-12, %v2493_v12 }
 0x640   :  { %7919 = vrsqrt.f32 %v2505_v51  ;;  %vm2595_vm10 = vweird.f32 %v2505_v51 }
 0x643   :  { %v2478_v44 = vpop.xlane.xlu2 %2477 }
 0x644   :  { %v2494_v11 = vmul.f32 %v2478_v44, %v9837_v1 }
 0x646   :  { %v7920_v26 = vpop.eup %7919  ;;  %v2506_v34 = vadd.f32 1e-12, %v2494_v11 }
 0x647   :  { %v2590_v13 = vmul.f32 %v7920_v26, %v2505_v51  ;;  %vm2596_vm9 = vweird.f32 %v7920_v26 }
 0x648   :  { %7921 = vrsqrt.f32 %v2506_v34  ;;  %vm2597_vm11 = vmor %vm2595_vm10, %vm2596_vm9  ;;  %vm2605_vm13 = vweird.f32 %v2506_v34 }
 0x649   :  { %v2591_v9 = vmul.f32 %v7920_v26, %v2590_v13 }
 0x64b   :  { %v2592_v17 = vmul.f32 0.5, %v2591_v9  ;;  %v2481_v2 = vpop.xlane.xlu0 %2480 }
 0x64c   :  { %v2495_v7 = vmul.f32 %v2481_v2, %v9837_v1 }
 0x64d   :  { %v2593_v24 = vsub.f32 1.5, %v2592_v17 }
 0x64e   :  { %v7922_v31 = vpop.eup %7921  ;;  %v2507_v43 = vadd.f32 1e-12, %v2495_v7 }
 0x64f   :  { %v2594_v58 = vmul.f32 %v7920_v26, %v2593_v24  ;;  %v2600_v47 = vmul.f32 %v7922_v31, %v2506_v34  ;;  %vm2606_vm12 = vweird.f32 %v7922_v31 }
 0x650   :  { %7923 = vrsqrt.f32 %v2507_v43  ;;  %vm2607_vm14 = vmor %vm2605_vm13, %vm2606_vm12  ;;  %vm2615_vm0 = vweird.f32 %v2507_v43 }
 0x651   :  { %v2598_v62 = vsel %vm2597_vm11, %v7920_v26, %v2594_v58  ;;  %v2601_v41 = vmul.f32 %v7922_v31, %v2600_v47 }
 0x652   :  { %v2637_v25 = vmul.f32 %v2598_v62, %v9915_v59 }
 0x653   :  { %v2602_v3 = vmul.f32 0.5, %v2601_v41  ;;  %v2484_v38 = vpop.xlane.xlu1 %2483 }
 0x654   :  { %v2652_v32 = vmul.f32 %v9953_v54, %v2637_v25  ;;  %v2496_v8 = vmul.f32 %v2484_v38, %v9837_v1 }
 0x655   :  { %v2603_v52 = vsub.f32 1.5, %v2602_v3 }
 0x656   :  { %v7924_v45 = vpop.eup %7923  ;;  %v10016_v61 = vadd.f32 %v9960_v57, %v2652_v32  ;;  %v2508_v18 = vadd.f32 1e-12, %v2496_v8 }
 0x657   :  { %v2604_v4 = vmul.f32 %v7922_v31, %v2603_v52  ;;  %v2610_v63 = vmul.f32 %v7924_v45, %v2507_v43  ;;  %vm2616_vm15 = vweird.f32 %v7924_v45 }
 0x658   :  { %12041 = vst [vmem:[#allocation34_spill] sm:$0xff] %v10016_v61  ;;  %7925 = vrsqrt.f32 %v2508_v18  ;;  %vm2617_vm1 = vmor %vm2615_vm0, %vm2616_vm15  ;;  %vm2625_vm4 = vweird.f32 %v2508_v18 }
 0x659   :  { %v2608_v6 = vsel %vm2607_vm14, %v7922_v31, %v2604_v4  ;;  %v2611_v59 = vmul.f32 %v7924_v45, %v2610_v63 }
 0x65a   :  { %v2638_v35 = vmul.f32 %v2608_v6, %v9922_v28 }
 0x65b   :  { %v2612_v49 = vmul.f32 0.5, %v2611_v59 }
 0x65c   :  { %v2653_v23 = vmul.f32 %v9953_v54, %v2638_v35 }
 0x65d   :  { %v2613_v5 = vsub.f32 1.5, %v2612_v49 }
 0x65e   :  { %v7926_v14 = vpop.eup %7925  ;;  %v10021_v10 = vadd.f32 %v9960_v57, %v2653_v23 }
 0x65f   :  { %v2614_v55 = vmul.f32 %v7924_v45, %v2613_v5  ;;  %v2620_v40 = vmul.f32 %v7926_v14, %v2508_v18  ;;  %vm2626_vm2 = vweird.f32 %v7926_v14 }
 0x660   :  { %12042 = vst [vmem:[#allocation35_spill] sm:$0xff] %v10021_v10  ;;  %vm2627_vm5 = vmor %vm2625_vm4, %vm2626_vm2 }
 0x661   :  { %v2618_v15 = vsel %vm2617_vm1, %v7924_v45, %v2614_v55  ;;  %v2621_v16 = vmul.f32 %v7926_v14, %v2620_v40 }
 0x662   :  { %v2639_v56 = vmul.f32 %v2618_v15, %v9930_v22 }
 0x663   :  { %v2622_v19 = vmul.f32 0.5, %v2621_v16 }
 0x664   :  { %v2654_v28 = vmul.f32 %v9953_v54, %v2639_v56 }
 0x665   :  { %v2623_v46 = vsub.f32 1.5, %v2622_v19 }
 0x666   :  { %v10026_v21 = vadd.f32 %v9960_v57, %v2654_v28 }
 0x667   :  { %v2624_v12 = vmul.f32 %v7926_v14, %v2623_v46 }
 0x668   :  { %12043 = vst [vmem:[#allocation36_spill] sm:$0xff] %v10026_v21 }
 0x669   :  { %v2628_v51 = vsel %vm2627_vm5, %v7926_v14, %v2624_v12 }
 0x66a   :  { %v2640_v44 = vmul.f32 %v2628_v51, %v9939_v50 }
 0x66c   :  { %v2655_v11 = vmul.f32 %v9953_v54, %v2640_v44 }
 0x66e   :  { %v10031_v26 = vadd.f32 %v9960_v57, %v2655_v11 }
 0x670   :  { %12044 = vst [vmem:[#allocation37_spill] sm:$0xff] %v10031_v26 }
 0x671   :  { %8296 = dma.done.wait [#allocation6], 6656 }
 0x672   :  { %8297 = vsyncadd [#allocation6], 4294960640 }
 0x673   :  { %8298 = dma.done.wait [#allocation6 + $0x1], 8192 }
 0x674   :  { %8299 = vsyncadd [#allocation6 + $0x1], 4294959104  ;;  %v2733_v22 = vld [vmem:[#allocation2 + $0x180] sm:$0x33]  ;;  %v2734_v35 = vld [vmem:[#allocation2 + $0x188] sm:$0x33] }
 0x675   :  { %v2903_v34 = vunpack.c.l.b16 %v2733_v22  ;;  %v2904_v13 = vunpack.c.h.b16 %v2733_v22  ;;  %v6991_v9 = vld [vmem:[#allocation2 + $0x140] sm:$0xf]  ;;  %v7665_v24 = vld [vmem:[#allocation2 + $0x144] sm:$0xf]  ;;  %v2905_v15 = vunpack.c.l.b16 %v2734_v35  ;;  %v2906_v16 = vunpack.c.h.b16 %v2734_v35 }
 0x676   :  { %v7669_v7 = vld [vmem:[#allocation2 + $0x15c] sm:$0xf0]  ;;  %v6993_v31 = vld [vmem:[#allocation2 + $0x160] sm:$0xf0] }
 0x677   :  { %v2959_v17 = vpack.c.b16 %v2903_v34, %v2903_v34  ;;  %v2960_v2 = vpack.c.b16 %v2904_v13, %v2904_v13  ;;  %v6992_v57 = vor.u32 %v7669_v7, %v6991_v9  ;;  %v6996_v43 = vor.u32 %v7665_v24, %v6993_v31  ;;  %v6959_v58 = vld [vmem:[#allocation2 + $0x100] sm:$0xf]  ;;  %v7657_v62 = vld [vmem:[#allocation2 + $0x104] sm:$0xf]  ;;  %v6999_v13 = vld [vmem:[#allocation2 + $0x148] sm:$0xf] }
 0x678   :  { %v7661_v47 = vld [vmem:[#allocation2 + $0x11c] sm:$0xf0]  ;;  %v6961_v41 = vld [vmem:[#allocation2 + $0x120] sm:$0xf0]  ;;  %v2961_v44 = vpack.c.b16 %v2905_v15, %v2905_v15  ;;  %v2962_v11 = vpack.c.b16 %v2906_v16, %v2906_v16  ;;  %v7670_v9 = vld [vmem:[#allocation2 + $0x164] sm:$0xf0]  ;;  %v10039_v31 = vpack.c.bf16 %v9979_v37, %v9966_v60 }
 0x679   :  { %v3034_v50 = vsel %vm1146_vm8, %v2959_v17, 0  ;;  %v3037_v54 = vsel %vm1146_vm8, %v2960_v2, 0  ;;  %v6927_v25 = vld [vmem:[#allocation2 + $0xc0] sm:$0xf]  ;;  %v6960_v3 = vor.u32 %v7661_v47, %v6959_v58  ;;  %v6964_v38 = vor.u32 %v7657_v62, %v6961_v41  ;;  %v7649_v8 = vld [vmem:[#allocation2 + $0xc4] sm:$0xf] }
 0x67a   :  { %3058 = vmatpush.bf16.msrb.mxu0 %v3034_v50  ;;  %3097 = vmatpush.bf16.msrb.mxu3 %v3037_v54  ;;  %v7653_v32 = vld [vmem:[#allocation2 + $0xdc] sm:$0xf0]  ;;  %v6929_v52 = vld [vmem:[#allocation2 + $0xe0] sm:$0xf0]  ;;  %v3040_v17 = vsel %vm1146_vm8, %v2961_v44, 0  ;;  %v3043_v2 = vsel %vm1146_vm8, %v2962_v11, 0  ;;  %v7000_v50 = vor.u32 %v7670_v9, %v6999_v13  ;;  %v10059_v9 = vpack.c.bf16 %v9998_v48, %v9992_v39 }
 0x67b   :  { %v6928_v45 = vor.u32 %v7653_v32, %v6927_v25  ;;  %v6932_v18 = vor.u32 %v7649_v8, %v6929_v52  ;;  %v6895_v4 = vld [vmem:[#allocation2 + $0x80] sm:$0xf]  ;;  %v7641_v6 = vld [vmem:[#allocation2 + $0x84] sm:$0xf]  ;;  %v7666_v7 = vld [vmem:[#allocation2 + $0x14c] sm:$0xf] }
 0x67c   :  { %v7645_v63 = vld [vmem:[#allocation2 + $0x9c] sm:$0xf0]  ;;  %v6897_v59 = vld [vmem:[#allocation2 + $0xa0] sm:$0xf0]  ;;  %v7001_v24 = vld [vmem:[#allocation2 + $0x168] sm:$0xf0] }
 0x67d   :  { %v6896_v49 = vor.u32 %v7645_v63, %v6895_v4  ;;  %v6900_v23 = vor.u32 %v7641_v6, %v6897_v59  ;;  %v6863_v5 = vld [vmem:[#allocation2 + $0x40] sm:$0xf]  ;;  %v7633_v55 = vld [vmem:[#allocation2 + $0x44] sm:$0xf]  ;;  %v7004_v54 = vor.u32 %v7666_v7, %v7001_v24  ;;  %v7658_v58 = vld [vmem:[#allocation2 + $0x10c] sm:$0xf] }
 0x67e   :  { %3059 = vmatpush.bf16.msrb.mxu0 %v6992_v57  ;;  %3098 = vmatpush.bf16.msrb.mxu3 %v6996_v43  ;;  %v7637_v14 = vld [vmem:[#allocation2 + $0x5c] sm:$0xf0]  ;;  %v6865_v40 = vld [vmem:[#allocation2 + $0x60] sm:$0xf0]  ;;  %v6967_v57 = vld [vmem:[#allocation2 + $0x108] sm:$0xf] }
 0x67f   :  { %v6864_v56 = vor.u32 %v7637_v14, %v6863_v5  ;;  %v6868_v19 = vor.u32 %v7633_v55, %v6865_v40  ;;  %v6831_v28 = vld [vmem:[#allocation2] sm:$0xf]  ;;  %v7625_v12 = vld [vmem:[#allocation2 + $0x4] sm:$0xf]  ;;  %v7662_v43 = vld [vmem:[#allocation2 + $0x124] sm:$0xf0] }
 0x680   :  { %v7629_v46 = vld [vmem:[#allocation2 + $0x1c] sm:$0xf0]  ;;  %v6833_v51 = vld [vmem:[#allocation2 + $0x20] sm:$0xf0]  ;;  %v6969_v47 = vld [vmem:[#allocation2 + $0x128] sm:$0xf0]  ;;  %v6968_v41 = vor.u32 %v7662_v43, %v6967_v57 }
 0x681   :  { %v6832_v22 = vor.u32 %v7629_v46, %v6831_v28  ;;  %v6836_v34 = vor.u32 %v7625_v12, %v6833_v51  ;;  %v10045_v62 = vld [vmem:[#allocation2 + $0x190] sm:$0x33]  ;;  %v6972_v25 = vor.u32 %v7658_v58, %v6969_v47  ;;  %v7654_v32 = vld [vmem:[#allocation2 + $0xe4] sm:$0xf0]  ;;  %v7650_v8 = vld [vmem:[#allocation2 + $0xcc] sm:$0xf]  ;;  %v10069_v47 = vpack.c.bf16 %v10007_v36, %v10002_v53 }
 0x682   :  { %3060 = vmatpush.bf16.msrb.mxu0 %v6960_v3  ;;  %3099 = vmatpush.bf16.msrb.mxu3 %v6964_v38  ;;  %v6935_v3 = vld [vmem:[#allocation2 + $0xc8] sm:$0xf]  ;;  %v2908_v38 = vunpack.c.h.b16 %v10045_v62  ;;  %v6937_v52 = vld [vmem:[#allocation2 + $0xe8] sm:$0xf0]  ;;  %v7009_v4 = vld [vmem:[#allocation2 + $0x170] sm:$0xf0] }
 0x683   :  { %v6936_v63 = vor.u32 %v7654_v32, %v6935_v3  ;;  %v6940_v6 = vor.u32 %v7650_v8, %v6937_v52  ;;  %v6977_v5 = vld [vmem:[#allocation2 + $0x130] sm:$0xf0]  ;;  %v6903_v15 = vld [vmem:[#allocation2 + $0x88] sm:$0xf]  ;;  %v6873_v43 = vld [vmem:[#allocation2 + $0x68] sm:$0xf0]  ;;  %v2907_v52 = vunpack.c.l.b16 %v10045_v62 }
 0x684   :  { %v7651_v55 = vld [vmem:[#allocation2 + $0xd4] sm:$0xf]  ;;  %v7646_v16 = vld [vmem:[#allocation2 + $0xa4] sm:$0xf0]  ;;  %v7626_v3 = vld [vmem:[#allocation2 + $0xc] sm:$0xf] }
 0x685   :  { %v6945_v40 = vld [vmem:[#allocation2 + $0xf0] sm:$0xf0]  ;;  %v6904_v46 = vor.u32 %v7646_v16, %v6903_v15  ;;  %v6871_v24 = vld [vmem:[#allocation2 + $0x48] sm:$0xf]  ;;  %v6841_v32 = vld [vmem:[#allocation2 + $0x28] sm:$0xf0]  ;;  %v10092_v15 = vpack.c.bf16 %v10031_v26, %v10026_v21 }
 0x686   :  { %3061 = vmatpush.bf16.msrb.mxu0 %v6928_v45  ;;  %3100 = vmatpush.bf16.msrb.mxu3 %v6932_v18  ;;  %v2964_v45 = vpack.c.b16 %v2908_v38, %v2908_v38  ;;  %v7667_v18 = vld [vmem:[#allocation2 + $0x154] sm:$0xf]  ;;  %v6948_v28 = vor.u32 %v7651_v55, %v6945_v40  ;;  %v6844_v8 = vor.u32 %v7626_v3, %v6841_v32  ;;  %v6975_v16 = vld [vmem:[#allocation2 + $0x110] sm:$0xf]  ;;  %v7648_v3 = vld [vmem:[#allocation2 + $0xb4] sm:$0xf0] }
 0x687   :  { %v7012_v35 = vor.u32 %v7667_v18, %v7009_v4  ;;  %v7643_v51 = vld [vmem:[#allocation2 + $0x94] sm:$0xf]  ;;  %v10080_v18 = vpack.c.bf16 %v10021_v10, %v10016_v61  ;;  %v7655_v32 = vld [vmem:[#allocation2 + $0xec] sm:$0xf0]  ;;  %v7727_v21 = vld [vmem:[#allocation3 + $0x68] sm:$0xff] }
 0x688   :  { %v3049_v59 = vsel %vm1146_vm8, %v2964_v45, 0  ;;  %v6913_v44 = vld [vmem:[#allocation2 + $0xb0] sm:$0xf0]  ;;  %v2963_v45 = vpack.c.b16 %v2907_v52, %v2907_v52  ;;  %v7715_v60 = vld [vmem:[#allocation3 + $0xe8] sm:$0xff] }
 0x689   :  { %3253 = vmatpush.bf16.msrb.mxu1 %v3049_v59  ;;  %v6916_v11 = vor.u32 %v7643_v51, %v6913_v44 }
 0x68a   :  { %3062 = vmatpush.bf16.msrb.mxu0 %v6896_v49  ;;  %3101 = vmatpush.bf16.msrb.mxu3 %v6900_v23  ;;  %v10051_v49 = vpack.c.bf16 %v9976_v20, %v9989_v0  ;;  %v7659_v23 = vld [vmem:[#allocation2 + $0x114] sm:$0xf]  ;;  %v3046_v4 = vsel %vm1146_vm8, %v2963_v45, 0 }
 0x68b   :  { %v6980_v14 = vor.u32 %v7659_v23, %v6977_v5  ;;  %v7668_v5 = vld [vmem:[#allocation2 + $0x15c] sm:$0xf] }
 0x68d   :  { %3254 = vmatpush.bf16.msrb.mxu1 %v7012_v35  ;;  %v7671_v35 = vld [vmem:[#allocation2 + $0x16c] sm:$0xf0] }
 0x68e   :  { %3063 = vmatpush.bf16.msrb.mxu0 %v6864_v56  ;;  %3102 = vmatpush.bf16.msrb.mxu3 %v6868_v19  ;;  %v7642_v56 = vld [vmem:[#allocation2 + $0x8c] sm:$0xf] }
 0x68f   :  { %v6905_v19 = vld [vmem:[#allocation2 + $0xa8] sm:$0xf0] }
 0x690   :  { %v6908_v12 = vor.u32 %v7642_v56, %v6905_v19  ;;  %v7663_v56 = vld [vmem:[#allocation2 + $0x12c] sm:$0xf0]  ;;  %v7660_v19 = vld [vmem:[#allocation2 + $0x11c] sm:$0xf] }
 0x691   :  { %3255 = vmatpush.bf16.msrb.mxu1 %v6980_v14  ;;  %v7017_v14 = vld [vmem:[#allocation2 + $0x178] sm:$0xf0] }
 0x692   :  { %3064 = vmatpush.bf16.msrb.mxu0 %v6832_v22  ;;  %3103 = vmatpush.bf16.msrb.mxu3 %v6836_v34  ;;  %v7635_v22 = vld [vmem:[#allocation2 + $0x54] sm:$0xf]  ;;  %v7020_v40 = vor.u32 %v7668_v5, %v7017_v14  ;;  %v7683_v5 = vld [vmem:[#allocation3 + $0x118] sm:$0xff] }
 0x693   :  { %v6881_v34 = vld [vmem:[#allocation2 + $0x70] sm:$0xf0] }
 0x694   :  { %v6884_v13 = vor.u32 %v7635_v22, %v6881_v34  ;;  %v7688_v22 = vld [vmem:[#allocation3 + $0x60] sm:$0xff]  ;;  %v7015_v34 = vld [vmem:[#allocation2 + $0x158] sm:$0xf] }
 0x695   :  { %7021 = vmatmul.msk.bf16.vlgmr.msrb.gmra.mxu0 %vm1127_vm3, %v10039_v31  ;;  %7027 = vmatmul.msk.bf16.vlgmr.msrb.gmra.mxu3 %vm1127_vm3, %v10039_v31 }
 0x696   :  { %3136 = vmatpush.bf16.msra.mxu0 %v3040_v17  ;;  %3175 = vmatpush.bf16.msra.mxu3 %v3043_v2  ;;  %v7627_v17 = vld [vmem:[#allocation2 + $0x14] sm:$0xf] }
 0x697   :  { %3256 = vmatpush.bf16.msrb.mxu1 %v6948_v28  ;;  %v6849_v2 = vld [vmem:[#allocation2 + $0x30] sm:$0xf0]  ;;  %v6976_v28 = vor.u32 %v7663_v56, %v6975_v16  ;;  %v6911_v16 = vld [vmem:[#allocation2 + $0x90] sm:$0xf] }
 0x698   :  { %v6852_v7 = vor.u32 %v7627_v17, %v6849_v2  ;;  %v7687_v2 = vld [vmem:[#allocation3 + $0x108] sm:$0xff]  ;;  %v7647_v56 = vld [vmem:[#allocation2 + $0xac] sm:$0xf0] }
 0x69a   :  { %3137 = vmatpush.bf16.msra.mxu0 %v7000_v50  ;;  %3176 = vmatpush.bf16.msra.mxu3 %v7004_v54  ;;  %v7638_v50 = vld [vmem:[#allocation2 + $0x64] sm:$0xf0]  ;;  %v7634_v54 = vld [vmem:[#allocation2 + $0x4c] sm:$0xf] }
 0x69b   :  { %3257 = vmatpush.bf16.msrb.mxu1 %v6916_v11  ;;  %v6872_v57 = vor.u32 %v7638_v50, %v6871_v24  ;;  %v6876_v58 = vor.u32 %v7634_v54, %v6873_v43  ;;  %v7664_v24 = vld [vmem:[#allocation2 + $0x134] sm:$0xf0]  ;;  %v7686_v54 = vld [vmem:[#allocation3 + $0x150] sm:$0xff] }
 0x69c   :  { %v7656_v43 = vld [vmem:[#allocation2 + $0xf4] sm:$0xf0] }
 0x69e   :  { %3138 = vmatpush.bf16.msra.mxu0 %v6968_v41  ;;  %3177 = vmatpush.bf16.msra.mxu3 %v6972_v25  ;;  %v6839_v41 = vld [vmem:[#allocation2 + $0x8] sm:$0xf] }
 0x69f   :  { %3258 = vmatpush.bf16.msrb.mxu1 %v6884_v13  ;;  %v7630_v25 = vld [vmem:[#allocation2 + $0x24] sm:$0xf0]  ;;  %v7672_v13 = vld [vmem:[#allocation2 + $0x174] sm:$0xf0] }
 0x6a0   :  { %v6840_v38 = vor.u32 %v7630_v25, %v6839_v41  ;;  %v7016_v17 = vor.u32 %v7672_v13, %v7015_v34  ;;  %v7685_v41 = vld [vmem:[#allocation3 + $0x120] sm:$0xff]  ;;  %v6919_v25 = vld [vmem:[#allocation2 + $0x98] sm:$0xf] }
 0x6a1   :  { %v6920_v52 = vor.u32 %v7648_v3, %v6919_v25 }
 0x6a2   :  { %3139 = vmatpush.bf16.msra.mxu0 %v6936_v63  ;;  %3178 = vmatpush.bf16.msra.mxu3 %v6940_v6  ;;  %v2736_v63 = vld [vmem:[#allocation2 + $0x198] sm:$0x33]  ;;  %v7007_v6 = vld [vmem:[#allocation2 + $0x150] sm:$0xf] }
 0x6a3   :  { %3259 = vmatpush.bf16.msrb.mxu1 %v6852_v7  ;;  %v2910_v59 = vunpack.c.h.b16 %v2736_v63  ;;  %v7008_v23 = vor.u32 %v7671_v35, %v7007_v6  ;;  %v2909_v51 = vunpack.c.l.b16 %v2736_v63  ;;  %v6983_v7 = vld [vmem:[#allocation2 + $0x118] sm:$0xf] }
 0x6a4   :  { %v6984_v50 = vor.u32 %v7664_v24, %v6983_v7  ;;  %v7684_v6 = vld [vmem:[#allocation3 + $0x98] sm:$0xff] }
 0x6a5   :  { %7022 = vmatmul.msk.bf16.gmra.mxu0 %vm1127_vm3, %v10051_v49  ;;  %7028 = vmatmul.msk.bf16.gmra.mxu3 %vm1127_vm3, %v10051_v49  ;;  %v2966_v62 = vpack.c.b16 %v2910_v59, %v2910_v59  ;;  %v2965_v44 = vpack.c.b16 %v2909_v51, %v2909_v51  ;;  %v6887_v59 = vld [vmem:[#allocation2 + $0x58] sm:$0xf] }
 0x6a6   :  { %3140 = vmatpush.bf16.msra.mxu0 %v6904_v46  ;;  %3179 = vmatpush.bf16.msra.mxu3 %v6908_v12  ;;  %v6985_v46 = vld [vmem:[#allocation2 + $0x138] sm:$0xf0]  ;;  %v7640_v35 = vld [vmem:[#allocation2 + $0x74] sm:$0xf0] }
 0x6a7   :  { %7051 = vmatmul.msk.bf16.vlgmr.msrb.gmra.mxu1 %vm1127_vm3, %v10039_v31  ;;  %v3055_v55 = vsel %vm1146_vm8, %v2966_v62, 0  ;;  %v6988_v12 = vor.u32 %v7660_v19, %v6985_v46  ;;  %v3052_v11 = vsel %vm1146_vm8, %v2965_v44, 0  ;;  %v6888_v62 = vor.u32 %v7640_v35, %v6887_v59  ;;  %v7644_v19 = vld [vmem:[#allocation2 + $0x9c] sm:$0xf]  ;;  %v7682_v44 = vld [vmem:[#allocation3 + $0x110] sm:$0xff] }
 0x6a8   :  { %3292 = vmatpush.bf16.msrb.mxu2 %v3052_v11  ;;  %4836 = vmatpush.bf16.msra.mxu1 %v7688_v22  ;;  %v6912_v46 = vor.u32 %v7647_v56, %v6911_v16 }
 0x6aa   :  { %3141 = vmatpush.bf16.msra.mxu0 %v6872_v57  ;;  %3180 = vmatpush.bf16.msra.mxu3 %v6876_v58  ;;  %v6951_v57 = vld [vmem:[#allocation2 + $0xd8] sm:$0xf] }
 0x6ab   :  { %v6952_v58 = vor.u32 %v7656_v43, %v6951_v57 }
 0x6ac   :  { %3293 = vmatpush.bf16.msrb.mxu2 %v7016_v17  ;;  %4837 = vmatpush.bf16.msra.mxu1 %v7687_v2  ;;  %v7681_v17 = vld [vmem:[#allocation3 + $0x180] sm:$0xff] }
 0x6ae   :  { %3142 = vmatpush.bf16.msra.mxu0 %v6840_v38  ;;  %3181 = vmatpush.bf16.msra.mxu3 %v6844_v8  ;;  %v6943_v38 = vld [vmem:[#allocation2 + $0xd0] sm:$0xf]  ;;  %v7652_v8 = vld [vmem:[#allocation2 + $0xdc] sm:$0xf] }
 0x6af   :  { %v6944_v45 = vor.u32 %v7655_v32, %v6943_v38  ;;  %v6879_v32 = vld [vmem:[#allocation2 + $0x50] sm:$0xf] }
 0x6b0   :  { %3294 = vmatpush.bf16.msrb.mxu2 %v6984_v50  ;;  %4838 = vmatpush.bf16.msra.mxu1 %v7686_v54 }
 0x6b2   :  { %3214 = vmatpush.bf16.msrb.mxu0 %v3046_v4  ;;  %3331 = vmatpush.bf16.msrb.mxu3 %v3055_v55  ;;  %v6953_v4 = vld [vmem:[#allocation2 + $0xf8] sm:$0xf0]  ;;  %v6855_v55 = vld [vmem:[#allocation2 + $0x18] sm:$0xf] }
 0x6b3   :  { %v6956_v63 = vor.u32 %v7652_v8, %v6953_v4  ;;  %v7639_v8 = vld [vmem:[#allocation2 + $0x6c] sm:$0xf0] }
 0x6b4   :  { %3295 = vmatpush.bf16.msrb.mxu2 %v6952_v58  ;;  %4839 = vmatpush.bf16.msra.mxu1 %v7685_v41 }
 0x6b5   :  { %7023 = vmatmul.msk.bf16.gmra.mxu0 %vm1127_vm3, %v10059_v9  ;;  %7029 = vmatmul.msk.bf16.gmra.mxu3 %vm1127_vm3, %v10059_v9 }
 0x6b6   :  { %3215 = vmatpush.bf16.msrb.mxu0 %v7008_v23  ;;  %3332 = vmatpush.bf16.msrb.mxu3 %v7020_v40  ;;  %v10114_v23 = vld [vmem:[%s11943_s17] sm:$0xff]  ;;  %v7632_v40 = vld [vmem:[#allocation2 + $0x34] sm:$0xf0] }
 0x6b7   :  { %7052 = vmatmul.msk.bf16.gmra.mxu1 %vm1127_vm3, %v10051_v49  ;;  %v10119_v14 = vperm.slane %v10114_v23, 0  ;;  %v10130_v13 = vperm.slane %v10114_v23, 1 }
 0x6b8   :  { %3296 = vmatpush.bf16.msrb.mxu2 %v6920_v52  ;;  %4840 = vmatpush.bf16.msra.mxu1 %v7684_v6  ;;  %v7636_v52 = vld [vmem:[#allocation2 + $0x5c] sm:$0xf] }
 0x6b9   :  { %v6889_v6 = vld [vmem:[#allocation2 + $0x78] sm:$0xf0] }
 0x6ba   :  { %3216 = vmatpush.bf16.msrb.mxu0 %v6976_v28  ;;  %3333 = vmatpush.bf16.msrb.mxu3 %v6988_v12  ;;  %v6856_v28 = vor.u32 %v7632_v40, %v6855_v55  ;;  %v6921_v12 = vld [vmem:[#allocation2 + $0xb8] sm:$0xf0] }
 0x6bb   :  { %v6924_v51 = vor.u32 %v7644_v19, %v6921_v12 }
 0x6bc   :  { %3297 = vmatpush.bf16.msrb.mxu2 %v6888_v62  ;;  %4841 = vmatpush.bf16.msra.mxu1 %v7683_v5  ;;  %v6892_v62 = vor.u32 %v7636_v52, %v6889_v6 }
 0x6be   :  { %3217 = vmatpush.bf16.msrb.mxu0 %v6944_v45  ;;  %3334 = vmatpush.bf16.msrb.mxu3 %v6956_v63  ;;  %v6880_v63 = vor.u32 %v7639_v8, %v6879_v32  ;;  %v7628_v32 = vld [vmem:[#allocation2 + $0x1c] sm:$0xf] }
 0x6bf   :  { %v6857_v8 = vld [vmem:[#allocation2 + $0x38] sm:$0xf0] }
 0x6c0   :  { %3298 = vmatpush.bf16.msrb.mxu2 %v6856_v28  ;;  %4842 = vmatpush.bf16.msra.mxu1 %v7682_v44 }
 0x6c2   :  { %3218 = vmatpush.bf16.msrb.mxu0 %v6912_v46  ;;  %3335 = vmatpush.bf16.msrb.mxu3 %v6924_v51 }
 0x6c3   :  { %7057 = vmatmul.msk.bf16.vlgmr.msrb.gmra.mxu2 %vm1127_vm3, %v10039_v31 }
 0x6c4   :  { %4843 = vmatpush.bf16.msra.mxu1 %v7681_v17 }
 0x6c5   :  { %7024 = vmatmul.msk.bf16.gmra.mxu0 %vm1127_vm3, %v10069_v47  ;;  %7030 = vmatmul.msk.bf16.gmra.mxu3 %vm1127_vm3, %v10069_v47 }
 0x6c6   :  { %3219 = vmatpush.bf16.msrb.mxu0 %v6880_v63  ;;  %3336 = vmatpush.bf16.msrb.mxu3 %v6892_v62 }
 0x6c7   :  { %7053 = vmatmul.msk.bf16.gmra.mxu1 %vm1127_vm3, %v10059_v9 }
 0x6d3   :  { %7058 = vmatmul.msk.bf16.gmra.mxu2 %vm1127_vm3, %v10051_v49 }
 0x6d5   :  { %7025 = vmatmul.msk.bf16.gmra.mxu0 %vm1127_vm3, %v10080_v18  ;;  %7031 = vmatmul.msk.bf16.gmra.mxu3 %vm1127_vm3, %v10080_v18 }
 0x6d7   :  { %7054 = vmatmul.msk.bf16.gmra.mxu1 %vm1127_vm3, %v10069_v47 }
 0x6e3   :  { %7059 = vmatmul.msk.bf16.gmra.mxu2 %vm1127_vm3, %v10059_v9 }
 0x6e5   :  { %7026 = vmatmul.msk.bf16.gmra.mxu0 %vm1127_vm3, %v10092_v15  ;;  %7032 = vmatmul.msk.bf16.gmra.mxu3 %vm1127_vm3, %v10092_v15 }
 0x6e7   :  { %7055 = vmatmul.msk.bf16.gmra.mxu1 %vm1127_vm3, %v10080_v18 }
 0x6f3   :  { %7060 = vmatmul.msk.bf16.gmra.mxu2 %vm1127_vm3, %v10069_v47 }
 0x6f5   :  { %7033 = vmatmul.msk.bf16.vlgmr.msra.gmra.mxu0 %vm1127_vm3, %v10039_v31  ;;  %7039 = vmatmul.msk.bf16.vlgmr.msra.gmra.mxu3 %vm1127_vm3, %v10039_v31 }
 0x6f7   :  { %7056 = vmatmul.msk.bf16.gmra.mxu1 %vm1127_vm3, %v10092_v15 }
 0x703   :  { %7061 = vmatmul.msk.bf16.gmra.mxu2 %vm1127_vm3, %v10080_v18 }
 0x705   :  { %7034 = vmatmul.msk.bf16.gmra.mxu0 %vm1127_vm3, %v10051_v49  ;;  %7040 = vmatmul.msk.bf16.gmra.mxu3 %vm1127_vm3, %v10051_v49 }
 0x712   :  { %v3066_v11 = vpop.f32.mrf.mxu0 }
 0x713   :  { %v10122_v22 = vadd.f32 %v3066_v11, %v10119_v14  ;;  %7062 = vmatmul.msk.bf16.gmra.mxu2 %vm1127_vm3, %v10092_v15 }
 0x715   :  { %v3465_v34 = vmul.f32 0.044715, %v10122_v22  ;;  %7035 = vmatmul.msk.bf16.gmra.mxu0 %vm1127_vm3, %v10059_v9  ;;  %7041 = vmatmul.msk.bf16.gmra.mxu3 %vm1127_vm3, %v10059_v9 }
 0x717   :  { %v3561_v2 = vmul.f32 %v3465_v34, %v10122_v22 }
 0x718   :  { %v3105_v7 = vpop.f32.mrf.mxu3 }
 0x719   :  { %v3657_v24 = vmul.f32 %v3561_v2, %v10122_v22  ;;  %v10137_v50 = vadd.f32 %v3105_v7, %v10130_v13 }
 0x71a   :  { %v3068_v54 = vpop.f32.mrf.mxu0 }
 0x71b   :  { %v3753_v57 = vadd.f32 %v3657_v24, %v10122_v22  ;;  %v3466_v43 = vmul.f32 0.044715, %v10137_v50  ;;  %v3069_v58 = vadd.f32 %v3068_v54, %v10119_v14 }
 0x71d   :  { %v3849_v41 = vmul.f32 0.7978846, %v3753_v57  ;;  %v3562_v25 = vmul.f32 %v3466_v43, %v10137_v50  ;;  %v3473_v3 = vmul.f32 0.044715, %v3069_v58  ;;  %v3377_v6 = vmul.f32 0.5, %v3069_v58 }
 0x71f   :  { %v3569_v38 = vmul.f32 %v3473_v3, %v3069_v58  ;;  %v3658_v45 = vmul.f32 %v3562_v25, %v10137_v50  ;;  %7930 = vtanh.f32 %v3849_v41  ;;  %v6847_v25 = vld [vmem:[#allocation2 + $0x10] sm:$0xf] }
 0x720   :  { %v3107_v4 = vpop.f32.mrf.mxu3 }
 0x721   :  { %v3665_v59 = vmul.f32 %v3569_v38, %v3069_v58  ;;  %v10145_v35 = vadd.f32 %v3107_v4, %v10130_v13  ;;  %v3754_v5 = vadd.f32 %v3658_v45, %v10137_v50  ;;  %v7631_v38 = vld [vmem:[#allocation2 + $0x2c] sm:$0xf0]  ;;  %v3369_v45 = vmul.f32 0.5, %v10122_v22 }
 0x722   :  { %v3071_v55 = vpop.f32.mrf.mxu0  ;;  %v6848_v63 = vor.u32 %v7631_v38, %v6847_v25 }
 0x723   :  { %v3761_v40 = vadd.f32 %v3665_v59, %v3069_v58  ;;  %v3474_v16 = vmul.f32 0.044715, %v10145_v35  ;;  %v10150_v56 = vadd.f32 %v3071_v55, %v10119_v14  ;;  %v3850_v12 = vmul.f32 0.7978846, %v3754_v5 }
 0x724   :  { %v6860_v59 = vor.u32 %v7628_v32, %v6857_v8  ;;  %3220 = vmatpush.bf16.msrb.mxu0 %v6848_v63  ;;  %v7680_v63 = vld [vmem:[#allocation3 + $0x48] sm:$0xff] }
 0x725   :  { %v3857_v19 = vmul.f32 0.7978846, %v3761_v40  ;;  %v3570_v28 = vmul.f32 %v3474_v16, %v10145_v35  ;;  %v3481_v46 = vmul.f32 0.044715, %v10150_v56  ;;  %7036 = vmatmul.msk.bf16.gmra.mxu0 %vm1127_vm3, %v10069_v47  ;;  %7042 = vmatmul.msk.bf16.gmra.mxu3 %vm1127_vm3, %v10069_v47  ;;  %v7931_v51 = vpop.eup %7930 }
 0x726   :  { %v4041_v24 = vadd.f32 1.0, %v7931_v51  ;;  %3337 = vmatpush.bf16.msrb.mxu3 %v6860_v59 }
 0x727   :  { %7932 = vtanh.f32 %v3857_v19  ;;  %v3577_v44 = vmul.f32 %v3481_v46, %v10150_v56  ;;  %v3666_v11 = vmul.f32 %v3570_v28, %v10145_v35 }
 0x728   :  { %v3110_v34 = vpop.f32.mrf.mxu3  ;;  %7934 = vtanh.f32 %v3850_v12  ;;  %v10177_v46 = vmul.f32 %v4041_v24, %v3369_v45  ;;  %4797 = vmatpush.bf16.msra.mxu0 %v7680_v63 }
 0x729   :  { %v10163_v17 = vadd.f32 %v3110_v34, %v10130_v13  ;;  %v3762_v2 = vadd.f32 %v3666_v11, %v10145_v35  ;;  %v3673_v7 = vmul.f32 %v3577_v44, %v10150_v56 }
 0x72a   :  { %v3073_v54 = vpop.f32.mrf.mxu0 }
 0x72b   :  { %v3482_v57 = vmul.f32 0.044715, %v10163_v17  ;;  %v10169_v43 = vadd.f32 %v3073_v54, %v10119_v14  ;;  %v3858_v41 = vmul.f32 0.7978846, %v3762_v2  ;;  %v3769_v3 = vadd.f32 %v3673_v7, %v10150_v56 }
 0x72d   :  { %v7933_v52 = vpop.eup %7932  ;;  %v3489_v4 = vmul.f32 0.044715, %v10169_v43  ;;  %7936 = vtanh.f32 %v3858_v41  ;;  %v3578_v62 = vmul.f32 %v3482_v57, %v10163_v17  ;;  %v3865_v16 = vmul.f32 0.7978846, %v3769_v3 }
 0x72e   :  { %v4049_v5 = vadd.f32 1.0, %v7933_v52  ;;  %v7935_v55 = vpop.eup %7934  ;;  %v3370_v57 = vmul.f32 0.5, %v10137_v50  ;;  %v3378_v41 = vmul.f32 0.5, %v10145_v35 }
 0x72f   :  { %v3585_v40 = vmul.f32 %v3489_v4, %v10169_v43  ;;  %v3674_v28 = vmul.f32 %v3578_v62, %v10163_v17  ;;  %v4042_v44 = vadd.f32 1.0, %v7935_v55  ;;  %7938 = vtanh.f32 %v3865_v16  ;;  %v7696_v4 = vld [vmem:[#allocation3 + $0x28] sm:$0xff] }
 0x730   :  { %v3112_v19 = vpop.f32.mrf.mxu3  ;;  %v10179_v22 = vmul.f32 %v4049_v5, %v3377_v6  ;;  %v7704_v6 = vld [vmem:[#allocation3 + $0x8] sm:$0xff]  ;;  %4875 = vmatpush.bf16.msra.mxu2 %v7696_v4 }
 0x731   :  { %v10182_v12 = vadd.f32 %v3112_v19, %v10130_v13  ;;  %v3681_v58 = vmul.f32 %v3585_v40, %v10169_v43  ;;  %v3770_v11 = vadd.f32 %v3674_v28, %v10163_v17  ;;  %v4138_v52 = vmul.f32 %v4042_v44, %v3370_v57  ;;  %4914 = vmatpush.bf16.msra.mxu3 %v7704_v6 }
 0x732   :  { %v3076_v51 = vpop.f32.mrf.mxu0  ;;  %v3385_v57 = vmul.f32 0.5, %v10150_v56  ;;  %v7679_v56 = vld [vmem:[#allocation3 + $0x130] sm:$0xff] }
 0x733   :  { %v7937_v2 = vpop.eup %7936  ;;  %v10189_v7 = vadd.f32 %v3076_v51, %v10119_v14  ;;  %v3490_v24 = vmul.f32 0.044715, %v10182_v12  ;;  %v3777_v54 = vadd.f32 %v3681_v58, %v10169_v43  ;;  %v3866_v32 = vmul.f32 0.7978846, %v3770_v11  ;;  %4798 = vmatpush.bf16.msra.mxu0 %v7679_v56 }
 0x734   :  { %v4050_v25 = vadd.f32 1.0, %v7937_v2 }
 0x735   :  { %v3497_v3 = vmul.f32 0.044715, %v10189_v7  ;;  %7037 = vmatmul.msk.bf16.gmra.mxu0 %vm1127_vm3, %v10080_v18  ;;  %7043 = vmatmul.msk.bf16.gmra.mxu3 %vm1127_vm3, %v10080_v18  ;;  %v3586_v38 = vmul.f32 %v3490_v24, %v10182_v12  ;;  %v3873_v8 = vmul.f32 0.7978846, %v3777_v54  ;;  %v7939_v5 = vpop.eup %7938 }
 0x736   :  { %v4146_v45 = vmul.f32 %v4050_v25, %v3378_v41  ;;  %v4057_v44 = vadd.f32 1.0, %v7939_v5  ;;  %v3393_v41 = vmul.f32 0.5, %v10169_v43  ;;  %v7703_v43 = vld [vmem:[#allocation3 + $0xf0] sm:$0xff] }
 0x737   :  { %v3593_v50 = vmul.f32 %v3497_v3, %v10189_v7  ;;  %v3682_v35 = vmul.f32 %v3586_v38, %v10182_v12  ;;  %7940 = vtanh.f32 %v3873_v8  ;;  %v7695_v8 = vld [vmem:[#allocation3 + $0x1b8] sm:$0xff]  ;;  %4915 = vmatpush.bf16.msra.mxu3 %v7703_v43 }
 0x738   :  { %v3115_v59 = vpop.f32.mrf.mxu3  ;;  %v4234_v62 = vpack.c.bf16 %v4146_v45, %v4138_v52  ;;  %7942 = vtanh.f32 %v3866_v32  ;;  %v10221_v45 = vmul.f32 %v4057_v44, %v3385_v57  ;;  %4876 = vmatpush.bf16.msra.mxu2 %v7695_v8 }
 0x739   :  { %v10206_v55 = vadd.f32 %v3115_v59, %v10130_v13  ;;  %v3778_v40 = vadd.f32 %v3682_v35, %v10182_v12  ;;  %v3689_v19 = vmul.f32 %v3593_v50, %v10189_v7 }
 0x73a   :  { %v3078_v16 = vpop.f32.mrf.mxu0  ;;  %4844 = vmatmul.bf16.vlgmr.msra.gmra.mxu1 %v4234_v62 }
 0x73b   :  { %v3498_v28 = vmul.f32 0.044715, %v10206_v55  ;;  %v10212_v58 = vadd.f32 %v3078_v16, %v10119_v14  ;;  %v3874_v51 = vmul.f32 0.7978846, %v3778_v40  ;;  %v3785_v54 = vadd.f32 %v3689_v19, %v10189_v7 }
 0x73d   :  { %v7941_v11 = vpop.eup %7940  ;;  %v3505_v2 = vmul.f32 0.044715, %v10212_v58  ;;  %7944 = vtanh.f32 %v3874_v51  ;;  %v3594_v24 = vmul.f32 %v3498_v28, %v10206_v55  ;;  %v3881_v6 = vmul.f32 0.7978846, %v3785_v54 }
 0x73e   :  { %v4065_v25 = vadd.f32 1.0, %v7941_v11  ;;  %v7943_v3 = vpop.eup %7942  ;;  %v3386_v28 = vmul.f32 0.5, %v10163_v17  ;;  %v3394_v51 = vmul.f32 0.5, %v10182_v12 }
 0x73f   :  { %v3601_v38 = vmul.f32 %v3505_v2, %v10212_v58  ;;  %v3690_v32 = vmul.f32 %v3594_v24, %v10206_v55  ;;  %v4058_v62 = vadd.f32 1.0, %v7943_v3  ;;  %7946 = vtanh.f32 %v3881_v6 }
 0x740   :  { %v3117_v52 = vpop.f32.mrf.mxu3  ;;  %v10223_v50 = vmul.f32 %v4065_v25, %v3393_v41 }
 0x741   :  { %v10226_v35 = vadd.f32 %v3117_v52, %v10130_v13  ;;  %v3786_v4 = vadd.f32 %v3690_v32, %v10206_v55  ;;  %v3697_v63 = vmul.f32 %v3601_v38, %v10212_v58  ;;  %v4154_v57 = vmul.f32 %v4058_v62, %v3386_v28  ;;  %v10259_v62 = vpop.f32.mrf.mxu1 }
 0x742   :  { %v3081_v59 = vpop.f32.mrf.mxu0 }
 0x743   :  { %v7945_v40 = vpop.eup %7944  ;;  %v10233_v16 = vadd.f32 %v3081_v59, %v10119_v14  ;;  %v3506_v19 = vmul.f32 0.044715, %v10226_v35  ;;  %v3793_v11 = vadd.f32 %v3697_v63, %v10212_v58  ;;  %v3882_v54 = vmul.f32 0.7978846, %v3786_v4 }
 0x744   :  { %v4066_v44 = vadd.f32 1.0, %v7945_v40 }
 0x745   :  { %v3513_v2 = vmul.f32 0.044715, %v10233_v16  ;;  %7038 = vmatmul.msk.bf16.gmra.mxu0 %vm1127_vm3, %v10092_v15  ;;  %7044 = vmatmul.msk.bf16.gmra.mxu3 %vm1127_vm3, %v10092_v15  ;;  %v3602_v24 = vmul.f32 %v3506_v19, %v10226_v35  ;;  %v3889_v17 = vmul.f32 0.7978846, %v3793_v11  ;;  %v7947_v56 = vpop.eup %7946 }
 0x746   :  { %v4162_v41 = vmul.f32 %v4066_v44, %v3394_v51  ;;  %v4073_v51 = vadd.f32 1.0, %v7947_v56 }
 0x747   :  { %v3609_v12 = vmul.f32 %v3513_v2, %v10233_v16  ;;  %v3698_v25 = vmul.f32 %v3602_v24, %v10226_v35  ;;  %7948 = vtanh.f32 %v3889_v17  ;;  %v7694_v24 = vld [vmem:[#allocation3 + $0x1a8] sm:$0xff] }
 0x748   :  { %v3120_v3 = vpop.f32.mrf.mxu3  ;;  %v4242_v38 = vpack.c.bf16 %v4162_v41, %v4154_v57  ;;  %7950 = vtanh.f32 %v3882_v54  ;;  %v7678_v54 = vld [vmem:[#allocation3 + $0x168] sm:$0xff]  ;;  %v7702_v57 = vld [vmem:[#allocation3] sm:$0xff]  ;;  %v3409_v41 = vmul.f32 0.5, %v10212_v58  ;;  %4877 = vmatpush.bf16.msra.mxu2 %v7694_v24 }
 0x749   :  { %v10250_v32 = vadd.f32 %v3120_v3, %v10130_v13  ;;  %v3794_v8 = vadd.f32 %v3698_v25, %v10226_v35  ;;  %v3705_v52 = vmul.f32 %v3609_v12, %v10233_v16  ;;  %v3401_v25 = vmul.f32 0.5, %v10189_v7  ;;  %4799 = vmatpush.bf16.msra.mxu0 %v7678_v54  ;;  %4916 = vmatpush.bf16.msra.mxu3 %v7702_v57 }
 0x74a   :  { %v3083_v4 = vpop.f32.mrf.mxu0  ;;  %4849 = vmatmul.bf16.gmra.mxu1 %v4242_v38 }
 0x74b   :  { %v3514_v43 = vmul.f32 0.044715, %v10250_v32  ;;  %v10256_v63 = vadd.f32 %v3083_v4, %v10119_v14  ;;  %v3890_v6 = vmul.f32 0.7978846, %v3794_v8  ;;  %v3801_v19 = vadd.f32 %v3705_v52, %v10233_v16 }
 0x74d   :  { %v3521_v59 = vmul.f32 0.044715, %v10256_v63  ;;  %7952 = vtanh.f32 %v3890_v6  ;;  %v3610_v40 = vmul.f32 %v3514_v43, %v10250_v32  ;;  %v7949_v28 = vpop.eup %7948  ;;  %v3897_v52 = vmul.f32 0.7978846, %v3801_v19 }
 0x74e   :  { %v7951_v44 = vpop.eup %7950  ;;  %v4081_v17 = vadd.f32 1.0, %v7949_v28  ;;  %v10273_v43 = vmul.f32 %v4073_v51, %v3401_v25  ;;  %v3410_v28 = vmul.f32 0.5, %v10226_v35 }
 0x74f   :  { %v3617_v11 = vmul.f32 %v3521_v59, %v10256_v63  ;;  %v3706_v2 = vmul.f32 %v3610_v40, %v10250_v32  ;;  %v4074_v56 = vadd.f32 1.0, %v7951_v44  ;;  %v3402_v59 = vmul.f32 0.5, %v10206_v55 }
 0x750   :  { %v3122_v12 = vpop.f32.mrf.mxu3  ;;  %v10271_v8 = vmul.f32 %v4081_v17, %v3409_v41  ;;  %12046 = vst [vmem:[#allocation39_spill] sm:$0xff] %v10273_v43  ;;  %7954 = vtanh.f32 %v3897_v52  ;;  %v10294_v41 = vpop.f32.mrf.mxu1 }
 0x751   :  { %v10268_v3 = vadd.f32 %v3122_v12, %v10130_v13  ;;  %v3802_v38 = vadd.f32 %v3706_v2, %v10250_v32  ;;  %v3713_v58 = vmul.f32 %v3617_v11, %v10256_v63  ;;  %v4170_v24 = vmul.f32 %v4074_v56, %v3402_v59  ;;  %v7693_v12 = vld [vmem:[#allocation3 + $0x80] sm:$0xff] }
 0x752   :  { %12045 = vst [vmem:[#allocation38_spill] sm:$0xff] %v10271_v8  ;;  %v3086_v4 = vpop.f32.mrf.mxu0  ;;  %4878 = vmatpush.bf16.msra.mxu2 %v7693_v12  ;;  %v3417_v12 = vmul.f32 0.5, %v10233_v16  ;;  %v3418_v16 = vmul.f32 0.5, %v10250_v32 }
 0x753   :  { %v7953_v6 = vpop.eup %7952  ;;  %v10277_v7 = vadd.f32 %v3086_v4, %v10119_v14  ;;  %v3522_v40 = vmul.f32 0.044715, %v10268_v3  ;;  %v3809_v44 = vadd.f32 %v3713_v58, %v10256_v63  ;;  %v3898_v11 = vmul.f32 0.7978846, %v3802_v38 }
 0x754   :  { %v4082_v2 = vadd.f32 1.0, %v7953_v6 }
 0x755   :  { %v3529_v51 = vmul.f32 0.044715, %v10277_v7  ;;  %7045 = vmatmul.msk.bf16.vlgmr.msrb.gmra.mxu0 %vm1127_vm3, %v10039_v31  ;;  %7063 = vmatmul.msk.bf16.vlgmr.msrb.gmra.mxu3 %vm1127_vm3, %v10039_v31  ;;  %v3618_v55 = vmul.f32 %v3522_v40, %v10268_v3  ;;  %v3905_v54 = vmul.f32 0.7978846, %v3809_v44 }
 0x756   :  { %v4178_v35 = vmul.f32 %v4082_v2, %v3410_v28  ;;  %v7955_v58 = vpop.eup %7954 }
 0x757   :  { %v3625_v57 = vmul.f32 %v3529_v51, %v10277_v7  ;;  %v3714_v17 = vmul.f32 %v3618_v55, %v10268_v3  ;;  %7956 = vtanh.f32 %v3905_v54  ;;  %v4089_v55 = vadd.f32 1.0, %v7955_v58 }
 0x758   :  { %v3125_v25 = vpop.f32.mrf.mxu3  ;;  %v4250_v4 = vpack.c.bf16 %v4178_v35, %v4170_v24  ;;  %7958 = vtanh.f32 %v3898_v11  ;;  %v3425_v54 = vmul.f32 0.5, %v10256_v63 }
 0x759   :  { %v10298_v31 = vadd.f32 %v3125_v25, %v10130_v13  ;;  %v3810_v38 = vadd.f32 %v3714_v17, %v10268_v3  ;;  %v3721_v52 = vmul.f32 %v3625_v57, %v10277_v7 }
 0x75a   :  { %v3088_v56 = vpop.f32.mrf.mxu0  ;;  %4854 = vmatmul.bf16.gmra.mxu1 %v4250_v4 }
 0x75b   :  { %v3530_v6 = vmul.f32 0.044715, %v10298_v31  ;;  %v10304_v59 = vadd.f32 %v3088_v56, %v10119_v14  ;;  %v3906_v40 = vmul.f32 0.7978846, %v3810_v38  ;;  %v3817_v28 = vadd.f32 %v3721_v52, %v10277_v7  ;;  %v10316_v38 = vpop.f32.mrf.mxu1 }
 0x75d   :  { %v3537_v2 = vmul.f32 0.044715, %v10304_v59  ;;  %7960 = vtanh.f32 %v3906_v40  ;;  %v3626_v44 = vmul.f32 %v3530_v6, %v10298_v31  ;;  %v7957_v51 = vpop.eup %7956  ;;  %v3913_v25 = vmul.f32 0.7978846, %v3817_v28 }
 0x75e   :  { %v7959_v11 = vpop.eup %7958  ;;  %v4097_v57 = vadd.f32 1.0, %v7957_v51  ;;  %v3426_v51 = vmul.f32 0.5, %v10268_v3 }
 0x75f   :  { %v3633_v24 = vmul.f32 %v3537_v2, %v10304_v59  ;;  %v3722_v35 = vmul.f32 %v3626_v44, %v10298_v31  ;;  %v4090_v40 = vadd.f32 1.0, %v7959_v11  ;;  %v10322_v2 = vmul.f32 %v4089_v55, %v3417_v12 }
 0x760   :  { %v3127_v17 = vpop.f32.mrf.mxu3  ;;  %v10319_v56 = vmul.f32 %v4097_v57, %v3425_v54  ;;  %7962 = vtanh.f32 %v3913_v25  ;;  %v7692_v57 = vld [vmem:[#allocation3 + $0x140] sm:$0xff] }
 0x761   :  { %v10314_v4 = vadd.f32 %v3127_v17, %v10130_v13  ;;  %v3818_v52 = vadd.f32 %v3722_v35, %v10298_v31  ;;  %v3729_v58 = vmul.f32 %v3633_v24, %v10304_v59  ;;  %12048 = vst [vmem:[#allocation41_spill] sm:$0xff] %v10322_v2  ;;  %v4186_v54 = vmul.f32 %v4090_v40, %v3418_v16  ;;  %v7691_v16 = vld [vmem:[#allocation3 + $0x138] sm:$0xff] }
 0x762   :  { %12047 = vst [vmem:[#allocation40_spill] sm:$0xff] %v10319_v56  ;;  %v3091_v6 = vpop.f32.mrf.mxu0  ;;  %4879 = vmatpush.bf16.msra.mxu2 %v7692_v57  ;;  %v7690_v57 = vld [vmem:[#allocation3 + $0x188] sm:$0xff] }
 0x763   :  { %v7961_v63 = vpop.eup %7960  ;;  %v10325_v44 = vadd.f32 %v3091_v6, %v10119_v14  ;;  %v3538_v28 = vmul.f32 0.044715, %v10314_v4  ;;  %v3825_v24 = vadd.f32 %v3729_v58, %v10304_v59  ;;  %v3914_v55 = vmul.f32 0.7978846, %v3818_v52 }
 0x764   :  { %v4098_v17 = vadd.f32 1.0, %v7961_v63 }
 0x765   :  { %v3545_v11 = vmul.f32 0.044715, %v10325_v44  ;;  %7046 = vmatmul.msk.bf16.gmra.mxu0 %vm1127_vm3, %v10051_v49  ;;  %7064 = vmatmul.msk.bf16.gmra.mxu3 %vm1127_vm3, %v10051_v49  ;;  %v3634_v32 = vmul.f32 %v3538_v28, %v10314_v4  ;;  %v3921_v12 = vmul.f32 0.7978846, %v3825_v24  ;;  %v10352_v24 = vpop.f32.mrf.mxu1 }
 0x766   :  { %v4194_v3 = vmul.f32 %v4098_v17, %v3426_v51  ;;  %v7963_v28 = vpop.eup %7962  ;;  %4880 = vmatpush.bf16.msra.mxu2 %v7691_v16 }
 0x767   :  { %v3641_v58 = vmul.f32 %v3545_v11, %v10325_v44  ;;  %v3730_v6 = vmul.f32 %v3634_v32, %v10314_v4  ;;  %7964 = vtanh.f32 %v3921_v12  ;;  %v7677_v32 = vld [vmem:[#allocation3 + $0x50] sm:$0xff] }
 0x768   :  { %v3130_v63 = vpop.f32.mrf.mxu3  ;;  %v4258_v42 = vpack.c.bf16 %v4194_v3, %v4186_v54  ;;  %7966 = vtanh.f32 %v3914_v55  ;;  %v7701_v54 = vld [vmem:[#allocation3 + $0x1e0] sm:$0xff]  ;;  %4800 = vmatpush.bf16.msra.mxu0 %v7677_v32 }
 0x769   :  { %v10344_v49 = vadd.f32 %v3130_v63, %v10130_v13  ;;  %v3826_v25 = vadd.f32 %v3730_v6, %v10314_v4  ;;  %v3737_v52 = vmul.f32 %v3641_v58, %v10325_v44  ;;  %v10358_v58 = vperm.slane %v10114_v23, 2  ;;  %4917 = vmatpush.bf16.msra.mxu3 %v7701_v54  ;;  %v7700_v6 = vld [vmem:[#allocation3 + $0x30] sm:$0xff] }
 0x76a   :  { %v3093_v40 = vpop.f32.mrf.mxu0  ;;  %4859 = vmatmul.bf16.gmra.mxu1 %v4258_v42  ;;  %v4105_v63 = vadd.f32 1.0, %v7963_v28  ;;  %4881 = vmatpush.bf16.msra.mxu2 %v7690_v57 }
 0x76b   :  { %v3546_v51 = vmul.f32 0.044715, %v10344_v49  ;;  %v10350_v17 = vadd.f32 %v3093_v40, %v10119_v14  ;;  %v3922_v11 = vmul.f32 0.7978846, %v3826_v25  ;;  %v3833_v42 = vadd.f32 %v3737_v52, %v10325_v44  ;;  %v7676_v14 = vld [vmem:[#allocation3 + $0x18] sm:$0xff] }
 0x76c   :  { %v3433_v52 = vmul.f32 0.5, %v10277_v7  ;;  %4801 = vmatpush.bf16.msra.mxu0 %v7676_v14 }
 0x76d   :  { %v3553_v3 = vmul.f32 0.044715, %v10350_v17  ;;  %7968 = vtanh.f32 %v3922_v11  ;;  %v3642_v55 = vmul.f32 %v3546_v51, %v10344_v49  ;;  %v7965_v12 = vpop.eup %7964  ;;  %v3441_v11 = vmul.f32 0.5, %v10304_v59  ;;  %4918 = vmatpush.bf16.msra.mxu3 %v7700_v6 }
 0x76e   :  { %v7967_v25 = vpop.eup %7966  ;;  %v4113_v51 = vadd.f32 1.0, %v7965_v12  ;;  %v3929_v28 = vmul.f32 0.7978846, %v3833_v42  ;;  %v3442_v12 = vmul.f32 0.5, %v10314_v4 }
 0x76f   :  { %v3649_v40 = vmul.f32 %v3553_v3, %v10350_v17  ;;  %v3738_v16 = vmul.f32 %v3642_v55, %v10344_v49  ;;  %v4106_v34 = vadd.f32 1.0, %v7967_v25  ;;  %v7689_v3 = vld [vmem:[#allocation3 + $0xe0] sm:$0xff]  ;;  %v10370_v55 = vmul.f32 %v4105_v63, %v3433_v52  ;;  %v7675_v25 = vld [vmem:[#allocation3 + $0xd8] sm:$0xff] }
 0x770   :  { %v3132_v35 = vpop.f32.mrf.mxu3  ;;  %v10368_v54 = vmul.f32 %v4113_v51, %v3441_v11  ;;  %4882 = vmatpush.bf16.msra.mxu2 %v7689_v3  ;;  %7970 = vtanh.f32 %v3929_v28  ;;  %4802 = vmatpush.bf16.msra.mxu0 %v7675_v25  ;;  %v10400_v25 = vperm.slane %v10114_v23, 5 }
 0x771   :  { %v10365_v19 = vadd.f32 %v3132_v35, %v10130_v13  ;;  %v3834_v32 = vadd.f32 %v3738_v16, %v10344_v49  ;;  %12050 = vst [vmem:[#allocation43_spill] sm:$0xff] %v10370_v55  ;;  %v3745_v59 = vmul.f32 %v3649_v40, %v10350_v17  ;;  %v3434_v13 = vmul.f32 0.5, %v10298_v31  ;;  %v7699_v40 = vld [vmem:[#allocation3 + $0x160] sm:$0xff]  ;;  %v7710_v55 = vld [vmem:[#allocation3 + $0x1f8] sm:$0xff] }
 0x772   :  { %12049 = vst [vmem:[#allocation42_spill] sm:$0xff] %v10368_v54  ;;  %v3144_v5 = vpop.f32.mrf.mxu0  ;;  %4919 = vmatpush.bf16.msra.mxu3 %v7699_v40 }
 0x773   :  { %v7969_v57 = vpop.eup %7968  ;;  %v10374_v7 = vadd.f32 %v3144_v5, %v10358_v58  ;;  %v3554_v35 = vmul.f32 0.044715, %v10365_v19  ;;  %v3841_v6 = vadd.f32 %v3745_v59, %v10350_v17  ;;  %v10387_v5 = vpop.f32.mrf.mxu1  ;;  %v3930_v4 = vmul.f32 0.7978846, %v3834_v32 }
 0x774   :  { %v4114_v42 = vadd.f32 1.0, %v7969_v57  ;;  %v4202_v16 = vmul.f32 %v4106_v34, %v3434_v13  ;;  %v10520_v10 = vadd.f32 %v10387_v5, %v10400_v25 }
 0x775   :  { %v3467_v63 = vmul.f32 0.044715, %v10374_v7  ;;  %7047 = vmatmul.msk.bf16.gmra.mxu0 %vm1127_vm3, %v10059_v9  ;;  %7065 = vmatmul.msk.bf16.gmra.mxu3 %vm1127_vm3, %v10059_v9  ;;  %v3650_v31 = vmul.f32 %v3554_v35, %v10365_v19  ;;  %v3937_v51 = vmul.f32 0.7978846, %v3841_v6  ;;  %v7674_v6 = vld [vmem:[#allocation3 + $0x1b0] sm:$0xff] }
 0x776   :  { %v4210_v11 = vmul.f32 %v4114_v42, %v3442_v12  ;;  %v7971_v28 = vpop.eup %7970  ;;  %4803 = vmatpush.bf16.msra.mxu0 %v7674_v6 }
 0x777   :  { %v3563_v52 = vmul.f32 %v3467_v63, %v10374_v7  ;;  %v3746_v3 = vmul.f32 %v3650_v31, %v10365_v19  ;;  %7972 = vtanh.f32 %v3937_v51  ;;  %v7698_v63 = vld [vmem:[#allocation3 + $0xf8] sm:$0xff]  ;;  %v3457_v51 = vmul.f32 0.5, %v10350_v17 }
 0x778   :  { %v3183_v59 = vpop.f32.mrf.mxu3  ;;  %v4266_v57 = vpack.c.bf16 %v4210_v11, %v4202_v16  ;;  %7974 = vtanh.f32 %v3930_v4  ;;  %v4121_v4 = vadd.f32 1.0, %v7971_v28  ;;  %4920 = vmatpush.bf16.msra.mxu3 %v7698_v63  ;;  %v10412_v28 = vadd.f32 %v10259_v62, %v10400_v25 }
 0x779   :  { %v3842_v9 = vadd.f32 %v3746_v3, %v10365_v19  ;;  %v3659_v32 = vmul.f32 %v3563_v52, %v10374_v7  ;;  %v10417_v17 = vperm.slane %v10114_v23, 3  ;;  %v3458_v63 = vmul.f32 0.5, %v10365_v19 }
 0x77a   :  { %v3146_v35 = vpop.f32.mrf.mxu0  ;;  %4864 = vmatmul.bf16.gmra.mxu1 %v4266_v57  ;;  %v3470_v19 = vmul.f32 0.044715, %v10412_v28 }
 0x77b   :  { %v10395_v34 = vadd.f32 %v3146_v35, %v10358_v58  ;;  %v3938_v13 = vmul.f32 0.7978846, %v3842_v9  ;;  %v3755_v12 = vadd.f32 %v3659_v32, %v10374_v7  ;;  %v10403_v11 = vpop.f32.mrf.mxu1  ;;  %v3449_v9 = vmul.f32 0.5, %v10325_v44 }
 0x77c   :  { %v3450_v44 = vmul.f32 0.5, %v10344_v49 }
 0x77d   :  { %v3475_v42 = vmul.f32 0.044715, %v10395_v34  ;;  %7976 = vtanh.f32 %v3938_v13  ;;  %v7973_v31 = vpop.eup %7972  ;;  %v3851_v57 = vmul.f32 0.7978846, %v3755_v12  ;;  %v10414_v14 = vmul.f32 %v4121_v4, %v3449_v9 }
 0x77e   :  { %v7975_v40 = vpop.eup %7974  ;;  %v4129_v52 = vadd.f32 1.0, %v7973_v31 }
 0x77f   :  { %v3571_v16 = vmul.f32 %v3475_v42, %v10395_v34  ;;  %v4122_v42 = vadd.f32 1.0, %v7975_v40  ;;  %12052 = vst [vmem:[#allocation45_spill] sm:$0xff] %v10414_v14  ;;  %7978 = vtanh.f32 %v3851_v57 }
 0x780   :  { %v3185_v3 = vpop.f32.mrf.mxu3  ;;  %v10408_v35 = vmul.f32 %v4129_v52, %v3457_v51  ;;  %v10435_v52 = vadd.f32 %v3183_v59, %v10417_v17  ;;  %v3566_v59 = vmul.f32 %v3470_v19, %v10412_v28 }
 0x781   :  { %v3667_v32 = vmul.f32 %v3571_v16, %v10395_v34  ;;  %v4218_v23 = vmul.f32 %v4122_v42, %v3450_v44  ;;  %v10438_v57 = vadd.f32 %v3185_v3, %v10417_v17  ;;  %v10450_v3 = vadd.f32 %v10294_v41, %v10400_v25 }
 0x782   :  { %12051 = vst [vmem:[#allocation44_spill] sm:$0xff] %v10408_v35  ;;  %v3149_v13 = vpop.f32.mrf.mxu0  ;;  %v3662_v41 = vmul.f32 %v3566_v59, %v10412_v28 }
 0x783   :  { %v7977_v6 = vpop.eup %7976  ;;  %v10420_v12 = vadd.f32 %v3149_v13, %v10358_v58  ;;  %v3763_v16 = vadd.f32 %v3667_v32, %v10395_v34  ;;  %v10440_v13 = vpop.f32.mrf.mxu1  ;;  %v3478_v33 = vmul.f32 0.044715, %v10450_v3  ;;  %v3380_v53 = vmul.f32 0.5, %v10438_v57 }
 0x784   :  { %v4130_v31 = vadd.f32 1.0, %v7977_v6 }
 0x785   :  { %v3483_v4 = vmul.f32 0.044715, %v10420_v12  ;;  %7048 = vmatmul.msk.bf16.gmra.mxu0 %vm1127_vm3, %v10069_v47  ;;  %7066 = vmatmul.msk.bf16.gmra.mxu3 %vm1127_vm3, %v10069_v47  ;;  %v3859_v49 = vmul.f32 0.7978846, %v3763_v16  ;;  %v7979_v42 = vpop.eup %7978  ;;  %v3476_v16 = vmul.f32 0.044715, %v10438_v57 }
 0x786   :  { %v4226_v40 = vmul.f32 %v4130_v31, %v3458_v63  ;;  %v3468_v31 = vmul.f32 0.044715, %v10435_v52 }
 0x787   :  { %v3579_v51 = vmul.f32 %v3483_v4, %v10420_v12  ;;  %7980 = vtanh.f32 %v3859_v49  ;;  %v4043_v4 = vadd.f32 1.0, %v7979_v42  ;;  %v7697_v49 = vld [vmem:[#allocation3 + $0x1e8] sm:$0xff]  ;;  %v3572_v29 = vmul.f32 %v3476_v16, %v10438_v57 }
 0x788   :  { %v3188_v9 = vpop.f32.mrf.mxu3  ;;  %v4274_v32 = vpack.c.bf16 %v4226_v40, %v4218_v23  ;;  %v7673_v40 = vld [vmem:[#allocation3 + $0xb0] sm:$0xff]  ;;  %4921 = vmatpush.bf16.msra.mxu3 %v7697_v49  ;;  %v3564_v42 = vmul.f32 %v3468_v31, %v10435_v52  ;;  %v3574_v16 = vmul.f32 %v3478_v33, %v10450_v3 }
 0x789   :  { %v3675_v47 = vmul.f32 %v3579_v51, %v10420_v12  ;;  %4804 = vmatpush.bf16.msra.mxu0 %v7673_v40  ;;  %v3758_v40 = vadd.f32 %v3662_v41, %v10412_v28 }
 0x78a   :  { %v3151_v6 = vpop.f32.mrf.mxu0  ;;  %4869 = vmatmul.bf16.gmra.mxu1 %v4274_v32  ;;  %v3371_v32 = vmul.f32 0.5, %v10374_v7  ;;  %v3660_v31 = vmul.f32 %v3564_v42, %v10435_v52 }
 0x78b   :  { %v10444_v44 = vadd.f32 %v3151_v6, %v10358_v58  ;;  %v3771_v63 = vadd.f32 %v3675_v47, %v10420_v12  ;;  %v3379_v47 = vmul.f32 0.5, %v10395_v34  ;;  %v3854_v33 = vmul.f32 0.7978846, %v3758_v40 }
 0x78c   :  { %v4139_v27 = vmul.f32 %v4043_v4, %v3371_v32  ;;  %v3668_v4 = vmul.f32 %v3572_v29, %v10438_v57 }
 0x78d   :  { %v3491_v23 = vmul.f32 0.044715, %v10444_v44  ;;  %v7981_v51 = vpop.eup %7980  ;;  %v3867_v62 = vmul.f32 0.7978846, %v3771_v63 }
 0x78e   :  { %v4051_v6 = vadd.f32 1.0, %v7981_v51  ;;  %v10463_v51 = vpop.f32.mrf.mxu1 }
 0x78f   :  { %v3587_v19 = vmul.f32 %v3491_v23, %v10444_v44  ;;  %7982 = vtanh.f32 %v3867_v62  ;;  %v7720_v62 = vld [vmem:[#allocation3 + $0xd0] sm:$0xff] }
 0x790   :  { %v3190_v30 = vpop.f32.mrf.mxu3  ;;  %v4147_v1 = vmul.f32 %v4051_v6, %v3379_v47  ;;  %v7728_v47 = vld [vmem:[#allocation3 + $0x190] sm:$0xff]  ;;  %v10479_v6 = vadd.f32 %v3188_v9, %v10417_v17  ;;  %4992 = vmatpush.bf16.msrb.mxu1 %v7720_v62 }
 0x791   :  { %v3683_v7 = vmul.f32 %v3587_v19, %v10444_v44  ;;  %5031 = vmatpush.bf16.msrb.mxu2 %v7728_v47  ;;  %v3756_v19 = vadd.f32 %v3660_v31, %v10435_v52  ;;  %v10489_v9 = vadd.f32 %v3190_v30, %v10417_v17  ;;  %v10496_v47 = vpop.f32.mrf.mxu2  ;;  %v10501_v30 = vadd.f32 %v10316_v38, %v10400_v25 }
 0x792   :  { %v3154_v34 = vpop.f32.mrf.mxu0  ;;  %v4235_v23 = vpack.c.bf16 %v4147_v1, %v4139_v27  ;;  %v7712_v27 = vld [vmem:[#allocation3 + $0x128] sm:$0xff]  ;;  %v7736_v1 = vld [vmem:[#allocation3 + $0xa0] sm:$0xff] }
 0x793   :  { %v10466_v63 = vadd.f32 %v3154_v34, %v10358_v58  ;;  %v3779_v59 = vadd.f32 %v3683_v7, %v10444_v44  ;;  %4953 = vmatpush.bf16.msrb.mxu0 %v7712_v27  ;;  %5070 = vmatpush.bf16.msrb.mxu3 %v7736_v1  ;;  %v3764_v7 = vadd.f32 %v3668_v4, %v10438_v57 }
 0x794   :  { %4883 = vmatmul.bf16.vlgmr.msra.gmra.mxu2 %v4235_v23 }
 0x795   :  { %v3499_v49 = vmul.f32 0.044715, %v10466_v63  ;;  %7049 = vmatmul.msk.bf16.gmra.mxu0 %vm1127_vm3, %v10080_v18  ;;  %v3875_v32 = vmul.f32 0.7978846, %v3779_v59  ;;  %7067 = vmatmul.msk.bf16.gmra.mxu3 %vm1127_vm3, %v10080_v18  ;;  %v7983_v42 = vpop.eup %7982  ;;  %v3670_v18 = vmul.f32 %v3574_v16, %v10450_v3  ;;  %v3484_v59 = vmul.f32 0.044715, %v10479_v6 }
 0x796   :  { %v4059_v16 = vadd.f32 1.0, %v7983_v42  ;;  %v3860_v1 = vmul.f32 0.7978846, %v3764_v7  ;;  %v10503_v62 = vpop.f32.mrf.mxu1  ;;  %v3395_v42 = vmul.f32 0.5, %v10444_v44  ;;  %5032 = vmatpush.bf16.msrb.mxu2 %v7727_v21  ;;  %v3502_v21 = vmul.f32 0.044715, %v10520_v10 }
 0x797   :  { %7984 = vtanh.f32 %v3875_v32  ;;  %v3595_v29 = vmul.f32 %v3499_v49, %v10466_v63  ;;  %v7719_v49 = vld [vmem:[#allocation3 + $0x1d8] sm:$0xff]  ;;  %v3852_v32 = vmul.f32 0.7978846, %v3756_v19  ;;  %v3766_v27 = vadd.f32 %v3670_v18, %v10450_v3 }
 0x798   :  { %v10483_v41 = vpop.f32.mrf.mxu3  ;;  %7986 = vtanh.f32 %v3854_v33  ;;  %4993 = vmatpush.bf16.msrb.mxu1 %v7719_v49  ;;  %v3492_v33 = vmul.f32 0.044715, %v10489_v9  ;;  %v3387_v19 = vmul.f32 0.5, %v10420_v12  ;;  %v10510_v18 = vmul.f32 0.5, %v10412_v28 }
 0x799   :  { %v3691_v34 = vmul.f32 %v3595_v29, %v10466_v63  ;;  %v3580_v38 = vmul.f32 %v3484_v59, %v10479_v6  ;;  %v10516_v49 = vadd.f32 %v10352_v24, %v10400_v25  ;;  %v10523_v28 = vmul.f32 0.5, %v10450_v3 }
 0x79a   :  { %v3156_v23 = vpop.f32.mrf.mxu0  ;;  %v4155_v44 = vmul.f32 %v4059_v16, %v3387_v19  ;;  %v3862_v61 = vmul.f32 0.7978846, %v3766_v27  ;;  %7988 = vtanh.f32 %v3860_v1  ;;  %v3486_v24 = vmul.f32 0.044715, %v10501_v30  ;;  %v7717_v27 = vld [vmem:[#allocation3 + $0x70] sm:$0xff] }
 0x79b   :  { %v10493_v40 = vadd.f32 %v3156_v23, %v10358_v58  ;;  %v3787_v31 = vadd.f32 %v3691_v34, %v10466_v63  ;;  %v7718_v34 = vld [vmem:[#allocation3 + $0x90] sm:$0xff]  ;;  %7990 = vtanh.f32 %v3852_v32  ;;  %v3676_v1 = vmul.f32 %v3580_v38, %v10479_v6  ;;  %v7711_v38 = vld [vmem:[#allocation3 + $0x20] sm:$0xff] }
 0x79c   :  { %4994 = vmatpush.bf16.msrb.mxu1 %v7718_v34  ;;  %v3494_v34 = vmul.f32 0.044715, %v10516_v49  ;;  %v10537_v32 = vadd.f32 %v10403_v11, %v10400_v25  ;;  %4954 = vmatpush.bf16.msrb.mxu0 %v7711_v38  ;;  %v3403_v57 = vmul.f32 0.5, %v10466_v63  ;;  %v7734_v63 = vld [vmem:[#allocation3 + $0x10] sm:$0xff] }
 0x79d   :  { %v7985_v4 = vpop.eup %7984  ;;  %v3507_v29 = vmul.f32 0.044715, %v10493_v40  ;;  %v3883_v26 = vmul.f32 0.7978846, %v3787_v31 }
 0x79e   :  { %v4067_v23 = vadd.f32 1.0, %v7985_v4  ;;  %v7987_v31 = vpop.eup %7986 }
 0x79f   :  { %v3603_v7 = vmul.f32 %v3507_v29, %v10493_v40  ;;  %v3588_v29 = vmul.f32 %v3492_v33, %v10489_v9  ;;  %7992 = vtanh.f32 %v3883_v26  ;;  %v10542_v33 = vld [vmem:[%s11943_s17] sm:$0xff]  ;;  %v10549_v26 = vadd.f32 %v10440_v13, %v10400_v25  ;;  %v10565_v13 = vpop.f32.mrf.mxu2 }
 0x7a0   :  { %v3195_v12 = vpop.f32.mrf.mxu3  ;;  %v4163_v4 = vmul.f32 %v4067_v23, %v3395_v42  ;;  %12053 = vst [vmem:[#allocation46_spill] sm:$0xff] %v10542_v33  ;;  %v10545_v19 = vperm.slane %v10542_v33, 6  ;;  %v10553_v42 = vadd.f32 %v10463_v51, %v10400_v25  ;;  %7994 = vtanh.f32 %v3862_v61  ;;  %4995 = vmatpush.bf16.msrb.mxu1 %v7717_v27  ;;  %v7716_v51 = vld [vmem:[#allocation3 + $0x78] sm:$0xff]  ;;  %4955 = vmatpush.bf16.msrb.mxu0 %v7710_v55 }
 0x7a1   :  { %v3699_v59 = vmul.f32 %v3603_v7, %v10493_v40  ;;  %12054 = vst [vmem:[#allocation47_spill] sm:$0xff] %v10549_v26  ;;  %v7735_v7 = vld [vmem:[#allocation3 + $0x58] sm:$0xff]  ;;  %v10577_v27 = vmul.f32 %v3502_v21, %v10520_v10 }
 0x7a2   :  { %v3159_v5 = vpop.f32.mrf.mxu0  ;;  %v4243_v36 = vpack.c.bf16 %v4163_v4, %v4155_v44  ;;  %v10558_v44 = vadd.f32 1.0, %v7987_v31  ;;  %v10561_v4 = vmul.f32 %v3486_v24, %v10501_v30  ;;  %5071 = vmatpush.bf16.msrb.mxu3 %v7735_v7  ;;  %v3772_v31 = vadd.f32 %v3676_v1, %v10479_v6 }
 0x7a3   :  { %v10529_v16 = vadd.f32 %v3159_v5, %v10358_v58  ;;  %v3795_v3 = vadd.f32 %v3699_v59, %v10493_v40  ;;  %v7989_v59 = vpop.eup %7988  ;;  %v3283_v5 = vpop.f32.mrf.mxu1  ;;  %v10588_v1 = vmul.f32 0.044715, %v10553_v42  ;;  %v3372_v7 = vmul.f32 0.5, %v10435_v52 }
 0x7a4   :  { %4888 = vmatmul.bf16.gmra.mxu2 %v4243_v36  ;;  %v3684_v36 = vmul.f32 %v3588_v29, %v10489_v9  ;;  %v7991_v24 = vpop.eup %7990  ;;  %v3510_v29 = vmul.f32 0.044715, %v10537_v32  ;;  %v4052_v48 = vadd.f32 1.0, %v7989_v59  ;;  %4996 = vmatpush.bf16.msrb.mxu1 %v7716_v51 }
 0x7a5   :  { %v3515_v23 = vmul.f32 0.044715, %v10529_v16  ;;  %7050 = vmatmul.msk.bf16.gmra.mxu0 %vm1127_vm3, %v10092_v15  ;;  %v3891_v11 = vmul.f32 0.7978846, %v3795_v3  ;;  %7068 = vmatmul.msk.bf16.gmra.mxu3 %vm1127_vm3, %v10092_v15  ;;  %v10569_v3 = vadd.f32 %v3195_v12, %v10417_v17  ;;  %v10574_v15 = vmul.f32 %v3494_v34, %v10516_v49  ;;  %v7993_v38 = vpop.eup %7992 }
 0x7a6   :  { %v10582_v12 = vadd.f32 %v10483_v41, %v10417_v17  ;;  %v10592_v34 = vadd.f32 %v10496_v47, %v10545_v19  ;;  %v3780_v39 = vadd.f32 %v3684_v36, %v10489_v9  ;;  %v3868_v47 = vmul.f32 0.7978846, %v3772_v31  ;;  %v7995_v14 = vpop.eup %7994  ;;  %v7726_v31 = vld [vmem:[#allocation3 + $0x178] sm:$0xff]  ;;  %5072 = vmatpush.bf16.msrb.mxu3 %v7734_v63 }
 0x7a7   :  { %7996 = vtanh.f32 %v3891_v11  ;;  %v3611_v61 = vmul.f32 %v3515_v23, %v10529_v16  ;;  %v3518_v23 = vmul.f32 0.044715, %v10549_v26  ;;  %v3508_v20 = vmul.f32 0.044715, %v10569_v3  ;;  %5033 = vmatpush.bf16.msrb.mxu2 %v7726_v31 }
 0x7a8   :  { %v10584_v11 = vpop.f32.mrf.mxu3  ;;  %v3500_v52 = vmul.f32 0.044715, %v10582_v12  ;;  %v4075_v35 = vadd.f32 1.0, %v7993_v38  ;;  %v10606_v36 = vmul.f32 %v3510_v29, %v10537_v32  ;;  %v4148_v2 = vmul.f32 %v4052_v48, %v3380_v53  ;;  %4997 = vmatpush.bf16.msrb.mxu1 %v7715_v60  ;;  %v7714_v38 = vld [vmem:[#allocation3 + $0x1f0] sm:$0xff]  ;;  %v10621_v60 = vpop.f32.mrf.mxu2 }
 0x7a9   :  { %v3707_v21 = vmul.f32 %v3611_v61, %v10529_v16  ;;  %v4044_v61 = vadd.f32 1.0, %v7991_v24  ;;  %v10609_v51 = vmul.f32 %v3518_v23, %v10549_v26  ;;  %v3411_v24 = vmul.f32 0.5, %v10493_v40 }
 0x7aa   :  { %v3161_v41 = vpop.f32.mrf.mxu0  ;;  %v3876_v56 = vmul.f32 0.7978846, %v3780_v39  ;;  %v3604_v29 = vmul.f32 %v3508_v20, %v10569_v3  ;;  %7998 = vtanh.f32 %v3868_v47  ;;  %v4171_v8 = vmul.f32 %v4075_v35, %v3403_v57 }
 0x7ab   :  { %v10600_v0 = vadd.f32 %v3161_v41, %v10358_v58  ;;  %v3803_v37 = vadd.f32 %v3707_v21, %v10529_v16  ;;  %12055 = vst [vmem:[#allocation48_spill] sm:$0xff] %v10609_v51  ;;  %v3471_v41 = vmul.f32 0.044715, %v10592_v34  ;;  %v3596_v51 = vmul.f32 %v3500_v52, %v10582_v12  ;;  %v3286_v39 = vpop.f32.mrf.mxu1 }
 0x7ac   :  { %v10619_v48 = vadd.f32 %v10565_v13, %v10545_v19  ;;  %v10625_v20 = vadd.f32 %v10503_v62, %v10400_v25  ;;  %v4140_v13 = vmul.f32 %v4044_v61, %v3372_v7  ;;  %8000 = vtanh.f32 %v3876_v56  ;;  %4998 = vmatpush.bf16.msrb.mxu1 %v7714_v38 }
 0x7ad   :  { %v7997_v59 = vpop.eup %7996  ;;  %v3523_v21 = vmul.f32 0.044715, %v10600_v0  ;;  %v3899_v23 = vmul.f32 0.7978846, %v3803_v37  ;;  %v10628_v37 = vadd.f32 %v3283_v5, %v10400_v25  ;;  %v3567_v53 = vmul.f32 %v3471_v41, %v10592_v34  ;;  %v7713_v5 = vld [vmem:[#allocation3 + $0x1a0] sm:$0xff] }
 0x7ae   :  { %v4083_v54 = vadd.f32 1.0, %v7997_v59  ;;  %v3700_v52 = vmul.f32 %v3604_v29, %v10569_v3  ;;  %v4236_v57 = vpack.c.bf16 %v4148_v2, %v4140_v13  ;;  %v3692_v59 = vmul.f32 %v3596_v51, %v10582_v12 }
 0x7af   :  { %v3619_v43 = vmul.f32 %v3523_v21, %v10600_v0  ;;  %8002 = vtanh.f32 %v3899_v23  ;;  %v4054_v41 = vadd.f32 1.0, %v7995_v14  ;;  %v3663_v7 = vmul.f32 %v3567_v53, %v10592_v34 }
 0x7b0   :  { %v3200_v26 = vpop.f32.mrf.mxu3  ;;  %v4179_v33 = vmul.f32 %v4083_v54, %v3411_v24  ;;  %v10633_v54 = vadd.f32 %v3286_v39, %v10400_v25  ;;  %v7999_v21 = vpop.eup %7998  ;;  %v10652_v61 = vmul.f32 0.044715, %v10625_v20  ;;  %4999 = vmatpush.bf16.msrb.mxu1 %v7713_v5  ;;  %v3796_v31 = vadd.f32 %v3700_v52, %v10569_v3 }
 0x7b1   :  { %v3715_v55 = vmul.f32 %v3619_v43, %v10600_v0  ;;  %v3479_v43 = vmul.f32 0.044715, %v10619_v48  ;;  %v10655_v14 = vadd.f32 %v3200_v26, %v10417_v17  ;;  %v4150_v51 = vmul.f32 %v4054_v41, %v10523_v28 }
 0x7b2   :  { %v3164_v35 = vpop.f32.mrf.mxu0  ;;  %v4251_v40 = vpack.c.bf16 %v4179_v33, %v4171_v8  ;;  %v10644_v8 = vadd.f32 %v10584_v11, %v10417_v17  ;;  %v12056_v33 = vpack.c.bf16 %v10179_v22, %v10177_v46  ;;  %v4142_v11 = vmul.f32 %v10558_v44, %v10510_v18  ;;  %v8001_v24 = vpop.eup %8000 }
 0x7b3   :  { %v10636_v47 = vadd.f32 %v3164_v35, %v10358_v58  ;;  %v3811_v62 = vadd.f32 %v3715_v55, %v10600_v0  ;;  %v3388_v46 = vmul.f32 0.5, %v10479_v6  ;;  %v3575_v26 = vmul.f32 %v3479_v43, %v10619_v48 }
 0x7b4   :  { %4893 = vmatmul.bf16.gmra.mxu2 %v4251_v40  ;;  %v3396_v38 = vmul.f32 0.5, %v10489_v9  ;;  %v4238_v29 = vpack.c.bf16 %v4150_v51, %v4142_v11  ;;  %v3678_v18 = vmul.f32 %v10561_v4, %v10501_v30  ;;  %v3516_v28 = vmul.f32 0.044715, %v10644_v8  ;;  %v10674_v40 = vpop.f32.mrf.mxu2 }
 0x7b5   :  { %v3531_v56 = vmul.f32 0.044715, %v10636_v47  ;;  %4805 = vmatmul.bf16.vlgmr.msra.gmra.mxu0 %v12056_v33  ;;  %v3907_v2 = vmul.f32 0.7978846, %v3811_v62  ;;  %4922 = vmatmul.bf16.vlgmr.msra.gmra.mxu3 %v4236_v57  ;;  %v8003_v44 = vpop.eup %8002  ;;  %v4060_v23 = vadd.f32 1.0, %v7999_v21  ;;  %v3788_v39 = vadd.f32 %v3692_v59, %v10582_v12 }
 0x7b6   :  { %v3524_v53 = vmul.f32 0.044715, %v10655_v14  ;;  %v3759_v55 = vadd.f32 %v3663_v7, %v10592_v34  ;;  %5000 = vmatmul.bf16.vlgmr.msrb.gmra.mxu1 %v4238_v29  ;;  %v3686_v9 = vmul.f32 %v10574_v15, %v10516_v49  ;;  %v3774_v4 = vadd.f32 %v3678_v18, %v10501_v30 }
 0x7b7   :  { %8004 = vtanh.f32 %v3907_v2  ;;  %v3627_v22 = vmul.f32 %v3531_v56, %v10636_v47  ;;  %v4068_v62 = vadd.f32 1.0, %v8001_v24  ;;  %v3892_v52 = vmul.f32 0.7978846, %v3796_v31 }
 0x7b8   :  { %v10663_v63 = vpop.f32.mrf.mxu3  ;;  %v3671_v57 = vmul.f32 %v3575_v26, %v10619_v48  ;;  %v4091_v43 = vadd.f32 1.0, %v8003_v44  ;;  %v3782_v59 = vadd.f32 %v3686_v9, %v10516_v49  ;;  %v3870_v41 = vmul.f32 0.7978846, %v3774_v4 }
 0x7b9   :  { %v3723_v6 = vmul.f32 %v3627_v22, %v10636_v47  ;;  %v3612_v56 = vmul.f32 %v3516_v28, %v10644_v8  ;;  %v3419_v15 = vmul.f32 0.5, %v10529_v16  ;;  %v3884_v7 = vmul.f32 0.7978846, %v3788_v39  ;;  %v3288_v39 = vpop.f32.mrf.mxu1 }
 0x7ba   :  { %v3166_v35 = vpop.f32.mrf.mxu0  ;;  %v3620_v2 = vmul.f32 %v3524_v53, %v10655_v14  ;;  %v3427_v11 = vmul.f32 0.5, %v10600_v0  ;;  %v3878_v22 = vmul.f32 0.7978846, %v3782_v59  ;;  %v4164_v31 = vmul.f32 %v4068_v62, %v3396_v38 }
 0x7bb   :  { %v10680_v13 = vadd.f32 %v3166_v35, %v10358_v58  ;;  %v3819_v5 = vadd.f32 %v3723_v6, %v10636_v47  ;;  %8006 = vtanh.f32 %v3892_v52  ;;  %v3767_v29 = vadd.f32 %v3671_v57, %v10619_v48 }
 0x7bc   :  { %v4187_v44 = vmul.f32 %v4091_v43, %v3419_v15  ;;  %8008 = vtanh.f32 %v3870_v41  ;;  %v10693_v16 = vmul.f32 0.044715, %v10628_v37  ;;  %v3708_v0 = vmul.f32 %v3612_v56, %v10644_v8  ;;  %v10708_v41 = vpop.f32.mrf.mxu2 }
 0x7bd   :  { %v8005_v21 = vpop.eup %8004  ;;  %v3539_v33 = vmul.f32 0.044715, %v10680_v13  ;;  %v3915_v26 = vmul.f32 0.7978846, %v3819_v5  ;;  %8010 = vtanh.f32 %v3878_v22  ;;  %v10698_v38 = vmul.f32 0.044715, %v10633_v54 }
 0x7be   :  { %v4099_v51 = vadd.f32 1.0, %v8005_v21  ;;  %v4156_v9 = vmul.f32 %v4060_v23, %v3388_v46  ;;  %v3716_v4 = vmul.f32 %v3620_v2, %v10655_v14  ;;  %v10702_v62 = vadd.f32 %v3288_v39, %v10400_v25  ;;  %v7725_v21 = vld [vmem:[#allocation3 + $0x170] sm:$0xff] }
 0x7bf   :  { %v3635_v24 = vmul.f32 %v3539_v33, %v10680_v13  ;;  %8012 = vtanh.f32 %v3915_v26  ;;  %v3855_v57 = vmul.f32 0.7978846, %v3759_v55  ;;  %v3863_v43 = vmul.f32 0.7978846, %v3767_v29  ;;  %5034 = vmatpush.bf16.msrb.mxu2 %v7725_v21  ;;  %v7723_v21 = vld [vmem:[#allocation3 + $0xa8] sm:$0xff] }
 0x7c0   :  { %v3205_v18 = vpop.f32.mrf.mxu3  ;;  %v4195_v28 = vmul.f32 %v4099_v51, %v3427_v11  ;;  %v4244_v59 = vpack.c.bf16 %v4164_v31, %v4156_v9  ;;  %8014 = vtanh.f32 %v3884_v7  ;;  %v12057_v25 = vpack.c.bf16 %v10223_v50, %v10221_v45 }
 0x7c1   :  { %v3731_v6 = vmul.f32 %v3635_v24, %v10680_v13  ;;  %v8007_v56 = vpop.eup %8006  ;;  %v3804_v15 = vadd.f32 %v3708_v0, %v10644_v8  ;;  %v3390_v33 = vmul.f32 0.5, %v10501_v30  ;;  %v10718_v7 = vadd.f32 %v10663_v63, %v10417_v17  ;;  %v7724_v24 = vld [vmem:[#allocation3 + $0x1c8] sm:$0xff] }
 0x7c2   :  { %v3169_v53 = vpop.f32.mrf.mxu0  ;;  %v4259_v35 = vpack.c.bf16 %v4195_v28, %v4187_v44  ;;  %v8009_v55 = vpop.eup %8008  ;;  %v10721_v2 = vmul.f32 0.5, %v10582_v12  ;;  %v3812_v11 = vadd.f32 %v3716_v4, %v10655_v14  ;;  %v3398_v45 = vmul.f32 0.5, %v10516_v49 }
 0x7c3   :  { %v10705_v5 = vadd.f32 %v3169_v53, %v10358_v58  ;;  %v3827_v52 = vadd.f32 %v3731_v6, %v10680_v13  ;;  %v8011_v50 = vpop.eup %8010  ;;  %v10726_v51 = vadd.f32 %v3205_v18, %v10417_v17  ;;  %v4062_v22 = vadd.f32 1.0, %v8009_v55  ;;  %5035 = vmatpush.bf16.msrb.mxu2 %v7724_v24 }
 0x7c4   :  { %4898 = vmatmul.bf16.gmra.mxu2 %v4259_v35  ;;  %v10731_v63 = vadd.f32 %v10621_v60, %v10545_v19  ;;  %v3412_v31 = vmul.f32 0.5, %v10569_v3  ;;  %v4070_v26 = vadd.f32 1.0, %v8011_v50  ;;  %v3900_v18 = vmul.f32 0.7978846, %v3804_v15  ;;  %v7708_v50 = vld [vmem:[#allocation3 + $0xc8] sm:$0xff] }
 0x7c5   :  { %v3547_v46 = vmul.f32 0.044715, %v10705_v5  ;;  %4810 = vmatmul.bf16.gmra.mxu0 %v12057_v25  ;;  %v3923_v23 = vmul.f32 0.7978846, %v3827_v52  ;;  %4927 = vmatmul.bf16.gmra.mxu3 %v4244_v59  ;;  %v8013_v49 = vpop.eup %8012  ;;  %v4158_v44 = vmul.f32 %v4062_v22, %v3390_v33  ;;  %v3532_v6 = vmul.f32 0.044715, %v10718_v7 }
 0x7c6   :  { %v8015_v28 = vpop.eup %8014  ;;  %v4084_v39 = vadd.f32 1.0, %v8007_v56  ;;  %v4166_v60 = vmul.f32 %v4070_v26, %v3398_v45  ;;  %v3694_v53 = vmul.f32 %v10577_v27, %v10520_v10  ;;  %v3540_v3 = vmul.f32 0.044715, %v10726_v51  ;;  %v10752_v45 = vpop.f32.mrf.mxu2  ;;  %v7722_v26 = vld [vmem:[#allocation3 + $0x88] sm:$0xff] }
 0x7c7   :  { %8016 = vtanh.f32 %v3923_v23  ;;  %v3643_v30 = vmul.f32 %v3547_v46, %v10705_v5  ;;  %v3908_v4 = vmul.f32 0.7978846, %v3812_v11  ;;  %v4107_v52 = vadd.f32 1.0, %v8013_v49  ;;  %5036 = vmatpush.bf16.msrb.mxu2 %v7723_v21 }
 0x7c8   :  { %8018 = vtanh.f32 %v3855_v57  ;;  %v10733_v12 = vpop.f32.mrf.mxu3  ;;  %v7709_v57 = vld [vmem:[#allocation3 + $0x40] sm:$0xff]  ;;  %v4246_v59 = vpack.c.bf16 %v4166_v60, %v4158_v44  ;;  %v3702_v56 = vmul.f32 %v10606_v36, %v10537_v32  ;;  %v3790_v46 = vadd.f32 %v3694_v53, %v10520_v10 }
 0x7c9   :  { %8020 = vtanh.f32 %v3863_v43  ;;  %v3739_v29 = vmul.f32 %v3643_v30, %v10705_v5  ;;  %v7733_v43 = vld [vmem:[#allocation3 + $0x158] sm:$0xff]  ;;  %v3435_v27 = vmul.f32 0.5, %v10636_v47  ;;  %v4076_v23 = vadd.f32 1.0, %v8015_v28  ;;  %4956 = vmatpush.bf16.msrb.mxu0 %v7709_v57  ;;  %v7732_v30 = vld [vmem:[#allocation3 + $0x1c0] sm:$0xff] }
 0x7ca   :  { %v3171_v0 = vpop.f32.mrf.mxu0  ;;  %8022 = vtanh.f32 %v3900_v18  ;;  %v3628_v33 = vmul.f32 %v3532_v6, %v10718_v7  ;;  %v3443_v55 = vmul.f32 0.5, %v10680_v13  ;;  %5073 = vmatpush.bf16.msrb.mxu3 %v7733_v43  ;;  %v4180_v47 = vmul.f32 %v4084_v39, %v3412_v31  ;;  %5005 = vmatmul.bf16.gmra.mxu1 %v4246_v59  ;;  %v7721_v59 = vld [vmem:[#allocation3 + $0xb8] sm:$0xff] }
 0x7cb   :  { %v10742_v35 = vadd.f32 %v3171_v0, %v10358_v58  ;;  %v3835_v9 = vadd.f32 %v3739_v29, %v10705_v5  ;;  %8024 = vtanh.f32 %v3908_v4  ;;  %v3798_v49 = vadd.f32 %v3702_v56, %v10537_v32  ;;  %5037 = vmatpush.bf16.msrb.mxu2 %v7722_v26 }
 0x7cc   :  { %v3636_v13 = vmul.f32 %v3540_v3, %v10726_v51  ;;  %v4203_v18 = vmul.f32 %v4107_v52, %v3435_v27  ;;  %v3886_v28 = vmul.f32 0.7978846, %v3790_v46  ;;  %v10763_v6 = vadd.f32 %v10674_v40, %v10545_v19 }
 0x7cd   :  { %v8017_v25 = vpop.eup %8016  ;;  %v3555_v58 = vmul.f32 0.044715, %v10742_v35  ;;  %v3931_v36 = vmul.f32 0.7978846, %v3835_v9  ;;  %v3894_v0 = vmul.f32 0.7978846, %v3798_v49  ;;  %v4172_v53 = vmul.f32 %v4076_v23, %v10721_v2  ;;  %4957 = vmatpush.bf16.msrb.mxu0 %v7708_v50 }
 0x7ce   :  { %v8019_v15 = vpop.eup %8018  ;;  %v4115_v11 = vadd.f32 1.0, %v8017_v25  ;;  %5074 = vmatpush.bf16.msrb.mxu3 %v7732_v30  ;;  %v3724_v3 = vmul.f32 %v3628_v33, %v10718_v7  ;;  %v10770_v4 = vmul.f32 %v10588_v1, %v10553_v42  ;;  %v3487_v40 = vmul.f32 0.044715, %v10731_v63  ;;  %v12058_v25 = vld [vmem:[#allocation46_spill] sm:$0xff]  ;;  %v12060_v23 = vld [vmem:[#allocation39_spill] sm:$0xff] }
 0x7cf   :  { %v10754_v22 = vpop.eup %8020  ;;  %v3651_v24 = vmul.f32 %v3555_v58, %v10742_v35  ;;  %8026 = vtanh.f32 %v3931_v36  ;;  %v10776_v57 = vmul.f32 %v10652_v61, %v10625_v20  ;;  %v10780_v2 = vmul.f32 %v10693_v16, %v10628_v37  ;;  %v12059_v61 = vld [vmem:[#allocation38_spill] sm:$0xff]  ;;  %5038 = vmatpush.bf16.msrb.mxu2 %v7721_v59 }
 0x7d0   :  { %v10759_v29 = vpop.f32.mrf.mxu3  ;;  %v4211_v44 = vmul.f32 %v4115_v11, %v3443_v55  ;;  %8028 = vtanh.f32 %v3886_v28  ;;  %v8023_v9 = vpop.eup %8022  ;;  %v4252_v43 = vpack.c.bf16 %v4180_v47, %v4172_v53  ;;  %v3732_v21 = vmul.f32 %v3636_v13, %v10726_v51  ;;  %v7707_v33 = vld [vmem:[#allocation3 + $0x100] sm:$0xff] }
 0x7d1   :  { %v3747_v31 = vmul.f32 %v3651_v24, %v10742_v35  ;;  %8030 = vtanh.f32 %v3894_v0  ;;  %v8025_v1 = vpop.eup %8024  ;;  %v10785_v56 = vmul.f32 %v10698_v38, %v10633_v54  ;;  %v3495_v46 = vmul.f32 0.044715, %v10763_v6  ;;  %v7731_v38 = vld [vmem:[#allocation3 + $0xc0] sm:$0xff]  ;;  %4958 = vmatpush.bf16.msrb.mxu0 %v7707_v33 }
 0x7d2   :  { %v3222_v39 = vpop.f32.mrf.mxu0  ;;  %v4267_v60 = vpack.c.bf16 %v4211_v44, %v4203_v18  ;;  %v10789_v27 = vperm.slane %v12058_v25, 4  ;;  %v12061_v58 = vpack.c.bf16 %v12059_v61, %v12060_v23  ;;  %v10795_v55 = vmul.f32 0.044715, %v10702_v62  ;;  %5075 = vmatpush.bf16.msrb.mxu3 %v7731_v38 }
 0x7d3   :  { %v3843_v52 = vadd.f32 %v3747_v31, %v10742_v35  ;;  %v3375_v11 = vmul.f32 0.5, %v10592_v34  ;;  %v4047_v36 = vadd.f32 1.0, %v8019_v15  ;;  %v3820_v50 = vadd.f32 %v3724_v3, %v10718_v7  ;;  %v3315_v34 = vpop.f32.mrf.mxu2 }
 0x7d4   :  { %4903 = vmatmul.bf16.gmra.mxu2 %v4267_v60  ;;  %v3383_v47 = vmul.f32 0.5, %v10619_v48  ;;  %v3583_v24 = vmul.f32 %v3487_v40, %v10731_v63  ;;  %v3420_v26 = vmul.f32 0.5, %v10644_v8  ;;  %v3428_v18 = vmul.f32 0.5, %v10655_v14 }
 0x7d5   :  { %4815 = vmatmul.bf16.gmra.mxu0 %v12061_v58  ;;  %v3939_v16 = vmul.f32 0.7978846, %v3843_v52  ;;  %4932 = vmatmul.bf16.gmra.mxu3 %v4252_v43  ;;  %v8027_v30 = vpop.eup %8026  ;;  %v3828_v15 = vadd.f32 %v3732_v21, %v10726_v51  ;;  %v3406_v44 = vmul.f32 0.5, %v10520_v10  ;;  %v3414_v28 = vmul.f32 0.5, %v10537_v32 }
 0x7d6   :  { %v8029_v49 = vpop.eup %8028  ;;  %v3591_v31 = vmul.f32 %v3495_v46, %v10763_v6  ;;  %v10808_v0 = vadd.f32 %v3222_v39, %v10789_v27  ;;  %v10811_v8 = vperm.slane %v12058_v25, 7  ;;  %v4055_v14 = vadd.f32 1.0, %v10754_v22 }
 0x7d7   :  { %8032 = vtanh.f32 %v3939_v16  ;;  %v8031_v48 = vpop.eup %8030  ;;  %v4078_v60 = vadd.f32 1.0, %v8029_v49  ;;  %v10814_v3 = vmul.f32 %v4047_v36, %v3375_v11  ;;  %v3916_v40 = vmul.f32 0.7978846, %v3820_v50  ;;  %v7706_v36 = vld [vmem:[#allocation3 + $0x1d0] sm:$0xff] }
 0x7d8   :  { %v3339_v13 = vpop.f32.mrf.mxu3  ;;  %v4086_v52 = vadd.f32 1.0, %v8031_v48  ;;  %v10818_v10 = vadd.f32 %v10733_v12, %v10417_v17  ;;  %v10822_v32 = vadd.f32 %v10759_v29, %v10417_v17  ;;  %v4092_v39 = vadd.f32 1.0, %v8023_v9  ;;  %4959 = vmatpush.bf16.msrb.mxu0 %v7706_v36 }
 0x7d9   :  { %v4100_v43 = vadd.f32 1.0, %v8025_v1  ;;  %v4123_v59 = vadd.f32 1.0, %v8027_v30  ;;  %v3924_v21 = vmul.f32 0.7978846, %v3828_v15  ;;  %v4174_v46 = vmul.f32 %v4078_v60, %v3406_v44 }
 0x7da   :  { %v3224_v53 = vpop.f32.mrf.mxu0  ;;  %v4182_v25 = vmul.f32 %v4086_v52, %v3414_v28  ;;  %v3469_v22 = vmul.f32 0.044715, %v10808_v0  ;;  %v10827_v23 = vadd.f32 %v10708_v41, %v10545_v19  ;;  %v3451_v12 = vmul.f32 0.5, %v10705_v5  ;;  %v7730_v41 = vld [vmem:[#allocation3 + $0x38] sm:$0xff] }
 0x7db   :  { %v3679_v58 = vmul.f32 %v3583_v24, %v10731_v63  ;;  %v3459_v17 = vmul.f32 0.5, %v10742_v35  ;;  %8034 = vtanh.f32 %v3916_v40  ;;  %v3548_v1 = vmul.f32 0.044715, %v10818_v10  ;;  %5076 = vmatpush.bf16.msrb.mxu3 %v7730_v41  ;;  %v3317_v48 = vpop.f32.mrf.mxu2 }
 0x7dc   :  { %v4254_v9 = vpack.c.bf16 %v4182_v25, %v4174_v46  ;;  %v3556_v16 = vmul.f32 0.044715, %v10822_v32  ;;  %v10835_v33 = vadd.f32 %v3224_v53, %v10789_v27  ;;  %v4196_v11 = vmul.f32 %v4100_v43, %v3428_v18  ;;  %v12062_v43 = vld [vmem:[#allocation40_spill] sm:$0xff] }
 0x7dd   :  { %v8033_v61 = vpop.eup %8032  ;;  %v4219_v50 = vmul.f32 %v4123_v59, %v3451_v12  ;;  %8036 = vtanh.f32 %v3924_v21  ;;  %v3687_v35 = vmul.f32 %v3591_v31, %v10763_v6  ;;  %v3565_v30 = vmul.f32 %v3469_v22, %v10808_v0  ;;  %v12063_v59 = vld [vmem:[#allocation41_spill] sm:$0xff] }
 0x7de   :  { %v4131_v29 = vadd.f32 1.0, %v8033_v61  ;;  %5010 = vmatmul.bf16.gmra.mxu1 %v4254_v9  ;;  %v10840_v24 = vadd.f32 %v3339_v13, %v10811_v8  ;;  %v10842_v49 = vmul.f32 %v4055_v14, %v3383_v47  ;;  %v10846_v18 = vadd.f32 %v10752_v45, %v10545_v19 }
 0x7df   :  { %v4188_v28 = vmul.f32 %v4092_v39, %v3420_v26  ;;  %v3775_v31 = vadd.f32 %v3679_v58, %v10731_v63  ;;  %v10853_v60 = vmul.f32 %v10795_v55, %v10702_v62  ;;  %v3652_v47 = vmul.f32 %v3556_v16, %v10822_v32 }
 0x7e0   :  { %v3341_v38 = vpop.f32.mrf.mxu3  ;;  %v4227_v5 = vmul.f32 %v4131_v29, %v3459_v17  ;;  %v3503_v13 = vmul.f32 0.044715, %v10827_v23  ;;  %v3477_v53 = vmul.f32 0.044715, %v10835_v33  ;;  %v3644_v45 = vmul.f32 %v3548_v1, %v10818_v10 }
 0x7e1   :  { %v8035_v14 = vpop.eup %8034  ;;  %v4260_v40 = vpack.c.bf16 %v4196_v11, %v4188_v28  ;;  %v10860_v52 = vadd.f32 %v3315_v34, %v10545_v19  ;;  %v3783_v26 = vadd.f32 %v3687_v35, %v10763_v6  ;;  %v3661_v39 = vmul.f32 %v3565_v30, %v10808_v0  ;;  %v12066_v35 = vld [vmem:[#allocation48_spill] sm:$0xff] }
 0x7e2   :  { %v10848_v15 = vpop.f32.mrf.mxu0  ;;  %v4275_v44 = vpack.c.bf16 %v4227_v5, %v4219_v50  ;;  %v3472_v55 = vmul.f32 0.044715, %v10840_v24  ;;  %v12064_v21 = vpack.c.bf16 %v12062_v43, %v12063_v59  ;;  %v4239_v46 = vpack.c.bf16 %v10842_v49, %v10814_v3  ;;  %v12065_v5 = vld [vmem:[#allocation47_spill] sm:$0xff] }
 0x7e3   :  { %v3436_v25 = vmul.f32 0.5, %v10718_v7  ;;  %v8037_v61 = vpop.eup %8036  ;;  %v3511_v34 = vmul.f32 0.044715, %v10846_v18  ;;  %v10873_v22 = vadd.f32 %v3341_v38, %v10811_v8  ;;  %v3444_v12 = vmul.f32 0.5, %v10726_v51 }
 0x7e4   :  { %4908 = vmatmul.bf16.gmra.mxu2 %v4275_v44  ;;  %v3871_v58 = vmul.f32 0.7978846, %v3775_v31  ;;  %v3599_v17 = vmul.f32 %v3503_v13, %v10827_v23  ;;  %v3573_v29 = vmul.f32 %v3477_v53, %v10835_v33  ;;  %v4108_v9 = vadd.f32 1.0, %v8035_v14 }
 0x7e5   :  { %4820 = vmatmul.bf16.gmra.mxu0 %v12064_v21  ;;  %4937 = vmatmul.bf16.gmra.mxu3 %v4260_v40  ;;  %v3748_v1 = vmul.f32 %v3652_v47, %v10822_v32  ;;  %v3519_v16 = vmul.f32 0.044715, %v10860_v52  ;;  %v10883_v11 = vadd.f32 %v3317_v48, %v10545_v19  ;;  %v3879_v36 = vmul.f32 0.7978846, %v3783_v26  ;;  %v3320_v40 = vpop.f32.mrf.mxu2  ;;  %v7705_v21 = vld [vmem:[#allocation3 + $0x148] sm:$0xff] }
 0x7e6   :  { %v3740_v41 = vmul.f32 %v3644_v45, %v10818_v10  ;;  %v3757_v51 = vadd.f32 %v3661_v39, %v10808_v0  ;;  %v3568_v38 = vmul.f32 %v3472_v55, %v10840_v24  ;;  %v4116_v50 = vadd.f32 1.0, %v8037_v61  ;;  %4960 = vmatpush.bf16.msrb.mxu0 %v7705_v21 }
 0x7e7   :  { %v3710_v30 = vmul.f32 %v12066_v35, %v12065_v5  ;;  %v3607_v44 = vmul.f32 %v3511_v34, %v10846_v18  ;;  %v3480_v28 = vmul.f32 0.044715, %v10873_v22  ;;  %8038 = vtanh.f32 %v3871_v58 }
 0x7e8   :  { %v10880_v7 = vpop.f32.mrf.mxu3  ;;  %v3718_v48 = vmul.f32 %v10770_v4, %v10553_v42  ;;  %v3669_v47 = vmul.f32 %v3573_v29, %v10835_v33  ;;  %v4204_v13 = vmul.f32 %v4108_v9, %v3436_v25  ;;  %v3844_v53 = vadd.f32 %v3748_v1, %v10822_v32  ;;  %v7729_v25 = vld [vmem:[#allocation3 + $0x198] sm:$0xff] }
 0x7e9   :  { %v3806_v14 = vadd.f32 %v3710_v30, %v12065_v5  ;;  %v10900_v45 = vmul.f32 %v3519_v16, %v10860_v52  ;;  %8040 = vtanh.f32 %v3879_v36  ;;  %v3836_v26 = vadd.f32 %v3740_v41, %v10818_v10  ;;  %5077 = vmatpush.bf16.msrb.mxu3 %v7729_v25 }
 0x7ea   :  { %v10892_v31 = vpop.f32.mrf.mxu0  ;;  %v3814_v39 = vadd.f32 %v3718_v48, %v10553_v42  ;;  %v3853_v55 = vmul.f32 0.7978846, %v3757_v51  ;;  %v3664_v43 = vmul.f32 %v3568_v38, %v10840_v24  ;;  %v3527_v4 = vmul.f32 0.044715, %v10883_v11 }
 0x7eb   :  { %v4212_v59 = vmul.f32 %v4116_v50, %v3444_v12  ;;  %v3576_v61 = vmul.f32 %v3480_v28, %v10873_v22  ;;  %v10908_v34 = vadd.f32 %v3320_v40, %v10545_v19  ;;  %v3902_v58 = vmul.f32 0.7978846, %v3806_v14 }
 0x7ec   :  { %v3910_v29 = vmul.f32 0.7978846, %v3814_v39  ;;  %v3765_v9 = vadd.f32 %v3669_v47, %v10835_v33  ;;  %v3391_v1 = vmul.f32 0.5, %v10731_v63  ;;  %v10913_v16 = vmul.f32 0.5, %v10763_v6 }
 0x7ed   :  { %v3940_v36 = vmul.f32 0.7978846, %v3844_v53  ;;  %v8039_v12 = vpop.eup %8038  ;;  %v10916_v41 = vmul.f32 0.5, %v10808_v0  ;;  %v10919_v38 = vmul.f32 0.5, %v10818_v10  ;;  %v3932_v50 = vmul.f32 0.7978846, %v3836_v26 }
 0x7ee   :  { %8042 = vtanh.f32 %v3902_v58  ;;  %v3760_v35 = vadd.f32 %v3664_v43, %v10840_v24  ;;  %v10923_v63 = vmul.f32 %v3527_v4, %v10883_v11  ;;  %v4268_v6 = vpack.c.bf16 %v4212_v59, %v4204_v13 }
 0x7ef   :  { %8044 = vtanh.f32 %v3910_v29  ;;  %v8041_v30 = vpop.eup %8040  ;;  %v10926_v28 = vmul.f32 0.5, %v10840_v24  ;;  %v3672_v0 = vmul.f32 %v3576_v61, %v10873_v22  ;;  %v3535_v10 = vmul.f32 0.044715, %v10908_v34 }
 0x7f0   :  { %v3346_v51 = vpop.f32.mrf.mxu3  ;;  %8046 = vtanh.f32 %v3853_v55  ;;  %v3861_v47 = vmul.f32 0.7978846, %v3765_v9  ;;  %v4063_v53 = vadd.f32 1.0, %v8039_v12  ;;  %v3695_v14 = vmul.f32 %v3599_v17, %v10827_v23  ;;  %v12067_v55 = vld [vmem:[#allocation42_spill] sm:$0xff]  ;;  %v12068_v17 = vld [vmem:[#allocation43_spill] sm:$0xff] }
 0x7f1   :  { %8048 = vtanh.f32 %v3940_v36  ;;  %v3703_v13 = vmul.f32 %v3607_v44, %v10846_v18  ;;  %v3726_v40 = vmul.f32 %v10776_v57, %v10625_v20  ;;  %v3734_v24 = vmul.f32 %v10780_v2, %v10628_v37  ;;  %v3322_v2 = vpop.f32.mrf.mxu2 }
 0x7f2   :  { %v10929_v48 = vpop.f32.mrf.mxu0  ;;  %8050 = vtanh.f32 %v3932_v50  ;;  %v3856_v26 = vmul.f32 0.7978846, %v3760_v35  ;;  %v10940_v39 = vadd.f32 %v10848_v15, %v10789_v27  ;;  %v12069_v43 = vpack.c.bf16 %v12067_v55, %v12068_v17 }
 0x7f3   :  { %v4071_v44 = vadd.f32 1.0, %v8041_v30  ;;  %v3422_v4 = vmul.f32 0.5, %v12065_v5  ;;  %v3768_v59 = vadd.f32 %v3672_v0, %v10873_v22  ;;  %v3430_v21 = vmul.f32 0.5, %v10553_v42 }
 0x7f4   :  { %5039 = vmatmul.bf16.vlgmr.msrb.gmra.mxu2 %v4239_v46  ;;  %v8043_v57 = vpop.eup %8042  ;;  %v3822_v15 = vadd.f32 %v3726_v40, %v10625_v20  ;;  %v3830_v25 = vadd.f32 %v3734_v24, %v10628_v37  ;;  %8052 = vtanh.f32 %v3861_v47  ;;  %v10953_v49 = vmul.f32 %v4063_v53, %v3391_v1 }
 0x7f5   :  { %4825 = vmatmul.bf16.gmra.mxu0 %v12069_v43  ;;  %4942 = vmatmul.bf16.gmra.mxu3 %v4268_v6  ;;  %v8045_v3 = vpop.eup %8044  ;;  %v4094_v46 = vadd.f32 1.0, %v8043_v57  ;;  %v3791_v61 = vadd.f32 %v3695_v14, %v10827_v23  ;;  %v3799_v9 = vadd.f32 %v3703_v13, %v10846_v18  ;;  %8054 = vtanh.f32 %v3856_v26 }
 0x7f6   :  { %v8047_v58 = vpop.eup %8046  ;;  %v4102_v29 = vadd.f32 1.0, %v8045_v3  ;;  %v3918_v36 = vmul.f32 0.7978846, %v3822_v15  ;;  %v3926_v12 = vmul.f32 0.7978846, %v3830_v25  ;;  %v10961_v50 = vadd.f32 %v10892_v31, %v10789_v27 }
 0x7f7   :  { %v8049_v42 = vpop.eup %8048  ;;  %v10964_v1 = vadd.f32 %v3322_v2, %v10545_v19  ;;  %v4190_v35 = vmul.f32 %v4094_v46, %v3422_v4  ;;  %v3864_v30 = vmul.f32 0.7978846, %v3768_v59  ;;  %v3485_v0 = vmul.f32 0.044715, %v10940_v39 }
 0x7f8   :  { %v10956_v5 = vpop.f32.mrf.mxu3  ;;  %v8051_v6 = vpop.eup %8050  ;;  %v4198_v53 = vmul.f32 %v4102_v29, %v3430_v21  ;;  %8056 = vtanh.f32 %v3918_v36  ;;  %v10970_v14 = vadd.f32 %v3346_v51, %v10811_v8  ;;  %v4167_v13 = vmul.f32 %v4071_v44, %v10913_v16 }
 0x7f9   :  { %v3887_v40 = vmul.f32 0.7978846, %v3791_v61  ;;  %8058 = vtanh.f32 %v3926_v12  ;;  %v10975_v31 = vadd.f32 %v10880_v7, %v10811_v8  ;;  %v4132_v24 = vadd.f32 1.0, %v8049_v42  ;;  %v3325_v46 = vpop.f32.mrf.mxu2 }
 0x7fa   :  { %v10967_v47 = vpop.f32.mrf.mxu0  ;;  %v4262_v26 = vpack.c.bf16 %v4198_v53, %v4190_v35  ;;  %v3895_v55 = vmul.f32 0.7978846, %v3799_v9  ;;  %v8053_v17 = vpop.eup %8052  ;;  %v3381_v43 = vmul.f32 0.5, %v10835_v33  ;;  %v3493_v4 = vmul.f32 0.044715, %v10961_v50 }
 0x7fb   :  { %v3460_v57 = vmul.f32 0.5, %v10822_v32  ;;  %v4124_v51 = vadd.f32 1.0, %v8051_v6  ;;  %v4045_v59 = vadd.f32 1.0, %v8047_v58  ;;  %v10981_v16 = vmul.f32 0.5, %v10873_v22  ;;  %v8055_v7 = vpop.eup %8054 }
 0x7fc   :  { %8060 = vtanh.f32 %v3864_v30  ;;  %v10984_v44 = vmul.f32 %v3535_v10, %v10908_v34  ;;  %5015 = vmatmul.bf16.gmra.mxu1 %v4262_v26  ;;  %v3581_v2 = vmul.f32 %v3485_v0, %v10940_v39  ;;  %v3496_v21 = vmul.f32 0.044715, %v10970_v14 }
 0x7fd   :  { %v3543_v33 = vmul.f32 0.044715, %v10964_v1  ;;  %8062 = vtanh.f32 %v3887_v40  ;;  %v3488_v32 = vmul.f32 0.044715, %v10975_v31  ;;  %v4247_v22 = vpack.c.bf16 %v4167_v13, %v10953_v49 }
 0x7fe   :  { %v8057_v15 = vpop.eup %8056  ;;  %v4228_v3 = vmul.f32 %v4132_v24, %v3460_v57  ;;  %8064 = vtanh.f32 %v3895_v55  ;;  %v3589_v61 = vmul.f32 %v3493_v4, %v10961_v50  ;;  %v4220_v58 = vmul.f32 %v4124_v51, %v10919_v38 }
 0x7ff   :  { %v8059_v10 = vpop.eup %8058  ;;  %v10994_v29 = vadd.f32 %v3325_v46, %v10545_v19  ;;  %v4053_v9 = vadd.f32 1.0, %v8053_v17  ;;  %v3438_v12 = vmul.f32 0.5, %v10625_v20  ;;  %v3446_v42 = vmul.f32 0.5, %v10628_v37  ;;  %v12071_v17 = vld [vmem:[#allocation45_spill] sm:$0xff] }
 0x800   :  { %v3351_v25 = vpop.f32.mrf.mxu3  ;;  %v4110_v35 = vadd.f32 1.0, %v8057_v15  ;;  %v4118_v49 = vadd.f32 1.0, %v8059_v10  ;;  %v3592_v6 = vmul.f32 %v3496_v21, %v10970_v14  ;;  %v11002_v30 = vmul.f32 %v3543_v33, %v10964_v1  ;;  %v11027_v21 = vpop.f32.mrf.mxu1 }
 0x801   :  { %v3407_v0 = vmul.f32 0.5, %v10827_v23  ;;  %v3711_v38 = vmul.f32 %v10900_v45, %v10860_v52  ;;  %v11009_v13 = vadd.f32 %v10929_v48, %v10789_v27  ;;  %v4276_v20 = vpack.c.bf16 %v4228_v3, %v4220_v58  ;;  %v12070_v23 = vld [vmem:[#allocation44_spill] sm:$0xff] }
 0x802   :  { %v10996_v36 = vpop.f32.mrf.mxu0  ;;  %v8061_v53 = vpop.eup %8060  ;;  %v3415_v37 = vmul.f32 0.5, %v10846_v18  ;;  %v3719_v40 = vmul.f32 %v10923_v63, %v10883_v11  ;;  %v4048_v26 = vadd.f32 1.0, %v8055_v7  ;;  %v3584_v55 = vmul.f32 %v3488_v32, %v10975_v31 }
 0x803   :  { %v8063_v24 = vpop.eup %8062  ;;  %v12072_v4 = vpack.c.bf16 %v12070_v23, %v12071_v17  ;;  %v11019_v45 = vmul.f32 0.044715, %v10994_v29  ;;  %v11022_v48 = vmul.f32 %v4045_v59, %v10916_v41  ;;  %v11024_v18 = vmul.f32 %v4053_v9, %v3381_v43 }
 0x804   :  { %5044 = vmatmul.bf16.gmra.mxu2 %v4247_v22  ;;  %v8065_v57 = vpop.eup %8064  ;;  %v4206_v63 = vmul.f32 %v4110_v35, %v3438_v12  ;;  %v4214_v51 = vmul.f32 %v4118_v49, %v3446_v42  ;;  %v3685_v7 = vmul.f32 %v3589_v61, %v10961_v50  ;;  %v4056_v33 = vadd.f32 1.0, %v8061_v53 }
 0x805   :  { %4830 = vmatmul.bf16.gmra.mxu0 %v12072_v4  ;;  %4947 = vmatmul.bf16.gmra.mxu3 %v4276_v20  ;;  %v3807_v15 = vadd.f32 %v3711_v38, %v10860_v52  ;;  %v3742_v32 = vmul.f32 %v10785_v56, %v10633_v54  ;;  %v3688_v22 = vmul.f32 %v3592_v6, %v10970_v14  ;;  %v3501_v41 = vmul.f32 0.044715, %v11009_v13 }
 0x806   :  { %v3815_v43 = vadd.f32 %v3719_v40, %v10883_v11  ;;  %v3677_v3 = vmul.f32 %v3581_v2, %v10940_v39  ;;  %v3750_v46 = vmul.f32 %v10853_v60, %v10702_v62  ;;  %v4079_v10 = vadd.f32 1.0, %v8063_v24  ;;  %v3327_v60 = vpop.f32.mrf.mxu2 }
 0x807   :  { %v4087_v61 = vadd.f32 1.0, %v8065_v57  ;;  %v3838_v58 = vadd.f32 %v3742_v32, %v10633_v54  ;;  %v3680_v9 = vmul.f32 %v3584_v55, %v10975_v31  ;;  %v11044_v56 = vadd.f32 %v10967_v47, %v10789_v27 }
 0x808   :  { %v11034_v59 = vpop.f32.mrf.mxu3  ;;  %v4270_v42 = vpack.c.bf16 %v4214_v51, %v4206_v63  ;;  %v3781_v35 = vadd.f32 %v3685_v7, %v10961_v50  ;;  %v3846_v2 = vadd.f32 %v3750_v46, %v10702_v62  ;;  %v11051_v49 = vadd.f32 %v3351_v25, %v10811_v8  ;;  %v11069_v32 = vpop.f32.mrf.mxu1 }
 0x809   :  { %v3903_v6 = vmul.f32 0.7978846, %v3807_v15  ;;  %v3934_v38 = vmul.f32 0.7978846, %v3838_v58  ;;  %v3784_v53 = vadd.f32 %v3688_v22, %v10970_v14  ;;  %v11055_v20 = vadd.f32 %v3327_v60, %v10545_v19 }
 0x80a   :  { %v11046_v12 = vpop.f32.mrf.mxu0  ;;  %v3911_v47 = vmul.f32 0.7978846, %v3815_v43  ;;  %v3773_v40 = vadd.f32 %v3677_v3, %v10940_v39  ;;  %v3942_v24 = vmul.f32 0.7978846, %v3846_v2  ;;  %v11060_v55 = vadd.f32 %v10956_v5, %v10811_v8 }
 0x80b   :  { %v4175_v23 = vmul.f32 %v4079_v10, %v3407_v0  ;;  %8066 = vtanh.f32 %v3934_v38  ;;  %v3776_v25 = vadd.f32 %v3680_v9, %v10975_v31  ;;  %v3509_v17 = vmul.f32 0.044715, %v11044_v56 }
 0x80c   :  { %v4183_v4 = vmul.f32 %v4087_v61, %v3415_v37  ;;  %5020 = vmatmul.bf16.gmra.mxu1 %v4270_v42  ;;  %v3877_v57 = vmul.f32 0.7978846, %v3781_v35  ;;  %8068 = vtanh.f32 %v3942_v24  ;;  %v3512_v19 = vmul.f32 0.044715, %v11051_v49 }
 0x80d   :  { %v4144_v63 = vmul.f32 %v4048_v26, %v10926_v28  ;;  %8070 = vtanh.f32 %v3903_v6  ;;  %v3880_v51 = vmul.f32 0.7978846, %v3784_v53  ;;  %v4237_v5 = vpack.c.bf16 %v11024_v18, %v11022_v48 }
 0x80e   :  { %v4152_v0 = vmul.f32 %v4056_v33, %v10981_v16  ;;  %8072 = vtanh.f32 %v3911_v47  ;;  %v3869_v15 = vmul.f32 0.7978846, %v3773_v40  ;;  %v3597_v37 = vmul.f32 %v3501_v41, %v11009_v13 }
 0x80f   :  { %v3504_v22 = vmul.f32 0.044715, %v11060_v55  ;;  %v3559_v43 = vmul.f32 0.044715, %v11055_v20  ;;  %v3872_v3 = vmul.f32 0.7978846, %v3776_v25  ;;  %v3605_v28 = vmul.f32 %v3509_v17, %v11044_v56 }
 0x810   :  { %v3356_v7 = vpop.f32.mrf.mxu3  ;;  %v4255_v46 = vpack.c.bf16 %v4183_v4, %v4175_v23  ;;  %8074 = vtanh.f32 %v3877_v57  ;;  %v3454_v48 = vmul.f32 0.5, %v10633_v54  ;;  %v3608_v18 = vmul.f32 %v3512_v19, %v11051_v49 }
 0x811   :  { %v8067_v16 = vpop.eup %8066  ;;  %v3462_v33 = vmul.f32 0.5, %v10702_v62  ;;  %8076 = vtanh.f32 %v3880_v51  ;;  %v3727_v41 = vmul.f32 %v10984_v44, %v10908_v34  ;;  %v4240_v61 = vpack.c.bf16 %v4152_v0, %v4144_v63 }
 0x812   :  { %v11075_v26 = vpop.f32.mrf.mxu0  ;;  %v8069_v10 = vpop.eup %8068  ;;  %8078 = vtanh.f32 %v3869_v15  ;;  %v4126_v58 = vadd.f32 1.0, %v8067_v16  ;;  %v3735_v9 = vmul.f32 %v11002_v30, %v10964_v1  ;;  %v3600_v35 = vmul.f32 %v3504_v22, %v11060_v55 }
 0x813   :  { %v8071_v42 = vpop.eup %8070  ;;  %v11087_v54 = vmul.f32 %v11019_v45, %v10994_v29  ;;  %v4134_v62 = vadd.f32 1.0, %v8069_v10  ;;  %8080 = vtanh.f32 %v3872_v3  ;;  %v11090_v44 = vmul.f32 %v3559_v43, %v11055_v20 }
 0x814   :  { %5049 = vmatmul.bf16.gmra.mxu2 %v4255_v46  ;;  %v8073_v2 = vpop.eup %8072  ;;  %v3423_v60 = vmul.f32 0.5, %v10860_v52  ;;  %v4222_v6 = vmul.f32 %v4126_v58, %v3454_v48  ;;  %v3701_v30 = vmul.f32 %v3605_v28, %v11044_v56  ;;  %v3431_v38 = vmul.f32 0.5, %v10883_v11 }
 0x815   :  { %4961 = vmatmul.bf16.vlgmr.msrb.gmra.mxu0 %v4237_v5  ;;  %5078 = vmatmul.bf16.vlgmr.msrb.gmra.mxu3 %v4240_v61  ;;  %v4230_v53 = vmul.f32 %v4134_v62, %v3462_v33  ;;  %v3823_v45 = vadd.f32 %v3727_v41, %v10908_v34  ;;  %v3704_v47 = vmul.f32 %v3608_v18, %v11051_v49  ;;  %v4095_v23 = vadd.f32 1.0, %v8071_v42 }
 0x816   :  { %v8075_v40 = vpop.eup %8074  ;;  %v3389_v25 = vmul.f32 0.5, %v10940_v39  ;;  %v3831_v17 = vadd.f32 %v3735_v9, %v10964_v1  ;;  %v3693_v52 = vmul.f32 %v3597_v37, %v11009_v13  ;;  %v4103_v19 = vadd.f32 1.0, %v8073_v2 }
 0x817   :  { %v11097_v24 = vpop.f32.mrf.mxu2  ;;  %v8077_v4 = vpop.eup %8076  ;;  %v3397_v11 = vmul.f32 0.5, %v10961_v50  ;;  %v3392_v63 = vmul.f32 0.5, %v10975_v31  ;;  %v3696_v51 = vmul.f32 %v3600_v35, %v11060_v55  ;;  %v11109_v0 = vadd.f32 %v10996_v36, %v10789_v27 }
 0x818   :  { %v11102_v57 = vpop.f32.mrf.mxu3  ;;  %v8079_v5 = vpop.eup %8078  ;;  %v11113_v39 = vadd.f32 %v11046_v12, %v10789_v27  ;;  %v4278_v37 = vpack.c.bf16 %v4230_v53, %v4222_v6  ;;  %v3797_v22 = vadd.f32 %v3701_v30, %v11044_v56  ;;  %v11121_v31 = vadd.f32 %v3356_v7, %v10811_v8 }
 0x819   :  { %v8081_v43 = vpop.eup %8080  ;;  %v11118_v50 = vpop.f32.mrf.mxu1  ;;  %v4069_v3 = vadd.f32 1.0, %v8075_v40  ;;  %v3919_v28 = vmul.f32 0.7978846, %v3823_v45  ;;  %v3800_v36 = vadd.f32 %v3704_v47, %v11051_v49  ;;  %v4191_v46 = vmul.f32 %v4095_v23, %v3423_v60 }
 0x81a   :  { %v11115_v15 = vpop.f32.mrf.mxu0  ;;  %v4072_v48 = vadd.f32 1.0, %v8077_v4  ;;  %v3927_v16 = vmul.f32 0.7978846, %v3831_v17  ;;  %v3789_v12 = vadd.f32 %v3693_v52, %v11009_v13  ;;  %v11127_v18 = vadd.f32 %v11034_v59, %v10811_v8 }
 0x81b   :  { %v4199_v33 = vmul.f32 %v4103_v19, %v3431_v38  ;;  %v4061_v41 = vadd.f32 1.0, %v8079_v5  ;;  %v3792_v10 = vadd.f32 %v3696_v51, %v11060_v55  ;;  %v3525_v7 = vmul.f32 0.044715, %v11113_v39 }
 0x81c   :  { %5025 = vmatmul.bf16.gmra.mxu1 %v4278_v37  ;;  %v3400_v61 = vmul.f32 0.5, %v10970_v14  ;;  %v4064_v58 = vadd.f32 1.0, %v8081_v43  ;;  %v3893_v9 = vmul.f32 0.7978846, %v3797_v22  ;;  %v3528_v42 = vmul.f32 0.044715, %v11121_v31 }
 0x81d   :  { %v4165_v35 = vmul.f32 %v4069_v3, %v3397_v11  ;;  %8082 = vtanh.f32 %v3919_v28  ;;  %v3896_v62 = vmul.f32 0.7978846, %v3800_v36  ;;  %v3517_v2 = vmul.f32 0.044715, %v11109_v0 }
 0x81e   :  { %v4168_v60 = vmul.f32 %v4072_v48, %v3400_v61  ;;  %8084 = vtanh.f32 %v3927_v16  ;;  %v3885_v6 = vmul.f32 0.7978846, %v3789_v12  ;;  %v3520_v30 = vmul.f32 0.044715, %v11127_v18 }
 0x81f   :  { %v11134_v59 = vpop.f32.mrf.mxu2  ;;  %v4263_v53 = vpack.c.bf16 %v4199_v33, %v4191_v46  ;;  %v4157_v45 = vmul.f32 %v4061_v41, %v3389_v25  ;;  %v3888_v14 = vmul.f32 0.7978846, %v3792_v10  ;;  %v3621_v47 = vmul.f32 %v3525_v7, %v11113_v39 }
 0x820   :  { %v3361_v38 = vpop.f32.mrf.mxu3  ;;  %v4160_v23 = vmul.f32 %v4064_v58, %v3392_v63  ;;  %8086 = vtanh.f32 %v3893_v9  ;;  %v3743_v17 = vmul.f32 %v11087_v54, %v10994_v29  ;;  %v3624_v52 = vmul.f32 %v3528_v42, %v11121_v31 }
 0x821   :  { %v4245_v4 = vpack.c.bf16 %v4165_v35, %v4157_v45  ;;  %8088 = vtanh.f32 %v3896_v62  ;;  %v3751_v19 = vmul.f32 %v11090_v44, %v11055_v20  ;;  %v3613_v11 = vmul.f32 %v3517_v2, %v11109_v0  ;;  %v11146_v5 = vpop.f32.mrf.mxu1 }
 0x822   :  { %v11138_v40 = vpop.f32.mrf.mxu0  ;;  %v4248_v25 = vpack.c.bf16 %v4168_v60, %v4160_v23  ;;  %8090 = vtanh.f32 %v3885_v6  ;;  %v3616_v63 = vmul.f32 %v3520_v30, %v11127_v18  ;;  %v3839_v37 = vadd.f32 %v3743_v17, %v10994_v29 }
 0x823   :  { %v8083_v51 = vpop.eup %8082  ;;  %8092 = vtanh.f32 %v3888_v14  ;;  %v3717_v22 = vmul.f32 %v3621_v47, %v11113_v39  ;;  %v3847_v44 = vadd.f32 %v3751_v19, %v11055_v20  ;;  %v3720_v43 = vmul.f32 %v3624_v52, %v11121_v31 }
 0x824   :  { %5054 = vmatmul.bf16.gmra.mxu2 %v4263_v53  ;;  %v8085_v54 = vpop.eup %8084  ;;  %v3439_v36 = vmul.f32 0.5, %v10908_v34  ;;  %v4111_v46 = vadd.f32 1.0, %v8083_v51  ;;  %v3405_v48 = vmul.f32 0.5, %v11009_v13  ;;  %v3709_v16 = vmul.f32 %v3613_v11, %v11109_v0 }
 0x825   :  { %4966 = vmatmul.bf16.gmra.mxu0 %v4245_v4  ;;  %5083 = vmatmul.bf16.gmra.mxu3 %v4248_v25  ;;  %v3447_v41 = vmul.f32 0.5, %v10964_v1  ;;  %v4119_v10 = vadd.f32 1.0, %v8085_v54  ;;  %v3413_v7 = vmul.f32 0.5, %v11044_v56  ;;  %v3712_v61 = vmul.f32 %v3616_v63, %v11127_v18  ;;  %v11192_v4 = vld [vmem:[%s11944_s18] ss:$0 sm:$0xff] }
 0x826   :  { %v8087_v3 = vpop.eup %8086  ;;  %v11165_v9 = vadd.f32 %v11075_v26, %v10789_v27  ;;  %v11169_v34 = vadd.f32 %v11115_v15, %v10789_v27  ;;  %v3935_v42 = vmul.f32 0.7978846, %v3839_v37  ;;  %v3813_v35 = vadd.f32 %v3717_v22, %v11113_v39 }
 0x827   :  { %v11153_v28 = vpop.f32.mrf.mxu2  ;;  %v8089_v12 = vpop.eup %8088  ;;  %v11175_v62 = vadd.f32 %v3361_v38, %v10811_v8  ;;  %v4085_v56 = vadd.f32 1.0, %v8087_v3  ;;  %v3943_v2 = vmul.f32 0.7978846, %v3847_v44  ;;  %v3816_v60 = vadd.f32 %v3720_v43, %v11121_v31 }
 0x828   :  { %v11158_v33 = vpop.f32.mrf.mxu3  ;;  %v8091_v58 = vpop.eup %8090  ;;  %v4207_v6 = vmul.f32 %v4111_v46, %v3439_v36  ;;  %v3416_v26 = vmul.f32 0.5, %v11051_v49  ;;  %v4088_v30 = vadd.f32 1.0, %v8089_v12  ;;  %v3805_v15 = vadd.f32 %v3709_v16, %v11109_v0 }
 0x829   :  { %v8093_v1 = vpop.eup %8092  ;;  %v11182_v53 = vadd.f32 %v11102_v57, %v10811_v8  ;;  %v4215_v45 = vmul.f32 %v4119_v10, %v3447_v41  ;;  %v4077_v14 = vadd.f32 1.0, %v8091_v58  ;;  %v3808_v47 = vadd.f32 %v3712_v61, %v11127_v18  ;;  %v11186_v52 = vpop.f32.mrf.mxu1 }
 0x82a   :  { %v11171_v13 = vpop.f32.mrf.mxu0  ;;  %v3541_v38 = vmul.f32 0.044715, %v11169_v34  ;;  %v4080_v23 = vadd.f32 1.0, %v8093_v1  ;;  %8094 = vtanh.f32 %v3935_v42  ;;  %v3909_v17 = vmul.f32 0.7978846, %v3813_v35 }
 0x82b   :  { %v3544_v49 = vmul.f32 0.044715, %v11175_v62  ;;  %v4181_v57 = vmul.f32 %v4085_v56, %v3413_v7  ;;  %8096 = vtanh.f32 %v3943_v2  ;;  %v3912_v19 = vmul.f32 0.7978846, %v3816_v60 }
 0x82c   :  { %v3533_v11 = vmul.f32 0.044715, %v11165_v9  ;;  %v3408_v51 = vmul.f32 0.5, %v11060_v55  ;;  %v4184_v63 = vmul.f32 %v4088_v30, %v3416_v26  ;;  %v3901_v54 = vmul.f32 0.7978846, %v3805_v15 }
 0x82d   :  { %v3536_v37 = vmul.f32 0.044715, %v11182_v53  ;;  %v4173_v44 = vmul.f32 %v4077_v14, %v3405_v48  ;;  %v3904_v43 = vmul.f32 0.7978846, %v3808_v47  ;;  %v3637_v3 = vmul.f32 %v3541_v38, %v11169_v34 }
 0x82e   :  { %v4271_v46 = vpack.c.bf16 %v4215_v45, %v4207_v6  ;;  %v4176_v16 = vmul.f32 %v4080_v23, %v3408_v51  ;;  %8098 = vtanh.f32 %v3909_v17  ;;  %v3640_v12 = vmul.f32 %v3544_v49, %v11175_v62 }
 0x82f   :  { %v11195_v25 = vpop.f32.mrf.mxu2  ;;  %v4253_v10 = vpack.c.bf16 %v4181_v57, %v4173_v44  ;;  %8100 = vtanh.f32 %v3912_v19  ;;  %v3629_v7 = vmul.f32 %v3533_v11, %v11165_v9  ;;  %v3632_v48 = vmul.f32 %v3536_v37, %v11182_v53 }
 0x830   :  { %v3366_v22 = vpop.f32.mrf.mxu3  ;;  %v8095_v55 = vpop.eup %8094  ;;  %v4256_v61 = vpack.c.bf16 %v4184_v63, %v4176_v16  ;;  %8102 = vtanh.f32 %v3901_v54  ;;  %v3733_v35 = vmul.f32 %v3637_v3, %v11169_v34  ;;  %v3455_v56 = vmul.f32 0.5, %v10994_v29 }
 0x831   :  { %v8097_v58 = vpop.eup %8096  ;;  %8104 = vtanh.f32 %v3904_v43  ;;  %v3736_v2 = vmul.f32 %v3640_v12, %v11175_v62  ;;  %v3463_v26 = vmul.f32 0.5, %v11055_v20  ;;  %v4127_v30 = vadd.f32 1.0, %v8095_v55  ;;  %v11213_v14 = vpop.f32.mrf.mxu1 }
 0x832   :  { %v4806_v36 = vpop.f32.mrf.mxu0  ;;  %v4135_v15 = vadd.f32 1.0, %v8097_v58  ;;  %v3421_v38 = vmul.f32 0.5, %v11109_v0  ;;  %v3728_v29 = vmul.f32 %v3632_v48, %v11182_v53  ;;  %v11220_v17 = vadd.f32 %v11138_v40, %v10789_v27 }
 0x833   :  { %v4807_v41 = vadd.f32 %v11192_v4, %v4806_v36  ;;  %v11224_v20 = vadd.f32 %v11171_v13, %v10789_v27  ;;  %v3829_v19 = vadd.f32 %v3733_v35, %v11169_v34  ;;  %v11230_v0 = vadd.f32 %v3366_v22, %v10811_v8 }
 0x834   :  { %5059 = vmatmul.bf16.gmra.mxu2 %v4271_v46  ;;  %v8099_v60 = vpop.eup %8098  ;;  %v3832_v63 = vadd.f32 %v3736_v2, %v11175_v62  ;;  %v4223_v40 = vmul.f32 %v4127_v30, %v3455_v56  ;;  %v4231_v54 = vmul.f32 %v4135_v15, %v3463_v26  ;;  %v11237_v13 = vadd.f32 %v11158_v33, %v10811_v8 }
 0x835   :  { %v4846_v42 = vadd.f32 %v11027_v21, %v4807_v41  ;;  %4971 = vmatmul.bf16.gmra.mxu0 %v4253_v10  ;;  %5088 = vmatmul.bf16.gmra.mxu3 %v4256_v61  ;;  %v3725_v21 = vmul.f32 %v3629_v7, %v11165_v9  ;;  %v8101_v45 = vpop.eup %8100  ;;  %v4101_v51 = vadd.f32 1.0, %v8099_v60  ;;  %v3824_v22 = vadd.f32 %v3728_v29, %v11182_v53 }
 0x836   :  { %v8103_v23 = vpop.eup %8102  ;;  %v4104_v37 = vadd.f32 1.0, %v8101_v45  ;;  %v3557_v3 = vmul.f32 0.044715, %v11224_v20  ;;  %v3432_v36 = vmul.f32 0.5, %v11121_v31  ;;  %v3925_v16 = vmul.f32 0.7978846, %v3829_v19 }
 0x837   :  { %v4885_v1 = vadd.f32 %v11097_v24, %v4846_v42  ;;  %v11209_v6 = vpop.f32.mrf.mxu2  ;;  %v3429_v24 = vmul.f32 0.5, %v11113_v39  ;;  %v8105_v11 = vpop.eup %8104  ;;  %v3821_v27 = vadd.f32 %v3725_v21, %v11165_v9  ;;  %v4093_v43 = vadd.f32 1.0, %v8103_v23 }
 0x838   :  { %v4923_v47 = vpop.f32.mrf.mxu3  ;;  %v4096_v46 = vadd.f32 1.0, %v8105_v11  ;;  %v3560_v12 = vmul.f32 0.044715, %v11230_v0  ;;  %v3928_v55 = vmul.f32 0.7978846, %v3832_v63  ;;  %v4200_v7 = vmul.f32 %v4104_v37, %v3432_v36 }
 0x839   :  { %v11226_v49 = vadd.f32 %v4923_v47, %v4885_v1  ;;  %v4197_v10 = vmul.f32 %v4101_v51, %v3429_v24  ;;  %v3549_v8 = vmul.f32 0.044715, %v11220_v17  ;;  %v3917_v61 = vmul.f32 0.7978846, %v3821_v27  ;;  %v11253_v60 = vpop.f32.mrf.mxu1 }
 0x83a   :  { %v4808_v57 = vpop.f32.mrf.mxu0  ;;  %v3552_v58 = vmul.f32 0.044715, %v11237_v13  ;;  %v4279_v31 = vpack.c.bf16 %v4231_v54, %v4223_v40  ;;  %v4189_v42 = vmul.f32 %v4093_v43, %v3421_v38  ;;  %v3920_v35 = vmul.f32 0.7978846, %v3824_v22 }
 0x83b   :  { %v4809_v39 = vadd.f32 %v11192_v4, %v4808_v57  ;;  %v3653_v1 = vmul.f32 %v3557_v3, %v11224_v20  ;;  %8106 = vtanh.f32 %v3925_v16  ;;  %v3656_v26 = vmul.f32 %v3560_v12, %v11230_v0 }
 0x83c   :  { %v4261_v30 = vpack.c.bf16 %v4197_v10, %v4189_v42  ;;  %8108 = vtanh.f32 %v3928_v55  ;;  %v3645_v15 = vmul.f32 %v3549_v8, %v11220_v17  ;;  %v3648_v45 = vmul.f32 %v3552_v58, %v11237_v13 }
 0x83d   :  { %v4848_v44 = vadd.f32 %v11069_v32, %v4809_v39  ;;  %v3424_v32 = vmul.f32 0.5, %v11127_v18  ;;  %8110 = vtanh.f32 %v3917_v61  ;;  %v3749_v38 = vmul.f32 %v3653_v1, %v11224_v20 }
 0x83e   :  { %8112 = vtanh.f32 %v3920_v35  ;;  %v3752_v29 = vmul.f32 %v3656_v26, %v11230_v0  ;;  %v3741_v19 = vmul.f32 %v3645_v15, %v11220_v17  ;;  %v3744_v51 = vmul.f32 %v3648_v45, %v11237_v13 }
 0x83f   :  { %v4887_v41 = vadd.f32 %v11134_v59, %v4848_v44  ;;  %v11246_v33 = vpop.f32.mrf.mxu2  ;;  %v4192_v2 = vmul.f32 %v4096_v46, %v3424_v32  ;;  %v3845_v54 = vadd.f32 %v3749_v38, %v11224_v20  ;;  %v3445_v46 = vmul.f32 0.5, %v11169_v34 }
 0x840   :  { %v4925_v48 = vpop.f32.mrf.mxu3  ;;  %v3848_v44 = vadd.f32 %v3752_v29, %v11230_v0  ;;  %v3837_v22 = vadd.f32 %v3741_v19, %v11220_v17  ;;  %v3840_v12 = vadd.f32 %v3744_v51, %v11237_v13  ;;  %v3437_v32 = vmul.f32 0.5, %v11165_v9 }
 0x841   :  { %v11251_v56 = vadd.f32 %v4925_v48, %v4887_v41  ;;  %v4264_v21 = vpack.c.bf16 %v4200_v7, %v4192_v2  ;;  %v8107_v23 = vpop.eup %8106  ;;  %v11273_v3 = vpop.f32.mrf.mxu1  ;;  %v3448_v41 = vmul.f32 0.5, %v11175_v62  ;;  %v3941_v55 = vmul.f32 0.7978846, %v3845_v54 }
 0x842   :  { %v4811_v59 = vpop.f32.mrf.mxu0  ;;  %v8109_v11 = vpop.eup %8108  ;;  %v4117_v27 = vadd.f32 1.0, %v8107_v23  ;;  %v3944_v61 = vmul.f32 0.7978846, %v3848_v44  ;;  %v3440_v48 = vmul.f32 0.5, %v11182_v53  ;;  %v3936_v35 = vmul.f32 0.7978846, %v3840_v12 }
 0x843   :  { %v4812_v18 = vadd.f32 %v11192_v4, %v4811_v59  ;;  %v4120_v43 = vadd.f32 1.0, %v8109_v11  ;;  %8114 = vtanh.f32 %v3941_v55  ;;  %v3453_v54 = vmul.f32 0.5, %v11220_v17 }
 0x844   :  { %5064 = vmatmul.bf16.gmra.mxu2 %v4279_v31  ;;  %v4213_v7 = vmul.f32 %v4117_v27, %v3445_v46  ;;  %v3933_v31 = vmul.f32 0.7978846, %v3837_v22  ;;  %8116 = vtanh.f32 %v3944_v61 }
 0x845   :  { %v4851_v47 = vadd.f32 %v11118_v50, %v4812_v18  ;;  %4976 = vmatmul.bf16.gmra.mxu0 %v4261_v30  ;;  %5093 = vmatmul.bf16.gmra.mxu3 %v4264_v21  ;;  %v8111_v50 = vpop.eup %8110 }
 0x846   :  { %v8113_v37 = vpop.eup %8112  ;;  %v4109_v16 = vadd.f32 1.0, %v8111_v50  ;;  %8118 = vtanh.f32 %v3933_v31 }
 0x847   :  { %v4890_v24 = vadd.f32 %v11153_v28, %v4851_v47  ;;  %v11263_v57 = vpop.f32.mrf.mxu2  ;;  %v4112_v10 = vadd.f32 1.0, %v8113_v37  ;;  %8120 = vtanh.f32 %v3936_v35 }
 0x848   :  { %v4928_v39 = vpop.f32.mrf.mxu3  ;;  %v4205_v42 = vmul.f32 %v4109_v16, %v3437_v32 }
 0x849   :  { %v11267_v63 = vadd.f32 %v4928_v39, %v4890_v24  ;;  %v4208_v59 = vmul.f32 %v4112_v10, %v3440_v48  ;;  %v4865_v53 = vpop.f32.mrf.mxu1  ;;  %v8115_v30 = vpop.eup %8114  ;;  %v3461_v39 = vmul.f32 0.5, %v11224_v20 }
 0x84a   :  { %v4813_v40 = vpop.f32.mrf.mxu0  ;;  %v4269_v2 = vpack.c.bf16 %v4213_v7, %v4205_v42  ;;  %v8117_v21 = vpop.eup %8116  ;;  %v4133_v19 = vadd.f32 1.0, %v8115_v30 }
 0x84b   :  { %v4814_v28 = vadd.f32 %v11192_v4, %v4813_v40  ;;  %v4136_v11 = vadd.f32 1.0, %v8117_v21 }
 0x84c   :  { %v8119_v47 = vpop.eup %8118  ;;  %v4229_v37 = vmul.f32 %v4133_v19, %v3461_v39 }
 0x84d   :  { %v4853_v36 = vadd.f32 %v11146_v5, %v4814_v28  ;;  %v4216_v5 = vmul.f32 %v4120_v43, %v3448_v41  ;;  %v8121_v29 = vpop.eup %8120  ;;  %v4125_v51 = vadd.f32 1.0, %v8119_v47  ;;  %v3456_v28 = vmul.f32 0.5, %v11237_v13 }
 0x84e   :  { %v4128_v50 = vadd.f32 1.0, %v8121_v29 }
 0x84f   :  { %v4892_v8 = vadd.f32 %v11195_v25, %v4853_v36  ;;  %v11281_v58 = vpop.f32.mrf.mxu2  ;;  %v4272_v9 = vpack.c.bf16 %v4216_v5, %v4208_v59  ;;  %v4221_v22 = vmul.f32 %v4125_v51, %v3453_v54 }
 0x850   :  { %v4930_v34 = vpop.f32.mrf.mxu3  ;;  %v4224_v20 = vmul.f32 %v4128_v50, %v3456_v28 }
 0x851   :  { %v11284_v1 = vadd.f32 %v4930_v34, %v4892_v8  ;;  %v4867_v44 = vpop.f32.mrf.mxu1 }
 0x852   :  { %v4816_v62 = vpop.f32.mrf.mxu0 }
 0x853   :  { %v4817_v25 = vadd.f32 %v11192_v4, %v4816_v62 }
 0x855   :  { %v4856_v26 = vadd.f32 %v11186_v52, %v4817_v25  ;;  %4981 = vmatmul.bf16.gmra.mxu0 %v4269_v2  ;;  %5098 = vmatmul.bf16.gmra.mxu3 %v4272_v9 }
 0x857   :  { %v4895_v18 = vadd.f32 %v11209_v6, %v4856_v26  ;;  %v4904_v15 = vpop.f32.mrf.mxu2  ;;  %v3464_v6 = vmul.f32 0.5, %v11230_v0  ;;  %v4277_v0 = vpack.c.bf16 %v4229_v37, %v4221_v22 }
 0x858   :  { %v4933_v45 = vpop.f32.mrf.mxu3 }
 0x859   :  { %v11289_v38 = vadd.f32 %v4933_v45, %v4895_v18  ;;  %v4232_v27 = vmul.f32 %v4136_v11, %v3464_v6  ;;  %v4870_v8 = vpop.f32.mrf.mxu1 }
 0x85a   :  { %v4818_v24 = vpop.f32.mrf.mxu0 }
 0x85b   :  { %v4819_v23 = vadd.f32 %v11192_v4, %v4818_v24  ;;  %v4280_v12 = vpack.c.bf16 %v4232_v27, %v4224_v20  ;;  %v12073_v20 = vld [vmem:[#allocation26_spill] sm:$0xff] }
 0x85d   :  { %v4858_v52 = vadd.f32 %v11213_v14, %v4819_v23 }
 0x85f   :  { %v4897_v40 = vadd.f32 %v11246_v33, %v4858_v52  ;;  %v4906_v36 = vpop.f32.mrf.mxu2 }
 0x860   :  { %v4935_v43 = vpop.f32.mrf.mxu3 }
 0x861   :  { %v11298_v46 = vadd.f32 %v4935_v43, %v4897_v40 }
 0x862   :  { %v4821_v14 = vpop.f32.mrf.mxu0 }
 0x863   :  { %v4822_v16 = vadd.f32 %v11192_v4, %v4821_v14 }
 0x865   :  { %v4861_v33 = vadd.f32 %v11253_v60, %v4822_v16  ;;  %4986 = vmatmul.bf16.gmra.mxu0 %v4277_v0  ;;  %5103 = vmatmul.bf16.gmra.mxu3 %v4280_v12 }
 0x867   :  { %v4900_v17 = vadd.f32 %v11263_v57, %v4861_v33  ;;  %v4909_v32 = vpop.f32.mrf.mxu2  ;;  %v4872_v57 = vpop.f32.mrf.mxu1 }
 0x868   :  { %v4938_v13 = vpop.f32.mrf.mxu3 }
 0x869   :  { %v11303_v41 = vadd.f32 %v4938_v13, %v4900_v17 }
 0x86a   :  { %v4823_v10 = vpop.f32.mrf.mxu0 }
 0x86b   :  { %v4824_v55 = vadd.f32 %v11192_v4, %v4823_v10 }
 0x86d   :  { %v4863_v7 = vadd.f32 %v11273_v3, %v4824_v55  ;;  %v12074_v55 = vld [vmem:[#allocation28_spill] sm:$0xff] }
 0x86f   :  { %v4902_v61 = vadd.f32 %v11281_v58, %v4863_v7  ;;  %v4911_v42 = vpop.f32.mrf.mxu2  ;;  %v5001_v3 = vpop.f32.mrf.mxu1 }
 0x870   :  { %v4940_v48 = vpop.f32.mrf.mxu3 }
 0x871   :  { %v11308_v5 = vadd.f32 %v4940_v48, %v4902_v61 }
 0x872   :  { %v4826_v60 = vpop.f32.mrf.mxu0 }
 0x873   :  { %v4827_v31 = vadd.f32 %v11192_v4, %v4826_v60 }
 0x875   :  { %v4866_v34 = vadd.f32 %v4865_v53, %v4827_v31 }
 0x877   :  { %v4905_v35 = vadd.f32 %v4904_v15, %v4866_v34  ;;  %v5040_v58 = vpop.f32.mrf.mxu2  ;;  %v5003_v24 = vpop.f32.mrf.mxu1 }
 0x878   :  { %v4943_v62 = vpop.f32.mrf.mxu3 }
 0x879   :  { %v11311_v59 = vadd.f32 %v4943_v62, %v4905_v35 }
 0x87a   :  { %v4828_v25 = vpop.f32.mrf.mxu0 }
 0x87b   :  { %v4829_v2 = vadd.f32 %v11192_v4, %v4828_v25 }
 0x87d   :  { %v4868_v9 = vadd.f32 %v4867_v44, %v4829_v2 }
 0x87f   :  { %v4907_v26 = vadd.f32 %v4906_v36, %v4868_v9  ;;  %v5042_v29 = vpop.f32.mrf.mxu2  ;;  %v5006_v6 = vpop.f32.mrf.mxu1 }
 0x880   :  { %v4945_v18 = vpop.f32.mrf.mxu3 }
 0x881   :  { %v11314_v30 = vadd.f32 %v4945_v18, %v4907_v26 }
 0x882   :  { %v4831_v21 = vpop.f32.mrf.mxu0 }
 0x883   :  { %v4832_v45 = vadd.f32 %v11192_v4, %v4831_v21  ;;  %v12076_v21 = vld [vmem:[#allocation27_spill] sm:$0xff] }
 0x885   :  { %v4871_v53 = vadd.f32 %v4870_v8, %v4832_v45 }
 0x887   :  { %v4910_v47 = vadd.f32 %v4909_v32, %v4871_v53  ;;  %v5045_v37 = vpop.f32.mrf.mxu2  ;;  %v5008_v14 = vpop.f32.mrf.mxu1 }
 0x888   :  { %v4948_v15 = vpop.f32.mrf.mxu3 }
 0x889   :  { %v11317_v23 = vadd.f32 %v4948_v15, %v4910_v47 }
 0x88a   :  { %v4833_v19 = vpop.f32.mrf.mxu0 }
 0x88b   :  { %v4834_v11 = vadd.f32 %v11192_v4, %v4833_v19 }
 0x88d   :  { %v4873_v52 = vadd.f32 %v4872_v57, %v4834_v11 }
 0x88f   :  { %v4912_v39 = vadd.f32 %v4911_v42, %v4873_v52  ;;  %v5047_v0 = vpop.f32.mrf.mxu2  ;;  %v5011_v32 = vpop.f32.mrf.mxu1  ;;  %v12075_v42 = vld [vmem:[#allocation29_spill] sm:$0xff] }
 0x890   :  { %v4950_v51 = vpop.f32.mrf.mxu3 }
 0x891   :  { %v11320_v50 = vadd.f32 %v4950_v51, %v4912_v39  ;;  %v12077_v39 = vld [vmem:[#allocation30_spill] sm:$0xff] }
 0x892   :  { %v4962_v40 = vpop.f32.mrf.mxu0 }
 0x893   :  { %v4963_v54 = vadd.f32 %v4962_v40, %v11226_v49 }
 0x895   :  { %v5002_v28 = vadd.f32 %v5001_v3, %v4963_v54 }
 0x897   :  { %v5041_v27 = vadd.f32 %v5040_v58, %v5002_v28  ;;  %v5050_v48 = vpop.f32.mrf.mxu2  ;;  %v5013_v2 = vpop.f32.mrf.mxu1 }
 0x898   :  { %v5079_v44 = vpop.f32.mrf.mxu3 }
 0x899   :  { %v5080_v43 = vadd.f32 %v5079_v44, %v5041_v27 }
 0x89a   :  { %v4964_v22 = vpop.f32.mrf.mxu0 }
 0x89b   :  { %v4965_v36 = vadd.f32 %v4964_v22, %v11251_v56  ;;  %v11325_v4 = vadd.f32 %v5080_v43, %v12073_v20  ;;  %v12078_v43 = vld [vmem:[#allocation31_spill] sm:$0xff] }
 0x89d   :  { %v5004_v16 = vadd.f32 %v5003_v24, %v4965_v36  ;;  %v5123_v12 = vsel %vm1127_vm3, %v11325_v4, 0.0 }
 0x89e   :  { %5124 = vadd.xlane.f32.xlu0 %v5123_v12 }
 0x89f   :  { %v5043_v33 = vadd.f32 %v5042_v29, %v5004_v16  ;;  %v5052_v3 = vpop.f32.mrf.mxu2  ;;  %v5016_v15 = vpop.f32.mrf.mxu1 }
 0x8a0   :  { %v5081_v49 = vpop.f32.mrf.mxu3 }
 0x8a1   :  { %v5082_v17 = vadd.f32 %v5081_v49, %v5043_v33  ;;  %v12079_v49 = vld [vmem:[#allocation32_spill] sm:$0xff] }
 0x8a2   :  { %v4967_v13 = vpop.f32.mrf.mxu0 }
 0x8a3   :  { %v4968_v10 = vadd.f32 %v4967_v13, %v11267_v63  ;;  %v11331_v8 = vadd.f32 %v5082_v17, %v12074_v55 }
 0x8a5   :  { %v5007_v56 = vadd.f32 %v5006_v6, %v4968_v10  ;;  %v5126_v7 = vsel %vm1127_vm3, %v11331_v8, 0.0 }
 0x8a6   :  { %5127 = vadd.xlane.f32.xlu0 %v5126_v7 }
 0x8a7   :  { %v5046_v61 = vadd.f32 %v5045_v37, %v5007_v56  ;;  %v5055_v52 = vpop.f32.mrf.mxu2  ;;  %v5018_v44 = vpop.f32.mrf.mxu1 }
 0x8a8   :  { %v5084_v60 = vpop.f32.mrf.mxu3 }
 0x8a9   :  { %v5085_v31 = vadd.f32 %v5084_v60, %v5046_v61  ;;  %v12080_v60 = vld [vmem:[#allocation33_spill] sm:$0xff] }
 0x8aa   :  { %v4969_v34 = vpop.f32.mrf.mxu0 }
 0x8ab   :  { %v4970_v57 = vadd.f32 %v4969_v34, %v11284_v1  ;;  %v11337_v35 = vadd.f32 %v5085_v31, %v12075_v42 }
 0x8ad   :  { %v5009_v63 = vadd.f32 %v5008_v14, %v4970_v57  ;;  %v5129_v62 = vsel %vm1127_vm3, %v11337_v35, 0.0 }
 0x8ae   :  { %5130 = vadd.xlane.f32.xlu1 %v5129_v62 }
 0x8af   :  { %v5048_v25 = vadd.f32 %v5047_v0, %v5009_v63  ;;  %v5057_v36 = vpop.f32.mrf.mxu2  ;;  %v5021_v13 = vpop.f32.mrf.mxu1 }
 0x8b0   :  { %v5086_v9 = vpop.f32.mrf.mxu3 }
 0x8b1   :  { %v5087_v26 = vadd.f32 %v5086_v9, %v5048_v25 }
 0x8b2   :  { %v4972_v58 = vpop.f32.mrf.mxu0 }
 0x8b3   :  { %v4973_v18 = vadd.f32 %v4972_v58, %v11289_v38  ;;  %v11343_v45 = vadd.f32 %v5087_v26, %v12076_v21 }
 0x8b5   :  { %v5012_v1 = vadd.f32 %v5011_v32, %v4973_v18  ;;  %v5132_v53 = vsel %vm1127_vm3, %v11343_v45, 0.0 }
 0x8b6   :  { %5133 = vadd.xlane.f32.xlu1 %v5132_v53 }
 0x8b7   :  { %v5051_v47 = vadd.f32 %v5050_v48, %v5012_v1  ;;  %v5060_v56 = vpop.f32.mrf.mxu2  ;;  %v5023_v42 = vpop.f32.mrf.mxu1 }
 0x8b8   :  { %v5089_v24 = vpop.f32.mrf.mxu3 }
 0x8b9   :  { %v5090_v29 = vadd.f32 %v5089_v24, %v5051_v47 }
 0x8ba   :  { %v4974_v19 = vpop.f32.mrf.mxu0 }
 0x8bb   :  { %v4975_v11 = vadd.f32 %v4974_v19, %v11298_v46  ;;  %v11349_v51 = vadd.f32 %v5090_v29, %v12077_v39  ;;  %v12082_v29 = vld [vmem:[#allocation35_spill] sm:$0xff] }
 0x8bd   :  { %v5014_v38 = vadd.f32 %v5013_v2, %v4975_v11  ;;  %v5135_v6 = vsel %vm1127_vm3, %v11349_v51, 0.0 }
 0x8be   :  { %5136 = vadd.xlane.f32.xlu2 %v5135_v6 }
 0x8bf   :  { %v5053_v40 = vadd.f32 %v5052_v3, %v5014_v38  ;;  %v5062_v62 = vpop.f32.mrf.mxu2  ;;  %v12081_v3 = vld [vmem:[#allocation34_spill] sm:$0xff]  ;;  %v5026_v1 = vpop.f32.mrf.mxu1 }
 0x8c0   :  { %v5091_v54 = vpop.f32.mrf.mxu3 }
 0x8c1   :  { %v5092_v37 = vadd.f32 %v5091_v54, %v5053_v40 }
 0x8c2   :  { %v4977_v28 = vpop.f32.mrf.mxu0 }
 0x8c3   :  { %v4978_v27 = vadd.f32 %v4977_v28, %v11303_v41  ;;  %v11355_v22 = vadd.f32 %v5092_v37, %v12078_v43  ;;  %v12083_v37 = vld [vmem:[#allocation36_spill] sm:$0xff] }
 0x8c5   :  { %v5017_v46 = vadd.f32 %v5016_v15, %v4978_v27  ;;  %v5138_v14 = vsel %vm1127_vm3, %v11355_v22, 0.0 }
 0x8c6   :  { %5139 = vadd.xlane.f32.xlu2 %v5138_v14  ;;  %v12084_v14 = vld [vmem:[#allocation37_spill] sm:$0xff] }
 0x8c7   :  { %v5056_v20 = vadd.f32 %v5055_v52, %v5017_v46  ;;  %v5065_v15 = vpop.f32.mrf.mxu2  ;;  %v5028_v54 = vpop.f32.mrf.mxu1 }
 0x8c8   :  { %v5094_v16 = vpop.f32.mrf.mxu3 }
 0x8c9   :  { %v5095_v0 = vadd.f32 %v5094_v16, %v5056_v20 }
 0x8ca   :  { %v4979_v12 = vpop.f32.mrf.mxu0 }
 0x8cb   :  { %v4980_v33 = vadd.f32 %v4979_v12, %v11308_v5  ;;  %v11361_v17 = vadd.f32 %v5095_v0, %v12079_v49  ;;  %v12085_v0 = vld [vmem:[#allocation25_spill] sm:$0xff] }
 0x8cd   :  { %v5019_v41 = vadd.f32 %v5018_v44, %v4980_v33  ;;  %v5141_v10 = vsel %vm1127_vm3, %v11361_v17, 0.0 }
 0x8ce   :  { %5142 = vadd.xlane.f32.xlu0 %v5141_v10 }
 0x8cf   :  { %v5058_v55 = vadd.f32 %v5057_v36, %v5019_v41  ;;  %v5067_v27 = vpop.f32.mrf.mxu2 }
 0x8d0   :  { %v5096_v32 = vpop.f32.mrf.mxu3 }
 0x8d1   :  { %v5097_v7 = vadd.f32 %v5096_v32, %v5058_v55 }
 0x8d2   :  { %v4982_v61 = vpop.f32.mrf.mxu0 }
 0x8d3   :  { %v4983_v48 = vadd.f32 %v4982_v61, %v11311_v59  ;;  %v11367_v31 = vadd.f32 %v5097_v7, %v12080_v60 }
 0x8d5   :  { %v5022_v5 = vadd.f32 %v5021_v13, %v4983_v48  ;;  %v5144_v34 = vsel %vm1127_vm3, %v11367_v31, 0.0 }
 0x8d6   :  { %5145 = vadd.xlane.f32.xlu1 %v5144_v34 }
 0x8d7   :  { %v5061_v57 = vadd.f32 %v5060_v56, %v5022_v5 }
 0x8d8   :  { %v5099_v63 = vpop.f32.mrf.mxu3 }
 0x8d9   :  { %v5100_v25 = vadd.f32 %v5099_v63, %v5061_v57 }
 0x8da   :  { %v4984_v2 = vpop.f32.mrf.mxu0 }
 0x8db   :  { %v4985_v9 = vadd.f32 %v4984_v2, %v11314_v30  ;;  %v11373_v26 = vadd.f32 %v5100_v25, %v12081_v3 }
 0x8dd   :  { %v5024_v59 = vadd.f32 %v5023_v42, %v4985_v9  ;;  %v5147_v58 = vsel %vm1127_vm3, %v11373_v26, 0.0 }
 0x8de   :  { %5148 = vadd.xlane.f32.xlu2 %v5147_v58 }
 0x8df   :  { %v5063_v18 = vadd.f32 %v5062_v62, %v5024_v59 }
 0x8e0   :  { %v5101_v21 = vpop.f32.mrf.mxu3 }
 0x8e1   :  { %v5102_v53 = vadd.f32 %v5101_v21, %v5063_v18 }
 0x8e2   :  { %v4987_v47 = vpop.f32.mrf.mxu0 }
 0x8e3   :  { %v4988_v24 = vadd.f32 %v4987_v47, %v11317_v23  ;;  %v11379_v19 = vadd.f32 %v5102_v53, %v12082_v29 }
 0x8e5   :  { %v5027_v30 = vadd.f32 %v5026_v1, %v4988_v24  ;;  %v5150_v11 = vsel %vm1127_vm3, %v11379_v19, 0.0 }
 0x8e6   :  { %5151 = vadd.xlane.f32.xlu0 %v5150_v11 }
 0x8e7   :  { %v5066_v52 = vadd.f32 %v5065_v15, %v5027_v30 }
 0x8e8   :  { %v5104_v39 = vpop.f32.mrf.mxu3 }
 0x8e9   :  { %v5105_v38 = vadd.f32 %v5104_v39, %v5066_v52 }
 0x8ea   :  { %v4989_v6 = vpop.f32.mrf.mxu0 }
 0x8eb   :  { %v4990_v40 = vadd.f32 %v4989_v6, %v11320_v50  ;;  %v11385_v28 = vadd.f32 %v5105_v38, %v12083_v37 }
 0x8ed   :  { %v5029_v23 = vadd.f32 %v5028_v54, %v4990_v40  ;;  %v5153_v44 = vsel %vm1127_vm3, %v11385_v28, 0.0 }
 0x8ee   :  { %5154 = vadd.xlane.f32.xlu1 %v5153_v44 }
 0x8ef   :  { %v5068_v43 = vadd.f32 %v5067_v27, %v5029_v23 }
 0x8f0   :  { %v5106_v46 = vpop.f32.mrf.mxu3 }
 0x8f1   :  { %v5107_v36 = vadd.f32 %v5106_v46, %v5068_v43 }
 0x8f3   :  { %v11390_v20 = vadd.f32 %v5107_v36, %v12084_v14 }
 0x8f5   :  { %v5156_v16 = vsel %vm1127_vm3, %v11390_v20, 0.0 }
 0x8f6   :  { %5157 = vadd.xlane.f32.xlu2 %v5156_v16 }
 0x911   :  { %v5125_v50 = vpop.xlane.xlu0 %5124 }
 0x912   :  { %v5159_v12 = vmul.f32 %v5125_v50, %v12085_v0 }
 0x914   :  { %v11396_v33 = vsub.f32 %v11325_v4, %v5159_v12 }
 0x916   :  { %v5183_v49 = vmul.f32 %v11396_v33, %v11396_v33 }
 0x918   :  { %v5195_v41 = vsel %vm1127_vm3, %v5183_v49, 0.0 }
 0x919   :  { %5196 = vadd.xlane.f32.xlu0 %v5195_v41  ;;  %v5128_v13 = vpop.xlane.xlu0 %5127 }
 0x91a   :  { %v5160_v10 = vmul.f32 %v5128_v13, %v12085_v0 }
 0x91c   :  { %v11403_v55 = vsub.f32 %v11331_v8, %v5160_v10 }
 0x91e   :  { %v5184_v56 = vmul.f32 %v11403_v55, %v11403_v55 }
 0x920   :  { %v5198_v32 = vsel %vm1127_vm3, %v5184_v56, 0.0 }
 0x921   :  { %v5131_v7 = vpop.xlane.xlu1 %5130  ;;  %5199 = vadd.xlane.f32.xlu1 %v5198_v32 }
 0x922   :  { %v5161_v4 = vmul.f32 %v5131_v7, %v12085_v0 }
 0x924   :  { %v11410_v61 = vsub.f32 %v11337_v35, %v5161_v4 }
 0x926   :  { %v5185_v48 = vmul.f32 %v11410_v61, %v11410_v61 }
 0x928   :  { %v5201_v60 = vsel %vm1127_vm3, %v5185_v48, 0.0 }
 0x929   :  { %5202 = vadd.xlane.f32.xlu2 %v5201_v60  ;;  %v5134_v8 = vpop.xlane.xlu1 %5133 }
 0x92a   :  { %v5162_v5 = vmul.f32 %v5134_v8, %v12085_v0 }
 0x92c   :  { %v11417_v34 = vsub.f32 %v11343_v45, %v5162_v5 }
 0x92e   :  { %v5186_v57 = vmul.f32 %v11417_v34, %v11417_v34 }
 0x930   :  { %v5204_v42 = vsel %vm1127_vm3, %v5186_v57, 0.0  ;;  %v11484_v57 = vld [vmem:[%s11945_s19] ss:$0 sm:$0xff] }
 0x931   :  { %v5137_v63 = vpop.xlane.xlu2 %5136  ;;  %5205 = vadd.xlane.f32.xlu0 %v5204_v42 }
 0x932   :  { %v5163_v35 = vmul.f32 %v5137_v63, %v12085_v0 }
 0x934   :  { %v11424_v62 = vsub.f32 %v11349_v51, %v5163_v35  ;;  %v11489_v35 = vld [vmem:[%s11946_s20] ss:$0 sm:$0xff] }
 0x936   :  { %v5187_v25 = vmul.f32 %v11424_v62, %v11424_v62 }
 0x938   :  { %v5207_v2 = vsel %vm1127_vm3, %v5187_v25, 0.0 }
 0x939   :  { %v5140_v9 = vpop.xlane.xlu2 %5139  ;;  %5208 = vadd.xlane.f32.xlu1 %v5207_v2 }
 0x93a   :  { %v5164_v45 = vmul.f32 %v5140_v9, %v12085_v0 }
 0x93c   :  { %v11431_v3 = vsub.f32 %v11355_v22, %v5164_v45 }
 0x93e   :  { %v5188_v59 = vmul.f32 %v11431_v3, %v11431_v3 }
 0x940   :  { %v5210_v58 = vsel %vm1127_vm3, %v5188_v59, 0.0 }
 0x941   :  { %5211 = vadd.xlane.f32.xlu2 %v5210_v58  ;;  %v5143_v51 = vpop.xlane.xlu0 %5142 }
 0x942   :  { %v5165_v18 = vmul.f32 %v5143_v51, %v12085_v0 }
 0x944   :  { %v11438_v21 = vsub.f32 %v11361_v17, %v5165_v18 }
 0x946   :  { %v5189_v1 = vmul.f32 %v11438_v21, %v11438_v21 }
 0x948   :  { %v5213_v53 = vsel %vm1127_vm3, %v5189_v1, 0.0 }
 0x949   :  { %v5146_v47 = vpop.xlane.xlu1 %5145  ;;  %5214 = vadd.xlane.f32.xlu0 %v5213_v53 }
 0x94a   :  { %v5166_v22 = vmul.f32 %v5146_v47, %v12085_v0 }
 0x94c   :  { %v11445_v24 = vsub.f32 %v11367_v31, %v5166_v22 }
 0x94e   :  { %v5190_v15 = vmul.f32 %v11445_v24, %v11445_v24 }
 0x950   :  { %v5216_v29 = vsel %vm1127_vm3, %v5190_v15, 0.0 }
 0x951   :  { %v5149_v30 = vpop.xlane.xlu2 %5148  ;;  %5217 = vadd.xlane.f32.xlu1 %v5216_v29 }
 0x952   :  { %v5167_v17 = vmul.f32 %v5149_v30, %v12085_v0 }
 0x954   :  { %v11452_v11 = vsub.f32 %v11373_v26, %v5167_v17 }
 0x956   :  { %v5191_v52 = vmul.f32 %v11452_v11, %v11452_v11 }
 0x958   :  { %v5219_v39 = vsel %vm1127_vm3, %v5191_v52, 0.0 }
 0x959   :  { %5220 = vadd.xlane.f32.xlu2 %v5219_v39  ;;  %v5152_v31 = vpop.xlane.xlu0 %5151 }
 0x95a   :  { %v5168_v38 = vmul.f32 %v5152_v31, %v12085_v0 }
 0x95c   :  { %v11459_v6 = vsub.f32 %v11379_v19, %v5168_v38 }
 0x95e   :  { %v5192_v40 = vmul.f32 %v11459_v6, %v11459_v6 }
 0x960   :  { %v5222_v54 = vsel %vm1127_vm3, %v5192_v40, 0.0 }
 0x961   :  { %v5155_v37 = vpop.xlane.xlu1 %5154  ;;  %5223 = vadd.xlane.f32.xlu0 %v5222_v54 }
 0x962   :  { %v5169_v26 = vmul.f32 %v5155_v37, %v12085_v0 }
 0x964   :  { %v11466_v23 = vsub.f32 %v11385_v28, %v5169_v26 }
 0x966   :  { %v5193_v27 = vmul.f32 %v11466_v23, %v11466_v23 }
 0x968   :  { %v5225_v44 = vsel %vm1127_vm3, %v5193_v27, 0.0 }
 0x969   :  { %v5158_v43 = vpop.xlane.xlu2 %5157  ;;  %5226 = vadd.xlane.f32.xlu1 %v5225_v44 }
 0x96a   :  { %v5170_v19 = vmul.f32 %v5158_v43, %v12085_v0 }
 0x96c   :  { %v11473_v46 = vsub.f32 %v11390_v20, %v5170_v19 }
 0x96e   :  { %v5194_v36 = vmul.f32 %v11473_v46, %v11473_v46 }
 0x970   :  { %v5228_v14 = vsel %vm1127_vm3, %v5194_v36, 0.0 }
 0x971   :  { %5229 = vadd.xlane.f32.xlu2 %v5228_v14 }
 0x98c   :  { %v5197_v28 = vpop.xlane.xlu0 %5196 }
 0x98d   :  { %v5231_v16 = vmul.f32 %v5197_v28, %v12085_v0 }
 0x98f   :  { %v5243_v50 = vadd.f32 1e-12, %v5231_v16 }
 0x991   :  { %8122 = vrsqrt.f32 %v5243_v50  ;;  %vm5261_vm7 = vweird.f32 %v5243_v50 }
 0x994   :  { %v5200_v12 = vpop.xlane.xlu1 %5199 }
 0x995   :  { %v5232_v49 = vmul.f32 %v5200_v12, %v12085_v0 }
 0x997   :  { %v8123_v41 = vpop.eup %8122  ;;  %v5244_v13 = vadd.f32 1e-12, %v5232_v49 }
 0x998   :  { %v5256_v10 = vmul.f32 %v8123_v41, %v5243_v50  ;;  %vm5262_vm6 = vweird.f32 %v8123_v41 }
 0x999   :  { %8124 = vrsqrt.f32 %v5244_v13  ;;  %vm5263_vm9 = vmor %vm5261_vm7, %vm5262_vm6  ;;  %vm5271_vm11 = vweird.f32 %v5244_v13 }
 0x99a   :  { %v5257_v20 = vmul.f32 %v8123_v41, %v5256_v10 }
 0x99c   :  { %v5258_v56 = vmul.f32 0.5, %v5257_v20  ;;  %v5203_v32 = vpop.xlane.xlu2 %5202 }
 0x99d   :  { %v5233_v7 = vmul.f32 %v5203_v32, %v12085_v0 }
 0x99e   :  { %v5259_v4 = vsub.f32 1.5, %v5258_v56 }
 0x99f   :  { %v8125_v48 = vpop.eup %8124  ;;  %v5245_v60 = vadd.f32 1e-12, %v5233_v7 }
 0x9a0   :  { %v5260_v8 = vmul.f32 %v8123_v41, %v5259_v4  ;;  %v5266_v5 = vmul.f32 %v8125_v48, %v5244_v13  ;;  %vm5272_vm10 = vweird.f32 %v8125_v48 }
 0x9a1   :  { %8126 = vrsqrt.f32 %v5245_v60  ;;  %vm5273_vm12 = vmor %vm5271_vm11, %vm5272_vm10  ;;  %vm5281_vm14 = vweird.f32 %v5245_v60 }
 0x9a2   :  { %v5264_v42 = vsel %vm5263_vm9, %v8123_v41, %v5260_v8  ;;  %v5267_v63 = vmul.f32 %v8125_v48, %v5266_v5 }
 0x9a3   :  { %v5375_v25 = vmul.f32 %v5264_v42, %v11396_v33 }
 0x9a4   :  { %v5268_v2 = vmul.f32 0.5, %v5267_v63  ;;  %v5206_v9 = vpop.xlane.xlu0 %5205 }
 0x9a5   :  { %v5390_v45 = vmul.f32 %v11484_v57, %v5375_v25  ;;  %v5234_v59 = vmul.f32 %v5206_v9, %v12085_v0 }
 0x9a6   :  { %v5269_v58 = vsub.f32 1.5, %v5268_v2 }
 0x9a7   :  { %v8127_v51 = vpop.eup %8126  ;;  %v11495_v18 = vadd.f32 %v11489_v35, %v5390_v45  ;;  %v5246_v1 = vadd.f32 1e-12, %v5234_v59 }
 0x9a8   :  { %v5270_v53 = vmul.f32 %v8125_v48, %v5269_v58  ;;  %v5276_v47 = vmul.f32 %v8127_v51, %v5245_v60  ;;  %vm5282_vm13 = vweird.f32 %v8127_v51 }
 0x9a9   :  { %8128 = vrsqrt.f32 %v5246_v1  ;;  %vm5283_vm15 = vmor %vm5281_vm14, %vm5282_vm13  ;;  %vm5291_vm1 = vweird.f32 %v5246_v1 }
 0x9aa   :  { %v5274_v22 = vsel %vm5273_vm12, %v8125_v48, %v5270_v53  ;;  %v5277_v33 = vmul.f32 %v8127_v51, %v5276_v47 }
 0x9ab   :  { %v5376_v15 = vmul.f32 %v5274_v22, %v11403_v55 }
 0x9ac   :  { %v5278_v29 = vmul.f32 0.5, %v5277_v33  ;;  %v5209_v30 = vpop.xlane.xlu1 %5208 }
 0x9ad   :  { %v5391_v17 = vmul.f32 %v11484_v57, %v5376_v15  ;;  %v5235_v52 = vmul.f32 %v5209_v30, %v12085_v0 }
 0x9ae   :  { %v5279_v39 = vsub.f32 1.5, %v5278_v29 }
 0x9af   :  { %v8129_v31 = vpop.eup %8128  ;;  %v11501_v38 = vadd.f32 %v11489_v35, %v5391_v17  ;;  %v5247_v40 = vadd.f32 1e-12, %v5235_v52 }
 0x9b0   :  { %v5280_v54 = vmul.f32 %v8127_v51, %v5279_v39  ;;  %v5286_v37 = vmul.f32 %v8129_v31, %v5246_v1  ;;  %vm5292_vm0 = vweird.f32 %v8129_v31 }
 0x9b1   :  { %8130 = vrsqrt.f32 %v5247_v40  ;;  %vm5293_vm2 = vmor %vm5291_vm1, %vm5292_vm0  ;;  %vm5301_vm5 = vweird.f32 %v5247_v40 }
 0x9b2   :  { %v5284_v26 = vsel %vm5283_vm15, %v8127_v51, %v5280_v54  ;;  %v5287_v55 = vmul.f32 %v8129_v31, %v5286_v37 }
 0x9b3   :  { %v5377_v27 = vmul.f32 %v5284_v26, %v11410_v61 }
 0x9b4   :  { %v5288_v44 = vmul.f32 0.5, %v5287_v55  ;;  %v5212_v43 = vpop.xlane.xlu2 %5211 }
 0x9b5   :  { %v5392_v19 = vmul.f32 %v11484_v57, %v5377_v27  ;;  %v5236_v36 = vmul.f32 %v5212_v43, %v12085_v0 }
 0x9b6   :  { %v5289_v14 = vsub.f32 1.5, %v5288_v44 }
 0x9b7   :  { %v8131_v28 = vpop.eup %8130  ;;  %v11507_v16 = vadd.f32 %v11489_v35, %v5392_v19  ;;  %v5248_v50 = vadd.f32 1e-12, %v5236_v36 }
 0x9b8   :  { %v5290_v12 = vmul.f32 %v8129_v31, %v5289_v14  ;;  %v5296_v49 = vmul.f32 %v8131_v28, %v5247_v40  ;;  %vm5302_vm4 = vweird.f32 %v8131_v28 }
 0x9b9   :  { %8132 = vrsqrt.f32 %v5248_v50  ;;  %vm5303_vm6 = vmor %vm5301_vm5, %vm5302_vm4  ;;  %vm5311_vm9 = vweird.f32 %v5248_v50 }
 0x9ba   :  { %v5294_v41 = vsel %vm5293_vm2, %v8129_v31, %v5290_v12  ;;  %v5297_v61 = vmul.f32 %v8131_v28, %v5296_v49 }
 0x9bb   :  { %v5378_v13 = vmul.f32 %v5294_v41, %v11417_v34 }
 0x9bc   :  { %v5298_v10 = vmul.f32 0.5, %v5297_v61  ;;  %v5215_v20 = vpop.xlane.xlu0 %5214 }
 0x9bd   :  { %v5393_v56 = vmul.f32 %v11484_v57, %v5378_v13  ;;  %v5237_v32 = vmul.f32 %v5215_v20, %v12085_v0 }
 0x9be   :  { %v5299_v7 = vsub.f32 1.5, %v5298_v10 }
 0x9bf   :  { %v8133_v4 = vpop.eup %8132  ;;  %v11513_v48 = vadd.f32 %v11489_v35, %v5393_v56  ;;  %v5249_v60 = vadd.f32 1e-12, %v5237_v32 }
 0x9c0   :  { %v5300_v8 = vmul.f32 %v8131_v28, %v5299_v7  ;;  %v5306_v5 = vmul.f32 %v8133_v4, %v5248_v50  ;;  %vm5312_vm7 = vweird.f32 %v8133_v4 }
 0x9c1   :  { %8134 = vrsqrt.f32 %v5249_v60  ;;  %vm5313_vm10 = vmor %vm5311_vm9, %vm5312_vm7  ;;  %vm5321_vm12 = vweird.f32 %v5249_v60 }
 0x9c2   :  { %v5304_v42 = vsel %vm5303_vm6, %v8131_v28, %v5300_v8  ;;  %v5307_v34 = vmul.f32 %v8133_v4, %v5306_v5 }
 0x9c3   :  { %v5379_v63 = vmul.f32 %v5304_v42, %v11424_v62 }
 0x9c4   :  { %v5308_v25 = vmul.f32 0.5, %v5307_v34  ;;  %v5218_v2 = vpop.xlane.xlu1 %5217 }
 0x9c5   :  { %v5394_v9 = vmul.f32 %v11484_v57, %v5379_v63  ;;  %v5238_v45 = vmul.f32 %v5218_v2, %v12085_v0 }
 0x9c6   :  { %v5309_v59 = vsub.f32 1.5, %v5308_v25 }
 0x9c7   :  { %v8135_v58 = vpop.eup %8134  ;;  %v11519_v51 = vadd.f32 %v11489_v35, %v5394_v9  ;;  %v5250_v1 = vadd.f32 1e-12, %v5238_v45 }
 0x9c8   :  { %v5310_v53 = vmul.f32 %v8133_v4, %v5309_v59  ;;  %v5316_v47 = vmul.f32 %v8135_v58, %v5249_v60  ;;  %vm5322_vm11 = vweird.f32 %v8135_v58 }
 0x9c9   :  { %8136 = vrsqrt.f32 %v5250_v1  ;;  %vm5323_vm13 = vmor %vm5321_vm12, %vm5322_vm11  ;;  %vm5331_vm15 = vweird.f32 %v5250_v1 }
 0x9ca   :  { %v5314_v22 = vsel %vm5313_vm10, %v8133_v4, %v5310_v53  ;;  %v5317_v62 = vmul.f32 %v8135_v58, %v5316_v47 }
 0x9cb   :  { %v5380_v33 = vmul.f32 %v5314_v22, %v11431_v3 }
 0x9cc   :  { %v5318_v15 = vmul.f32 0.5, %v5317_v62  ;;  %v5221_v29 = vpop.xlane.xlu2 %5220 }
 0x9cd   :  { %v5395_v30 = vmul.f32 %v11484_v57, %v5380_v33  ;;  %v5239_v17 = vmul.f32 %v5221_v29, %v12085_v0 }
 0x9ce   :  { %v5319_v52 = vsub.f32 1.5, %v5318_v15 }
 0x9cf   :  { %v8137_v39 = vpop.eup %8136  ;;  %v11525_v31 = vadd.f32 %v11489_v35, %v5395_v30  ;;  %v5251_v40 = vadd.f32 1e-12, %v5239_v17 }
 0x9d0   :  { %v5320_v54 = vmul.f32 %v8135_v58, %v5319_v52  ;;  %v5326_v37 = vmul.f32 %v8137_v39, %v5250_v1  ;;  %vm5332_vm14 = vweird.f32 %v8137_v39 }
 0x9d1   :  { %8138 = vrsqrt.f32 %v5251_v40  ;;  %vm5333_vm0 = vmor %vm5331_vm15, %vm5332_vm14  ;;  %vm5341_vm2 = vweird.f32 %v5251_v40 }
 0x9d2   :  { %v5324_v26 = vsel %vm5323_vm13, %v8135_v58, %v5320_v54  ;;  %v5327_v3 = vmul.f32 %v8137_v39, %v5326_v37 }
 0x9d3   :  { %v5381_v55 = vmul.f32 %v5324_v26, %v11438_v21 }
 0x9d4   :  { %v5328_v27 = vmul.f32 0.5, %v5327_v3  ;;  %v5224_v44 = vpop.xlane.xlu0 %5223 }
 0x9d5   :  { %v5396_v43 = vmul.f32 %v11484_v57, %v5381_v55  ;;  %v5240_v19 = vmul.f32 %v5224_v44, %v12085_v0 }
 0x9d6   :  { %v5329_v36 = vsub.f32 1.5, %v5328_v27 }
 0x9d7   :  { %v8139_v14 = vpop.eup %8138  ;;  %v11531_v28 = vadd.f32 %v11489_v35, %v5396_v43  ;;  %v5252_v50 = vadd.f32 1e-12, %v5240_v19 }
 0x9d8   :  { %v5330_v12 = vmul.f32 %v8137_v39, %v5329_v36  ;;  %v5336_v49 = vmul.f32 %v8139_v14, %v5251_v40  ;;  %vm5342_vm1 = vweird.f32 %v8139_v14 }
 0x9d9   :  { %8140 = vrsqrt.f32 %v5252_v50  ;;  %vm5343_vm4 = vmor %vm5341_vm2, %vm5342_vm1  ;;  %vm5351_vm6 = vweird.f32 %v5252_v50 }
 0x9da   :  { %v5334_v41 = vsel %vm5333_vm0, %v8137_v39, %v5330_v12  ;;  %v5337_v21 = vmul.f32 %v8139_v14, %v5336_v49 }
 0x9db   :  { %v5382_v61 = vmul.f32 %v5334_v41, %v11445_v24 }
 0x9dc   :  { %v5338_v13 = vmul.f32 0.5, %v5337_v21  ;;  %v5227_v10 = vpop.xlane.xlu1 %5226 }
 0x9dd   :  { %v5397_v20 = vmul.f32 %v11484_v57, %v5382_v61  ;;  %v5241_v56 = vmul.f32 %v5227_v10, %v12085_v0 }
 0x9de   :  { %v5339_v32 = vsub.f32 1.5, %v5338_v13 }
 0x9df   :  { %v8141_v7 = vpop.eup %8140  ;;  %v11537_v4 = vadd.f32 %v11489_v35, %v5397_v20  ;;  %v5253_v60 = vadd.f32 1e-12, %v5241_v56 }
 0x9e0   :  { %v5340_v8 = vmul.f32 %v8139_v14, %v5339_v32  ;;  %v5346_v5 = vmul.f32 %v8141_v7, %v5252_v50  ;;  %vm5352_vm5 = vweird.f32 %v8141_v7 }
 0x9e1   :  { %8142 = vrsqrt.f32 %v5253_v60  ;;  %vm5353_vm7 = vmor %vm5351_vm6, %vm5352_vm5  ;;  %vm5361_vm10 = vweird.f32 %v5253_v60 }
 0x9e2   :  { %v5344_v42 = vsel %vm5343_vm4, %v8139_v14, %v5340_v8  ;;  %v5347_v24 = vmul.f32 %v8141_v7, %v5346_v5 }
 0x9e3   :  { %v5383_v34 = vmul.f32 %v5344_v42, %v11452_v11 }
 0x9e4   :  { %v5348_v63 = vmul.f32 0.5, %v5347_v24  ;;  %v5230_v25 = vpop.xlane.xlu2 %5229 }
 0x9e5   :  { %v5398_v2 = vmul.f32 %v11484_v57, %v5383_v34  ;;  %v5242_v9 = vmul.f32 %v5230_v25, %v12085_v0 }
 0x9e6   :  { %v5349_v45 = vsub.f32 1.5, %v5348_v63 }
 0x9e7   :  { %v8143_v59 = vpop.eup %8142  ;;  %v11543_v58 = vadd.f32 %v11489_v35, %v5398_v2  ;;  %v5254_v1 = vadd.f32 1e-12, %v5242_v9 }
 0x9e8   :  { %v5350_v53 = vmul.f32 %v8141_v7, %v5349_v45  ;;  %v5356_v47 = vmul.f32 %v8143_v59, %v5253_v60  ;;  %vm5362_vm9 = vweird.f32 %v8143_v59 }
 0x9e9   :  { %8144 = vrsqrt.f32 %v5254_v1  ;;  %vm5363_vm11 = vmor %vm5361_vm10, %vm5362_vm9  ;;  %vm5371_vm13 = vweird.f32 %v5254_v1 }
 0x9ea   :  { %v5354_v22 = vsel %vm5353_vm7, %v8141_v7, %v5350_v53  ;;  %v5357_v11 = vmul.f32 %v8143_v59, %v5356_v47 }
 0x9eb   :  { %v5384_v62 = vmul.f32 %v5354_v22, %v11459_v6 }
 0x9ec   :  { %v5358_v33 = vmul.f32 0.5, %v5357_v11 }
 0x9ed   :  { %v5399_v15 = vmul.f32 %v11484_v57, %v5384_v62 }
 0x9ee   :  { %v5359_v0 = vsub.f32 1.5, %v5358_v33 }
 0x9ef   :  { %v8145_v29 = vpop.eup %8144  ;;  %v11548_v30 = vadd.f32 %v11489_v35, %v5399_v15 }
 0x9f0   :  { %v5360_v17 = vmul.f32 %v8143_v59, %v5359_v0  ;;  %v5366_v52 = vmul.f32 %v8145_v29, %v5254_v1  ;;  %vm5372_vm12 = vweird.f32 %v8145_v29 }
 0x9f1   :  { %vm5373_vm14 = vmor %vm5371_vm13, %vm5372_vm12 }
 0x9f2   :  { %v5364_v39 = vsel %vm5363_vm11, %v8143_v59, %v5360_v17  ;;  %v5367_v40 = vmul.f32 %v8145_v29, %v5366_v52 }
 0x9f3   :  { %v5385_v54 = vmul.f32 %v5364_v39, %v11466_v23 }
 0x9f4   :  { %v5368_v37 = vmul.f32 0.5, %v5367_v40 }
 0x9f5   :  { %v5400_v6 = vmul.f32 %v11484_v57, %v5385_v54 }
 0x9f6   :  { %v5369_v26 = vsub.f32 1.5, %v5368_v37 }
 0x9f7   :  { %v11553_v3 = vadd.f32 %v11489_v35, %v5400_v6 }
 0x9f8   :  { %v5370_v55 = vmul.f32 %v8145_v29, %v5369_v26 }
 0x9fa   :  { %v5374_v27 = vsel %vm5373_vm14, %v8145_v29, %v5370_v55 }
 0x9fb   :  { %v5386_v44 = vmul.f32 %v5374_v27, %v11473_v46 }
 0x9fd   :  { %v5401_v43 = vmul.f32 %v11484_v57, %v5386_v44 }
 0x9ff   :  { %v11558_v19 = vadd.f32 %v11489_v35, %v5401_v43 }
 0xa00   :  { %8300 = dma.done.wait [#allocation6 + $0x2], 2496 }
 0xa01   :  { %8301 = vsyncadd [#allocation6 + $0x2], 4294964800  ;;  %v5450_v23 = vld [vmem:[#allocation4 + $0x90] sm:$0x33]  ;;  %v5451_v36 = vld [vmem:[#allocation4 + $0x98] sm:$0x3] }
 0xa02   :  { %v5515_v14 = vunpack.c.h.b16 %v5450_v23  ;;  %v5516_v50 = vunpack.c.l.b16 %v5451_v36  ;;  %v5514_v12 = vunpack.c.l.b16 %v5450_v23  ;;  %v7752_v49 = vld [vmem:[#allocation4 + $0x7c] sm:$0xf]  ;;  %v7389_v13 = vld [vmem:[#allocation4 + $0x84] sm:$0xf0]  ;;  %v7395_v10 = vld [vmem:[#allocation4 + $0x80] sm:$0xf] }
 0xa03   :  { %v7754_v20 = vld [vmem:[#allocation4 + $0x88] sm:$0xf0]  ;;  %v7387_v46 = vld [vmem:[#allocation4 + $0x78] sm:$0xf]  ;;  %v7753_v56 = vld [vmem:[#allocation4 + $0x80] sm:$0xf0]  ;;  %v7392_v7 = vor.u32 %v7752_v49, %v7389_v13 }
 0xa04   :  { %v5536_v41 = vpack.c.b16 %v5515_v14, %v5515_v14  ;;  %v5537_v21 = vpack.c.b16 %v5516_v50, %v5516_v50  ;;  %v5535_v61 = vpack.c.b16 %v5514_v12, %v5514_v12  ;;  %v7396_v60 = vor.u32 %v7754_v20, %v7395_v10  ;;  %v7749_v8 = vld [vmem:[#allocation4 + $0x64] sm:$0xf]  ;;  %v7377_v42 = vld [vmem:[#allocation4 + $0x6c] sm:$0xf0]  ;;  %v7383_v24 = vld [vmem:[#allocation4 + $0x68] sm:$0xf] }
 0xa05   :  { %v7388_v5 = vor.u32 %v7753_v56, %v7387_v46  ;;  %v7751_v34 = vld [vmem:[#allocation4 + $0x70] sm:$0xf0]  ;;  %v7375_v63 = vld [vmem:[#allocation4 + $0x60] sm:$0xf]  ;;  %v7750_v25 = vld [vmem:[#allocation4 + $0x68] sm:$0xf0]  ;;  %v7380_v2 = vor.u32 %v7749_v8, %v7377_v42  ;;  %v5420_v56 = vpack.c.bf16 %v11501_v38, %v11495_v18  ;;  %v5422_v18 = vpack.c.bf16 %v11525_v31, %v11519_v51 }
 0xa06   :  { %v5578_v57 = vsel %vm1146_vm8, %v5536_v41, 0  ;;  %v5581_v35 = vsel %vm1146_vm8, %v5537_v21, 0  ;;  %v5575_v32 = vsel %vm1146_vm8, %v5535_v61, 0  ;;  %v7384_v9 = vor.u32 %v7751_v34, %v7383_v24  ;;  %v7746_v45 = vld [vmem:[#allocation4 + $0x4c] sm:$0xf] }
 0xa07   :  { %5615 = vmatpush.bf16.msra.mxu1 %v5578_v57  ;;  %5646 = vmatpush.bf16.msra.mxu2 %v5581_v35  ;;  %v7376_v59 = vor.u32 %v7750_v25, %v7375_v63  ;;  %v7365_v1 = vld [vmem:[#allocation4 + $0x54] sm:$0xf0]  ;;  %v7371_v53 = vld [vmem:[#allocation4 + $0x50] sm:$0xf]  ;;  %v7748_v47 = vld [vmem:[#allocation4 + $0x58] sm:$0xf0]  ;;  %v5421_v57 = vpack.c.bf16 %v11513_v48, %v11507_v16  ;;  %v5423_v38 = vpack.c.bf16 %v11537_v4, %v11531_v28 }
 0xa08   :  { %5584 = vmatpush.bf16.msra.mxu0 %v5575_v32  ;;  %v7363_v22 = vld [vmem:[#allocation4 + $0x48] sm:$0xf]  ;;  %v7747_v11 = vld [vmem:[#allocation4 + $0x50] sm:$0xf0]  ;;  %v7368_v62 = vor.u32 %v7746_v45, %v7365_v1  ;;  %v7372_v33 = vor.u32 %v7748_v47, %v7371_v53  ;;  %v7353_v29 = vld [vmem:[#allocation4 + $0x3c] sm:$0xf0]  ;;  %v5424_v16 = vpack.c.bf16 %v11548_v30, %v11543_v58  ;;  %v5425_v48 = vpack.c.bf16 %v11558_v19, %v11553_v3 }
 0xa09   :  { %v7743_v15 = vld [vmem:[#allocation4 + $0x34] sm:$0xf]  ;;  %v7364_v0 = vor.u32 %v7747_v11, %v7363_v22  ;;  %v7359_v17 = vld [vmem:[#allocation4 + $0x38] sm:$0xf]  ;;  %v7745_v52 = vld [vmem:[#allocation4 + $0x40] sm:$0xf0] }
 0xa0a   :  { %v7351_v39 = vld [vmem:[#allocation4 + $0x30] sm:$0xf]  ;;  %v7744_v40 = vld [vmem:[#allocation4 + $0x38] sm:$0xf0]  ;;  %v7356_v54 = vor.u32 %v7743_v15, %v7353_v29  ;;  %v7360_v37 = vor.u32 %v7745_v52, %v7359_v17  ;;  %v7341_v55 = vld [vmem:[#allocation4 + $0x24] sm:$0xf0] }
 0xa0b   :  { %5616 = vmatpush.bf16.msra.mxu1 %v7392_v7  ;;  %5647 = vmatpush.bf16.msra.mxu2 %v7396_v60  ;;  %v7740_v6 = vld [vmem:[#allocation4 + $0x1c] sm:$0xf]  ;;  %v7352_v26 = vor.u32 %v7744_v40, %v7351_v39  ;;  %v7347_v27 = vld [vmem:[#allocation4 + $0x20] sm:$0xf]  ;;  %v7742_v44 = vld [vmem:[#allocation4 + $0x28] sm:$0xf0] }
 0xa0c   :  { %5585 = vmatpush.bf16.msra.mxu0 %v7388_v5  ;;  %v7339_v43 = vld [vmem:[#allocation4 + $0x18] sm:$0xf]  ;;  %v7741_v23 = vld [vmem:[#allocation4 + $0x20] sm:$0xf0]  ;;  %v7344_v36 = vor.u32 %v7740_v6, %v7341_v55  ;;  %v7348_v14 = vor.u32 %v7742_v44, %v7347_v27  ;;  %v7329_v49 = vld [vmem:[#allocation4 + $0xc] sm:$0xf0] }
 0xa0d   :  { %v7737_v50 = vld [vmem:[#allocation4 + $0x4] sm:$0xf]  ;;  %v7340_v12 = vor.u32 %v7741_v23, %v7339_v43  ;;  %v7335_v41 = vld [vmem:[#allocation4 + $0x8] sm:$0xf]  ;;  %v7739_v21 = vld [vmem:[#allocation4 + $0x10] sm:$0xf0] }
 0xa0e   :  { %v7327_v61 = vld [vmem:[#allocation4] sm:$0xf]  ;;  %v7738_v13 = vld [vmem:[#allocation4 + $0x8] sm:$0xf0]  ;;  %v7332_v10 = vor.u32 %v7737_v50, %v7329_v49  ;;  %v7336_v20 = vor.u32 %v7739_v21, %v7335_v41 }
 0xa0f   :  { %5617 = vmatpush.bf16.msra.mxu1 %v7380_v2  ;;  %5648 = vmatpush.bf16.msra.mxu2 %v7384_v9  ;;  %v7328_v46 = vor.u32 %v7738_v13, %v7327_v61  ;;  %v8147_v11 = vld [vmem:[%s11947_s21] ss:$0 sm:$0xff] }
 0xa10   :  { %5586 = vmatpush.bf16.msra.mxu0 %v7376_v59 }
 0xa13   :  { %5618 = vmatpush.bf16.msra.mxu1 %v7368_v62  ;;  %5649 = vmatpush.bf16.msra.mxu2 %v7372_v33 }
 0xa14   :  { %5587 = vmatpush.bf16.msra.mxu0 %v7364_v0 }
 0xa17   :  { %5619 = vmatpush.bf16.msra.mxu1 %v7356_v54  ;;  %5650 = vmatpush.bf16.msra.mxu2 %v7360_v37 }
 0xa18   :  { %5588 = vmatpush.bf16.msra.mxu0 %v7352_v26 }
 0xa1b   :  { %5620 = vmatpush.bf16.msra.mxu1 %v7344_v36  ;;  %5651 = vmatpush.bf16.msra.mxu2 %v7348_v14 }
 0xa1c   :  { %5589 = vmatpush.bf16.msra.mxu0 %v7340_v12 }
 0xa1f   :  { %5621 = vmatpush.bf16.msra.mxu1 %v7332_v10  ;;  %5652 = vmatpush.bf16.msra.mxu2 %v7336_v20 }
 0xa20   :  { %5590 = vmatpush.bf16.msra.mxu0 %v7328_v46 }
 0xa22   :  { %7403 = vmatmul.msk.bf16.vlgmr.msra.gmra.mxu1 %vm1127_vm3, %v5420_v56  ;;  %7409 = vmatmul.msk.bf16.vlgmr.msra.gmra.mxu2 %vm1127_vm3, %v5420_v56 }
 0xa23   :  { %7397 = vmatmul.msk.bf16.vlgmr.msra.gmra.mxu0 %vm1127_vm3, %v5420_v56 }
 0xa32   :  { %7404 = vmatmul.msk.bf16.gmra.mxu1 %vm1127_vm3, %v5421_v57  ;;  %7410 = vmatmul.msk.bf16.gmra.mxu2 %vm1127_vm3, %v5421_v57 }
 0xa33   :  { %7398 = vmatmul.msk.bf16.gmra.mxu0 %vm1127_vm3, %v5421_v57 }
 0xa42   :  { %7405 = vmatmul.msk.bf16.gmra.mxu1 %vm1127_vm3, %v5422_v18  ;;  %7411 = vmatmul.msk.bf16.gmra.mxu2 %vm1127_vm3, %v5422_v18 }
 0xa43   :  { %7399 = vmatmul.msk.bf16.gmra.mxu0 %vm1127_vm3, %v5422_v18 }
 0xa52   :  { %7406 = vmatmul.msk.bf16.gmra.mxu1 %vm1127_vm3, %v5423_v38  ;;  %7412 = vmatmul.msk.bf16.gmra.mxu2 %vm1127_vm3, %v5423_v38 }
 0xa53   :  { %7400 = vmatmul.msk.bf16.gmra.mxu0 %vm1127_vm3, %v5423_v38 }
 0xa62   :  { %7413 = vmatmul.msk.bf16.gmra.mxu2 %vm1127_vm3, %v5424_v16  ;;  %7407 = vmatmul.msk.bf16.gmra.mxu1 %vm1127_vm3, %v5424_v16 }
 0xa63   :  { %7401 = vmatmul.msk.bf16.gmra.mxu0 %vm1127_vm3, %v5424_v16 }
 0xa72   :  { %7414 = vmatmul.msk.bf16.gmra.mxu2 %vm1127_vm3, %v5425_v48  ;;  %7408 = vmatmul.msk.bf16.gmra.mxu1 %vm1127_vm3, %v5425_v48 }
 0xa73   :  { %7402 = vmatmul.msk.bf16.gmra.mxu0 %vm1127_vm3, %v5425_v48 }
 0xa9f   :  { %v5623_v51 = vpop.f32.mrf.mxu1 }
 0xaa0   :  { %v5592_v31 = vpop.f32.mrf.mxu0 }
 0xaa5   :  { %v5654_v28 = vpop.f32.mrf.mxu2 }
 0xaa7   :  { %v5624_v4 = vpop.f32.mrf.mxu1 }
 0xaa8   :  { %v5594_v58 = vpop.f32.mrf.mxu0 }
 0xaad   :  { %v5655_v30 = vpop.f32.mrf.mxu2 }
 0xaaf   :  { %v5626_v35 = vpop.f32.mrf.mxu1 }
 0xab0   :  { %v5597_v32 = vpop.f32.mrf.mxu0 }
 0xab5   :  { %v5657_v7 = vpop.f32.mrf.mxu2 }
 0xab7   :  { %v5627_v60 = vpop.f32.mrf.mxu1 }
 0xab8   :  { %v5599_v8 = vpop.f32.mrf.mxu0 }
 0xabd   :  { %v5658_v5 = vpop.f32.mrf.mxu2 }
 0xabf   :  { %v5629_v42 = vpop.f32.mrf.mxu1 }
 0xac0   :  { %v5602_v3 = vpop.f32.mrf.mxu0  ;;  %v5676_v22 = vadd.f32 %v5629_v42, %v5592_v31 }
 0xac5   :  { %v5660_v19 = vpop.f32.mrf.mxu2 }
 0xac7   :  { %v5631_v24 = vpop.f32.mrf.mxu1 }
 0xac8   :  { %v5603_v34 = vpop.f32.mrf.mxu0  ;;  %v5677_v17 = vadd.f32 %v5631_v24, %v5594_v58 }
 0xacd   :  { %v5661_v63 = vpop.f32.mrf.mxu2 }
 0xacf   :  { %v5634_v25 = vpop.f32.mrf.mxu1 }
 0xad0   :  { %v5605_v2 = vpop.f32.mrf.mxu0  ;;  %v5678_v6 = vadd.f32 %v5634_v25, %v5597_v32 }
 0xad5   :  { %v5663_v9 = vpop.f32.mrf.mxu2 }
 0xad7   :  { %v5636_v45 = vpop.f32.mrf.mxu1 }
 0xad8   :  { %v5606_v59 = vpop.f32.mrf.mxu0  ;;  %v5679_v23 = vadd.f32 %v5636_v45, %v5599_v8 }
 0xadd   :  { %v5664_v1 = vpop.f32.mrf.mxu2 }
 0xadf   :  { %v5639_v53 = vpop.f32.mrf.mxu1 }
 0xae0   :  { %v5608_v47 = vpop.f32.mrf.mxu0 }
 0xae5   :  { %v5666_v62 = vpop.f32.mrf.mxu2 }
 0xae6   :  { %v5680_v33 = vadd.f32 %v5676_v22, %v5666_v62 }
 0xae7   :  { %v5640_v15 = vpop.f32.mrf.mxu1 }
 0xae8   :  { %v11596_v0 = vadd.f32 %v8147_v11, %v5680_v33  ;;  %v5609_v29 = vpop.f32.mrf.mxu0 }
 0xaed   :  { %v5668_v52 = vpop.f32.mrf.mxu2 }
 0xaee   :  { %v5681_v39 = vadd.f32 %v5677_v17, %v5668_v52 }
 0xaef   :  { %v5642_v40 = vpop.f32.mrf.mxu1 }
 0xaf0   :  { %v11598_v54 = vadd.f32 %v8147_v11, %v5681_v39  ;;  %v5611_v37 = vpop.f32.mrf.mxu0 }
 0xaf5   :  { %v5671_v26 = vpop.f32.mrf.mxu2 }
 0xaf6   :  { %v5682_v55 = vadd.f32 %v5678_v6, %v5671_v26 }
 0xaf7   :  { %v5643_v27 = vpop.f32.mrf.mxu1 }
 0xaf8   :  { %v11600_v44 = vadd.f32 %v8147_v11, %v5682_v55  ;;  %v5612_v43 = vpop.f32.mrf.mxu0 }
 0xafd   :  { %v5673_v36 = vpop.f32.mrf.mxu2 }
 0xafe   :  { %v5683_v14 = vadd.f32 %v5679_v23, %v5673_v36 }
 0xb00   :  { %v11602_v50 = vadd.f32 %v8147_v11, %v5683_v14 }
 0xb01   :  { %8302 = dma.done.wait [#allocation6 + $0x3], 4096 }
 0xb02   :  { %8303 = vsyncadd [#allocation6 + $0x3], 4294963200  ;;  %v12086_v12 = vmov 0   ;;  %v7529_v49 = vld [vmem:[#allocation5 + $0xe0] sm:$0xf]  ;;  %s12087_s6 = sld [smem:[#allocation52_spill]] }
 0xb03   :  { %8148 = vset.pattern.permute.xlu0 %v12086_v12  ;;  %8149 = vset.pattern.permute.xlu1 %v12086_v12  ;;  %v7785_v41 = vld [vmem:[#allocation5 + $0xec] sm:$0xf0]  ;;  %v7783_v21 = vld [vmem:[#allocation5 + $0xe4] sm:$0xf]  ;;  %v7531_v13 = vld [vmem:[#allocation5 + $0xf0] sm:$0xf0] }
 0xb04   :  { %v7530_v61 = vor.u32 %v7785_v41, %v7529_v49  ;;  %v7537_v10 = vld [vmem:[#allocation5 + $0xe8] sm:$0xf]  ;;  %v7786_v20 = vld [vmem:[#allocation5 + $0xf4] sm:$0xf0]  ;;  %v7534_v46 = vor.u32 %v7783_v21, %v7531_v13  ;;  %v7513_v57 = vld [vmem:[#allocation5 + $0xc0] sm:$0xf] }
 0xb05   :  { %v7538_v56 = vor.u32 %v7786_v20, %v7537_v10  ;;  %v7781_v18 = vld [vmem:[#allocation5 + $0xcc] sm:$0xf0]  ;;  %v7779_v38 = vld [vmem:[#allocation5 + $0xc4] sm:$0xf]  ;;  %v7515_v48 = vld [vmem:[#allocation5 + $0xd0] sm:$0xf0] }
 0xb06   :  { %5900 = vmatpush.bf16.msra.mxu3 %v7530_v61  ;;  %v7514_v16 = vor.u32 %v7781_v18, %v7513_v57  ;;  %v7521_v51 = vld [vmem:[#allocation5 + $0xc8] sm:$0xf]  ;;  %v7782_v31 = vld [vmem:[#allocation5 + $0xd4] sm:$0xf0]  ;;  %5919 = vmatpush.bf16.msrb.mxu0 %v7534_v46  ;;  %v7518_v28 = vor.u32 %v7779_v38, %v7515_v48  ;;  %v7497_v58 = vld [vmem:[#allocation5 + $0xa0] sm:$0xf] }
 0xb07   :  { %5938 = vmatpush.bf16.msrb.mxu1 %v7538_v56  ;;  %v7522_v4 = vor.u32 %v7782_v31, %v7521_v51  ;;  %v7777_v30 = vld [vmem:[#allocation5 + $0xac] sm:$0xf0]  ;;  %v7775_v35 = vld [vmem:[#allocation5 + $0xa4] sm:$0xf]  ;;  %v7499_v32 = vld [vmem:[#allocation5 + $0xb0] sm:$0xf0] }
 0xb08   :  { %v7505_v7 = vld [vmem:[#allocation5 + $0xa8] sm:$0xf]  ;;  %v7778_v60 = vld [vmem:[#allocation5 + $0xb4] sm:$0xf0]  ;;  %v7498_v8 = vor.u32 %v7777_v30, %v7497_v58  ;;  %v7502_v5 = vor.u32 %v7775_v35, %v7499_v32  ;;  %v7481_v3 = vld [vmem:[#allocation5 + $0x80] sm:$0xf]  ;;  %v5696_v58 = vpack.c.bf16 %v11598_v54, %v11596_v0 }
 0xb09   :  { %v7506_v42 = vor.u32 %v7778_v60, %v7505_v7  ;;  %v7773_v19 = vld [vmem:[#allocation5 + $0x8c] sm:$0xf0]  ;;  %v7771_v24 = vld [vmem:[#allocation5 + $0x84] sm:$0xf]  ;;  %v7483_v34 = vld [vmem:[#allocation5 + $0x90] sm:$0xf0] }
 0xb0a   :  { %5901 = vmatpush.bf16.msra.mxu3 %v7514_v16  ;;  %5920 = vmatpush.bf16.msrb.mxu0 %v7518_v28  ;;  %v7489_v63 = vld [vmem:[#allocation5 + $0x88] sm:$0xf]  ;;  %v7774_v25 = vld [vmem:[#allocation5 + $0x94] sm:$0xf0]  ;;  %v7482_v2 = vor.u32 %v7773_v19, %v7481_v3  ;;  %v7486_v9 = vor.u32 %v7771_v24, %v7483_v34  ;;  %v7465_v59 = vld [vmem:[#allocation5 + $0x60] sm:$0xf]  ;;  %v5697_v34 = vpack.c.bf16 %v11602_v50, %v11600_v44 }
 0xb0b   :  { %5939 = vmatpush.bf16.msrb.mxu1 %v7522_v4  ;;  %v7490_v45 = vor.u32 %v7774_v25, %v7489_v63  ;;  %v7769_v1 = vld [vmem:[#allocation5 + $0x6c] sm:$0xf0]  ;;  %v7767_v53 = vld [vmem:[#allocation5 + $0x64] sm:$0xf]  ;;  %v7467_v47 = vld [vmem:[#allocation5 + $0x70] sm:$0xf0] }
 0xb0c   :  { %v7473_v22 = vld [vmem:[#allocation5 + $0x68] sm:$0xf]  ;;  %v7770_v11 = vld [vmem:[#allocation5 + $0x74] sm:$0xf0]  ;;  %v7466_v62 = vor.u32 %v7769_v1, %v7465_v59  ;;  %v7470_v33 = vor.u32 %v7767_v53, %v7467_v47  ;;  %v7449_v29 = vld [vmem:[#allocation5 + $0x40] sm:$0xf] }
 0xb0d   :  { %v7474_v15 = vor.u32 %v7770_v11, %v7473_v22  ;;  %v7765_v17 = vld [vmem:[#allocation5 + $0x4c] sm:$0xf0]  ;;  %v7763_v52 = vld [vmem:[#allocation5 + $0x44] sm:$0xf]  ;;  %v7451_v39 = vld [vmem:[#allocation5 + $0x50] sm:$0xf0] }
 0xb0e   :  { %5902 = vmatpush.bf16.msra.mxu3 %v7498_v8  ;;  %5921 = vmatpush.bf16.msrb.mxu0 %v7502_v5  ;;  %v7457_v40 = vld [vmem:[#allocation5 + $0x48] sm:$0xf]  ;;  %v7766_v37 = vld [vmem:[#allocation5 + $0x54] sm:$0xf0]  ;;  %v7450_v26 = vor.u32 %v7765_v17, %v7449_v29  ;;  %v7454_v55 = vor.u32 %v7763_v52, %v7451_v39  ;;  %v7433_v43 = vld [vmem:[#allocation5 + $0x20] sm:$0xf] }
 0xb0f   :  { %5940 = vmatpush.bf16.msrb.mxu1 %v7506_v42  ;;  %v6184_v6 = vld [vmem:[%s12087_s6] sm:$0xff]  ;;  %v7458_v27 = vor.u32 %v7766_v37, %v7457_v40  ;;  %v7761_v23 = vld [vmem:[#allocation5 + $0x2c] sm:$0xf0]  ;;  %v7435_v14 = vld [vmem:[#allocation5 + $0x30] sm:$0xf0]  ;;  %v12090_v37 = vmov 0.0  }
 0xb10   :  { %6189 = vperm.xlu0 %8148, %v6184_v6   ;;  %v7759_v36 = vld [vmem:[#allocation5 + $0x24] sm:$0xf]  ;;  %v7441_v12 = vld [vmem:[#allocation5 + $0x28] sm:$0xf]  ;;  %v7762_v49 = vld [vmem:[#allocation5 + $0x34] sm:$0xf0]  ;;  %v7434_v41 = vor.u32 %v7761_v23, %v7433_v43 }
 0xb11   :  { %v7417_v21 = vld [vmem:[#allocation5] sm:$0xf]  ;;  %v7438_v61 = vor.u32 %v7759_v36, %v7435_v14  ;;  %v7442_v13 = vor.u32 %v7762_v49, %v7441_v12  ;;  %v7757_v10 = vld [vmem:[#allocation5 + $0xc] sm:$0xf0]  ;;  %v7755_v20 = vld [vmem:[#allocation5 + $0x4] sm:$0xf] }
 0xb12   :  { %5903 = vmatpush.bf16.msra.mxu3 %v7482_v2  ;;  %5922 = vmatpush.bf16.msrb.mxu0 %v7486_v9  ;;  %v6185_v46 = vld [vmem:[%s12087_s6 + $0x8] sm:$0xff]  ;;  %v7419_v56 = vld [vmem:[#allocation5 + $0x10] sm:$0xf0]  ;;  %v7425_v57 = vld [vmem:[#allocation5 + $0x8] sm:$0xf]  ;;  %v7418_v48 = vor.u32 %v7757_v10, %v7417_v21  ;;  %s6368_s11 = sshll.u32 %s11954_s28, 4  ;;  %s6369_s11 = int_to_ptr.hbm [resolvable:$true] %s6368_s11 }
 0xb13   :  { %5941 = vmatpush.bf16.msrb.mxu1 %v7490_v45  ;;  %v7758_v18 = vld [vmem:[#allocation5 + $0x14] sm:$0xf0]  ;;  %v7784_v38 = vld [vmem:[#allocation5 + $0xec] sm:$0xf]  ;;  %v7539_v16 = vld [vmem:[#allocation5 + $0xf8] sm:$0xf0]  ;;  %v7422_v51 = vor.u32 %v7755_v20, %v7419_v56 }
 0xb14   :  { %v7426_v31 = vor.u32 %v7758_v18, %v7425_v57  ;;  %v7542_v28 = vor.u32 %v7784_v38, %v7539_v16  ;;  %v6186_v4 = vld [vmem:[%s12087_s6 + $0x10] sm:$0xff]  ;;  %v7780_v30 = vld [vmem:[#allocation5 + $0xcc] sm:$0xf]  ;;  %v7523_v35 = vld [vmem:[#allocation5 + $0xd8] sm:$0xf0]  ;;  %s8313_s29 = smov 512  }
 0xb15   :  { %6195 = vperm.xlu1 %8149, %v6186_v4   ;;  %v7526_v32 = vor.u32 %v7780_v30, %v7523_v35  ;;  %v7776_v7 = vld [vmem:[#allocation5 + $0xac] sm:$0xf]  ;;  %v7507_v60 = vld [vmem:[#allocation5 + $0xb8] sm:$0xf0]  ;;  %v11625_v44 = vld [vmem:[%s11948_s22] sm:$0xf] }
 0xb16   :  { %5904 = vmatpush.bf16.msra.mxu3 %v7466_v62  ;;  %5923 = vmatpush.bf16.msrb.mxu0 %v7470_v33  ;;  %v6187_v8 = vld [vmem:[%s12087_s6 + $0x18] sm:$0xff]  ;;  %v7510_v5 = vor.u32 %v7776_v7, %v7507_v60  ;;  %v7772_v0 = vld [vmem:[#allocation5 + $0x8c] sm:$0xf]  ;;  %v11628_v50 = vperm.slane %v11625_v44, 1  ;;  %v11634_v29 = vperm.slane %v11625_v44, 0  ;;  %v11639_v52 = vperm.slane %v11625_v44, 2 }
 0xb17   :  { %5942 = vmatpush.bf16.msrb.mxu1 %v7474_v15  ;;  %v7491_v54 = vld [vmem:[#allocation5 + $0x98] sm:$0xf0]  ;;  %v7768_v3 = vld [vmem:[#allocation5 + $0x6c] sm:$0xf]  ;;  %v12088_v15 = vld [vmem:[#allocation21_spill] sm:$0xff]  ;;  %s8312_s22 = smov [#allocation9]  }
 0xb18   :  { %6192 = vperm.xlu0 %8148, %v6185_v46   ;;  %v7494_v42 = vor.u32 %v7772_v0, %v7491_v54  ;;  %v7475_v19 = vld [vmem:[#allocation5 + $0x78] sm:$0xf0]  ;;  %v7764_v63 = vld [vmem:[#allocation5 + $0x4c] sm:$0xf]  ;;  %s6366_s0 = sshll.u32 %s8312_s22, 4  ;;  %s8314_s15 = smov 32   ;;  %s6367_s0 = int_to_ptr.vmem [resolvable:$true] %s6366_s0 }
 0xb19   :  { %v7478_v24 = vor.u32 %v7768_v3, %v7475_v19  ;;  %v7459_v25 = vld [vmem:[#allocation5 + $0x58] sm:$0xf0]  ;;  %v7760_v9 = vld [vmem:[#allocation5 + $0x2c] sm:$0xf]  ;;  %s8316_s28 = smov [#allocation7]   ;;  %s6358_s17 = sshll.u32 %s11953_s27, 4  ;;  %s6359_s17 = int_to_ptr.hbm [resolvable:$true] %s6358_s17 }
 0xb1a   :  { %5905 = vmatpush.bf16.msra.mxu3 %v7450_v26  ;;  %5924 = vmatpush.bf16.msrb.mxu0 %v7454_v55  ;;  %v7462_v2 = vor.u32 %v7764_v63, %v7459_v25  ;;  %v7443_v45 = vld [vmem:[#allocation5 + $0x38] sm:$0xf0]  ;;  %v7756_v1 = vld [vmem:[#allocation5 + $0xc] sm:$0xf]  ;;  %s6356_s16 = sshll.u32 %s8316_s28, 4  ;;  %s6357_s16 = int_to_ptr.vmem [resolvable:$true] %s6356_s16 }
 0xb1b   :  { %5943 = vmatpush.bf16.msrb.mxu1 %v7458_v27  ;;  %v7446_v59 = vor.u32 %v7760_v9, %v7443_v45  ;;  %v7427_v53 = vld [vmem:[#allocation5 + $0x18] sm:$0xf0]  ;;  %v12089_v40 = vld [vmem:[#allocation22_spill] sm:$0xff]  ;;  %v12091_v27 = vld [vmem:[#allocation23_spill] sm:$0xff] }
 0xb1c   :  { %v7430_v47 = vor.u32 %v7756_v1, %v7427_v53  ;;  %v12092_v12 = vld [vmem:[#allocation24_spill] sm:$0xff] }
 0xb1d   :  { %6198 = vperm.xlu1 %8149, %v6187_v8  }
 0xb1e   :  { %5906 = vmatpush.bf16.msra.mxu3 %v7434_v41  ;;  %5925 = vmatpush.bf16.msrb.mxu0 %v7438_v61 }
 0xb1f   :  { %5944 = vmatpush.bf16.msrb.mxu1 %v7442_v13 }
 0xb22   :  { %5907 = vmatpush.bf16.msra.mxu3 %v7418_v48  ;;  %5926 = vmatpush.bf16.msrb.mxu0 %v7422_v51 }
 0xb23   :  { %5945 = vmatpush.bf16.msrb.mxu1 %v7426_v31 }
 0xb25   :  { %5908 = vmatmul.bf16.vlgmr.msra.gmra.mxu3 %v5696_v58  ;;  %5927 = vmatmul.bf16.vlgmr.msrb.gmra.mxu0 %v5696_v58 }
 0xb26   :  { %5957 = vmatpush.bf16.msrb.mxu3 %v7542_v28  ;;  %5946 = vmatmul.bf16.vlgmr.msrb.gmra.mxu1 %v5696_v58 }
 0xb2a   :  { %5958 = vmatpush.bf16.msrb.mxu3 %v7526_v32 }
 0xb2e   :  { %5959 = vmatpush.bf16.msrb.mxu3 %v7510_v5 }
 0xb32   :  { %5960 = vmatpush.bf16.msrb.mxu3 %v7494_v42 }
 0xb35   :  { %5913 = vmatmul.bf16.gmra.mxu3 %v5697_v34  ;;  %5932 = vmatmul.bf16.gmra.mxu0 %v5697_v34 }
 0xb36   :  { %5961 = vmatpush.bf16.msrb.mxu3 %v7478_v24  ;;  %5951 = vmatmul.bf16.gmra.mxu1 %v5697_v34 }
 0xb3a   :  { %5962 = vmatpush.bf16.msrb.mxu3 %v7462_v2 }
 0xb3e   :  { %5963 = vmatpush.bf16.msrb.mxu3 %v7446_v59 }
 0xb42   :  { %5964 = vmatpush.bf16.msrb.mxu3 %v7430_v47 }
 0xb45   :  { %5965 = vmatmul.bf16.vlgmr.msrb.gmra.mxu3 %v5696_v58 }
 0xb55   :  { %5970 = vmatmul.bf16.gmra.mxu3 %v5697_v34 }
 0xb82   :  { %v6190_v22 = vpop.permute.xlu0 %6189 }
 0xb83   :  { %vm6200_vm8 = vcmp.eq.s32.totalorder %v12088_v15, %v6190_v22  ;;  %vm6201_vm3 = vcmp.eq.s32.totalorder %v12089_v40, %v6190_v22  ;;  %vm6202_vm0 = vcmp.eq.s32.totalorder %v12091_v27, %v6190_v22  ;;  %vm6203_vm1 = vcmp.eq.s32.totalorder %v12092_v12, %v6190_v22 }
 0xb84   :  { %v7543_v6 = vsel %vm6200_vm8, 1.0, %v12090_v37  ;;  %v7544_v43 = vsel %vm6201_vm3, 1.0, %v12090_v37  ;;  %v7545_v10 = vsel %vm6202_vm0, 1.0, %v12090_v37  ;;  %v7546_v56 = vsel %vm6203_vm1, 1.0, %v12090_v37 }
 0xb85   :  { %v6248_v49 = vmul.f32 0.9, %v7543_v6  ;;  %v6249_v20 = vmul.f32 0.9, %v7544_v43  ;;  %v6250_v51 = vmul.f32 0.9, %v7545_v10 }
 0xb86   :  { %v11676_v30 = vmul.f32 0.9, %v7546_v56  ;;  %vm6349_vm3 = vcmask 0  }
 0xb87   :  { %v11636_v17 = vpop.permute.xlu1 %6195  ;;  %v11667_v16 = vadd.f32 0.0001953125, %v6248_v49  ;;  %v11678_v35 = vadd.f32 0.0001953125, %v6249_v20  ;;  %v11703_v53 = vadd.f32 0.0001953125, %v6250_v51 }
 0xb88   :  { %vm6208_vm2 = vcmp.eq.s32.totalorder %v12088_v15, %v11636_v17  ;;  %vm6209_vm9 = vcmp.eq.s32.totalorder %v12089_v40, %v11636_v17  ;;  %vm6210_vm10 = vcmp.eq.s32.totalorder %v12091_v27, %v11636_v17  ;;  %vm6211_vm11 = vcmp.eq.s32.totalorder %v12092_v12, %v11636_v17 }
 0xb89   :  { %v7551_v5 = vsel %vm6208_vm2, 1.0, %v12090_v37  ;;  %v6267_v17 = vadd.f32 0.0001953125, %v11676_v30 }
 0xb8a   :  { %v11630_v33 = vpop.permute.xlu0 %6192  ;;  %v6256_v25 = vmul.f32 0.9, %v7551_v5 }
 0xb8b   :  { %vm6204_vm15 = vcmp.eq.s32.totalorder %v12088_v15, %v11630_v33  ;;  %vm6205_vm5 = vcmp.eq.s32.totalorder %v12089_v40, %v11630_v33  ;;  %vm6206_vm6 = vcmp.eq.s32.totalorder %v12091_v27, %v11630_v33  ;;  %vm6207_vm7 = vcmp.eq.s32.totalorder %v12092_v12, %v11630_v33 }
 0xb8c   :  { %v7547_v36 = vsel %vm6204_vm15, 1.0, %v12090_v37  ;;  %v7548_v59 = vsel %vm6205_vm5, 1.0, %v12090_v37  ;;  %v7549_v47 = vsel %vm6206_vm6, 1.0, %v12090_v37  ;;  %v7550_v33 = vsel %vm6207_vm7, 1.0, %v12090_v37 }
 0xb8d   :  { %v6252_v46 = vmul.f32 0.9, %v7547_v36  ;;  %v6254_v49 = vmul.f32 0.9, %v7549_v47 }
 0xb8f   :  { %v11671_v48 = vpop.permute.xlu1 %6198  ;;  %v11680_v32 = vadd.f32 0.0001953125, %v6252_v46 }
 0xb90   :  { %vm6212_vm4 = vcmp.eq.s32.totalorder %v12088_v15, %v11671_v48  ;;  %vm6213_vm12 = vcmp.eq.s32.totalorder %v12089_v40, %v11671_v48  ;;  %vm6214_vm13 = vcmp.eq.s32.totalorder %v12091_v27, %v11671_v48  ;;  %vm6215_vm14 = vcmp.eq.s32.totalorder %v12092_v12, %v11671_v48 }
 0xb91   :  { %v7555_v9 = vsel %vm6212_vm4, 1.0, %v12090_v37  ;;  %v7558_v12 = vsel %vm6215_vm14, 1.0, %v12090_v37 }
 0xb92   :  { %v6260_v6 = vmul.f32 0.9, %v7555_v9 }
 0xba2   :  { %v5928_v11 = vpop.f32.mrf.mxu0 }
 0xba3   :  { %v5947_v62 = vpop.f32.mrf.mxu1  ;;  %v11642_v39 = vadd.f32 %v5928_v11, %v11628_v50 }
 0xba4   :  { %v11654_v23 = vadd.f32 %v5947_v62, %v11639_v52 }
 0xba5   :  { %v5993_v14 = vand.u32 2147483647, %v11642_v39  ;;  %v5977_v51 = vmax.f32 %v11642_v39, 0.0 }
 0xba6   :  { %v5994_v57 = vand.u32 2147483647, %v11654_v23  ;;  %v5978_v5 = vmax.f32 %v11654_v23, 0.0 }
 0xba7   :  { %v6009_v38 = vsub.f32 0.0, %v5993_v14 }
 0xba8   :  { %v5909_v26 = vpop.f32.mrf.mxu3  ;;  %v6010_v60 = vsub.f32 0.0, %v5994_v57 }
 0xba9   :  { %v11649_v55 = vadd.f32 %v5909_v26, %v11634_v29  ;;  %v6026_v0 = vmul.f32 1.442695, %v6009_v38  ;;  %v6253_v26 = vmul.f32 0.9, %v7548_v59  ;;  %v6255_v59 = vmul.f32 0.9, %v7550_v33 }
 0xbaa   :  { %v5930_v41 = vpop.f32.mrf.mxu0  ;;  %v6028_v45 = vmul.f32 1.442695, %v6010_v60  ;;  %v11725_v60 = vadd.f32 0.0001953125, %v6254_v49 }
 0xbab   :  { %v5949_v21 = vpop.f32.mrf.mxu1  ;;  %v5992_v61 = vand.u32 2147483647, %v11649_v55  ;;  %v11661_v13 = vadd.f32 %v5930_v41, %v11628_v50 }
 0xbac   :  { %v11674_v4 = vadd.f32 %v5949_v21, %v11639_v52  ;;  %v11713_v21 = vadd.f32 0.0001953125, %v6256_v25 }
 0xbad   :  { %v5997_v18 = vand.u32 2147483647, %v11661_v13  ;;  %v6008_v31 = vsub.f32 0.0, %v5992_v61 }
 0xbae   :  { %v5998_v19 = vand.u32 2147483647, %v11674_v4  ;;  %v5982_v49 = vmax.f32 %v11674_v4, 0.0 }
 0xbaf   :  { %v6013_v28 = vsub.f32 0.0, %v5997_v18  ;;  %v6024_v3 = vmul.f32 1.442695, %v6008_v31  ;;  %v11721_v18 = vadd.f32 0.0001953125, %v6260_v6 }
 0xbb0   :  { %v5911_v58 = vpop.f32.mrf.mxu3  ;;  %v6014_v11 = vsub.f32 0.0, %v5998_v19  ;;  %v6269_v31 = vadd.f32 0.0001953125, %v6253_v26  ;;  %v11731_v19 = vperm.slane %v11625_v44, 3 }
 0xbb1   :  { %v11683_v7 = vadd.f32 %v5911_v58, %v11634_v29  ;;  %v6034_v8 = vmul.f32 1.442695, %v6013_v28 }
 0xbb2   :  { %v5933_v42 = vpop.f32.mrf.mxu0  ;;  %v6036_v56 = vmul.f32 1.442695, %v6014_v11 }
 0xbb3   :  { %v5996_v54 = vand.u32 2147483647, %v11683_v7  ;;  %8150 = vpow2.f32 %v6034_v8  ;;  %v11695_v24 = vadd.f32 %v5933_v42, %v11628_v50  ;;  %v5952_v34 = vpop.f32.mrf.mxu1 }
 0xbb4   :  { %v11698_v2 = vadd.f32 %v5952_v34, %v11639_v52  ;;  %8152 = vpow2.f32 %v6026_v0 }
 0xbb5   :  { %v6012_v63 = vsub.f32 0.0, %v5996_v54  ;;  %v6001_v1 = vand.u32 2147483647, %v11695_v24  ;;  %8154 = vpow2.f32 %v6024_v3 }
 0xbb6   :  { %v6002_v43 = vand.u32 2147483647, %v11698_v2 }
 0xbb7   :  { %v6032_v22 = vmul.f32 1.442695, %v6012_v63  ;;  %v6017_v62 = vsub.f32 0.0, %v6001_v1  ;;  %v5981_v63 = vmax.f32 %v11661_v13, 0.0 }
 0xbb8   :  { %v5914_v15 = vpop.f32.mrf.mxu3  ;;  %v6018_v10 = vsub.f32 0.0, %v6002_v43 }
 0xbb9   :  { %8156 = vpow2.f32 %v6032_v22  ;;  %v11711_v36 = vadd.f32 %v5914_v15, %v11634_v29  ;;  %v8151_v14 = vpop.eup %8150  ;;  %v6042_v41 = vmul.f32 1.442695, %v6017_v62 }
 0xbba   :  { %8158 = vpow2.f32 %v6028_v45  ;;  %v6061_v61 = vadd.f32 1.0, %v8151_v14  ;;  %v5935_v46 = vpop.f32.mrf.mxu0  ;;  %v8153_v38 = vpop.eup %8152  ;;  %v6044_v54 = vmul.f32 1.442695, %v6018_v10  ;;  %v11746_v14 = vmul.f32 %v6269_v31, %v11661_v13 }
 0xbbb   :  { %v6000_v20 = vand.u32 2147483647, %v11711_v36  ;;  %8160 = vpow2.f32 %v6042_v41  ;;  %v11719_v57 = vadd.f32 %v5935_v46, %v11628_v50  ;;  %v8155_v58 = vpop.eup %8154  ;;  %v5976_v50 = vmax.f32 %v11649_v55, 0.0  ;;  %v5954_v3 = vpop.f32.mrf.mxu1 }
 0xbbc   :  { %8162 = vlog2.f32 %v6061_v61  ;;  %v6056_v22 = vadd.f32 1.0, %v8155_v58  ;;  %v11740_v11 = vadd.f32 %v5954_v3, %v11639_v52  ;;  %v6057_v15 = vadd.f32 1.0, %v8153_v38 }
 0xbbd   :  { %v6016_v28 = vsub.f32 0.0, %v6000_v20  ;;  %v6005_v8 = vand.u32 2147483647, %v11719_v57  ;;  %8164 = vpow2.f32 %v6036_v56  ;;  %v11751_v52 = vmul.f32 %v11667_v16, %v11649_v55 }
 0xbbe   :  { %v6006_v10 = vand.u32 2147483647, %v11740_v11  ;;  %v11756_v56 = vadd.f32 0.0001953125, %v6255_v59  ;;  %v7552_v38 = vsel %vm6209_vm9, 1.0, %v12090_v37  ;;  %v11766_v16 = vsel %vm6210_vm10, 1.0, %v12090_v37 }
 0xbbf   :  { %v8157_v0 = vpop.eup %8156  ;;  %v6040_v42 = vmul.f32 1.442695, %v6016_v28  ;;  %v6021_v9 = vsub.f32 0.0, %v6005_v8  ;;  %v5985_v3 = vmax.f32 %v11695_v24, 0.0 }
 0xbc0   :  { %v8159_v34 = vpop.eup %8158  ;;  %v6060_v25 = vadd.f32 1.0, %v8157_v0  ;;  %v5916_v45 = vpop.f32.mrf.mxu3 }
 0xbc1   :  { %8166 = vpow2.f32 %v6040_v42  ;;  %v11737_v1 = vadd.f32 %v5916_v45, %v11634_v29  ;;  %v8161_v47 = vpop.eup %8160  ;;  %v6050_v44 = vmul.f32 1.442695, %v6021_v9  ;;  %v6058_v29 = vadd.f32 1.0, %v8159_v34 }
 0xbc2   :  { %8168 = vlog2.f32 %v6060_v25  ;;  %v8163_v62 = vpop.eup %8162  ;;  %v6065_v6 = vadd.f32 1.0, %v8161_v47  ;;  %v6022_v9 = vsub.f32 0.0, %v6006_v10 }
 0xbc3   :  { %8170 = vpow2.f32 %v6044_v54  ;;  %v6083_v26 = vmul.f32 0.6931472, %v8163_v62  ;;  %v6004_v43 = vand.u32 2147483647, %v11737_v1  ;;  %v8165_v41 = vpop.eup %8164  ;;  %v5980_v54 = vmax.f32 %v11683_v7, 0.0 }
 0xbc4   :  { %8172 = vpow2.f32 %v6050_v44  ;;  %v6062_v45 = vadd.f32 1.0, %v8165_v41 }
 0xbc5   :  { %8174 = vlog2.f32 %v6065_v6  ;;  %v11753_v61 = vadd.f32 %v6083_v26, %v5981_v63  ;;  %v6020_v20 = vsub.f32 0.0, %v6004_v43 }
 0xbc6   :  { %8176 = vlog2.f32 %v6056_v22 }
 0xbc7   :  { %v8167_v46 = vpop.eup %8166  ;;  %8178 = vlog2.f32 %v6057_v15  ;;  %v6125_v28 = vsub.f32 %v11661_v13, %v11753_v61  ;;  %v6048_v33 = vmul.f32 1.442695, %v6020_v20  ;;  %v6257_v15 = vmul.f32 0.9, %v7552_v38 }
 0xbc8   :  { %v8169_v31 = vpop.eup %8168  ;;  %v6064_v58 = vadd.f32 1.0, %v8167_v46  ;;  %v5966_v8 = vpop.f32.mrf.mxu3  ;;  %8180 = vlog2.f32 %v6058_v29  ;;  %v5984_v46 = vmax.f32 %v11711_v36, 0.0 }
 0xbc9   :  { %v8171_v0 = vpop.eup %8170  ;;  %v6081_v42 = vmul.f32 0.6931472, %v8169_v31  ;;  %v11773_v34 = vadd.f32 %v5966_v8, %v11731_v19  ;;  %v6146_v25 = vmul.f32 1.442695, %v6125_v28  ;;  %v6052_v31 = vmul.f32 1.442695, %v6022_v9 }
 0xbca   :  { %v8173_v63 = vpop.eup %8172  ;;  %8182 = vlog2.f32 %v6064_v58  ;;  %v6066_v6 = vadd.f32 1.0, %v8171_v0 }
 0xbcb   :  { %v8175_v59 = vpop.eup %8174  ;;  %v11775_v13 = vadd.f32 %v6081_v42, %v5980_v54  ;;  %v6069_v47 = vadd.f32 1.0, %v8173_v63  ;;  %8184 = vpow2.f32 %v6048_v33  ;;  %v5995_v22 = vand.u32 2147483647, %v11773_v34 }
 0xbcc   :  { %v8177_v44 = vpop.eup %8176  ;;  %8186 = vpow2.f32 %v6146_v25  ;;  %v6091_v62 = vmul.f32 0.6931472, %v8175_v59  ;;  %v5989_v54 = vmax.f32 %v11719_v57, 0.0 }
 0xbcd   :  { %v8179_v26 = vpop.eup %8178  ;;  %v6124_v43 = vsub.f32 %v11683_v7, %v11775_v13  ;;  %8188 = vlog2.f32 %v6069_v47  ;;  %v6011_v29 = vsub.f32 0.0, %v5995_v22  ;;  %v6073_v10 = vmul.f32 0.6931472, %v8177_v44 }
 0xbce   :  { %v8181_v41 = vpop.eup %8180  ;;  %v11780_v20 = vadd.f32 %v6091_v62, %v5985_v3  ;;  %8190 = vlog2.f32 %v6062_v45  ;;  %v6075_v3 = vmul.f32 0.6931472, %v8179_v26 }
 0xbcf   :  { %v6144_v28 = vmul.f32 1.442695, %v6124_v43  ;;  %v6030_v58 = vmul.f32 1.442695, %v6011_v29  ;;  %v6077_v33 = vmul.f32 0.6931472, %v8181_v41  ;;  %v11785_v38 = vadd.f32 %v6073_v10, %v5976_v50 }
 0xbd0   :  { %v8183_v8 = vpop.eup %8182  ;;  %v6129_v0 = vsub.f32 %v11695_v24, %v11780_v20  ;;  %v5968_v42 = vpop.f32.mrf.mxu3  ;;  %8192 = vlog2.f32 %v6066_v6  ;;  %v11806_v29 = vadd.f32 %v6075_v3, %v5977_v51  ;;  %v11819_v3 = vadd.f32 0.0001953125, %v6257_v15 }
 0xbd1   :  { %v8185_v63 = vpop.eup %8184  ;;  %8194 = vpow2.f32 %v6144_v28  ;;  %v6089_v25 = vmul.f32 0.6931472, %v8183_v8  ;;  %v11791_v9 = vadd.f32 %v5968_v42, %v11731_v19  ;;  %v11795_v45 = vadd.f32 %v6077_v33, %v5978_v5 }
 0xbd2   :  { %v8187_v50 = vpop.eup %8186  ;;  %v6154_v59 = vmul.f32 1.442695, %v6129_v0  ;;  %v6068_v47 = vadd.f32 1.0, %v8185_v63  ;;  %8196 = vpow2.f32 %v6030_v58  ;;  %v6120_v22 = vsub.f32 %v11649_v55, %v11785_v38 }
 0xbd3   :  { %v8189_v44 = vpop.eup %8188  ;;  %6173 = vst [vmem:[#allocation9 + $0x28] sm:$0xff] %v8187_v50  ;;  %v11799_v62 = vadd.f32 %v6089_v25, %v5984_v46  ;;  %8198 = vpow2.f32 %v6052_v31  ;;  %v5999_v6 = vand.u32 2147483647, %v11791_v9  ;;  %v6122_v26 = vsub.f32 %v11654_v23, %v11795_v45 }
 0xbd4   :  { %v8191_v43 = vpop.eup %8190  ;;  %8200 = vpow2.f32 %v6154_v59  ;;  %v6099_v5 = vmul.f32 0.6931472, %v8189_v44  ;;  %v6136_v10 = vmul.f32 1.442695, %v6120_v22  ;;  %v11813_v28 = vmul.f32 0.9, %v11766_v16 }
 0xbd5   :  { %v6128_v55 = vsub.f32 %v11711_v36, %v11799_v62  ;;  %8202 = vlog2.f32 %v6068_v47  ;;  %v6015_v41 = vsub.f32 0.0, %v5999_v6  ;;  %v6140_v46 = vmul.f32 1.442695, %v6122_v26 }
 0xbd6   :  { %v8193_v31 = vpop.eup %8192  ;;  %v11815_v58 = vadd.f32 %v6099_v5, %v5989_v54  ;;  %8204 = vpow2.f32 %v6136_v10  ;;  %v6121_v0 = vsub.f32 %v11642_v39, %v11806_v29  ;;  %v5986_v63 = vmax.f32 %v11698_v2, 0.0 }
 0xbd7   :  { %v8195_v33 = vpop.eup %8194  ;;  %v6152_v51 = vmul.f32 1.442695, %v6128_v55  ;;  %v6038_v8 = vmul.f32 1.442695, %v6015_v41  ;;  %8206 = vpow2.f32 %v6140_v46  ;;  %v6085_v54 = vmul.f32 0.6931472, %v8191_v43 }
 0xbd8   :  { %v8197_v42 = vpop.eup %8196  ;;  %6172 = vst [vmem:[#allocation9 + $0x20] sm:$0xff] %v8195_v33  ;;  %v6133_v16 = vsub.f32 %v11719_v57, %v11815_v58  ;;  %v5971_v25 = vpop.f32.mrf.mxu3  ;;  %v6138_v22 = vmul.f32 1.442695, %v6121_v0  ;;  %v6281_v15 = vmul.f32 %v11678_v35, %v11642_v39  ;;  %v5988_v43 = vmax.f32 %v11737_v1, 0.0 }
 0xbd9   :  { %v8199_v50 = vpop.eup %8198  ;;  %8208 = vpow2.f32 %v6152_v51  ;;  %v11825_v59 = vadd.f32 %v5971_v25, %v11731_v19  ;;  %v6059_v47 = vadd.f32 1.0, %v8197_v42  ;;  %v11831_v26 = vadd.f32 %v6085_v54, %v5982_v49 }
 0xbda   :  { %v8201_v44 = vpop.eup %8200  ;;  %v6162_v6 = vmul.f32 1.442695, %v6133_v16  ;;  %8210 = vpow2.f32 %v6038_v8  ;;  %v6093_v55 = vmul.f32 0.6931472, %v8193_v31  ;;  %v6282_v33 = vmul.f32 %v11703_v53, %v11654_v23 }
 0xbdb   :  { %v8203_v5 = vpop.eup %8202  ;;  %6177 = vst [vmem:[#allocation9 + $0x48] sm:$0xff] %v8201_v44  ;;  %v6003_v10 = vand.u32 2147483647, %v11825_v59  ;;  %8212 = vlog2.f32 %v6059_v47  ;;  %v6126_v39 = vsub.f32 %v11674_v4, %v11831_v26  ;;  %v7554_v49 = vsel %vm6211_vm11, 1.0, %v12090_v37 }
 0xbdc   :  { %v8205_v41 = vpop.eup %8204  ;;  %8214 = vpow2.f32 %v6162_v6  ;;  %v6097_v46 = vmul.f32 0.6931472, %v8203_v5  ;;  %v11843_v8 = vadd.f32 %v6093_v55, %v5986_v63  ;;  %v6296_v23 = vsub.f32 %v11785_v38, %v11751_v52 }
 0xbdd   :  { %v8207_v35 = vpop.eup %8206  ;;  %v6019_v51 = vsub.f32 0.0, %v6003_v10  ;;  %6168 = vst [vmem:[#allocation9] sm:$0xff] %v8205_v41  ;;  %8216 = vpow2.f32 %v6138_v22  ;;  %v6297_v53 = vsub.f32 %v11806_v29, %v6281_v15  ;;  %v6148_v0 = vmul.f32 1.442695, %v6126_v39 }
 0xbde   :  { %v11845_v31 = vadd.f32 %v6097_v46, %v5988_v43  ;;  %6170 = vst [vmem:[#allocation9 + $0x10] sm:$0xff] %v8207_v35  ;;  %v5979_v25 = vmax.f32 %v11773_v34, 0.0  ;;  %v6130_v54 = vsub.f32 %v11698_v2, %v11843_v8  ;;  %v6298_v52 = vsub.f32 %v11795_v45, %v6282_v33 }
 0xbdf   :  { %v8209_v42 = vpop.eup %8208  ;;  %v6046_v16 = vmul.f32 1.442695, %v6019_v51  ;;  %8218 = vpow2.f32 %v6148_v0  ;;  %v6070_v38 = vadd.f32 1.0, %v8199_v50  ;;  %v6312_v10 = vadd.f32 %v6297_v53, %v6296_v23 }
 0xbe0   :  { %v8211_v63 = vpop.eup %8210  ;;  %6176 = vst [vmem:[#allocation9 + $0x40] sm:$0xff] %v8209_v42  ;;  %v6132_v47 = vsub.f32 %v11737_v1, %v11845_v31  ;;  %v5973_v22 = vpop.f32.mrf.mxu3  ;;  %v6156_v30 = vmul.f32 1.442695, %v6130_v54  ;;  %v6284_v41 = vmul.f32 %v11680_v32, %v11683_v7  ;;  %v6283_v46 = vmul.f32 %v6267_v17, %v11773_v34 }
 0xbe1   :  { %v8213_v29 = vpop.eup %8212  ;;  %8220 = vpow2.f32 %v6046_v16  ;;  %v11858_v44 = vadd.f32 %v5973_v22, %v11731_v19  ;;  %v6063_v6 = vadd.f32 1.0, %v8211_v63  ;;  %v6274_v19 = vadd.f32 0.0001953125, %v11813_v28 }
 0xbe2   :  { %v8215_v15 = vpop.eup %8214  ;;  %v6160_v5 = vmul.f32 1.442695, %v6132_v47  ;;  %v6079_v43 = vmul.f32 0.6931472, %v8213_v29  ;;  %8222 = vlog2.f32 %v6070_v38  ;;  %v6259_v33 = vmul.f32 0.9, %v7554_v49 }
 0xbe3   :  { %v8217_v55 = vpop.eup %8216  ;;  %6181 = vst [vmem:[#allocation9 + $0x68] sm:$0xff] %v8215_v15  ;;  %v6007_v45 = vand.u32 2147483647, %v11858_v44  ;;  %8224 = vlog2.f32 %v6063_v6  ;;  %v6300_v35 = vsub.f32 %v11775_v13, %v6284_v41  ;;  %v11870_v7 = vmul.f32 %v11819_v3, %v11695_v24 }
 0xbe4   :  { %8226 = vpow2.f32 %v6160_v5  ;;  %v6107_v50 = vadd.f32 %v6079_v43, %v5979_v25  ;;  %6169 = vst [vmem:[#allocation9 + $0x8] sm:$0xff] %v8217_v55  ;;  %v6313_v53 = vadd.f32 %v6312_v10, %v6298_v52  ;;  %v5990_v0 = vmax.f32 %v11740_v11, 0.0 }
 0xbe5   :  { %v6023_v39 = vsub.f32 0.0, %v6007_v45  ;;  %8228 = vpow2.f32 %v6156_v30  ;;  %v8219_v32 = vpop.eup %8218  ;;  %v6286_v49 = vmul.f32 %v11725_v60, %v11674_v4  ;;  %v6301_v13 = vsub.f32 %v11753_v61, %v11746_v14 }
 0xbe6   :  { %v6123_v51 = vsub.f32 %v11773_v34, %v6107_v50  ;;  %v6299_v23 = vsub.f32 %v6107_v50, %v6283_v46  ;;  %6174 = vst [vmem:[#allocation9 + $0x30] sm:$0xff] %v8219_v32  ;;  %v7556_v24 = vsel %vm6213_vm12, 1.0, %v12090_v37  ;;  %v6275_v60 = vadd.f32 0.0001953125, %v6259_v33 }
 0xbe7   :  { %v8221_v28 = vpop.eup %8220  ;;  %v6054_v42 = vmul.f32 1.442695, %v6023_v39  ;;  %v6317_v54 = vadd.f32 %v6301_v13, %v6300_v35  ;;  %v5983_v14 = vmax.f32 %v11791_v9, 0.0  ;;  %v6261_v40 = vmul.f32 0.9, %v7556_v24 }
 0xbe8   :  { %v8223_v16 = vpop.eup %8222  ;;  %v6142_v34 = vmul.f32 1.442695, %v6123_v51  ;;  %v6314_v3 = vadd.f32 %v6313_v53, %v6299_v23  ;;  %v6067_v25 = vadd.f32 1.0, %v8221_v28  ;;  %v6302_v22 = vsub.f32 %v11831_v26, %v6286_v49 }
 0xbe9   :  { %v8225_v17 = vpop.eup %8224  ;;  %8230 = vpow2.f32 %v6054_v42  ;;  %v6101_v63 = vmul.f32 0.6931472, %v8223_v16  ;;  %v6288_v38 = vmul.f32 %v11713_v21, %v11711_v36  ;;  %v7557_v29 = vsel %vm6214_vm13, 1.0, %v12090_v37 }
 0xbea   :  { %v8227_v4 = vpop.eup %8226  ;;  %8232 = vpow2.f32 %v6142_v34  ;;  %6315 = vadd.xlane.f32.xlu2 %v6314_v3  ;;  %v6087_v61 = vmul.f32 0.6931472, %v8225_v17  ;;  %v6287_v30 = vmul.f32 %v11756_v56, %v11791_v9  ;;  %v6318_v26 = vadd.f32 %v6317_v54, %v6302_v22 }
 0xbeb   :  { %v8229_v47 = vpop.eup %8228  ;;  %6180 = vst [vmem:[#allocation9 + $0x60] sm:$0xff] %v8227_v4  ;;  %8234 = vlog2.f32 %v6067_v25  ;;  %v11886_v52 = vadd.f32 %v6101_v63, %v5990_v0  ;;  %v6290_v15 = vmul.f32 %v6274_v19, %v11698_v2  ;;  %v6304_v27 = vsub.f32 %v11799_v62, %v6288_v38 }
 0xbec   :  { %v6111_v6 = vadd.f32 %v6087_v61, %v5983_v14  ;;  %6178 = vst [vmem:[#allocation9 + $0x50] sm:$0xff] %v8229_v47  ;;  %v6305_v43 = vsub.f32 %v11780_v20, %v11870_v7  ;;  %v6262_v56 = vmul.f32 0.9, %v7557_v29  ;;  %v6277_v55 = vadd.f32 0.0001953125, %v6261_v40 }
 0xbed   :  { %v6134_v5 = vsub.f32 %v11740_v11, %v11886_v52  ;;  %v6306_v20 = vsub.f32 %v11843_v8, %v6290_v15  ;;  %v6263_v33 = vmul.f32 0.9, %v7558_v12  ;;  %v6292_v37 = vmul.f32 %v11721_v18, %v11737_v1 }
 0xbee   :  { %v6127_v36 = vsub.f32 %v11791_v9, %v6111_v6  ;;  %v6303_v21 = vsub.f32 %v6111_v6, %v6287_v30  ;;  %v5987_v9 = vmax.f32 %v11825_v59, 0.0  ;;  %v6322_v46 = vadd.f32 %v6305_v43, %v6304_v27 }
 0xbef   :  { %v8231_v10 = vpop.eup %8230  ;;  %v6164_v41 = vmul.f32 1.442695, %v6134_v5  ;;  %v6278_v39 = vadd.f32 0.0001953125, %v6262_v56  ;;  %v6293_v35 = vmul.f32 %v6277_v55, %v11719_v57  ;;  %v6291_v7 = vmul.f32 %v6275_v60, %v11825_v59 }
 0xbf0   :  { %v8233_v45 = vpop.eup %8232  ;;  %v6150_v48 = vmul.f32 1.442695, %v6127_v36  ;;  %v6319_v2 = vadd.f32 %v6318_v26, %v6303_v21  ;;  %v6071_v19 = vadd.f32 1.0, %v8231_v10  ;;  %v6323_v53 = vadd.f32 %v6322_v46, %v6306_v20 }
 0xbf1   :  { %v8235_v50 = vpop.eup %8234  ;;  %6171 = vst [vmem:[#allocation9 + $0x18] sm:$0xff] %v8233_v45  ;;  %8236 = vpow2.f32 %v6164_v41  ;;  %v6308_v28 = vsub.f32 %v11845_v31, %v6292_v37  ;;  %v6279_v8 = vadd.f32 0.0001953125, %v6263_v33  ;;  %v6294_v57 = vmul.f32 %v6278_v39, %v11740_v11 }
 0xbf2   :  { %8238 = vpow2.f32 %v6150_v48  ;;  %6320 = vadd.xlane.f32.xlu2 %v6319_v2  ;;  %v6095_v62 = vmul.f32 0.6931472, %v8235_v50  ;;  %v6309_v16 = vsub.f32 %v11815_v58, %v6293_v35  ;;  %v5991_v1 = vmax.f32 %v11858_v44, 0.0 }
 0xbf3   :  { %8240 = vlog2.f32 %v6071_v19  ;;  %v6295_v31 = vmul.f32 %v6279_v8, %v11858_v44  ;;  %v6310_v3 = vsub.f32 %v11886_v52, %v6294_v57  ;;  %v8315_v60 = vmov 32.0  }
 0xbf4   :  { %v6115_v32 = vadd.f32 %v6095_v62, %v5987_v9  ;;  %v6327_v24 = vadd.f32 %v6309_v16, %v6308_v28 }
 0xbf6   :  { %v6131_v51 = vsub.f32 %v11825_v59, %v6115_v32  ;;  %v6307_v23 = vsub.f32 %v6115_v32, %v6291_v7  ;;  %v6328_v54 = vadd.f32 %v6327_v24, %v6310_v3 }
 0xbf7   :  { %v8237_v0 = vpop.eup %8236 }
 0xbf8   :  { %v8239_v42 = vpop.eup %8238  ;;  %v6158_v49 = vmul.f32 1.442695, %v6131_v51  ;;  %v6324_v13 = vadd.f32 %v6323_v53, %v6307_v23  ;;  %6182 = vst [vmem:[#allocation9 + $0x70] sm:$0xff] %v8237_v0 }
 0xbf9   :  { %v8241_v18 = vpop.eup %8240  ;;  %6175 = vst [vmem:[#allocation9 + $0x38] sm:$0xff] %v8239_v42 }
 0xbfa   :  { %8242 = vpow2.f32 %v6158_v49  ;;  %6325 = vadd.xlane.f32.xlu0 %v6324_v13  ;;  %v6103_v59 = vmul.f32 0.6931472, %v8241_v18 }
 0xbfc   :  { %v6119_v34 = vadd.f32 %v6103_v59, %v5991_v1 }
 0xbfe   :  { %v6135_v25 = vsub.f32 %v11858_v44, %v6119_v34  ;;  %v6311_v17 = vsub.f32 %v6119_v34, %v6295_v31 }
 0xc00   :  { %v8243_v11 = vpop.eup %8242  ;;  %v6166_v63 = vmul.f32 1.442695, %v6135_v25  ;;  %v6329_v58 = vadd.f32 %v6328_v54, %v6311_v17 }
 0xc01   :  { %6179 = vst [vmem:[#allocation9 + $0x58] sm:$0xff] %v8243_v11 }
 0xc02   :  { %8244 = vpow2.f32 %v6166_v63  ;;  %6330 = vadd.xlane.f32.xlu1 %v6329_v58 }
 0xc03   :  { %8246 = vrcp.f32 %v8315_v60 }
 0xc08   :  { %v8245_v4 = vpop.eup %8244 }
 0xc09   :  { %6183 = vst [vmem:[#allocation9 + $0x78] sm:$0xff] %v8245_v4  ;;  %v8247_v14 = vpop.eup %8246 }
 0xc0a   :  { %6374 = dma.vmem_to_hbm [thread:$0]  %s6367_s0, 2048, %s6369_s11, [#allocation10], %s8313_s29, %s8313_s29, %s8314_s15   ;;  %v6342_v40 = vmul.f32 32.0, %v8247_v14  ;;  %vm6346_vm8 = vweird.f32 %v8247_v14 }
 0xc0c   :  { %v6343_v29 = vsub.f32 1.0, %v6342_v40 }
 0xc0e   :  { %v6344_v26 = vmul.f32 %v8247_v14, %v6343_v29 }
 0xc10   :  { %v6345_v36 = vadd.f32 %v8247_v14, %v6344_v26 }
 0xc12   :  { %v6347_v43 = vsel %vm6346_vm8, %v8247_v14, %v6345_v36 }
 0xc5d   :  { %v6316_v44 = vpop.xlane.xlu2 %6315 }
 0xc65   :  { %v6321_v61 = vpop.xlane.xlu2 %6320 }
 0xc66   :  { %v6332_v22 = vadd.f32 %v6321_v61, %v6316_v44 }
 0xc6d   :  { %v6326_v47 = vpop.xlane.xlu0 %6325 }
 0xc6e   :  { %v6333_v52 = vadd.f32 %v6332_v22, %v6326_v47 }
 0xc75   :  { %v6331_v38 = vpop.xlane.xlu1 %6330 }
 0xc76   :  { %v6334_v6 = vadd.f32 %v6333_v52, %v6331_v38 }
 0xc78   :  { %v6335_v30 = vrot.slane %v6334_v6, 4 }
 0xc7a   :  { %v6336_v15 = vadd.f32 %v6335_v30, %v6334_v6 }
 0xc7c   :  { %v6337_v5 = vrot.slane %v6336_v15, 2 }
 0xc7e   :  { %v6338_v21 = vadd.f32 %v6337_v5, %v6336_v15 }
 0xc80   :  { %v6339_v27 = vrot.slane %v6338_v21, 1 }
 0xc82   :  { %v6340_v10 = vadd.f32 %v6339_v27, %v6338_v21 }
 0xc84   :  { %v6348_v56 = vmul.f32 %v6347_v43, %v6340_v10 }
 0xc86   :  { %6350 = vst.msk [vmem:[#allocation7] sm:$0x1] %vm6349_vm3, %v6348_v56 }
 0xc87   :  { %6361 = dma.vmem_to_hbm [thread:$0]  %s6357_s16, 16, %s6359_s17, [#allocation8]  }
 0xc88   :  { %8304 = dma.done.wait [#allocation8], 16  }
 0xc89   :  { %8305 = vsyncadd [#allocation8], 4294967280 }
 0xc8a   :  { %8306 = dma.done.wait [#allocation10], 2048  }
 0xc8b   :  { %8307 = vsyncadd [#allocation10], 4294965248 }
 0xc8c   :  { %6383 = vsyncpa [#allocation8], 1 }
 0xc8d   :  { %6384 = vsyncpa [#allocation10], 1 }
 0xc8e   :  { %6385 = vsyncmov [#allocation6] }
 0xc91   :  { %s6386_s7 = vpop.sfrf %6385 }
 0xc92   :  { %p7559_p0 = scmp.ne.s32.totalorder %s6386_s7, 0 }
 0xc94   :  { %6390 = shalt.err (%p7559_p0)  }
 0xc95   :  { %6392 = vsyncmov [#allocation6 + $0x1] }
 0xc98   :  { %s6393_s18 = vpop.sfrf %6392 }
 0xc99   :  { %p7560_p1 = scmp.ne.s32.totalorder %s6393_s18, 0 }
 0xc9b   :  { %6397 = shalt.err (%p7560_p1)  }
 0xc9c   :  { %6399 = vsyncmov [#allocation6 + $0x2] }
 0xc9f   :  { %s6400_s27 = vpop.sfrf %6399 }
 0xca0   :  { %p7561_p2 = scmp.ne.s32.totalorder %s6400_s27, 0 }
 0xca2   :  { %6404 = shalt.err (%p7561_p2)  }
 0xca3   :  { %6406 = vsyncmov [#allocation6 + $0x3] }
 0xca6   :  { %s6407_s1 = vpop.sfrf %6406 }
 0xca7   :  { %p7562_p3 = scmp.ne.s32.totalorder %s6407_s1, 0 }
 0xca9   :  { %6411 = shalt.err (%p7562_p3)  }

</bundles_post_ra>
